<compile_context>
chip_gen: v5e
topology: v5e:2x2
jax: 0.10.0
libtpu: 0.0.40
codegen_flags: <defaults>
</compile_context>

<pallas_src>
import functools

import numpy as np
import jax
import jax.numpy as jnp
from jax.experimental import pallas as pl
from jax.experimental.pallas import tpu as pltpu


# ----------------------------- in-kernel math helpers -----------------------------

def _erf(x):
    # Abramowitz & Stegun 7.1.26 polynomial approximation of erf, |error| < 1.5e-7.
    a1, a2, a3, a4, a5 = (0.254829592, -0.284496736, 1.421413741,
                          -1.453152027, 1.061405429)
    p = 0.3275911
    s = jnp.where(x >= 0.0, 1.0, -1.0)
    ax = jnp.abs(x)
    d = 1.0 + p * ax
    # EUP approximate reciprocal + one Newton refinement.
    t0 = pl.reciprocal(d, approx=True)
    t = t0 * (2.0 - d * t0)
    poly = ((((a5 * t + a4) * t + a3) * t + a2) * t + a1) * t
    return s * (1.0 - poly * jnp.exp(-ax * ax))


def _gelu_exact(x):
    # PyTorch nn.GELU() default ('none' == erf-based).
    return 0.5 * x * (1.0 + _erf(x * 0.7071067811865476))


# ----------------------------- fused forward kernel -----------------------------

def _fused_forward_kernel(x_ref, wconv_ref, wglu_ref, wpk_ref, o_ref, slab_ref, *,
                          n_blocks, K, dilation, padding, B, T, PC, out_dim, offs):
    # x_ref:     [B*T, n_in]            (batch folded into sublanes, time-major/channel-last)
    # wconv_ref: [2*n_blocks, K*H, H]   (conv1/conv2 weights, taps stacked on contraction dim)
    # wglu_ref:  [n_blocks, K*H, 2H]    (GLU conv weights, value lanes :H, gate lanes H:2H)
    # wpk_ref:   [R, 128]               (all biases/scales/shifts/small matrices, packed)
    # o_ref:     [B, out_dim]
    # slab_ref:  VMEM scratch [B*T, K*H] (im2col slab, rewritten once per conv layer)
    f32 = jnp.float32
    H = wconv_ref.shape[2]
    n_in = x_ref.shape[1]
    BT = B * T

    def vec(name, n_rows, width):
        start = offs[name]
        return wpk_ref[start:start + n_rows, :width]

    def vrow(name, i, width):
        start = offs[name] + i
        return wpk_ref[start:start + 1, :width]

    # One-time zero of the im2col slab: rows outside a tap's valid window are never written
    # afterwards, so they provide the conv's zero padding for every layer.
    slab_ref[...] = jnp.zeros_like(slab_ref)

    # ---- initial 1x1 conv: [B*T, n_in] @ [n_in, H] ----
    x2 = (jnp.dot(x_ref[...], vec("w0", n_in, H), preferred_element_type=f32)
          + vec("b0", 1, H))                                          # [BT, H]

    shifts = [k * dilation - padding for k in range(K)]

    def write_slab(v):
        # slab[b*T + t, k*H + c] = v[b*T + t + s_k, c] for valid t (zero otherwise).
        # All writes are static slices; the subsequent full read of slab_ref is aligned.
        for k, s in enumerate(shifts):
            band = slice(k * H, (k + 1) * H)
            if s == 0:
                slab_ref[:, band] = v
                continue
            lo, hi = max(0, -s), min(T, T - s)                        # valid t range per sample
            if lo >= hi:
                continue                                              # tap fully out of range
            for b in range(B):
                slab_ref[b * T + lo:b * T + hi, band] = v[b * T + lo + s:b * T + hi + s, :]

    # ---- 5 ConvBlocks: 2x (dilated conv -> BN(eval) -> GELU -> +res), then conv -> GLU ----
    for blk in range(n_blocks):
        for j in range(2):
            l = blk * 2 + j
            write_slab(x2)
            y = jnp.dot(slab_ref[...], wconv_ref[l], preferred_element_type=f32)
            y = y * vrow("scale", l, H) + vrow("shift", l, H)         # folded eval BatchNorm
            x2 = _gelu_exact(y) + x2                                  # skip connection

        write_slab(x2)
        yg = (jnp.dot(slab_ref[...], wglu_ref[blk], preferred_element_type=f32)
              + vrow("b3", blk, 2 * H))                               # [BT, 2H]
        x2 = yg[:, :H] * jax.nn.sigmoid(yg[:, H:2 * H])               # GLU (value * sigmoid(gate))

    # ---- pooling 1x1 conv: [B*T, H] @ [H, PC] ----
    y_pool = (jnp.dot(x2, vec("wp", H, PC), preferred_element_type=f32)
              + vec("bp", 1, PC))                                     # [BT, PC]

    # ---- flatten (torch order c*T + t) + linear.  The weight is pre-reshaped to
    #      [PC, T, out_dim] and pre-tiled over the batch, so row b*T+t of block c is
    #      exactly wl[c*T + t].  Accumulator starts from the c=0 product. ----
    wl0 = offs["wl"]
    acc = y_pool[:, 0:1] * wpk_ref[wl0:wl0 + BT, :out_dim]
    for c in range(1, PC):
        acc = acc + y_pool[:, c:c + 1] * wpk_ref[wl0 + c * BT:wl0 + (c + 1) * BT, :out_dim]
    bl = vec("bl", 1, out_dim)
    for b in range(B):
        o_ref[b:b + 1, :] = jnp.sum(acc[b * T:(b + 1) * T, :], axis=0, keepdims=True) + bl


# ----------------------------- wrapper (single pallas_call, no grid) -----------------------------

def conv_module_forward(x_nct, kp, *, dilation, padding):
    """Full fused ConvolutionalModule forward. x_nct: [B, n_in_channels, T] -> [B, out_dim]."""
    B, n_in, T = x_nct.shape
    d = kp["dims"]
    assert (B, T) == (d["B"], d["T"]), "params were packed for a different (B, T)"
    H, PC, out_dim = d["H"], d["PC"], d["out_dim"]
    K, n_blocks = kp["K"], kp["n_blocks"]

    # NCT -> time-major/channel-last with the batch folded into the row (sublane) dim.
    x2d = jnp.transpose(x_nct, (0, 2, 1)).reshape(B * T, n_in)

    kern = functools.partial(
        _fused_forward_kernel,
        n_blocks=n_blocks, K=K, dilation=dilation, padding=padding,
        B=B, T=T, PC=PC, out_dim=out_dim, offs=kp["offs"])

    return pl.pallas_call(
        kern,
        out_shape=jax.ShapeDtypeStruct((B, out_dim), jnp.float32),
        scratch_shapes=[pltpu.VMEM((B * T, K * H), jnp.float32)],     # im2col slab
    )(x2d, kp["wconv"], kp["wglu"], kp["wpk"])


# ----------------------------- parameters (deterministic, synthetic) -----------------------------

def make_params(n_in, H, T, K, PC, out_dim, key, eps=1e-5):
    ks = iter(jax.random.split(key, 96))

    def u(shape, fan_in):
        bound = 1.0 / np.sqrt(fan_in)
        return jax.random.uniform(next(ks), shape, jnp.float32, -bound, bound)

    p = {}
    # conv weights stored as [K, Cin, Cout]  (== torch weight[co, ci, k] transposed)
    p["w0"] = u((n_in, H), n_in)
    p["b0"] = u((1, H), n_in)
    blocks = []
    for _ in range(5):
        blk = {}
        for name in ("1", "2"):
            w = u((K, H, H), H * K)
            b = u((H,), H * K)
            gamma = jax.random.uniform(next(ks), (H,), jnp.float32, 0.5, 1.5)
            beta = jax.random.uniform(next(ks), (H,), jnp.float32, -0.1, 0.1)
            mean = jax.random.uniform(next(ks), (H,), jnp.float32, -0.1, 0.1)
            var = jax.random.uniform(next(ks), (H,), jnp.float32, 0.5, 1.5)
            scale = gamma / jnp.sqrt(var + eps)
            shift = beta + scale * (b - mean)       # fold conv bias + BN(eval) affine
            blk["w" + name] = w
            blk["scale" + name] = scale[None, :]
            blk["shift" + name] = shift[None, :]
            blk["raw" + name] = (b, gamma, beta, mean, var)   # kept only for the JAX reference
        blk["w3"] = u((K, H, 2 * H), H * K)
        blk["b3"] = u((1, 2 * H), H * K)
        blocks.append(blk)
    p["blocks"] = blocks
    p["wp"] = u((H, PC), H)
    p["bp"] = u((1, PC), H)
    p["wl"] = u((PC * T, out_dim), PC * T)          # == torch linear.weight.T (rows = c*T + t)
    p["bl"] = u((1, out_dim), PC * T)
    return p


def prep_kernel_params(p, *, K, T, B, n_blocks=5):
    """Host-side, one-time repack of the params into the fused-kernel layout."""
    H = p["w0"].shape[1]
    PC = p["wp"].shape[1]
    out_dim = p["bl"].shape[1]
    KH = K * H
    blocks = p["blocks"]
    LANES = 128

    # --- matmul-weight slabs: taps concatenated along the contraction dim ---
    wconv = jnp.stack([blocks[b]["w" + nm].reshape(KH, H)
                       for b in range(n_blocks) for nm in ("1", "2")], axis=0)  # [10, KH, H]
    wglu = jnp.stack([blocks[b]["w3"].reshape(KH, 2 * H)
                      for b in range(n_blocks)], axis=0)                         # [5, KH, 2H]

    # --- packed vector / small-matrix slab [R, 128] at static, 8-aligned row offsets ---
    pieces, offs = [], {}
    cur = 0

    def add(name, mat):
        nonlocal cur
        mat = jnp.asarray(mat, jnp.float32)
        pad_r = (-cur) % 8
        if pad_r:
            pieces.append(jnp.zeros((pad_r, LANES), jnp.float32))
            cur += pad_r
        offs[name] = cur
        pieces.append(jnp.pad(mat, ((0, 0), (0, LANES - mat.shape[1]))))
        cur += mat.shape[0]

    add("w0", p["w0"])                                                   # [n_in, H]
    add("b0", p["b0"])                                                   # [1, H]
    add("scale", jnp.concatenate([blocks[b]["scale" + nm]
                                  for b in range(n_blocks) for nm in ("1", "2")], axis=0))
    add("shift", jnp.concatenate([blocks[b]["shift" + nm]
                                  for b in range(n_blocks) for nm in ("1", "2")], axis=0))
    add("b3", jnp.concatenate([blocks[b]["b3"] for b in range(n_blocks)], axis=0))  # [5, 2H]
    add("wp", p["wp"])                                                   # [H, PC]
    add("bp", p["bp"])                                                   # [1, PC]
    add("bl", p["bl"])                                                   # [1, out_dim]
    # Linear weight rows are torch-flatten order c*T+t; reshape to [PC, T, out_dim] and tile
    # each c-block over the batch so the kernel indexes it directly with the folded row b*T+t.
    wl3 = p["wl"].reshape(PC, T, out_dim)
    add("wl", jnp.concatenate([jnp.tile(wl3[c], (B, 1)) for c in range(PC)], axis=0))
    pad_r = (-cur) % 8
    if pad_r:
        pieces.append(jnp.zeros((pad_r, LANES), jnp.float32))
    wpk = jnp.concatenate(pieces, axis=0)

    return dict(wconv=wconv, wglu=wglu, wpk=wpk, offs=offs, K=K, n_blocks=n_blocks,
                dims=dict(H=H, PC=PC, out_dim=out_dim, T=T, B=B))


# ----------------------------- pure-JAX reference (PyTorch semantics) -----------------------------

def ref_forward(x_nct, p, *, dilation, padding, eps=1e-5):
    HP = jax.lax.Precision.HIGHEST

    def block_conv(x, w_kio, pad, dil):
        w_oiw = jnp.transpose(w_kio, (2, 1, 0))     # -> [Cout, Cin, K] (torch layout)
        return jax.lax.conv_general_dilated(
            x, w_oiw, window_strides=(1,), padding=[(pad, pad)],
            rhs_dilation=(dil,), dimension_numbers=("NCH", "OIH", "NCH"),
            precision=HP)

    x = jnp.einsum("bct,co->bot", x_nct, p["w0"], precision=HP) + p["b0"][0][None, :, None]
    for blk in p["blocks"]:
        for name in ("1", "2"):
            identity = x
            b, gamma, beta, mean, var = blk["raw" + name]
            y = block_conv(x, blk["w" + name], padding, dilation) + b[None, :, None]
            y = ((y - mean[None, :, None]) / jnp.sqrt(var + eps)[None, :, None]
                 * gamma[None, :, None] + beta[None, :, None])
            y = jax.nn.gelu(y, approximate=False)
            x = y + identity
        y = block_conv(x, blk["w3"], padding, dilation) + blk["b3"][0][None, :, None]
        H = x.shape[1]
        x = y[:, :H] * jax.nn.sigmoid(y[:, H:])
    y = jnp.einsum("bct,co->bot", x, p["wp"], precision=HP) + p["bp"][0][None, :, None]
    flat = y.reshape(y.shape[0], -1)                # [B, PC*T], index c*T + t
    return jnp.dot(flat, p["wl"], precision=HP) + p["bl"]


# ----------------------------- main -----------------------------

if __name__ == "__main__":
    # Small shapes consistent with the module's forward.
    B, n_in, H, T = 2, 4, 32, 16
    K, dilation = 3, 3
    padding = (K // 2) * dilation
    PC, out_dim = 8, 32

    key = jax.random.PRNGKey(0)
    kx, kp_key = jax.random.split(key)
    x = jax.random.normal(kx, (B, n_in, T), jnp.float32)    # PyTorch NCT input
    params = make_params(n_in, H, T, K, PC, out_dim, kp_key)
    kparams = prep_kernel_params(params, K=K, T=T, B=B)

    out = conv_module_forward(x, kparams, dilation=dilation, padding=padding)
    out = jax.block_until_ready(out)
    assert out.shape == (B, out_dim)

    ref = ref_forward(x, params, dilation=dilation, padding=padding)
    err = float(jnp.max(jnp.abs(out - ref)))
    assert np.isfinite(err) and err < 2e-3, f"mismatch vs reference: max abs err {err}"

    print("KERNEL_OK")
</pallas_src>

<mosaic_0001>
module attributes {stable_mosaic.version = 11 : i64} {
  func.func @_fused_forward_kernel(%arg0: memref<32x4xf32, #tpu.memory_space<vmem>>, %arg1: memref<10x96x32xf32, #tpu.memory_space<vmem>>, %arg2: memref<5x96x64xf32, #tpu.memory_space<vmem>>, %arg3: memref<360x128xf32, #tpu.memory_space<vmem>>, %arg4: memref<2x32xf32, #tpu.memory_space<vmem>>, %arg5: memref<32x96xf32, #tpu.memory_space<vmem>>) attributes {dimension_semantics = [], scalar_prefetch = 0 : i64, scratch_operands = 1 : i64, tpu.core_type = #tpu.core_type<tc>} {
    %cst = arith.constant 0.000000e+00 : f32
    %0 = vector.broadcast %cst : f32 to vector<32x96xf32>
    %c0 = arith.constant 0 : index
    %c0_0 = arith.constant 0 : index
    %1 = vector.load %arg5[%c0, %c0_0] : memref<32x96xf32, #tpu.memory_space<vmem>>, vector<32x96xf32>
    tpu.vector_store %arg5[%c0, %c0_0], %0 {strides = array<i32>} : memref<32x96xf32, #tpu.memory_space<vmem>>, vector<32x96xf32>,
    %c0_1 = arith.constant 0 : index
    %c0_2 = arith.constant 0 : index
    %2 = vector.load %arg0[%c0_1, %c0_2] : memref<32x4xf32, #tpu.memory_space<vmem>>, vector<32x4xf32>
    %c0_3 = arith.constant 0 : index
    %c0_4 = arith.constant 0 : index
    %3 = vector.load %arg3[%c0_3, %c0_4] : memref<360x128xf32, #tpu.memory_space<vmem>>, vector<4x32xf32>
    %cst_5 = arith.constant dense<0.000000e+00> : vector<32x32xf32>
    %4 = tpu.matmul %2, %3, %cst_5 {dimension_numbers = #tpu.dot_dimension_numbers<[1], [0], [0], [1], [0, 0, 1, 1], [], []>} : vector<32x4xf32>, vector<4x32xf32>, vector<32x32xf32> -> vector<32x32xf32>
    %c8 = arith.constant 8 : index
    %c0_6 = arith.constant 0 : index
    %5 = vector.load %arg3[%c8, %c0_6] : memref<360x128xf32, #tpu.memory_space<vmem>>, vector<1x32xf32>
    %6 = vector.broadcast %5 : vector<1x32xf32> to vector<32x32xf32>
    %7 = arith.addf %4, %6 : vector<32x32xf32>
    %8 = vector.extract_strided_slice %7 {offsets = [0, 0], sizes = [13, 32], strides = [1, 1]} : vector<32x32xf32> to vector<13x32xf32>
    %c3 = arith.constant 3 : index
    %c0_7 = arith.constant 0 : index
    %9 = vector.load %arg5[%c3, %c0_7] : memref<32x96xf32, #tpu.memory_space<vmem>>, vector<13x32xf32>
    tpu.vector_store %arg5[%c3, %c0_7], %8 {strides = array<i32>} : memref<32x96xf32, #tpu.memory_space<vmem>>, vector<13x32xf32>,
    %10 = vector.extract_strided_slice %7 {offsets = [16, 0], sizes = [13, 32], strides = [1, 1]} : vector<32x32xf32> to vector<13x32xf32>
    %c19 = arith.constant 19 : index
    %c0_8 = arith.constant 0 : index
    %11 = vector.load %arg5[%c19, %c0_8] : memref<32x96xf32, #tpu.memory_space<vmem>>, vector<13x32xf32>
    tpu.vector_store %arg5[%c19, %c0_8], %10 {strides = array<i32>} : memref<32x96xf32, #tpu.memory_space<vmem>>, vector<13x32xf32>,
    %c0_9 = arith.constant 0 : index
    %c32 = arith.constant 32 : index
    %12 = vector.load %arg5[%c0_9, %c32] : memref<32x96xf32, #tpu.memory_space<vmem>>, vector<32x32xf32>
    tpu.vector_store %arg5[%c0_9, %c32], %7 {strides = array<i32>} : memref<32x96xf32, #tpu.memory_space<vmem>>, vector<32x32xf32>,
    %13 = vector.extract_strided_slice %7 {offsets = [3, 0], sizes = [13, 32], strides = [1, 1]} : vector<32x32xf32> to vector<13x32xf32>
    %c0_10 = arith.constant 0 : index
    %c64 = arith.constant 64 : index
    %14 = vector.load %arg5[%c0_10, %c64] : memref<32x96xf32, #tpu.memory_space<vmem>>, vector<13x32xf32>
    tpu.vector_store %arg5[%c0_10, %c64], %13 {strides = array<i32>} : memref<32x96xf32, #tpu.memory_space<vmem>>, vector<13x32xf32>,
    %15 = vector.extract_strided_slice %7 {offsets = [19, 0], sizes = [13, 32], strides = [1, 1]} : vector<32x32xf32> to vector<13x32xf32>
    %c16 = arith.constant 16 : index
    %c64_11 = arith.constant 64 : index
    %16 = vector.load %arg5[%c16, %c64_11] : memref<32x96xf32, #tpu.memory_space<vmem>>, vector<13x32xf32>
    tpu.vector_store %arg5[%c16, %c64_11], %15 {strides = array<i32>} : memref<32x96xf32, #tpu.memory_space<vmem>>, vector<13x32xf32>,
    %c0_12 = arith.constant 0 : index
    %c0_13 = arith.constant 0 : index
    %17 = vector.load %arg5[%c0_12, %c0_13] : memref<32x96xf32, #tpu.memory_space<vmem>>, vector<32x96xf32>
    %c0_14 = arith.constant 0 : index
    %c0_15 = arith.constant 0 : index
    %c0_16 = arith.constant 0 : index
    %18 = vector.load %arg1[%c0_14, %c0_15, %c0_16] : memref<10x96x32xf32, #tpu.memory_space<vmem>>, vector<1x96x32xf32>
    %19 = vector.shape_cast %18 : vector<1x96x32xf32> to vector<96x32xf32>
    %cst_17 = arith.constant dense<0.000000e+00> : vector<32x32xf32>
    %20 = tpu.matmul %17, %19, %cst_17 {dimension_numbers = #tpu.dot_dimension_numbers<[1], [0], [0], [1], [0, 0, 1, 1], [], []>} : vector<32x96xf32>, vector<96x32xf32>, vector<32x32xf32> -> vector<32x32xf32>
    %c16_18 = arith.constant 16 : index
    %c0_19 = arith.constant 0 : index
    %21 = vector.load %arg3[%c16_18, %c0_19] : memref<360x128xf32, #tpu.memory_space<vmem>>, vector<1x32xf32>
    %22 = vector.broadcast %21 : vector<1x32xf32> to vector<32x32xf32>
    %23 = arith.mulf %20, %22 : vector<32x32xf32>
    %c32_20 = arith.constant 32 : index
    %c0_21 = arith.constant 0 : index
    %24 = vector.load %arg3[%c32_20, %c0_21] : memref<360x128xf32, #tpu.memory_space<vmem>>, vector<1x32xf32>
    %25 = vector.broadcast %24 : vector<1x32xf32> to vector<32x32xf32>
    %26 = arith.addf %23, %25 : vector<32x32xf32>
    %cst_22 = arith.constant 5.000000e-01 : f32
    %27 = vector.broadcast %cst_22 : f32 to vector<32x32xf32>
    %28 = arith.mulf %27, %26 : vector<32x32xf32>
    %cst_23 = arith.constant 0.707106769 : f32
    %29 = vector.broadcast %cst_23 : f32 to vector<32x32xf32>
    %30 = arith.mulf %26, %29 : vector<32x32xf32>
    %cst_24 = arith.constant 0.000000e+00 : f32
    %31 = vector.broadcast %cst_24 : f32 to vector<32x32xf32>
    %32 = arith.cmpf oge, %30, %31 : vector<32x32xf32>
    %cst_25 = arith.constant 1.000000e+00 : f32
    %cst_26 = arith.constant -1.000000e+00 : f32
    %33 = vector.broadcast %cst_25 : f32 to vector<32x32xf32>
    %34 = vector.broadcast %cst_26 : f32 to vector<32x32xf32>
    %35 = arith.select %32, %33, %34 : vector<32x32xi1>, vector<32x32xf32>
    %36 = math.absf %30 : vector<32x32xf32>
    %cst_27 = arith.constant 0.327591091 : f32
    %37 = vector.broadcast %cst_27 : f32 to vector<32x32xf32>
    %38 = arith.mulf %37, %36 : vector<32x32xf32>
    %cst_28 = arith.constant 1.000000e+00 : f32
    %39 = vector.broadcast %cst_28 : f32 to vector<32x32xf32>
    %40 = arith.addf %39, %38 : vector<32x32xf32>
    %41 = tpu.reciprocal %40 {approx = true} : vector<32x32xf32> -> vector<32x32xf32>
    %42 = arith.mulf %40, %41 : vector<32x32xf32>
    %cst_29 = arith.constant 2.000000e+00 : f32
    %43 = vector.broadcast %cst_29 : f32 to vector<32x32xf32>
    %44 = arith.subf %43, %42 : vector<32x32xf32>
    %45 = arith.mulf %41, %44 : vector<32x32xf32>
    %cst_30 = arith.constant 1.06140542 : f32
    %46 = vector.broadcast %cst_30 : f32 to vector<32x32xf32>
    %47 = arith.mulf %46, %45 : vector<32x32xf32>
    %cst_31 = arith.constant -1.45315206 : f32
    %48 = vector.broadcast %cst_31 : f32 to vector<32x32xf32>
    %49 = arith.addf %47, %48 : vector<32x32xf32>
    %50 = arith.mulf %49, %45 : vector<32x32xf32>
    %cst_32 = arith.constant 1.42141378 : f32
    %51 = vector.broadcast %cst_32 : f32 to vector<32x32xf32>
    %52 = arith.addf %50, %51 : vector<32x32xf32>
    %53 = arith.mulf %52, %45 : vector<32x32xf32>
    %cst_33 = arith.constant -0.284496725 : f32
    %54 = vector.broadcast %cst_33 : f32 to vector<32x32xf32>
    %55 = arith.addf %53, %54 : vector<32x32xf32>
    %56 = arith.mulf %55, %45 : vector<32x32xf32>
    %cst_34 = arith.constant 0.254829586 : f32
    %57 = vector.broadcast %cst_34 : f32 to vector<32x32xf32>
    %58 = arith.addf %56, %57 : vector<32x32xf32>
    %59 = arith.mulf %58, %45 : vector<32x32xf32>
    %cst_35 = arith.constant 0.000000e+00 : f32
    %60 = vector.broadcast %cst_35 : f32 to vector<32x32xf32>
    %61 = arith.subf %60, %36 : vector<32x32xf32>
    %62 = arith.mulf %61, %36 : vector<32x32xf32>
    %63 = math.exp %62 : vector<32x32xf32>
    %64 = arith.mulf %59, %63 : vector<32x32xf32>
    %cst_36 = arith.constant 1.000000e+00 : f32
    %65 = vector.broadcast %cst_36 : f32 to vector<32x32xf32>
    %66 = arith.subf %65, %64 : vector<32x32xf32>
    %67 = arith.mulf %35, %66 : vector<32x32xf32>
    %cst_37 = arith.constant 1.000000e+00 : f32
    %68 = vector.broadcast %cst_37 : f32 to vector<32x32xf32>
    %69 = arith.addf %68, %67 : vector<32x32xf32>
    %70 = arith.mulf %28, %69 : vector<32x32xf32>
    %71 = arith.addf %70, %7 : vector<32x32xf32>
    %72 = vector.extract_strided_slice %71 {offsets = [0, 0], sizes = [13, 32], strides = [1, 1]} : vector<32x32xf32> to vector<13x32xf32>
    %c3_38 = arith.constant 3 : index
    %c0_39 = arith.constant 0 : index
    %73 = vector.load %arg5[%c3_38, %c0_39] : memref<32x96xf32, #tpu.memory_space<vmem>>, vector<13x32xf32>
    tpu.vector_store %arg5[%c3_38, %c0_39], %72 {strides = array<i32>} : memref<32x96xf32, #tpu.memory_space<vmem>>, vector<13x32xf32>,
    %74 = vector.extract_strided_slice %71 {offsets = [16, 0], sizes = [13, 32], strides = [1, 1]} : vector<32x32xf32> to vector<13x32xf32>
    %c19_40 = arith.constant 19 : index
    %c0_41 = arith.constant 0 : index
    %75 = vector.load %arg5[%c19_40, %c0_41] : memref<32x96xf32, #tpu.memory_space<vmem>>, vector<13x32xf32>
    tpu.vector_store %arg5[%c19_40, %c0_41], %74 {strides = array<i32>} : memref<32x96xf32, #tpu.memory_space<vmem>>, vector<13x32xf32>,
    %c0_42 = arith.constant 0 : index
    %c32_43 = arith.constant 32 : index
    %76 = vector.load %arg5[%c0_42, %c32_43] : memref<32x96xf32, #tpu.memory_space<vmem>>, vector<32x32xf32>
    tpu.vector_store %arg5[%c0_42, %c32_43], %71 {strides = array<i32>} : memref<32x96xf32, #tpu.memory_space<vmem>>, vector<32x32xf32>,
    %77 = vector.extract_strided_slice %71 {offsets = [3, 0], sizes = [13, 32], strides = [1, 1]} : vector<32x32xf32> to vector<13x32xf32>
    %c0_44 = arith.constant 0 : index
    %c64_45 = arith.constant 64 : index
    %78 = vector.load %arg5[%c0_44, %c64_45] : memref<32x96xf32, #tpu.memory_space<vmem>>, vector<13x32xf32>
    tpu.vector_store %arg5[%c0_44, %c64_45], %77 {strides = array<i32>} : memref<32x96xf32, #tpu.memory_space<vmem>>, vector<13x32xf32>,
    %79 = vector.extract_strided_slice %71 {offsets = [19, 0], sizes = [13, 32], strides = [1, 1]} : vector<32x32xf32> to vector<13x32xf32>
    %c16_46 = arith.constant 16 : index
    %c64_47 = arith.constant 64 : index
    %80 = vector.load %arg5[%c16_46, %c64_47] : memref<32x96xf32, #tpu.memory_space<vmem>>, vector<13x32xf32>
    tpu.vector_store %arg5[%c16_46, %c64_47], %79 {strides = array<i32>} : memref<32x96xf32, #tpu.memory_space<vmem>>, vector<13x32xf32>,
    %c0_48 = arith.constant 0 : index
    %c0_49 = arith.constant 0 : index
    %81 = vector.load %arg5[%c0_48, %c0_49] : memref<32x96xf32, #tpu.memory_space<vmem>>, vector<32x96xf32>
    %c1 = arith.constant 1 : index
    %c0_50 = arith.constant 0 : index
    %c0_51 = arith.constant 0 : index
    %82 = vector.load %arg1[%c1, %c0_50, %c0_51] : memref<10x96x32xf32, #tpu.memory_space<vmem>>, vector<1x96x32xf32>
    %83 = vector.shape_cast %82 : vector<1x96x32xf32> to vector<96x32xf32>
    %cst_52 = arith.constant dense<0.000000e+00> : vector<32x32xf32>
    %84 = tpu.matmul %81, %83, %cst_52 {dimension_numbers = #tpu.dot_dimension_numbers<[1], [0], [0], [1], [0, 0, 1, 1], [], []>} : vector<32x96xf32>, vector<96x32xf32>, vector<32x32xf32> -> vector<32x32xf32>
    %c17 = arith.constant 17 : index
    %c0_53 = arith.constant 0 : index
    %85 = vector.load %arg3[%c17, %c0_53] : memref<360x128xf32, #tpu.memory_space<vmem>>, vector<1x32xf32>
    %86 = vector.broadcast %85 : vector<1x32xf32> to vector<32x32xf32>
    %87 = arith.mulf %84, %86 : vector<32x32xf32>
    %c33 = arith.constant 33 : index
    %c0_54 = arith.constant 0 : index
    %88 = vector.load %arg3[%c33, %c0_54] : memref<360x128xf32, #tpu.memory_space<vmem>>, vector<1x32xf32>
    %89 = vector.broadcast %88 : vector<1x32xf32> to vector<32x32xf32>
    %90 = arith.addf %87, %89 : vector<32x32xf32>
    %cst_55 = arith.constant 5.000000e-01 : f32
    %91 = vector.broadcast %cst_55 : f32 to vector<32x32xf32>
    %92 = arith.mulf %91, %90 : vector<32x32xf32>
    %cst_56 = arith.constant 0.707106769 : f32
    %93 = vector.broadcast %cst_56 : f32 to vector<32x32xf32>
    %94 = arith.mulf %90, %93 : vector<32x32xf32>
    %cst_57 = arith.constant 0.000000e+00 : f32
    %95 = vector.broadcast %cst_57 : f32 to vector<32x32xf32>
    %96 = arith.cmpf oge, %94, %95 : vector<32x32xf32>
    %cst_58 = arith.constant 1.000000e+00 : f32
    %cst_59 = arith.constant -1.000000e+00 : f32
    %97 = vector.broadcast %cst_58 : f32 to vector<32x32xf32>
    %98 = vector.broadcast %cst_59 : f32 to vector<32x32xf32>
    %99 = arith.select %96, %97, %98 : vector<32x32xi1>, vector<32x32xf32>
    %100 = math.absf %94 : vector<32x32xf32>
    %cst_60 = arith.constant 0.327591091 : f32
    %101 = vector.broadcast %cst_60 : f32 to vector<32x32xf32>
    %102 = arith.mulf %101, %100 : vector<32x32xf32>
    %cst_61 = arith.constant 1.000000e+00 : f32
    %103 = vector.broadcast %cst_61 : f32 to vector<32x32xf32>
    %104 = arith.addf %103, %102 : vector<32x32xf32>
    %105 = tpu.reciprocal %104 {approx = true} : vector<32x32xf32> -> vector<32x32xf32>
    %106 = arith.mulf %104, %105 : vector<32x32xf32>
    %cst_62 = arith.constant 2.000000e+00 : f32
    %107 = vector.broadcast %cst_62 : f32 to vector<32x32xf32>
    %108 = arith.subf %107, %106 : vector<32x32xf32>
    %109 = arith.mulf %105, %108 : vector<32x32xf32>
    %cst_63 = arith.constant 1.06140542 : f32
    %110 = vector.broadcast %cst_63 : f32 to vector<32x32xf32>
    %111 = arith.mulf %110, %109 : vector<32x32xf32>
    %cst_64 = arith.constant -1.45315206 : f32
    %112 = vector.broadcast %cst_64 : f32 to vector<32x32xf32>
    %113 = arith.addf %111, %112 : vector<32x32xf32>
    %114 = arith.mulf %113, %109 : vector<32x32xf32>
    %cst_65 = arith.constant 1.42141378 : f32
    %115 = vector.broadcast %cst_65 : f32 to vector<32x32xf32>
    %116 = arith.addf %114, %115 : vector<32x32xf32>
    %117 = arith.mulf %116, %109 : vector<32x32xf32>
    %cst_66 = arith.constant -0.284496725 : f32
    %118 = vector.broadcast %cst_66 : f32 to vector<32x32xf32>
    %119 = arith.addf %117, %118 : vector<32x32xf32>
    %120 = arith.mulf %119, %109 : vector<32x32xf32>
    %cst_67 = arith.constant 0.254829586 : f32
    %121 = vector.broadcast %cst_67 : f32 to vector<32x32xf32>
    %122 = arith.addf %120, %121 : vector<32x32xf32>
    %123 = arith.mulf %122, %109 : vector<32x32xf32>
    %cst_68 = arith.constant 0.000000e+00 : f32
    %124 = vector.broadcast %cst_68 : f32 to vector<32x32xf32>
    %125 = arith.subf %124, %100 : vector<32x32xf32>
    %126 = arith.mulf %125, %100 : vector<32x32xf32>
    %127 = math.exp %126 : vector<32x32xf32>
    %128 = arith.mulf %123, %127 : vector<32x32xf32>
    %cst_69 = arith.constant 1.000000e+00 : f32
    %129 = vector.broadcast %cst_69 : f32 to vector<32x32xf32>
    %130 = arith.subf %129, %128 : vector<32x32xf32>
    %131 = arith.mulf %99, %130 : vector<32x32xf32>
    %cst_70 = arith.constant 1.000000e+00 : f32
    %132 = vector.broadcast %cst_70 : f32 to vector<32x32xf32>
    %133 = arith.addf %132, %131 : vector<32x32xf32>
    %134 = arith.mulf %92, %133 : vector<32x32xf32>
    %135 = arith.addf %134, %71 : vector<32x32xf32>
    %136 = vector.extract_strided_slice %135 {offsets = [0, 0], sizes = [13, 32], strides = [1, 1]} : vector<32x32xf32> to vector<13x32xf32>
    %c3_71 = arith.constant 3 : index
    %c0_72 = arith.constant 0 : index
    %137 = vector.load %arg5[%c3_71, %c0_72] : memref<32x96xf32, #tpu.memory_space<vmem>>, vector<13x32xf32>
    tpu.vector_store %arg5[%c3_71, %c0_72], %136 {strides = array<i32>} : memref<32x96xf32, #tpu.memory_space<vmem>>, vector<13x32xf32>,
    %138 = vector.extract_strided_slice %135 {offsets = [16, 0], sizes = [13, 32], strides = [1, 1]} : vector<32x32xf32> to vector<13x32xf32>
    %c19_73 = arith.constant 19 : index
    %c0_74 = arith.constant 0 : index
    %139 = vector.load %arg5[%c19_73, %c0_74] : memref<32x96xf32, #tpu.memory_space<vmem>>, vector<13x32xf32>
    tpu.vector_store %arg5[%c19_73, %c0_74], %138 {strides = array<i32>} : memref<32x96xf32, #tpu.memory_space<vmem>>, vector<13x32xf32>,
    %c0_75 = arith.constant 0 : index
    %c32_76 = arith.constant 32 : index
    %140 = vector.load %arg5[%c0_75, %c32_76] : memref<32x96xf32, #tpu.memory_space<vmem>>, vector<32x32xf32>
    tpu.vector_store %arg5[%c0_75, %c32_76], %135 {strides = array<i32>} : memref<32x96xf32, #tpu.memory_space<vmem>>, vector<32x32xf32>,
    %141 = vector.extract_strided_slice %135 {offsets = [3, 0], sizes = [13, 32], strides = [1, 1]} : vector<32x32xf32> to vector<13x32xf32>
    %c0_77 = arith.constant 0 : index
    %c64_78 = arith.constant 64 : index
    %142 = vector.load %arg5[%c0_77, %c64_78] : memref<32x96xf32, #tpu.memory_space<vmem>>, vector<13x32xf32>
    tpu.vector_store %arg5[%c0_77, %c64_78], %141 {strides = array<i32>} : memref<32x96xf32, #tpu.memory_space<vmem>>, vector<13x32xf32>,
    %143 = vector.extract_strided_slice %135 {offsets = [19, 0], sizes = [13, 32], strides = [1, 1]} : vector<32x32xf32> to vector<13x32xf32>
    %c16_79 = arith.constant 16 : index
    %c64_80 = arith.constant 64 : index
    %144 = vector.load %arg5[%c16_79, %c64_80] : memref<32x96xf32, #tpu.memory_space<vmem>>, vector<13x32xf32>
    tpu.vector_store %arg5[%c16_79, %c64_80], %143 {strides = array<i32>} : memref<32x96xf32, #tpu.memory_space<vmem>>, vector<13x32xf32>,
    %c0_81 = arith.constant 0 : index
    %c0_82 = arith.constant 0 : index
    %145 = vector.load %arg5[%c0_81, %c0_82] : memref<32x96xf32, #tpu.memory_space<vmem>>, vector<32x96xf32>
    %c0_83 = arith.constant 0 : index
    %c0_84 = arith.constant 0 : index
    %c0_85 = arith.constant 0 : index
    %146 = vector.load %arg2[%c0_83, %c0_84, %c0_85] : memref<5x96x64xf32, #tpu.memory_space<vmem>>, vector<1x96x64xf32>
    %147 = vector.shape_cast %146 : vector<1x96x64xf32> to vector<96x64xf32>
    %cst_86 = arith.constant dense<0.000000e+00> : vector<32x64xf32>
    %148 = tpu.matmul %145, %147, %cst_86 {dimension_numbers = #tpu.dot_dimension_numbers<[1], [0], [0], [1], [0, 0, 1, 1], [], []>} : vector<32x96xf32>, vector<96x64xf32>, vector<32x64xf32> -> vector<32x64xf32>
    %c48 = arith.constant 48 : index
    %c0_87 = arith.constant 0 : index
    %149 = vector.load %arg3[%c48, %c0_87] : memref<360x128xf32, #tpu.memory_space<vmem>>, vector<1x64xf32>
    %150 = vector.broadcast %149 : vector<1x64xf32> to vector<32x64xf32>
    %151 = arith.addf %148, %150 : vector<32x64xf32>
    %152 = vector.extract_strided_slice %151 {offsets = [0, 0], sizes = [32, 32], strides = [1, 1]} : vector<32x64xf32> to vector<32x32xf32>
    %153 = vector.extract_strided_slice %151 {offsets = [0, 32], sizes = [32, 32], strides = [1, 1]} : vector<32x64xf32> to vector<32x32xf32>
    %154 = arith.negf %153 : vector<32x32xf32>
    %155 = math.exp %154 : vector<32x32xf32>
    %cst_88 = arith.constant 1.000000e+00 : f32
    %156 = vector.broadcast %cst_88 : f32 to vector<32x32xf32>
    %157 = arith.addf %156, %155 : vector<32x32xf32>
    %158 = arith.divf %156, %157 : vector<32x32xf32>
    %159 = arith.mulf %152, %158 : vector<32x32xf32>
    %160 = vector.extract_strided_slice %159 {offsets = [0, 0], sizes = [13, 32], strides = [1, 1]} : vector<32x32xf32> to vector<13x32xf32>
    %c3_89 = arith.constant 3 : index
    %c0_90 = arith.constant 0 : index
    %161 = vector.load %arg5[%c3_89, %c0_90] : memref<32x96xf32, #tpu.memory_space<vmem>>, vector<13x32xf32>
    tpu.vector_store %arg5[%c3_89, %c0_90], %160 {strides = array<i32>} : memref<32x96xf32, #tpu.memory_space<vmem>>, vector<13x32xf32>,
    %162 = vector.extract_strided_slice %159 {offsets = [16, 0], sizes = [13, 32], strides = [1, 1]} : vector<32x32xf32> to vector<13x32xf32>
    %c19_91 = arith.constant 19 : index
    %c0_92 = arith.constant 0 : index
    %163 = vector.load %arg5[%c19_91, %c0_92] : memref<32x96xf32, #tpu.memory_space<vmem>>, vector<13x32xf32>
    tpu.vector_store %arg5[%c19_91, %c0_92], %162 {strides = array<i32>} : memref<32x96xf32, #tpu.memory_space<vmem>>, vector<13x32xf32>,
    %c0_93 = arith.constant 0 : index
    %c32_94 = arith.constant 32 : index
    %164 = vector.load %arg5[%c0_93, %c32_94] : memref<32x96xf32, #tpu.memory_space<vmem>>, vector<32x32xf32>
    tpu.vector_store %arg5[%c0_93, %c32_94], %159 {strides = array<i32>} : memref<32x96xf32, #tpu.memory_space<vmem>>, vector<32x32xf32>,
    %165 = vector.extract_strided_slice %159 {offsets = [3, 0], sizes = [13, 32], strides = [1, 1]} : vector<32x32xf32> to vector<13x32xf32>
    %c0_95 = arith.constant 0 : index
    %c64_96 = arith.constant 64 : index
    %166 = vector.load %arg5[%c0_95, %c64_96] : memref<32x96xf32, #tpu.memory_space<vmem>>, vector<13x32xf32>
    tpu.vector_store %arg5[%c0_95, %c64_96], %165 {strides = array<i32>} : memref<32x96xf32, #tpu.memory_space<vmem>>, vector<13x32xf32>,
    %167 = vector.extract_strided_slice %159 {offsets = [19, 0], sizes = [13, 32], strides = [1, 1]} : vector<32x32xf32> to vector<13x32xf32>
    %c16_97 = arith.constant 16 : index
    %c64_98 = arith.constant 64 : index
    %168 = vector.load %arg5[%c16_97, %c64_98] : memref<32x96xf32, #tpu.memory_space<vmem>>, vector<13x32xf32>
    tpu.vector_store %arg5[%c16_97, %c64_98], %167 {strides = array<i32>} : memref<32x96xf32, #tpu.memory_space<vmem>>, vector<13x32xf32>,
    %c0_99 = arith.constant 0 : index
    %c0_100 = arith.constant 0 : index
    %169 = vector.load %arg5[%c0_99, %c0_100] : memref<32x96xf32, #tpu.memory_space<vmem>>, vector<32x96xf32>
    %c2 = arith.constant 2 : index
    %c0_101 = arith.constant 0 : index
    %c0_102 = arith.constant 0 : index
    %170 = vector.load %arg1[%c2, %c0_101, %c0_102] : memref<10x96x32xf32, #tpu.memory_space<vmem>>, vector<1x96x32xf32>
    %171 = vector.shape_cast %170 : vector<1x96x32xf32> to vector<96x32xf32>
    %cst_103 = arith.constant dense<0.000000e+00> : vector<32x32xf32>
    %172 = tpu.matmul %169, %171, %cst_103 {dimension_numbers = #tpu.dot_dimension_numbers<[1], [0], [0], [1], [0, 0, 1, 1], [], []>} : vector<32x96xf32>, vector<96x32xf32>, vector<32x32xf32> -> vector<32x32xf32>
    %c18 = arith.constant 18 : index
    %c0_104 = arith.constant 0 : index
    %173 = vector.load %arg3[%c18, %c0_104] : memref<360x128xf32, #tpu.memory_space<vmem>>, vector<1x32xf32>
    %174 = vector.broadcast %173 : vector<1x32xf32> to vector<32x32xf32>
    %175 = arith.mulf %172, %174 : vector<32x32xf32>
    %c34 = arith.constant 34 : index
    %c0_105 = arith.constant 0 : index
    %176 = vector.load %arg3[%c34, %c0_105] : memref<360x128xf32, #tpu.memory_space<vmem>>, vector<1x32xf32>
    %177 = vector.broadcast %176 : vector<1x32xf32> to vector<32x32xf32>
    %178 = arith.addf %175, %177 : vector<32x32xf32>
    %cst_106 = arith.constant 5.000000e-01 : f32
    %179 = vector.broadcast %cst_106 : f32 to vector<32x32xf32>
    %180 = arith.mulf %179, %178 : vector<32x32xf32>
    %cst_107 = arith.constant 0.707106769 : f32
    %181 = vector.broadcast %cst_107 : f32 to vector<32x32xf32>
    %182 = arith.mulf %178, %181 : vector<32x32xf32>
    %cst_108 = arith.constant 0.000000e+00 : f32
    %183 = vector.broadcast %cst_108 : f32 to vector<32x32xf32>
    %184 = arith.cmpf oge, %182, %183 : vector<32x32xf32>
    %cst_109 = arith.constant 1.000000e+00 : f32
    %cst_110 = arith.constant -1.000000e+00 : f32
    %185 = vector.broadcast %cst_109 : f32 to vector<32x32xf32>
    %186 = vector.broadcast %cst_110 : f32 to vector<32x32xf32>
    %187 = arith.select %184, %185, %186 : vector<32x32xi1>, vector<32x32xf32>
    %188 = math.absf %182 : vector<32x32xf32>
    %cst_111 = arith.constant 0.327591091 : f32
    %189 = vector.broadcast %cst_111 : f32 to vector<32x32xf32>
    %190 = arith.mulf %189, %188 : vector<32x32xf32>
    %cst_112 = arith.constant 1.000000e+00 : f32
    %191 = vector.broadcast %cst_112 : f32 to vector<32x32xf32>
    %192 = arith.addf %191, %190 : vector<32x32xf32>
    %193 = tpu.reciprocal %192 {approx = true} : vector<32x32xf32> -> vector<32x32xf32>
    %194 = arith.mulf %192, %193 : vector<32x32xf32>
    %cst_113 = arith.constant 2.000000e+00 : f32
    %195 = vector.broadcast %cst_113 : f32 to vector<32x32xf32>
    %196 = arith.subf %195, %194 : vector<32x32xf32>
    %197 = arith.mulf %193, %196 : vector<32x32xf32>
    %cst_114 = arith.constant 1.06140542 : f32
    %198 = vector.broadcast %cst_114 : f32 to vector<32x32xf32>
    %199 = arith.mulf %198, %197 : vector<32x32xf32>
    %cst_115 = arith.constant -1.45315206 : f32
    %200 = vector.broadcast %cst_115 : f32 to vector<32x32xf32>
    %201 = arith.addf %199, %200 : vector<32x32xf32>
    %202 = arith.mulf %201, %197 : vector<32x32xf32>
    %cst_116 = arith.constant 1.42141378 : f32
    %203 = vector.broadcast %cst_116 : f32 to vector<32x32xf32>
    %204 = arith.addf %202, %203 : vector<32x32xf32>
    %205 = arith.mulf %204, %197 : vector<32x32xf32>
    %cst_117 = arith.constant -0.284496725 : f32
    %206 = vector.broadcast %cst_117 : f32 to vector<32x32xf32>
    %207 = arith.addf %205, %206 : vector<32x32xf32>
    %208 = arith.mulf %207, %197 : vector<32x32xf32>
    %cst_118 = arith.constant 0.254829586 : f32
    %209 = vector.broadcast %cst_118 : f32 to vector<32x32xf32>
    %210 = arith.addf %208, %209 : vector<32x32xf32>
    %211 = arith.mulf %210, %197 : vector<32x32xf32>
    %cst_119 = arith.constant 0.000000e+00 : f32
    %212 = vector.broadcast %cst_119 : f32 to vector<32x32xf32>
    %213 = arith.subf %212, %188 : vector<32x32xf32>
    %214 = arith.mulf %213, %188 : vector<32x32xf32>
    %215 = math.exp %214 : vector<32x32xf32>
    %216 = arith.mulf %211, %215 : vector<32x32xf32>
    %cst_120 = arith.constant 1.000000e+00 : f32
    %217 = vector.broadcast %cst_120 : f32 to vector<32x32xf32>
    %218 = arith.subf %217, %216 : vector<32x32xf32>
    %219 = arith.mulf %187, %218 : vector<32x32xf32>
    %cst_121 = arith.constant 1.000000e+00 : f32
    %220 = vector.broadcast %cst_121 : f32 to vector<32x32xf32>
    %221 = arith.addf %220, %219 : vector<32x32xf32>
    %222 = arith.mulf %180, %221 : vector<32x32xf32>
    %223 = arith.addf %222, %159 : vector<32x32xf32>
    %224 = vector.extract_strided_slice %223 {offsets = [0, 0], sizes = [13, 32], strides = [1, 1]} : vector<32x32xf32> to vector<13x32xf32>
    %c3_122 = arith.constant 3 : index
    %c0_123 = arith.constant 0 : index
    %225 = vector.load %arg5[%c3_122, %c0_123] : memref<32x96xf32, #tpu.memory_space<vmem>>, vector<13x32xf32>
    tpu.vector_store %arg5[%c3_122, %c0_123], %224 {strides = array<i32>} : memref<32x96xf32, #tpu.memory_space<vmem>>, vector<13x32xf32>,
    %226 = vector.extract_strided_slice %223 {offsets = [16, 0], sizes = [13, 32], strides = [1, 1]} : vector<32x32xf32> to vector<13x32xf32>
    %c19_124 = arith.constant 19 : index
    %c0_125 = arith.constant 0 : index
    %227 = vector.load %arg5[%c19_124, %c0_125] : memref<32x96xf32, #tpu.memory_space<vmem>>, vector<13x32xf32>
    tpu.vector_store %arg5[%c19_124, %c0_125], %226 {strides = array<i32>} : memref<32x96xf32, #tpu.memory_space<vmem>>, vector<13x32xf32>,
    %c0_126 = arith.constant 0 : index
    %c32_127 = arith.constant 32 : index
    %228 = vector.load %arg5[%c0_126, %c32_127] : memref<32x96xf32, #tpu.memory_space<vmem>>, vector<32x32xf32>
    tpu.vector_store %arg5[%c0_126, %c32_127], %223 {strides = array<i32>} : memref<32x96xf32, #tpu.memory_space<vmem>>, vector<32x32xf32>,
    %229 = vector.extract_strided_slice %223 {offsets = [3, 0], sizes = [13, 32], strides = [1, 1]} : vector<32x32xf32> to vector<13x32xf32>
    %c0_128 = arith.constant 0 : index
    %c64_129 = arith.constant 64 : index
    %230 = vector.load %arg5[%c0_128, %c64_129] : memref<32x96xf32, #tpu.memory_space<vmem>>, vector<13x32xf32>
    tpu.vector_store %arg5[%c0_128, %c64_129], %229 {strides = array<i32>} : memref<32x96xf32, #tpu.memory_space<vmem>>, vector<13x32xf32>,
    %231 = vector.extract_strided_slice %223 {offsets = [19, 0], sizes = [13, 32], strides = [1, 1]} : vector<32x32xf32> to vector<13x32xf32>
    %c16_130 = arith.constant 16 : index
    %c64_131 = arith.constant 64 : index
    %232 = vector.load %arg5[%c16_130, %c64_131] : memref<32x96xf32, #tpu.memory_space<vmem>>, vector<13x32xf32>
    tpu.vector_store %arg5[%c16_130, %c64_131], %231 {strides = array<i32>} : memref<32x96xf32, #tpu.memory_space<vmem>>, vector<13x32xf32>,
    %c0_132 = arith.constant 0 : index
    %c0_133 = arith.constant 0 : index
    %233 = vector.load %arg5[%c0_132, %c0_133] : memref<32x96xf32, #tpu.memory_space<vmem>>, vector<32x96xf32>
    %c3_134 = arith.constant 3 : index
    %c0_135 = arith.constant 0 : index
    %c0_136 = arith.constant 0 : index
    %234 = vector.load %arg1[%c3_134, %c0_135, %c0_136] : memref<10x96x32xf32, #tpu.memory_space<vmem>>, vector<1x96x32xf32>
    %235 = vector.shape_cast %234 : vector<1x96x32xf32> to vector<96x32xf32>
    %cst_137 = arith.constant dense<0.000000e+00> : vector<32x32xf32>
    %236 = tpu.matmul %233, %235, %cst_137 {dimension_numbers = #tpu.dot_dimension_numbers<[1], [0], [0], [1], [0, 0, 1, 1], [], []>} : vector<32x96xf32>, vector<96x32xf32>, vector<32x32xf32> -> vector<32x32xf32>
    %c19_138 = arith.constant 19 : index
    %c0_139 = arith.constant 0 : index
    %237 = vector.load %arg3[%c19_138, %c0_139] : memref<360x128xf32, #tpu.memory_space<vmem>>, vector<1x32xf32>
    %238 = vector.broadcast %237 : vector<1x32xf32> to vector<32x32xf32>
    %239 = arith.mulf %236, %238 : vector<32x32xf32>
    %c35 = arith.constant 35 : index
    %c0_140 = arith.constant 0 : index
    %240 = vector.load %arg3[%c35, %c0_140] : memref<360x128xf32, #tpu.memory_space<vmem>>, vector<1x32xf32>
    %241 = vector.broadcast %240 : vector<1x32xf32> to vector<32x32xf32>
    %242 = arith.addf %239, %241 : vector<32x32xf32>
    %cst_141 = arith.constant 5.000000e-01 : f32
    %243 = vector.broadcast %cst_141 : f32 to vector<32x32xf32>
    %244 = arith.mulf %243, %242 : vector<32x32xf32>
    %cst_142 = arith.constant 0.707106769 : f32
    %245 = vector.broadcast %cst_142 : f32 to vector<32x32xf32>
    %246 = arith.mulf %242, %245 : vector<32x32xf32>
    %cst_143 = arith.constant 0.000000e+00 : f32
    %247 = vector.broadcast %cst_143 : f32 to vector<32x32xf32>
    %248 = arith.cmpf oge, %246, %247 : vector<32x32xf32>
    %cst_144 = arith.constant 1.000000e+00 : f32
    %cst_145 = arith.constant -1.000000e+00 : f32
    %249 = vector.broadcast %cst_144 : f32 to vector<32x32xf32>
    %250 = vector.broadcast %cst_145 : f32 to vector<32x32xf32>
    %251 = arith.select %248, %249, %250 : vector<32x32xi1>, vector<32x32xf32>
    %252 = math.absf %246 : vector<32x32xf32>
    %cst_146 = arith.constant 0.327591091 : f32
    %253 = vector.broadcast %cst_146 : f32 to vector<32x32xf32>
    %254 = arith.mulf %253, %252 : vector<32x32xf32>
    %cst_147 = arith.constant 1.000000e+00 : f32
    %255 = vector.broadcast %cst_147 : f32 to vector<32x32xf32>
    %256 = arith.addf %255, %254 : vector<32x32xf32>
    %257 = tpu.reciprocal %256 {approx = true} : vector<32x32xf32> -> vector<32x32xf32>
    %258 = arith.mulf %256, %257 : vector<32x32xf32>
    %cst_148 = arith.constant 2.000000e+00 : f32
    %259 = vector.broadcast %cst_148 : f32 to vector<32x32xf32>
    %260 = arith.subf %259, %258 : vector<32x32xf32>
    %261 = arith.mulf %257, %260 : vector<32x32xf32>
    %cst_149 = arith.constant 1.06140542 : f32
    %262 = vector.broadcast %cst_149 : f32 to vector<32x32xf32>
    %263 = arith.mulf %262, %261 : vector<32x32xf32>
    %cst_150 = arith.constant -1.45315206 : f32
    %264 = vector.broadcast %cst_150 : f32 to vector<32x32xf32>
    %265 = arith.addf %263, %264 : vector<32x32xf32>
    %266 = arith.mulf %265, %261 : vector<32x32xf32>
    %cst_151 = arith.constant 1.42141378 : f32
    %267 = vector.broadcast %cst_151 : f32 to vector<32x32xf32>
    %268 = arith.addf %266, %267 : vector<32x32xf32>
    %269 = arith.mulf %268, %261 : vector<32x32xf32>
    %cst_152 = arith.constant -0.284496725 : f32
    %270 = vector.broadcast %cst_152 : f32 to vector<32x32xf32>
    %271 = arith.addf %269, %270 : vector<32x32xf32>
    %272 = arith.mulf %271, %261 : vector<32x32xf32>
    %cst_153 = arith.constant 0.254829586 : f32
    %273 = vector.broadcast %cst_153 : f32 to vector<32x32xf32>
    %274 = arith.addf %272, %273 : vector<32x32xf32>
    %275 = arith.mulf %274, %261 : vector<32x32xf32>
    %cst_154 = arith.constant 0.000000e+00 : f32
    %276 = vector.broadcast %cst_154 : f32 to vector<32x32xf32>
    %277 = arith.subf %276, %252 : vector<32x32xf32>
    %278 = arith.mulf %277, %252 : vector<32x32xf32>
    %279 = math.exp %278 : vector<32x32xf32>
    %280 = arith.mulf %275, %279 : vector<32x32xf32>
    %cst_155 = arith.constant 1.000000e+00 : f32
    %281 = vector.broadcast %cst_155 : f32 to vector<32x32xf32>
    %282 = arith.subf %281, %280 : vector<32x32xf32>
    %283 = arith.mulf %251, %282 : vector<32x32xf32>
    %cst_156 = arith.constant 1.000000e+00 : f32
    %284 = vector.broadcast %cst_156 : f32 to vector<32x32xf32>
    %285 = arith.addf %284, %283 : vector<32x32xf32>
    %286 = arith.mulf %244, %285 : vector<32x32xf32>
    %287 = arith.addf %286, %223 : vector<32x32xf32>
    %288 = vector.extract_strided_slice %287 {offsets = [0, 0], sizes = [13, 32], strides = [1, 1]} : vector<32x32xf32> to vector<13x32xf32>
    %c3_157 = arith.constant 3 : index
    %c0_158 = arith.constant 0 : index
    %289 = vector.load %arg5[%c3_157, %c0_158] : memref<32x96xf32, #tpu.memory_space<vmem>>, vector<13x32xf32>
    tpu.vector_store %arg5[%c3_157, %c0_158], %288 {strides = array<i32>} : memref<32x96xf32, #tpu.memory_space<vmem>>, vector<13x32xf32>,
    %290 = vector.extract_strided_slice %287 {offsets = [16, 0], sizes = [13, 32], strides = [1, 1]} : vector<32x32xf32> to vector<13x32xf32>
    %c19_159 = arith.constant 19 : index
    %c0_160 = arith.constant 0 : index
    %291 = vector.load %arg5[%c19_159, %c0_160] : memref<32x96xf32, #tpu.memory_space<vmem>>, vector<13x32xf32>
    tpu.vector_store %arg5[%c19_159, %c0_160], %290 {strides = array<i32>} : memref<32x96xf32, #tpu.memory_space<vmem>>, vector<13x32xf32>,
    %c0_161 = arith.constant 0 : index
    %c32_162 = arith.constant 32 : index
    %292 = vector.load %arg5[%c0_161, %c32_162] : memref<32x96xf32, #tpu.memory_space<vmem>>, vector<32x32xf32>
    tpu.vector_store %arg5[%c0_161, %c32_162], %287 {strides = array<i32>} : memref<32x96xf32, #tpu.memory_space<vmem>>, vector<32x32xf32>,
    %293 = vector.extract_strided_slice %287 {offsets = [3, 0], sizes = [13, 32], strides = [1, 1]} : vector<32x32xf32> to vector<13x32xf32>
    %c0_163 = arith.constant 0 : index
    %c64_164 = arith.constant 64 : index
    %294 = vector.load %arg5[%c0_163, %c64_164] : memref<32x96xf32, #tpu.memory_space<vmem>>, vector<13x32xf32>
    tpu.vector_store %arg5[%c0_163, %c64_164], %293 {strides = array<i32>} : memref<32x96xf32, #tpu.memory_space<vmem>>, vector<13x32xf32>,
    %295 = vector.extract_strided_slice %287 {offsets = [19, 0], sizes = [13, 32], strides = [1, 1]} : vector<32x32xf32> to vector<13x32xf32>
    %c16_165 = arith.constant 16 : index
    %c64_166 = arith.constant 64 : index
    %296 = vector.load %arg5[%c16_165, %c64_166] : memref<32x96xf32, #tpu.memory_space<vmem>>, vector<13x32xf32>
    tpu.vector_store %arg5[%c16_165, %c64_166], %295 {strides = array<i32>} : memref<32x96xf32, #tpu.memory_space<vmem>>, vector<13x32xf32>,
    %c0_167 = arith.constant 0 : index
    %c0_168 = arith.constant 0 : index
    %297 = vector.load %arg5[%c0_167, %c0_168] : memref<32x96xf32, #tpu.memory_space<vmem>>, vector<32x96xf32>
    %c1_169 = arith.constant 1 : index
    %c0_170 = arith.constant 0 : index
    %c0_171 = arith.constant 0 : index
    %298 = vector.load %arg2[%c1_169, %c0_170, %c0_171] : memref<5x96x64xf32, #tpu.memory_space<vmem>>, vector<1x96x64xf32>
    %299 = vector.shape_cast %298 : vector<1x96x64xf32> to vector<96x64xf32>
    %cst_172 = arith.constant dense<0.000000e+00> : vector<32x64xf32>
    %300 = tpu.matmul %297, %299, %cst_172 {dimension_numbers = #tpu.dot_dimension_numbers<[1], [0], [0], [1], [0, 0, 1, 1], [], []>} : vector<32x96xf32>, vector<96x64xf32>, vector<32x64xf32> -> vector<32x64xf32>
    %c49 = arith.constant 49 : index
    %c0_173 = arith.constant 0 : index
    %301 = vector.load %arg3[%c49, %c0_173] : memref<360x128xf32, #tpu.memory_space<vmem>>, vector<1x64xf32>
    %302 = vector.broadcast %301 : vector<1x64xf32> to vector<32x64xf32>
    %303 = arith.addf %300, %302 : vector<32x64xf32>
    %304 = vector.extract_strided_slice %303 {offsets = [0, 0], sizes = [32, 32], strides = [1, 1]} : vector<32x64xf32> to vector<32x32xf32>
    %305 = vector.extract_strided_slice %303 {offsets = [0, 32], sizes = [32, 32], strides = [1, 1]} : vector<32x64xf32> to vector<32x32xf32>
    %306 = arith.negf %305 : vector<32x32xf32>
    %307 = math.exp %306 : vector<32x32xf32>
    %cst_174 = arith.constant 1.000000e+00 : f32
    %308 = vector.broadcast %cst_174 : f32 to vector<32x32xf32>
    %309 = arith.addf %308, %307 : vector<32x32xf32>
    %310 = arith.divf %308, %309 : vector<32x32xf32>
    %311 = arith.mulf %304, %310 : vector<32x32xf32>
    %312 = vector.extract_strided_slice %311 {offsets = [0, 0], sizes = [13, 32], strides = [1, 1]} : vector<32x32xf32> to vector<13x32xf32>
    %c3_175 = arith.constant 3 : index
    %c0_176 = arith.constant 0 : index
    %313 = vector.load %arg5[%c3_175, %c0_176] : memref<32x96xf32, #tpu.memory_space<vmem>>, vector<13x32xf32>
    tpu.vector_store %arg5[%c3_175, %c0_176], %312 {strides = array<i32>} : memref<32x96xf32, #tpu.memory_space<vmem>>, vector<13x32xf32>,
    %314 = vector.extract_strided_slice %311 {offsets = [16, 0], sizes = [13, 32], strides = [1, 1]} : vector<32x32xf32> to vector<13x32xf32>
    %c19_177 = arith.constant 19 : index
    %c0_178 = arith.constant 0 : index
    %315 = vector.load %arg5[%c19_177, %c0_178] : memref<32x96xf32, #tpu.memory_space<vmem>>, vector<13x32xf32>
    tpu.vector_store %arg5[%c19_177, %c0_178], %314 {strides = array<i32>} : memref<32x96xf32, #tpu.memory_space<vmem>>, vector<13x32xf32>,
    %c0_179 = arith.constant 0 : index
    %c32_180 = arith.constant 32 : index
    %316 = vector.load %arg5[%c0_179, %c32_180] : memref<32x96xf32, #tpu.memory_space<vmem>>, vector<32x32xf32>
    tpu.vector_store %arg5[%c0_179, %c32_180], %311 {strides = array<i32>} : memref<32x96xf32, #tpu.memory_space<vmem>>, vector<32x32xf32>,
    %317 = vector.extract_strided_slice %311 {offsets = [3, 0], sizes = [13, 32], strides = [1, 1]} : vector<32x32xf32> to vector<13x32xf32>
    %c0_181 = arith.constant 0 : index
    %c64_182 = arith.constant 64 : index
    %318 = vector.load %arg5[%c0_181, %c64_182] : memref<32x96xf32, #tpu.memory_space<vmem>>, vector<13x32xf32>
    tpu.vector_store %arg5[%c0_181, %c64_182], %317 {strides = array<i32>} : memref<32x96xf32, #tpu.memory_space<vmem>>, vector<13x32xf32>,
    %319 = vector.extract_strided_slice %311 {offsets = [19, 0], sizes = [13, 32], strides = [1, 1]} : vector<32x32xf32> to vector<13x32xf32>
    %c16_183 = arith.constant 16 : index
    %c64_184 = arith.constant 64 : index
    %320 = vector.load %arg5[%c16_183, %c64_184] : memref<32x96xf32, #tpu.memory_space<vmem>>, vector<13x32xf32>
    tpu.vector_store %arg5[%c16_183, %c64_184], %319 {strides = array<i32>} : memref<32x96xf32, #tpu.memory_space<vmem>>, vector<13x32xf32>,
    %c0_185 = arith.constant 0 : index
    %c0_186 = arith.constant 0 : index
    %321 = vector.load %arg5[%c0_185, %c0_186] : memref<32x96xf32, #tpu.memory_space<vmem>>, vector<32x96xf32>
    %c4 = arith.constant 4 : index
    %c0_187 = arith.constant 0 : index
    %c0_188 = arith.constant 0 : index
    %322 = vector.load %arg1[%c4, %c0_187, %c0_188] : memref<10x96x32xf32, #tpu.memory_space<vmem>>, vector<1x96x32xf32>
    %323 = vector.shape_cast %322 : vector<1x96x32xf32> to vector<96x32xf32>
    %cst_189 = arith.constant dense<0.000000e+00> : vector<32x32xf32>
    %324 = tpu.matmul %321, %323, %cst_189 {dimension_numbers = #tpu.dot_dimension_numbers<[1], [0], [0], [1], [0, 0, 1, 1], [], []>} : vector<32x96xf32>, vector<96x32xf32>, vector<32x32xf32> -> vector<32x32xf32>
    %c20 = arith.constant 20 : index
    %c0_190 = arith.constant 0 : index
    %325 = vector.load %arg3[%c20, %c0_190] : memref<360x128xf32, #tpu.memory_space<vmem>>, vector<1x32xf32>
    %326 = vector.broadcast %325 : vector<1x32xf32> to vector<32x32xf32>
    %327 = arith.mulf %324, %326 : vector<32x32xf32>
    %c36 = arith.constant 36 : index
    %c0_191 = arith.constant 0 : index
    %328 = vector.load %arg3[%c36, %c0_191] : memref<360x128xf32, #tpu.memory_space<vmem>>, vector<1x32xf32>
    %329 = vector.broadcast %328 : vector<1x32xf32> to vector<32x32xf32>
    %330 = arith.addf %327, %329 : vector<32x32xf32>
    %cst_192 = arith.constant 5.000000e-01 : f32
    %331 = vector.broadcast %cst_192 : f32 to vector<32x32xf32>
    %332 = arith.mulf %331, %330 : vector<32x32xf32>
    %cst_193 = arith.constant 0.707106769 : f32
    %333 = vector.broadcast %cst_193 : f32 to vector<32x32xf32>
    %334 = arith.mulf %330, %333 : vector<32x32xf32>
    %cst_194 = arith.constant 0.000000e+00 : f32
    %335 = vector.broadcast %cst_194 : f32 to vector<32x32xf32>
    %336 = arith.cmpf oge, %334, %335 : vector<32x32xf32>
    %cst_195 = arith.constant 1.000000e+00 : f32
    %cst_196 = arith.constant -1.000000e+00 : f32
    %337 = vector.broadcast %cst_195 : f32 to vector<32x32xf32>
    %338 = vector.broadcast %cst_196 : f32 to vector<32x32xf32>
    %339 = arith.select %336, %337, %338 : vector<32x32xi1>, vector<32x32xf32>
    %340 = math.absf %334 : vector<32x32xf32>
    %cst_197 = arith.constant 0.327591091 : f32
    %341 = vector.broadcast %cst_197 : f32 to vector<32x32xf32>
    %342 = arith.mulf %341, %340 : vector<32x32xf32>
    %cst_198 = arith.constant 1.000000e+00 : f32
    %343 = vector.broadcast %cst_198 : f32 to vector<32x32xf32>
    %344 = arith.addf %343, %342 : vector<32x32xf32>
    %345 = tpu.reciprocal %344 {approx = true} : vector<32x32xf32> -> vector<32x32xf32>
    %346 = arith.mulf %344, %345 : vector<32x32xf32>
    %cst_199 = arith.constant 2.000000e+00 : f32
    %347 = vector.broadcast %cst_199 : f32 to vector<32x32xf32>
    %348 = arith.subf %347, %346 : vector<32x32xf32>
    %349 = arith.mulf %345, %348 : vector<32x32xf32>
    %cst_200 = arith.constant 1.06140542 : f32
    %350 = vector.broadcast %cst_200 : f32 to vector<32x32xf32>
    %351 = arith.mulf %350, %349 : vector<32x32xf32>
    %cst_201 = arith.constant -1.45315206 : f32
    %352 = vector.broadcast %cst_201 : f32 to vector<32x32xf32>
    %353 = arith.addf %351, %352 : vector<32x32xf32>
    %354 = arith.mulf %353, %349 : vector<32x32xf32>
    %cst_202 = arith.constant 1.42141378 : f32
    %355 = vector.broadcast %cst_202 : f32 to vector<32x32xf32>
    %356 = arith.addf %354, %355 : vector<32x32xf32>
    %357 = arith.mulf %356, %349 : vector<32x32xf32>
    %cst_203 = arith.constant -0.284496725 : f32
    %358 = vector.broadcast %cst_203 : f32 to vector<32x32xf32>
    %359 = arith.addf %357, %358 : vector<32x32xf32>
    %360 = arith.mulf %359, %349 : vector<32x32xf32>
    %cst_204 = arith.constant 0.254829586 : f32
    %361 = vector.broadcast %cst_204 : f32 to vector<32x32xf32>
    %362 = arith.addf %360, %361 : vector<32x32xf32>
    %363 = arith.mulf %362, %349 : vector<32x32xf32>
    %cst_205 = arith.constant 0.000000e+00 : f32
    %364 = vector.broadcast %cst_205 : f32 to vector<32x32xf32>
    %365 = arith.subf %364, %340 : vector<32x32xf32>
    %366 = arith.mulf %365, %340 : vector<32x32xf32>
    %367 = math.exp %366 : vector<32x32xf32>
    %368 = arith.mulf %363, %367 : vector<32x32xf32>
    %cst_206 = arith.constant 1.000000e+00 : f32
    %369 = vector.broadcast %cst_206 : f32 to vector<32x32xf32>
    %370 = arith.subf %369, %368 : vector<32x32xf32>
    %371 = arith.mulf %339, %370 : vector<32x32xf32>
    %cst_207 = arith.constant 1.000000e+00 : f32
    %372 = vector.broadcast %cst_207 : f32 to vector<32x32xf32>
    %373 = arith.addf %372, %371 : vector<32x32xf32>
    %374 = arith.mulf %332, %373 : vector<32x32xf32>
    %375 = arith.addf %374, %311 : vector<32x32xf32>
    %376 = vector.extract_strided_slice %375 {offsets = [0, 0], sizes = [13, 32], strides = [1, 1]} : vector<32x32xf32> to vector<13x32xf32>
    %c3_208 = arith.constant 3 : index
    %c0_209 = arith.constant 0 : index
    %377 = vector.load %arg5[%c3_208, %c0_209] : memref<32x96xf32, #tpu.memory_space<vmem>>, vector<13x32xf32>
    tpu.vector_store %arg5[%c3_208, %c0_209], %376 {strides = array<i32>} : memref<32x96xf32, #tpu.memory_space<vmem>>, vector<13x32xf32>,
    %378 = vector.extract_strided_slice %375 {offsets = [16, 0], sizes = [13, 32], strides = [1, 1]} : vector<32x32xf32> to vector<13x32xf32>
    %c19_210 = arith.constant 19 : index
    %c0_211 = arith.constant 0 : index
    %379 = vector.load %arg5[%c19_210, %c0_211] : memref<32x96xf32, #tpu.memory_space<vmem>>, vector<13x32xf32>
    tpu.vector_store %arg5[%c19_210, %c0_211], %378 {strides = array<i32>} : memref<32x96xf32, #tpu.memory_space<vmem>>, vector<13x32xf32>,
    %c0_212 = arith.constant 0 : index
    %c32_213 = arith.constant 32 : index
    %380 = vector.load %arg5[%c0_212, %c32_213] : memref<32x96xf32, #tpu.memory_space<vmem>>, vector<32x32xf32>
    tpu.vector_store %arg5[%c0_212, %c32_213], %375 {strides = array<i32>} : memref<32x96xf32, #tpu.memory_space<vmem>>, vector<32x32xf32>,
    %381 = vector.extract_strided_slice %375 {offsets = [3, 0], sizes = [13, 32], strides = [1, 1]} : vector<32x32xf32> to vector<13x32xf32>
    %c0_214 = arith.constant 0 : index
    %c64_215 = arith.constant 64 : index
    %382 = vector.load %arg5[%c0_214, %c64_215] : memref<32x96xf32, #tpu.memory_space<vmem>>, vector<13x32xf32>
    tpu.vector_store %arg5[%c0_214, %c64_215], %381 {strides = array<i32>} : memref<32x96xf32, #tpu.memory_space<vmem>>, vector<13x32xf32>,
    %383 = vector.extract_strided_slice %375 {offsets = [19, 0], sizes = [13, 32], strides = [1, 1]} : vector<32x32xf32> to vector<13x32xf32>
    %c16_216 = arith.constant 16 : index
    %c64_217 = arith.constant 64 : index
    %384 = vector.load %arg5[%c16_216, %c64_217] : memref<32x96xf32, #tpu.memory_space<vmem>>, vector<13x32xf32>
    tpu.vector_store %arg5[%c16_216, %c64_217], %383 {strides = array<i32>} : memref<32x96xf32, #tpu.memory_space<vmem>>, vector<13x32xf32>,
    %c0_218 = arith.constant 0 : index
    %c0_219 = arith.constant 0 : index
    %385 = vector.load %arg5[%c0_218, %c0_219] : memref<32x96xf32, #tpu.memory_space<vmem>>, vector<32x96xf32>
    %c5 = arith.constant 5 : index
    %c0_220 = arith.constant 0 : index
    %c0_221 = arith.constant 0 : index
    %386 = vector.load %arg1[%c5, %c0_220, %c0_221] : memref<10x96x32xf32, #tpu.memory_space<vmem>>, vector<1x96x32xf32>
    %387 = vector.shape_cast %386 : vector<1x96x32xf32> to vector<96x32xf32>
    %cst_222 = arith.constant dense<0.000000e+00> : vector<32x32xf32>
    %388 = tpu.matmul %385, %387, %cst_222 {dimension_numbers = #tpu.dot_dimension_numbers<[1], [0], [0], [1], [0, 0, 1, 1], [], []>} : vector<32x96xf32>, vector<96x32xf32>, vector<32x32xf32> -> vector<32x32xf32>
    %c21 = arith.constant 21 : index
    %c0_223 = arith.constant 0 : index
    %389 = vector.load %arg3[%c21, %c0_223] : memref<360x128xf32, #tpu.memory_space<vmem>>, vector<1x32xf32>
    %390 = vector.broadcast %389 : vector<1x32xf32> to vector<32x32xf32>
    %391 = arith.mulf %388, %390 : vector<32x32xf32>
    %c37 = arith.constant 37 : index
    %c0_224 = arith.constant 0 : index
    %392 = vector.load %arg3[%c37, %c0_224] : memref<360x128xf32, #tpu.memory_space<vmem>>, vector<1x32xf32>
    %393 = vector.broadcast %392 : vector<1x32xf32> to vector<32x32xf32>
    %394 = arith.addf %391, %393 : vector<32x32xf32>
    %cst_225 = arith.constant 5.000000e-01 : f32
    %395 = vector.broadcast %cst_225 : f32 to vector<32x32xf32>
    %396 = arith.mulf %395, %394 : vector<32x32xf32>
    %cst_226 = arith.constant 0.707106769 : f32
    %397 = vector.broadcast %cst_226 : f32 to vector<32x32xf32>
    %398 = arith.mulf %394, %397 : vector<32x32xf32>
    %cst_227 = arith.constant 0.000000e+00 : f32
    %399 = vector.broadcast %cst_227 : f32 to vector<32x32xf32>
    %400 = arith.cmpf oge, %398, %399 : vector<32x32xf32>
    %cst_228 = arith.constant 1.000000e+00 : f32
    %cst_229 = arith.constant -1.000000e+00 : f32
    %401 = vector.broadcast %cst_228 : f32 to vector<32x32xf32>
    %402 = vector.broadcast %cst_229 : f32 to vector<32x32xf32>
    %403 = arith.select %400, %401, %402 : vector<32x32xi1>, vector<32x32xf32>
    %404 = math.absf %398 : vector<32x32xf32>
    %cst_230 = arith.constant 0.327591091 : f32
    %405 = vector.broadcast %cst_230 : f32 to vector<32x32xf32>
    %406 = arith.mulf %405, %404 : vector<32x32xf32>
    %cst_231 = arith.constant 1.000000e+00 : f32
    %407 = vector.broadcast %cst_231 : f32 to vector<32x32xf32>
    %408 = arith.addf %407, %406 : vector<32x32xf32>
    %409 = tpu.reciprocal %408 {approx = true} : vector<32x32xf32> -> vector<32x32xf32>
    %410 = arith.mulf %408, %409 : vector<32x32xf32>
    %cst_232 = arith.constant 2.000000e+00 : f32
    %411 = vector.broadcast %cst_232 : f32 to vector<32x32xf32>
    %412 = arith.subf %411, %410 : vector<32x32xf32>
    %413 = arith.mulf %409, %412 : vector<32x32xf32>
    %cst_233 = arith.constant 1.06140542 : f32
    %414 = vector.broadcast %cst_233 : f32 to vector<32x32xf32>
    %415 = arith.mulf %414, %413 : vector<32x32xf32>
    %cst_234 = arith.constant -1.45315206 : f32
    %416 = vector.broadcast %cst_234 : f32 to vector<32x32xf32>
    %417 = arith.addf %415, %416 : vector<32x32xf32>
    %418 = arith.mulf %417, %413 : vector<32x32xf32>
    %cst_235 = arith.constant 1.42141378 : f32
    %419 = vector.broadcast %cst_235 : f32 to vector<32x32xf32>
    %420 = arith.addf %418, %419 : vector<32x32xf32>
    %421 = arith.mulf %420, %413 : vector<32x32xf32>
    %cst_236 = arith.constant -0.284496725 : f32
    %422 = vector.broadcast %cst_236 : f32 to vector<32x32xf32>
    %423 = arith.addf %421, %422 : vector<32x32xf32>
    %424 = arith.mulf %423, %413 : vector<32x32xf32>
    %cst_237 = arith.constant 0.254829586 : f32
    %425 = vector.broadcast %cst_237 : f32 to vector<32x32xf32>
    %426 = arith.addf %424, %425 : vector<32x32xf32>
    %427 = arith.mulf %426, %413 : vector<32x32xf32>
    %cst_238 = arith.constant 0.000000e+00 : f32
    %428 = vector.broadcast %cst_238 : f32 to vector<32x32xf32>
    %429 = arith.subf %428, %404 : vector<32x32xf32>
    %430 = arith.mulf %429, %404 : vector<32x32xf32>
    %431 = math.exp %430 : vector<32x32xf32>
    %432 = arith.mulf %427, %431 : vector<32x32xf32>
    %cst_239 = arith.constant 1.000000e+00 : f32
    %433 = vector.broadcast %cst_239 : f32 to vector<32x32xf32>
    %434 = arith.subf %433, %432 : vector<32x32xf32>
    %435 = arith.mulf %403, %434 : vector<32x32xf32>
    %cst_240 = arith.constant 1.000000e+00 : f32
    %436 = vector.broadcast %cst_240 : f32 to vector<32x32xf32>
    %437 = arith.addf %436, %435 : vector<32x32xf32>
    %438 = arith.mulf %396, %437 : vector<32x32xf32>
    %439 = arith.addf %438, %375 : vector<32x32xf32>
    %440 = vector.extract_strided_slice %439 {offsets = [0, 0], sizes = [13, 32], strides = [1, 1]} : vector<32x32xf32> to vector<13x32xf32>
    %c3_241 = arith.constant 3 : index
    %c0_242 = arith.constant 0 : index
    %441 = vector.load %arg5[%c3_241, %c0_242] : memref<32x96xf32, #tpu.memory_space<vmem>>, vector<13x32xf32>
    tpu.vector_store %arg5[%c3_241, %c0_242], %440 {strides = array<i32>} : memref<32x96xf32, #tpu.memory_space<vmem>>, vector<13x32xf32>,
    %442 = vector.extract_strided_slice %439 {offsets = [16, 0], sizes = [13, 32], strides = [1, 1]} : vector<32x32xf32> to vector<13x32xf32>
    %c19_243 = arith.constant 19 : index
    %c0_244 = arith.constant 0 : index
    %443 = vector.load %arg5[%c19_243, %c0_244] : memref<32x96xf32, #tpu.memory_space<vmem>>, vector<13x32xf32>
    tpu.vector_store %arg5[%c19_243, %c0_244], %442 {strides = array<i32>} : memref<32x96xf32, #tpu.memory_space<vmem>>, vector<13x32xf32>,
    %c0_245 = arith.constant 0 : index
    %c32_246 = arith.constant 32 : index
    %444 = vector.load %arg5[%c0_245, %c32_246] : memref<32x96xf32, #tpu.memory_space<vmem>>, vector<32x32xf32>
    tpu.vector_store %arg5[%c0_245, %c32_246], %439 {strides = array<i32>} : memref<32x96xf32, #tpu.memory_space<vmem>>, vector<32x32xf32>,
    %445 = vector.extract_strided_slice %439 {offsets = [3, 0], sizes = [13, 32], strides = [1, 1]} : vector<32x32xf32> to vector<13x32xf32>
    %c0_247 = arith.constant 0 : index
    %c64_248 = arith.constant 64 : index
    %446 = vector.load %arg5[%c0_247, %c64_248] : memref<32x96xf32, #tpu.memory_space<vmem>>, vector<13x32xf32>
    tpu.vector_store %arg5[%c0_247, %c64_248], %445 {strides = array<i32>} : memref<32x96xf32, #tpu.memory_space<vmem>>, vector<13x32xf32>,
    %447 = vector.extract_strided_slice %439 {offsets = [19, 0], sizes = [13, 32], strides = [1, 1]} : vector<32x32xf32> to vector<13x32xf32>
    %c16_249 = arith.constant 16 : index
    %c64_250 = arith.constant 64 : index
    %448 = vector.load %arg5[%c16_249, %c64_250] : memref<32x96xf32, #tpu.memory_space<vmem>>, vector<13x32xf32>
    tpu.vector_store %arg5[%c16_249, %c64_250], %447 {strides = array<i32>} : memref<32x96xf32, #tpu.memory_space<vmem>>, vector<13x32xf32>,
    %c0_251 = arith.constant 0 : index
    %c0_252 = arith.constant 0 : index
    %449 = vector.load %arg5[%c0_251, %c0_252] : memref<32x96xf32, #tpu.memory_space<vmem>>, vector<32x96xf32>
    %c2_253 = arith.constant 2 : index
    %c0_254 = arith.constant 0 : index
    %c0_255 = arith.constant 0 : index
    %450 = vector.load %arg2[%c2_253, %c0_254, %c0_255] : memref<5x96x64xf32, #tpu.memory_space<vmem>>, vector<1x96x64xf32>
    %451 = vector.shape_cast %450 : vector<1x96x64xf32> to vector<96x64xf32>
    %cst_256 = arith.constant dense<0.000000e+00> : vector<32x64xf32>
    %452 = tpu.matmul %449, %451, %cst_256 {dimension_numbers = #tpu.dot_dimension_numbers<[1], [0], [0], [1], [0, 0, 1, 1], [], []>} : vector<32x96xf32>, vector<96x64xf32>, vector<32x64xf32> -> vector<32x64xf32>
    %c50 = arith.constant 50 : index
    %c0_257 = arith.constant 0 : index
    %453 = vector.load %arg3[%c50, %c0_257] : memref<360x128xf32, #tpu.memory_space<vmem>>, vector<1x64xf32>
    %454 = vector.broadcast %453 : vector<1x64xf32> to vector<32x64xf32>
    %455 = arith.addf %452, %454 : vector<32x64xf32>
    %456 = vector.extract_strided_slice %455 {offsets = [0, 0], sizes = [32, 32], strides = [1, 1]} : vector<32x64xf32> to vector<32x32xf32>
    %457 = vector.extract_strided_slice %455 {offsets = [0, 32], sizes = [32, 32], strides = [1, 1]} : vector<32x64xf32> to vector<32x32xf32>
    %458 = arith.negf %457 : vector<32x32xf32>
    %459 = math.exp %458 : vector<32x32xf32>
    %cst_258 = arith.constant 1.000000e+00 : f32
    %460 = vector.broadcast %cst_258 : f32 to vector<32x32xf32>
    %461 = arith.addf %460, %459 : vector<32x32xf32>
    %462 = arith.divf %460, %461 : vector<32x32xf32>
    %463 = arith.mulf %456, %462 : vector<32x32xf32>
    %464 = vector.extract_strided_slice %463 {offsets = [0, 0], sizes = [13, 32], strides = [1, 1]} : vector<32x32xf32> to vector<13x32xf32>
    %c3_259 = arith.constant 3 : index
    %c0_260 = arith.constant 0 : index
    %465 = vector.load %arg5[%c3_259, %c0_260] : memref<32x96xf32, #tpu.memory_space<vmem>>, vector<13x32xf32>
    tpu.vector_store %arg5[%c3_259, %c0_260], %464 {strides = array<i32>} : memref<32x96xf32, #tpu.memory_space<vmem>>, vector<13x32xf32>,
    %466 = vector.extract_strided_slice %463 {offsets = [16, 0], sizes = [13, 32], strides = [1, 1]} : vector<32x32xf32> to vector<13x32xf32>
    %c19_261 = arith.constant 19 : index
    %c0_262 = arith.constant 0 : index
    %467 = vector.load %arg5[%c19_261, %c0_262] : memref<32x96xf32, #tpu.memory_space<vmem>>, vector<13x32xf32>
    tpu.vector_store %arg5[%c19_261, %c0_262], %466 {strides = array<i32>} : memref<32x96xf32, #tpu.memory_space<vmem>>, vector<13x32xf32>,
    %c0_263 = arith.constant 0 : index
    %c32_264 = arith.constant 32 : index
    %468 = vector.load %arg5[%c0_263, %c32_264] : memref<32x96xf32, #tpu.memory_space<vmem>>, vector<32x32xf32>
    tpu.vector_store %arg5[%c0_263, %c32_264], %463 {strides = array<i32>} : memref<32x96xf32, #tpu.memory_space<vmem>>, vector<32x32xf32>,
    %469 = vector.extract_strided_slice %463 {offsets = [3, 0], sizes = [13, 32], strides = [1, 1]} : vector<32x32xf32> to vector<13x32xf32>
    %c0_265 = arith.constant 0 : index
    %c64_266 = arith.constant 64 : index
    %470 = vector.load %arg5[%c0_265, %c64_266] : memref<32x96xf32, #tpu.memory_space<vmem>>, vector<13x32xf32>
    tpu.vector_store %arg5[%c0_265, %c64_266], %469 {strides = array<i32>} : memref<32x96xf32, #tpu.memory_space<vmem>>, vector<13x32xf32>,
    %471 = vector.extract_strided_slice %463 {offsets = [19, 0], sizes = [13, 32], strides = [1, 1]} : vector<32x32xf32> to vector<13x32xf32>
    %c16_267 = arith.constant 16 : index
    %c64_268 = arith.constant 64 : index
    %472 = vector.load %arg5[%c16_267, %c64_268] : memref<32x96xf32, #tpu.memory_space<vmem>>, vector<13x32xf32>
    tpu.vector_store %arg5[%c16_267, %c64_268], %471 {strides = array<i32>} : memref<32x96xf32, #tpu.memory_space<vmem>>, vector<13x32xf32>,
    %c0_269 = arith.constant 0 : index
    %c0_270 = arith.constant 0 : index
    %473 = vector.load %arg5[%c0_269, %c0_270] : memref<32x96xf32, #tpu.memory_space<vmem>>, vector<32x96xf32>
    %c6 = arith.constant 6 : index
    %c0_271 = arith.constant 0 : index
    %c0_272 = arith.constant 0 : index
    %474 = vector.load %arg1[%c6, %c0_271, %c0_272] : memref<10x96x32xf32, #tpu.memory_space<vmem>>, vector<1x96x32xf32>
    %475 = vector.shape_cast %474 : vector<1x96x32xf32> to vector<96x32xf32>
    %cst_273 = arith.constant dense<0.000000e+00> : vector<32x32xf32>
    %476 = tpu.matmul %473, %475, %cst_273 {dimension_numbers = #tpu.dot_dimension_numbers<[1], [0], [0], [1], [0, 0, 1, 1], [], []>} : vector<32x96xf32>, vector<96x32xf32>, vector<32x32xf32> -> vector<32x32xf32>
    %c22 = arith.constant 22 : index
    %c0_274 = arith.constant 0 : index
    %477 = vector.load %arg3[%c22, %c0_274] : memref<360x128xf32, #tpu.memory_space<vmem>>, vector<1x32xf32>
    %478 = vector.broadcast %477 : vector<1x32xf32> to vector<32x32xf32>
    %479 = arith.mulf %476, %478 : vector<32x32xf32>
    %c38 = arith.constant 38 : index
    %c0_275 = arith.constant 0 : index
    %480 = vector.load %arg3[%c38, %c0_275] : memref<360x128xf32, #tpu.memory_space<vmem>>, vector<1x32xf32>
    %481 = vector.broadcast %480 : vector<1x32xf32> to vector<32x32xf32>
    %482 = arith.addf %479, %481 : vector<32x32xf32>
    %cst_276 = arith.constant 5.000000e-01 : f32
    %483 = vector.broadcast %cst_276 : f32 to vector<32x32xf32>
    %484 = arith.mulf %483, %482 : vector<32x32xf32>
    %cst_277 = arith.constant 0.707106769 : f32
    %485 = vector.broadcast %cst_277 : f32 to vector<32x32xf32>
    %486 = arith.mulf %482, %485 : vector<32x32xf32>
    %cst_278 = arith.constant 0.000000e+00 : f32
    %487 = vector.broadcast %cst_278 : f32 to vector<32x32xf32>
    %488 = arith.cmpf oge, %486, %487 : vector<32x32xf32>
    %cst_279 = arith.constant 1.000000e+00 : f32
    %cst_280 = arith.constant -1.000000e+00 : f32
    %489 = vector.broadcast %cst_279 : f32 to vector<32x32xf32>
    %490 = vector.broadcast %cst_280 : f32 to vector<32x32xf32>
    %491 = arith.select %488, %489, %490 : vector<32x32xi1>, vector<32x32xf32>
    %492 = math.absf %486 : vector<32x32xf32>
    %cst_281 = arith.constant 0.327591091 : f32
    %493 = vector.broadcast %cst_281 : f32 to vector<32x32xf32>
    %494 = arith.mulf %493, %492 : vector<32x32xf32>
    %cst_282 = arith.constant 1.000000e+00 : f32
    %495 = vector.broadcast %cst_282 : f32 to vector<32x32xf32>
    %496 = arith.addf %495, %494 : vector<32x32xf32>
    %497 = tpu.reciprocal %496 {approx = true} : vector<32x32xf32> -> vector<32x32xf32>
    %498 = arith.mulf %496, %497 : vector<32x32xf32>
    %cst_283 = arith.constant 2.000000e+00 : f32
    %499 = vector.broadcast %cst_283 : f32 to vector<32x32xf32>
    %500 = arith.subf %499, %498 : vector<32x32xf32>
    %501 = arith.mulf %497, %500 : vector<32x32xf32>
    %cst_284 = arith.constant 1.06140542 : f32
    %502 = vector.broadcast %cst_284 : f32 to vector<32x32xf32>
    %503 = arith.mulf %502, %501 : vector<32x32xf32>
    %cst_285 = arith.constant -1.45315206 : f32
    %504 = vector.broadcast %cst_285 : f32 to vector<32x32xf32>
    %505 = arith.addf %503, %504 : vector<32x32xf32>
    %506 = arith.mulf %505, %501 : vector<32x32xf32>
    %cst_286 = arith.constant 1.42141378 : f32
    %507 = vector.broadcast %cst_286 : f32 to vector<32x32xf32>
    %508 = arith.addf %506, %507 : vector<32x32xf32>
    %509 = arith.mulf %508, %501 : vector<32x32xf32>
    %cst_287 = arith.constant -0.284496725 : f32
    %510 = vector.broadcast %cst_287 : f32 to vector<32x32xf32>
    %511 = arith.addf %509, %510 : vector<32x32xf32>
    %512 = arith.mulf %511, %501 : vector<32x32xf32>
    %cst_288 = arith.constant 0.254829586 : f32
    %513 = vector.broadcast %cst_288 : f32 to vector<32x32xf32>
    %514 = arith.addf %512, %513 : vector<32x32xf32>
    %515 = arith.mulf %514, %501 : vector<32x32xf32>
    %cst_289 = arith.constant 0.000000e+00 : f32
    %516 = vector.broadcast %cst_289 : f32 to vector<32x32xf32>
    %517 = arith.subf %516, %492 : vector<32x32xf32>
    %518 = arith.mulf %517, %492 : vector<32x32xf32>
    %519 = math.exp %518 : vector<32x32xf32>
    %520 = arith.mulf %515, %519 : vector<32x32xf32>
    %cst_290 = arith.constant 1.000000e+00 : f32
    %521 = vector.broadcast %cst_290 : f32 to vector<32x32xf32>
    %522 = arith.subf %521, %520 : vector<32x32xf32>
    %523 = arith.mulf %491, %522 : vector<32x32xf32>
    %cst_291 = arith.constant 1.000000e+00 : f32
    %524 = vector.broadcast %cst_291 : f32 to vector<32x32xf32>
    %525 = arith.addf %524, %523 : vector<32x32xf32>
    %526 = arith.mulf %484, %525 : vector<32x32xf32>
    %527 = arith.addf %526, %463 : vector<32x32xf32>
    %528 = vector.extract_strided_slice %527 {offsets = [0, 0], sizes = [13, 32], strides = [1, 1]} : vector<32x32xf32> to vector<13x32xf32>
    %c3_292 = arith.constant 3 : index
    %c0_293 = arith.constant 0 : index
    %529 = vector.load %arg5[%c3_292, %c0_293] : memref<32x96xf32, #tpu.memory_space<vmem>>, vector<13x32xf32>
    tpu.vector_store %arg5[%c3_292, %c0_293], %528 {strides = array<i32>} : memref<32x96xf32, #tpu.memory_space<vmem>>, vector<13x32xf32>,
    %530 = vector.extract_strided_slice %527 {offsets = [16, 0], sizes = [13, 32], strides = [1, 1]} : vector<32x32xf32> to vector<13x32xf32>
    %c19_294 = arith.constant 19 : index
    %c0_295 = arith.constant 0 : index
    %531 = vector.load %arg5[%c19_294, %c0_295] : memref<32x96xf32, #tpu.memory_space<vmem>>, vector<13x32xf32>
    tpu.vector_store %arg5[%c19_294, %c0_295], %530 {strides = array<i32>} : memref<32x96xf32, #tpu.memory_space<vmem>>, vector<13x32xf32>,
    %c0_296 = arith.constant 0 : index
    %c32_297 = arith.constant 32 : index
    %532 = vector.load %arg5[%c0_296, %c32_297] : memref<32x96xf32, #tpu.memory_space<vmem>>, vector<32x32xf32>
    tpu.vector_store %arg5[%c0_296, %c32_297], %527 {strides = array<i32>} : memref<32x96xf32, #tpu.memory_space<vmem>>, vector<32x32xf32>,
    %533 = vector.extract_strided_slice %527 {offsets = [3, 0], sizes = [13, 32], strides = [1, 1]} : vector<32x32xf32> to vector<13x32xf32>
    %c0_298 = arith.constant 0 : index
    %c64_299 = arith.constant 64 : index
    %534 = vector.load %arg5[%c0_298, %c64_299] : memref<32x96xf32, #tpu.memory_space<vmem>>, vector<13x32xf32>
    tpu.vector_store %arg5[%c0_298, %c64_299], %533 {strides = array<i32>} : memref<32x96xf32, #tpu.memory_space<vmem>>, vector<13x32xf32>,
    %535 = vector.extract_strided_slice %527 {offsets = [19, 0], sizes = [13, 32], strides = [1, 1]} : vector<32x32xf32> to vector<13x32xf32>
    %c16_300 = arith.constant 16 : index
    %c64_301 = arith.constant 64 : index
    %536 = vector.load %arg5[%c16_300, %c64_301] : memref<32x96xf32, #tpu.memory_space<vmem>>, vector<13x32xf32>
    tpu.vector_store %arg5[%c16_300, %c64_301], %535 {strides = array<i32>} : memref<32x96xf32, #tpu.memory_space<vmem>>, vector<13x32xf32>,
    %c0_302 = arith.constant 0 : index
    %c0_303 = arith.constant 0 : index
    %537 = vector.load %arg5[%c0_302, %c0_303] : memref<32x96xf32, #tpu.memory_space<vmem>>, vector<32x96xf32>
    %c7 = arith.constant 7 : index
    %c0_304 = arith.constant 0 : index
    %c0_305 = arith.constant 0 : index
    %538 = vector.load %arg1[%c7, %c0_304, %c0_305] : memref<10x96x32xf32, #tpu.memory_space<vmem>>, vector<1x96x32xf32>
    %539 = vector.shape_cast %538 : vector<1x96x32xf32> to vector<96x32xf32>
    %cst_306 = arith.constant dense<0.000000e+00> : vector<32x32xf32>
    %540 = tpu.matmul %537, %539, %cst_306 {dimension_numbers = #tpu.dot_dimension_numbers<[1], [0], [0], [1], [0, 0, 1, 1], [], []>} : vector<32x96xf32>, vector<96x32xf32>, vector<32x32xf32> -> vector<32x32xf32>
    %c23 = arith.constant 23 : index
    %c0_307 = arith.constant 0 : index
    %541 = vector.load %arg3[%c23, %c0_307] : memref<360x128xf32, #tpu.memory_space<vmem>>, vector<1x32xf32>
    %542 = vector.broadcast %541 : vector<1x32xf32> to vector<32x32xf32>
    %543 = arith.mulf %540, %542 : vector<32x32xf32>
    %c39 = arith.constant 39 : index
    %c0_308 = arith.constant 0 : index
    %544 = vector.load %arg3[%c39, %c0_308] : memref<360x128xf32, #tpu.memory_space<vmem>>, vector<1x32xf32>
    %545 = vector.broadcast %544 : vector<1x32xf32> to vector<32x32xf32>
    %546 = arith.addf %543, %545 : vector<32x32xf32>
    %cst_309 = arith.constant 5.000000e-01 : f32
    %547 = vector.broadcast %cst_309 : f32 to vector<32x32xf32>
    %548 = arith.mulf %547, %546 : vector<32x32xf32>
    %cst_310 = arith.constant 0.707106769 : f32
    %549 = vector.broadcast %cst_310 : f32 to vector<32x32xf32>
    %550 = arith.mulf %546, %549 : vector<32x32xf32>
    %cst_311 = arith.constant 0.000000e+00 : f32
    %551 = vector.broadcast %cst_311 : f32 to vector<32x32xf32>
    %552 = arith.cmpf oge, %550, %551 : vector<32x32xf32>
    %cst_312 = arith.constant 1.000000e+00 : f32
    %cst_313 = arith.constant -1.000000e+00 : f32
    %553 = vector.broadcast %cst_312 : f32 to vector<32x32xf32>
    %554 = vector.broadcast %cst_313 : f32 to vector<32x32xf32>
    %555 = arith.select %552, %553, %554 : vector<32x32xi1>, vector<32x32xf32>
    %556 = math.absf %550 : vector<32x32xf32>
    %cst_314 = arith.constant 0.327591091 : f32
    %557 = vector.broadcast %cst_314 : f32 to vector<32x32xf32>
    %558 = arith.mulf %557, %556 : vector<32x32xf32>
    %cst_315 = arith.constant 1.000000e+00 : f32
    %559 = vector.broadcast %cst_315 : f32 to vector<32x32xf32>
    %560 = arith.addf %559, %558 : vector<32x32xf32>
    %561 = tpu.reciprocal %560 {approx = true} : vector<32x32xf32> -> vector<32x32xf32>
    %562 = arith.mulf %560, %561 : vector<32x32xf32>
    %cst_316 = arith.constant 2.000000e+00 : f32
    %563 = vector.broadcast %cst_316 : f32 to vector<32x32xf32>
    %564 = arith.subf %563, %562 : vector<32x32xf32>
    %565 = arith.mulf %561, %564 : vector<32x32xf32>
    %cst_317 = arith.constant 1.06140542 : f32
    %566 = vector.broadcast %cst_317 : f32 to vector<32x32xf32>
    %567 = arith.mulf %566, %565 : vector<32x32xf32>
    %cst_318 = arith.constant -1.45315206 : f32
    %568 = vector.broadcast %cst_318 : f32 to vector<32x32xf32>
    %569 = arith.addf %567, %568 : vector<32x32xf32>
    %570 = arith.mulf %569, %565 : vector<32x32xf32>
    %cst_319 = arith.constant 1.42141378 : f32
    %571 = vector.broadcast %cst_319 : f32 to vector<32x32xf32>
    %572 = arith.addf %570, %571 : vector<32x32xf32>
    %573 = arith.mulf %572, %565 : vector<32x32xf32>
    %cst_320 = arith.constant -0.284496725 : f32
    %574 = vector.broadcast %cst_320 : f32 to vector<32x32xf32>
    %575 = arith.addf %573, %574 : vector<32x32xf32>
    %576 = arith.mulf %575, %565 : vector<32x32xf32>
    %cst_321 = arith.constant 0.254829586 : f32
    %577 = vector.broadcast %cst_321 : f32 to vector<32x32xf32>
    %578 = arith.addf %576, %577 : vector<32x32xf32>
    %579 = arith.mulf %578, %565 : vector<32x32xf32>
    %cst_322 = arith.constant 0.000000e+00 : f32
    %580 = vector.broadcast %cst_322 : f32 to vector<32x32xf32>
    %581 = arith.subf %580, %556 : vector<32x32xf32>
    %582 = arith.mulf %581, %556 : vector<32x32xf32>
    %583 = math.exp %582 : vector<32x32xf32>
    %584 = arith.mulf %579, %583 : vector<32x32xf32>
    %cst_323 = arith.constant 1.000000e+00 : f32
    %585 = vector.broadcast %cst_323 : f32 to vector<32x32xf32>
    %586 = arith.subf %585, %584 : vector<32x32xf32>
    %587 = arith.mulf %555, %586 : vector<32x32xf32>
    %cst_324 = arith.constant 1.000000e+00 : f32
    %588 = vector.broadcast %cst_324 : f32 to vector<32x32xf32>
    %589 = arith.addf %588, %587 : vector<32x32xf32>
    %590 = arith.mulf %548, %589 : vector<32x32xf32>
    %591 = arith.addf %590, %527 : vector<32x32xf32>
    %592 = vector.extract_strided_slice %591 {offsets = [0, 0], sizes = [13, 32], strides = [1, 1]} : vector<32x32xf32> to vector<13x32xf32>
    %c3_325 = arith.constant 3 : index
    %c0_326 = arith.constant 0 : index
    %593 = vector.load %arg5[%c3_325, %c0_326] : memref<32x96xf32, #tpu.memory_space<vmem>>, vector<13x32xf32>
    tpu.vector_store %arg5[%c3_325, %c0_326], %592 {strides = array<i32>} : memref<32x96xf32, #tpu.memory_space<vmem>>, vector<13x32xf32>,
    %594 = vector.extract_strided_slice %591 {offsets = [16, 0], sizes = [13, 32], strides = [1, 1]} : vector<32x32xf32> to vector<13x32xf32>
    %c19_327 = arith.constant 19 : index
    %c0_328 = arith.constant 0 : index
    %595 = vector.load %arg5[%c19_327, %c0_328] : memref<32x96xf32, #tpu.memory_space<vmem>>, vector<13x32xf32>
    tpu.vector_store %arg5[%c19_327, %c0_328], %594 {strides = array<i32>} : memref<32x96xf32, #tpu.memory_space<vmem>>, vector<13x32xf32>,
    %c0_329 = arith.constant 0 : index
    %c32_330 = arith.constant 32 : index
    %596 = vector.load %arg5[%c0_329, %c32_330] : memref<32x96xf32, #tpu.memory_space<vmem>>, vector<32x32xf32>
    tpu.vector_store %arg5[%c0_329, %c32_330], %591 {strides = array<i32>} : memref<32x96xf32, #tpu.memory_space<vmem>>, vector<32x32xf32>,
    %597 = vector.extract_strided_slice %591 {offsets = [3, 0], sizes = [13, 32], strides = [1, 1]} : vector<32x32xf32> to vector<13x32xf32>
    %c0_331 = arith.constant 0 : index
    %c64_332 = arith.constant 64 : index
    %598 = vector.load %arg5[%c0_331, %c64_332] : memref<32x96xf32, #tpu.memory_space<vmem>>, vector<13x32xf32>
    tpu.vector_store %arg5[%c0_331, %c64_332], %597 {strides = array<i32>} : memref<32x96xf32, #tpu.memory_space<vmem>>, vector<13x32xf32>,
    %599 = vector.extract_strided_slice %591 {offsets = [19, 0], sizes = [13, 32], strides = [1, 1]} : vector<32x32xf32> to vector<13x32xf32>
    %c16_333 = arith.constant 16 : index
    %c64_334 = arith.constant 64 : index
    %600 = vector.load %arg5[%c16_333, %c64_334] : memref<32x96xf32, #tpu.memory_space<vmem>>, vector<13x32xf32>
    tpu.vector_store %arg5[%c16_333, %c64_334], %599 {strides = array<i32>} : memref<32x96xf32, #tpu.memory_space<vmem>>, vector<13x32xf32>,
    %c0_335 = arith.constant 0 : index
    %c0_336 = arith.constant 0 : index
    %601 = vector.load %arg5[%c0_335, %c0_336] : memref<32x96xf32, #tpu.memory_space<vmem>>, vector<32x96xf32>
    %c3_337 = arith.constant 3 : index
    %c0_338 = arith.constant 0 : index
    %c0_339 = arith.constant 0 : index
    %602 = vector.load %arg2[%c3_337, %c0_338, %c0_339] : memref<5x96x64xf32, #tpu.memory_space<vmem>>, vector<1x96x64xf32>
    %603 = vector.shape_cast %602 : vector<1x96x64xf32> to vector<96x64xf32>
    %cst_340 = arith.constant dense<0.000000e+00> : vector<32x64xf32>
    %604 = tpu.matmul %601, %603, %cst_340 {dimension_numbers = #tpu.dot_dimension_numbers<[1], [0], [0], [1], [0, 0, 1, 1], [], []>} : vector<32x96xf32>, vector<96x64xf32>, vector<32x64xf32> -> vector<32x64xf32>
    %c51 = arith.constant 51 : index
    %c0_341 = arith.constant 0 : index
    %605 = vector.load %arg3[%c51, %c0_341] : memref<360x128xf32, #tpu.memory_space<vmem>>, vector<1x64xf32>
    %606 = vector.broadcast %605 : vector<1x64xf32> to vector<32x64xf32>
    %607 = arith.addf %604, %606 : vector<32x64xf32>
    %608 = vector.extract_strided_slice %607 {offsets = [0, 0], sizes = [32, 32], strides = [1, 1]} : vector<32x64xf32> to vector<32x32xf32>
    %609 = vector.extract_strided_slice %607 {offsets = [0, 32], sizes = [32, 32], strides = [1, 1]} : vector<32x64xf32> to vector<32x32xf32>
    %610 = arith.negf %609 : vector<32x32xf32>
    %611 = math.exp %610 : vector<32x32xf32>
    %cst_342 = arith.constant 1.000000e+00 : f32
    %612 = vector.broadcast %cst_342 : f32 to vector<32x32xf32>
    %613 = arith.addf %612, %611 : vector<32x32xf32>
    %614 = arith.divf %612, %613 : vector<32x32xf32>
    %615 = arith.mulf %608, %614 : vector<32x32xf32>
    %616 = vector.extract_strided_slice %615 {offsets = [0, 0], sizes = [13, 32], strides = [1, 1]} : vector<32x32xf32> to vector<13x32xf32>
    %c3_343 = arith.constant 3 : index
    %c0_344 = arith.constant 0 : index
    %617 = vector.load %arg5[%c3_343, %c0_344] : memref<32x96xf32, #tpu.memory_space<vmem>>, vector<13x32xf32>
    tpu.vector_store %arg5[%c3_343, %c0_344], %616 {strides = array<i32>} : memref<32x96xf32, #tpu.memory_space<vmem>>, vector<13x32xf32>,
    %618 = vector.extract_strided_slice %615 {offsets = [16, 0], sizes = [13, 32], strides = [1, 1]} : vector<32x32xf32> to vector<13x32xf32>
    %c19_345 = arith.constant 19 : index
    %c0_346 = arith.constant 0 : index
    %619 = vector.load %arg5[%c19_345, %c0_346] : memref<32x96xf32, #tpu.memory_space<vmem>>, vector<13x32xf32>
    tpu.vector_store %arg5[%c19_345, %c0_346], %618 {strides = array<i32>} : memref<32x96xf32, #tpu.memory_space<vmem>>, vector<13x32xf32>,
    %c0_347 = arith.constant 0 : index
    %c32_348 = arith.constant 32 : index
    %620 = vector.load %arg5[%c0_347, %c32_348] : memref<32x96xf32, #tpu.memory_space<vmem>>, vector<32x32xf32>
    tpu.vector_store %arg5[%c0_347, %c32_348], %615 {strides = array<i32>} : memref<32x96xf32, #tpu.memory_space<vmem>>, vector<32x32xf32>,
    %621 = vector.extract_strided_slice %615 {offsets = [3, 0], sizes = [13, 32], strides = [1, 1]} : vector<32x32xf32> to vector<13x32xf32>
    %c0_349 = arith.constant 0 : index
    %c64_350 = arith.constant 64 : index
    %622 = vector.load %arg5[%c0_349, %c64_350] : memref<32x96xf32, #tpu.memory_space<vmem>>, vector<13x32xf32>
    tpu.vector_store %arg5[%c0_349, %c64_350], %621 {strides = array<i32>} : memref<32x96xf32, #tpu.memory_space<vmem>>, vector<13x32xf32>,
    %623 = vector.extract_strided_slice %615 {offsets = [19, 0], sizes = [13, 32], strides = [1, 1]} : vector<32x32xf32> to vector<13x32xf32>
    %c16_351 = arith.constant 16 : index
    %c64_352 = arith.constant 64 : index
    %624 = vector.load %arg5[%c16_351, %c64_352] : memref<32x96xf32, #tpu.memory_space<vmem>>, vector<13x32xf32>
    tpu.vector_store %arg5[%c16_351, %c64_352], %623 {strides = array<i32>} : memref<32x96xf32, #tpu.memory_space<vmem>>, vector<13x32xf32>,
    %c0_353 = arith.constant 0 : index
    %c0_354 = arith.constant 0 : index
    %625 = vector.load %arg5[%c0_353, %c0_354] : memref<32x96xf32, #tpu.memory_space<vmem>>, vector<32x96xf32>
    %c8_355 = arith.constant 8 : index
    %c0_356 = arith.constant 0 : index
    %c0_357 = arith.constant 0 : index
    %626 = vector.load %arg1[%c8_355, %c0_356, %c0_357] : memref<10x96x32xf32, #tpu.memory_space<vmem>>, vector<1x96x32xf32>
    %627 = vector.shape_cast %626 : vector<1x96x32xf32> to vector<96x32xf32>
    %cst_358 = arith.constant dense<0.000000e+00> : vector<32x32xf32>
    %628 = tpu.matmul %625, %627, %cst_358 {dimension_numbers = #tpu.dot_dimension_numbers<[1], [0], [0], [1], [0, 0, 1, 1], [], []>} : vector<32x96xf32>, vector<96x32xf32>, vector<32x32xf32> -> vector<32x32xf32>
    %c24 = arith.constant 24 : index
    %c0_359 = arith.constant 0 : index
    %629 = vector.load %arg3[%c24, %c0_359] : memref<360x128xf32, #tpu.memory_space<vmem>>, vector<1x32xf32>
    %630 = vector.broadcast %629 : vector<1x32xf32> to vector<32x32xf32>
    %631 = arith.mulf %628, %630 : vector<32x32xf32>
    %c40 = arith.constant 40 : index
    %c0_360 = arith.constant 0 : index
    %632 = vector.load %arg3[%c40, %c0_360] : memref<360x128xf32, #tpu.memory_space<vmem>>, vector<1x32xf32>
    %633 = vector.broadcast %632 : vector<1x32xf32> to vector<32x32xf32>
    %634 = arith.addf %631, %633 : vector<32x32xf32>
    %cst_361 = arith.constant 5.000000e-01 : f32
    %635 = vector.broadcast %cst_361 : f32 to vector<32x32xf32>
    %636 = arith.mulf %635, %634 : vector<32x32xf32>
    %cst_362 = arith.constant 0.707106769 : f32
    %637 = vector.broadcast %cst_362 : f32 to vector<32x32xf32>
    %638 = arith.mulf %634, %637 : vector<32x32xf32>
    %cst_363 = arith.constant 0.000000e+00 : f32
    %639 = vector.broadcast %cst_363 : f32 to vector<32x32xf32>
    %640 = arith.cmpf oge, %638, %639 : vector<32x32xf32>
    %cst_364 = arith.constant 1.000000e+00 : f32
    %cst_365 = arith.constant -1.000000e+00 : f32
    %641 = vector.broadcast %cst_364 : f32 to vector<32x32xf32>
    %642 = vector.broadcast %cst_365 : f32 to vector<32x32xf32>
    %643 = arith.select %640, %641, %642 : vector<32x32xi1>, vector<32x32xf32>
    %644 = math.absf %638 : vector<32x32xf32>
    %cst_366 = arith.constant 0.327591091 : f32
    %645 = vector.broadcast %cst_366 : f32 to vector<32x32xf32>
    %646 = arith.mulf %645, %644 : vector<32x32xf32>
    %cst_367 = arith.constant 1.000000e+00 : f32
    %647 = vector.broadcast %cst_367 : f32 to vector<32x32xf32>
    %648 = arith.addf %647, %646 : vector<32x32xf32>
    %649 = tpu.reciprocal %648 {approx = true} : vector<32x32xf32> -> vector<32x32xf32>
    %650 = arith.mulf %648, %649 : vector<32x32xf32>
    %cst_368 = arith.constant 2.000000e+00 : f32
    %651 = vector.broadcast %cst_368 : f32 to vector<32x32xf32>
    %652 = arith.subf %651, %650 : vector<32x32xf32>
    %653 = arith.mulf %649, %652 : vector<32x32xf32>
    %cst_369 = arith.constant 1.06140542 : f32
    %654 = vector.broadcast %cst_369 : f32 to vector<32x32xf32>
    %655 = arith.mulf %654, %653 : vector<32x32xf32>
    %cst_370 = arith.constant -1.45315206 : f32
    %656 = vector.broadcast %cst_370 : f32 to vector<32x32xf32>
    %657 = arith.addf %655, %656 : vector<32x32xf32>
    %658 = arith.mulf %657, %653 : vector<32x32xf32>
    %cst_371 = arith.constant 1.42141378 : f32
    %659 = vector.broadcast %cst_371 : f32 to vector<32x32xf32>
    %660 = arith.addf %658, %659 : vector<32x32xf32>
    %661 = arith.mulf %660, %653 : vector<32x32xf32>
    %cst_372 = arith.constant -0.284496725 : f32
    %662 = vector.broadcast %cst_372 : f32 to vector<32x32xf32>
    %663 = arith.addf %661, %662 : vector<32x32xf32>
    %664 = arith.mulf %663, %653 : vector<32x32xf32>
    %cst_373 = arith.constant 0.254829586 : f32
    %665 = vector.broadcast %cst_373 : f32 to vector<32x32xf32>
    %666 = arith.addf %664, %665 : vector<32x32xf32>
    %667 = arith.mulf %666, %653 : vector<32x32xf32>
    %cst_374 = arith.constant 0.000000e+00 : f32
    %668 = vector.broadcast %cst_374 : f32 to vector<32x32xf32>
    %669 = arith.subf %668, %644 : vector<32x32xf32>
    %670 = arith.mulf %669, %644 : vector<32x32xf32>
    %671 = math.exp %670 : vector<32x32xf32>
    %672 = arith.mulf %667, %671 : vector<32x32xf32>
    %cst_375 = arith.constant 1.000000e+00 : f32
    %673 = vector.broadcast %cst_375 : f32 to vector<32x32xf32>
    %674 = arith.subf %673, %672 : vector<32x32xf32>
    %675 = arith.mulf %643, %674 : vector<32x32xf32>
    %cst_376 = arith.constant 1.000000e+00 : f32
    %676 = vector.broadcast %cst_376 : f32 to vector<32x32xf32>
    %677 = arith.addf %676, %675 : vector<32x32xf32>
    %678 = arith.mulf %636, %677 : vector<32x32xf32>
    %679 = arith.addf %678, %615 : vector<32x32xf32>
    %680 = vector.extract_strided_slice %679 {offsets = [0, 0], sizes = [13, 32], strides = [1, 1]} : vector<32x32xf32> to vector<13x32xf32>
    %c3_377 = arith.constant 3 : index
    %c0_378 = arith.constant 0 : index
    %681 = vector.load %arg5[%c3_377, %c0_378] : memref<32x96xf32, #tpu.memory_space<vmem>>, vector<13x32xf32>
    tpu.vector_store %arg5[%c3_377, %c0_378], %680 {strides = array<i32>} : memref<32x96xf32, #tpu.memory_space<vmem>>, vector<13x32xf32>,
    %682 = vector.extract_strided_slice %679 {offsets = [16, 0], sizes = [13, 32], strides = [1, 1]} : vector<32x32xf32> to vector<13x32xf32>
    %c19_379 = arith.constant 19 : index
    %c0_380 = arith.constant 0 : index
    %683 = vector.load %arg5[%c19_379, %c0_380] : memref<32x96xf32, #tpu.memory_space<vmem>>, vector<13x32xf32>
    tpu.vector_store %arg5[%c19_379, %c0_380], %682 {strides = array<i32>} : memref<32x96xf32, #tpu.memory_space<vmem>>, vector<13x32xf32>,
    %c0_381 = arith.constant 0 : index
    %c32_382 = arith.constant 32 : index
    %684 = vector.load %arg5[%c0_381, %c32_382] : memref<32x96xf32, #tpu.memory_space<vmem>>, vector<32x32xf32>
    tpu.vector_store %arg5[%c0_381, %c32_382], %679 {strides = array<i32>} : memref<32x96xf32, #tpu.memory_space<vmem>>, vector<32x32xf32>,
    %685 = vector.extract_strided_slice %679 {offsets = [3, 0], sizes = [13, 32], strides = [1, 1]} : vector<32x32xf32> to vector<13x32xf32>
    %c0_383 = arith.constant 0 : index
    %c64_384 = arith.constant 64 : index
    %686 = vector.load %arg5[%c0_383, %c64_384] : memref<32x96xf32, #tpu.memory_space<vmem>>, vector<13x32xf32>
    tpu.vector_store %arg5[%c0_383, %c64_384], %685 {strides = array<i32>} : memref<32x96xf32, #tpu.memory_space<vmem>>, vector<13x32xf32>,
    %687 = vector.extract_strided_slice %679 {offsets = [19, 0], sizes = [13, 32], strides = [1, 1]} : vector<32x32xf32> to vector<13x32xf32>
    %c16_385 = arith.constant 16 : index
    %c64_386 = arith.constant 64 : index
    %688 = vector.load %arg5[%c16_385, %c64_386] : memref<32x96xf32, #tpu.memory_space<vmem>>, vector<13x32xf32>
    tpu.vector_store %arg5[%c16_385, %c64_386], %687 {strides = array<i32>} : memref<32x96xf32, #tpu.memory_space<vmem>>, vector<13x32xf32>,
    %c0_387 = arith.constant 0 : index
    %c0_388 = arith.constant 0 : index
    %689 = vector.load %arg5[%c0_387, %c0_388] : memref<32x96xf32, #tpu.memory_space<vmem>>, vector<32x96xf32>
    %c9 = arith.constant 9 : index
    %c0_389 = arith.constant 0 : index
    %c0_390 = arith.constant 0 : index
    %690 = vector.load %arg1[%c9, %c0_389, %c0_390] : memref<10x96x32xf32, #tpu.memory_space<vmem>>, vector<1x96x32xf32>
    %691 = vector.shape_cast %690 : vector<1x96x32xf32> to vector<96x32xf32>
    %cst_391 = arith.constant dense<0.000000e+00> : vector<32x32xf32>
    %692 = tpu.matmul %689, %691, %cst_391 {dimension_numbers = #tpu.dot_dimension_numbers<[1], [0], [0], [1], [0, 0, 1, 1], [], []>} : vector<32x96xf32>, vector<96x32xf32>, vector<32x32xf32> -> vector<32x32xf32>
    %c25 = arith.constant 25 : index
    %c0_392 = arith.constant 0 : index
    %693 = vector.load %arg3[%c25, %c0_392] : memref<360x128xf32, #tpu.memory_space<vmem>>, vector<1x32xf32>
    %694 = vector.broadcast %693 : vector<1x32xf32> to vector<32x32xf32>
    %695 = arith.mulf %692, %694 : vector<32x32xf32>
    %c41 = arith.constant 41 : index
    %c0_393 = arith.constant 0 : index
    %696 = vector.load %arg3[%c41, %c0_393] : memref<360x128xf32, #tpu.memory_space<vmem>>, vector<1x32xf32>
    %697 = vector.broadcast %696 : vector<1x32xf32> to vector<32x32xf32>
    %698 = arith.addf %695, %697 : vector<32x32xf32>
    %cst_394 = arith.constant 5.000000e-01 : f32
    %699 = vector.broadcast %cst_394 : f32 to vector<32x32xf32>
    %700 = arith.mulf %699, %698 : vector<32x32xf32>
    %cst_395 = arith.constant 0.707106769 : f32
    %701 = vector.broadcast %cst_395 : f32 to vector<32x32xf32>
    %702 = arith.mulf %698, %701 : vector<32x32xf32>
    %cst_396 = arith.constant 0.000000e+00 : f32
    %703 = vector.broadcast %cst_396 : f32 to vector<32x32xf32>
    %704 = arith.cmpf oge, %702, %703 : vector<32x32xf32>
    %cst_397 = arith.constant 1.000000e+00 : f32
    %cst_398 = arith.constant -1.000000e+00 : f32
    %705 = vector.broadcast %cst_397 : f32 to vector<32x32xf32>
    %706 = vector.broadcast %cst_398 : f32 to vector<32x32xf32>
    %707 = arith.select %704, %705, %706 : vector<32x32xi1>, vector<32x32xf32>
    %708 = math.absf %702 : vector<32x32xf32>
    %cst_399 = arith.constant 0.327591091 : f32
    %709 = vector.broadcast %cst_399 : f32 to vector<32x32xf32>
    %710 = arith.mulf %709, %708 : vector<32x32xf32>
    %cst_400 = arith.constant 1.000000e+00 : f32
    %711 = vector.broadcast %cst_400 : f32 to vector<32x32xf32>
    %712 = arith.addf %711, %710 : vector<32x32xf32>
    %713 = tpu.reciprocal %712 {approx = true} : vector<32x32xf32> -> vector<32x32xf32>
    %714 = arith.mulf %712, %713 : vector<32x32xf32>
    %cst_401 = arith.constant 2.000000e+00 : f32
    %715 = vector.broadcast %cst_401 : f32 to vector<32x32xf32>
    %716 = arith.subf %715, %714 : vector<32x32xf32>
    %717 = arith.mulf %713, %716 : vector<32x32xf32>
    %cst_402 = arith.constant 1.06140542 : f32
    %718 = vector.broadcast %cst_402 : f32 to vector<32x32xf32>
    %719 = arith.mulf %718, %717 : vector<32x32xf32>
    %cst_403 = arith.constant -1.45315206 : f32
    %720 = vector.broadcast %cst_403 : f32 to vector<32x32xf32>
    %721 = arith.addf %719, %720 : vector<32x32xf32>
    %722 = arith.mulf %721, %717 : vector<32x32xf32>
    %cst_404 = arith.constant 1.42141378 : f32
    %723 = vector.broadcast %cst_404 : f32 to vector<32x32xf32>
    %724 = arith.addf %722, %723 : vector<32x32xf32>
    %725 = arith.mulf %724, %717 : vector<32x32xf32>
    %cst_405 = arith.constant -0.284496725 : f32
    %726 = vector.broadcast %cst_405 : f32 to vector<32x32xf32>
    %727 = arith.addf %725, %726 : vector<32x32xf32>
    %728 = arith.mulf %727, %717 : vector<32x32xf32>
    %cst_406 = arith.constant 0.254829586 : f32
    %729 = vector.broadcast %cst_406 : f32 to vector<32x32xf32>
    %730 = arith.addf %728, %729 : vector<32x32xf32>
    %731 = arith.mulf %730, %717 : vector<32x32xf32>
    %cst_407 = arith.constant 0.000000e+00 : f32
    %732 = vector.broadcast %cst_407 : f32 to vector<32x32xf32>
    %733 = arith.subf %732, %708 : vector<32x32xf32>
    %734 = arith.mulf %733, %708 : vector<32x32xf32>
    %735 = math.exp %734 : vector<32x32xf32>
    %736 = arith.mulf %731, %735 : vector<32x32xf32>
    %cst_408 = arith.constant 1.000000e+00 : f32
    %737 = vector.broadcast %cst_408 : f32 to vector<32x32xf32>
    %738 = arith.subf %737, %736 : vector<32x32xf32>
    %739 = arith.mulf %707, %738 : vector<32x32xf32>
    %cst_409 = arith.constant 1.000000e+00 : f32
    %740 = vector.broadcast %cst_409 : f32 to vector<32x32xf32>
    %741 = arith.addf %740, %739 : vector<32x32xf32>
    %742 = arith.mulf %700, %741 : vector<32x32xf32>
    %743 = arith.addf %742, %679 : vector<32x32xf32>
    %744 = vector.extract_strided_slice %743 {offsets = [0, 0], sizes = [13, 32], strides = [1, 1]} : vector<32x32xf32> to vector<13x32xf32>
    %c3_410 = arith.constant 3 : index
    %c0_411 = arith.constant 0 : index
    %745 = vector.load %arg5[%c3_410, %c0_411] : memref<32x96xf32, #tpu.memory_space<vmem>>, vector<13x32xf32>
    tpu.vector_store %arg5[%c3_410, %c0_411], %744 {strides = array<i32>} : memref<32x96xf32, #tpu.memory_space<vmem>>, vector<13x32xf32>,
    %746 = vector.extract_strided_slice %743 {offsets = [16, 0], sizes = [13, 32], strides = [1, 1]} : vector<32x32xf32> to vector<13x32xf32>
    %c19_412 = arith.constant 19 : index
    %c0_413 = arith.constant 0 : index
    %747 = vector.load %arg5[%c19_412, %c0_413] : memref<32x96xf32, #tpu.memory_space<vmem>>, vector<13x32xf32>
    tpu.vector_store %arg5[%c19_412, %c0_413], %746 {strides = array<i32>} : memref<32x96xf32, #tpu.memory_space<vmem>>, vector<13x32xf32>,
    %c0_414 = arith.constant 0 : index
    %c32_415 = arith.constant 32 : index
    %748 = vector.load %arg5[%c0_414, %c32_415] : memref<32x96xf32, #tpu.memory_space<vmem>>, vector<32x32xf32>
    tpu.vector_store %arg5[%c0_414, %c32_415], %743 {strides = array<i32>} : memref<32x96xf32, #tpu.memory_space<vmem>>, vector<32x32xf32>,
    %749 = vector.extract_strided_slice %743 {offsets = [3, 0], sizes = [13, 32], strides = [1, 1]} : vector<32x32xf32> to vector<13x32xf32>
    %c0_416 = arith.constant 0 : index
    %c64_417 = arith.constant 64 : index
    %750 = vector.load %arg5[%c0_416, %c64_417] : memref<32x96xf32, #tpu.memory_space<vmem>>, vector<13x32xf32>
    tpu.vector_store %arg5[%c0_416, %c64_417], %749 {strides = array<i32>} : memref<32x96xf32, #tpu.memory_space<vmem>>, vector<13x32xf32>,
    %751 = vector.extract_strided_slice %743 {offsets = [19, 0], sizes = [13, 32], strides = [1, 1]} : vector<32x32xf32> to vector<13x32xf32>
    %c16_418 = arith.constant 16 : index
    %c64_419 = arith.constant 64 : index
    %752 = vector.load %arg5[%c16_418, %c64_419] : memref<32x96xf32, #tpu.memory_space<vmem>>, vector<13x32xf32>
    tpu.vector_store %arg5[%c16_418, %c64_419], %751 {strides = array<i32>} : memref<32x96xf32, #tpu.memory_space<vmem>>, vector<13x32xf32>,
    %c0_420 = arith.constant 0 : index
    %c0_421 = arith.constant 0 : index
    %753 = vector.load %arg5[%c0_420, %c0_421] : memref<32x96xf32, #tpu.memory_space<vmem>>, vector<32x96xf32>
    %c4_422 = arith.constant 4 : index
    %c0_423 = arith.constant 0 : index
    %c0_424 = arith.constant 0 : index
    %754 = vector.load %arg2[%c4_422, %c0_423, %c0_424] : memref<5x96x64xf32, #tpu.memory_space<vmem>>, vector<1x96x64xf32>
    %755 = vector.shape_cast %754 : vector<1x96x64xf32> to vector<96x64xf32>
    %cst_425 = arith.constant dense<0.000000e+00> : vector<32x64xf32>
    %756 = tpu.matmul %753, %755, %cst_425 {dimension_numbers = #tpu.dot_dimension_numbers<[1], [0], [0], [1], [0, 0, 1, 1], [], []>} : vector<32x96xf32>, vector<96x64xf32>, vector<32x64xf32> -> vector<32x64xf32>
    %c52 = arith.constant 52 : index
    %c0_426 = arith.constant 0 : index
    %757 = vector.load %arg3[%c52, %c0_426] : memref<360x128xf32, #tpu.memory_space<vmem>>, vector<1x64xf32>
    %758 = vector.broadcast %757 : vector<1x64xf32> to vector<32x64xf32>
    %759 = arith.addf %756, %758 : vector<32x64xf32>
    %760 = vector.extract_strided_slice %759 {offsets = [0, 0], sizes = [32, 32], strides = [1, 1]} : vector<32x64xf32> to vector<32x32xf32>
    %761 = vector.extract_strided_slice %759 {offsets = [0, 32], sizes = [32, 32], strides = [1, 1]} : vector<32x64xf32> to vector<32x32xf32>
    %762 = arith.negf %761 : vector<32x32xf32>
    %763 = math.exp %762 : vector<32x32xf32>
    %cst_427 = arith.constant 1.000000e+00 : f32
    %764 = vector.broadcast %cst_427 : f32 to vector<32x32xf32>
    %765 = arith.addf %764, %763 : vector<32x32xf32>
    %766 = arith.divf %764, %765 : vector<32x32xf32>
    %767 = arith.mulf %760, %766 : vector<32x32xf32>
    %c56 = arith.constant 56 : index
    %c0_428 = arith.constant 0 : index
    %768 = vector.load %arg3[%c56, %c0_428] : memref<360x128xf32, #tpu.memory_space<vmem>>, vector<32x8xf32>
    %cst_429 = arith.constant dense<0.000000e+00> : vector<32x8xf32>
    %769 = tpu.matmul %767, %768, %cst_429 {dimension_numbers = #tpu.dot_dimension_numbers<[1], [0], [0], [1], [0, 0, 1, 1], [], []>} : vector<32x32xf32>, vector<32x8xf32>, vector<32x8xf32> -> vector<32x8xf32>
    %c88 = arith.constant 88 : index
    %c0_430 = arith.constant 0 : index
    %770 = vector.load %arg3[%c88, %c0_430] : memref<360x128xf32, #tpu.memory_space<vmem>>, vector<1x8xf32>
    %771 = vector.broadcast %770 : vector<1x8xf32> to vector<32x8xf32>
    %772 = arith.addf %769, %771 : vector<32x8xf32>
    %773 = vector.extract_strided_slice %772 {offsets = [0, 0], sizes = [32, 1], strides = [1, 1]} : vector<32x8xf32> to vector<32x1xf32>
    %c104 = arith.constant 104 : index
    %c0_431 = arith.constant 0 : index
    %774 = vector.load %arg3[%c104, %c0_431] : memref<360x128xf32, #tpu.memory_space<vmem>>, vector<32x32xf32>
    %775 = vector.broadcast %773 : vector<32x1xf32> to vector<32x32xf32>
    %776 = arith.mulf %775, %774 : vector<32x32xf32>
    %777 = vector.extract_strided_slice %772 {offsets = [0, 1], sizes = [32, 1], strides = [1, 1]} : vector<32x8xf32> to vector<32x1xf32>
    %c136 = arith.constant 136 : index
    %c0_432 = arith.constant 0 : index
    %778 = vector.load %arg3[%c136, %c0_432] : memref<360x128xf32, #tpu.memory_space<vmem>>, vector<32x32xf32>
    %779 = vector.broadcast %777 : vector<32x1xf32> to vector<32x32xf32>
    %780 = arith.mulf %779, %778 : vector<32x32xf32>
    %781 = arith.addf %776, %780 : vector<32x32xf32>
    %782 = vector.extract_strided_slice %772 {offsets = [0, 2], sizes = [32, 1], strides = [1, 1]} : vector<32x8xf32> to vector<32x1xf32>
    %c168 = arith.constant 168 : index
    %c0_433 = arith.constant 0 : index
    %783 = vector.load %arg3[%c168, %c0_433] : memref<360x128xf32, #tpu.memory_space<vmem>>, vector<32x32xf32>
    %784 = vector.broadcast %782 : vector<32x1xf32> to vector<32x32xf32>
    %785 = arith.mulf %784, %783 : vector<32x32xf32>
    %786 = arith.addf %781, %785 : vector<32x32xf32>
    %787 = vector.extract_strided_slice %772 {offsets = [0, 3], sizes = [32, 1], strides = [1, 1]} : vector<32x8xf32> to vector<32x1xf32>
    %c200 = arith.constant 200 : index
    %c0_434 = arith.constant 0 : index
    %788 = vector.load %arg3[%c200, %c0_434] : memref<360x128xf32, #tpu.memory_space<vmem>>, vector<32x32xf32>
    %789 = vector.broadcast %787 : vector<32x1xf32> to vector<32x32xf32>
    %790 = arith.mulf %789, %788 : vector<32x32xf32>
    %791 = arith.addf %786, %790 : vector<32x32xf32>
    %792 = vector.extract_strided_slice %772 {offsets = [0, 4], sizes = [32, 1], strides = [1, 1]} : vector<32x8xf32> to vector<32x1xf32>
    %c232 = arith.constant 232 : index
    %c0_435 = arith.constant 0 : index
    %793 = vector.load %arg3[%c232, %c0_435] : memref<360x128xf32, #tpu.memory_space<vmem>>, vector<32x32xf32>
    %794 = vector.broadcast %792 : vector<32x1xf32> to vector<32x32xf32>
    %795 = arith.mulf %794, %793 : vector<32x32xf32>
    %796 = arith.addf %791, %795 : vector<32x32xf32>
    %797 = vector.extract_strided_slice %772 {offsets = [0, 5], sizes = [32, 1], strides = [1, 1]} : vector<32x8xf32> to vector<32x1xf32>
    %c264 = arith.constant 264 : index
    %c0_436 = arith.constant 0 : index
    %798 = vector.load %arg3[%c264, %c0_436] : memref<360x128xf32, #tpu.memory_space<vmem>>, vector<32x32xf32>
    %799 = vector.broadcast %797 : vector<32x1xf32> to vector<32x32xf32>
    %800 = arith.mulf %799, %798 : vector<32x32xf32>
    %801 = arith.addf %796, %800 : vector<32x32xf32>
    %802 = vector.extract_strided_slice %772 {offsets = [0, 6], sizes = [32, 1], strides = [1, 1]} : vector<32x8xf32> to vector<32x1xf32>
    %c296 = arith.constant 296 : index
    %c0_437 = arith.constant 0 : index
    %803 = vector.load %arg3[%c296, %c0_437] : memref<360x128xf32, #tpu.memory_space<vmem>>, vector<32x32xf32>
    %804 = vector.broadcast %802 : vector<32x1xf32> to vector<32x32xf32>
    %805 = arith.mulf %804, %803 : vector<32x32xf32>
    %806 = arith.addf %801, %805 : vector<32x32xf32>
    %807 = vector.extract_strided_slice %772 {offsets = [0, 7], sizes = [32, 1], strides = [1, 1]} : vector<32x8xf32> to vector<32x1xf32>
    %c328 = arith.constant 328 : index
    %c0_438 = arith.constant 0 : index
    %808 = vector.load %arg3[%c328, %c0_438] : memref<360x128xf32, #tpu.memory_space<vmem>>, vector<32x32xf32>
    %809 = vector.broadcast %807 : vector<32x1xf32> to vector<32x32xf32>
    %810 = arith.mulf %809, %808 : vector<32x32xf32>
    %811 = arith.addf %806, %810 : vector<32x32xf32>
    %c96 = arith.constant 96 : index
    %c0_439 = arith.constant 0 : index
    %812 = vector.load %arg3[%c96, %c0_439] : memref<360x128xf32, #tpu.memory_space<vmem>>, vector<1x32xf32>
    %813 = vector.extract_strided_slice %811 {offsets = [0, 0], sizes = [16, 32], strides = [1, 1]} : vector<32x32xf32> to vector<16x32xf32>
    %cst_440 = arith.constant dense<0.000000e+00> : vector<32xf32>
    %814 = vector.multi_reduction <add>, %813, %cst_440 [0] : vector<16x32xf32> to vector<32xf32>
    %815 = vector.shape_cast %814 : vector<32xf32> to vector<1x32xf32>
    %816 = arith.addf %815, %812 : vector<1x32xf32>
    %c0_441 = arith.constant 0 : index
    %c0_442 = arith.constant 0 : index
    %817 = vector.load %arg4[%c0_441, %c0_442] : memref<2x32xf32, #tpu.memory_space<vmem>>, vector<1x32xf32>
    tpu.vector_store %arg4[%c0_441, %c0_442], %816 {strides = array<i32>} : memref<2x32xf32, #tpu.memory_space<vmem>>, vector<1x32xf32>,
    %818 = vector.extract_strided_slice %811 {offsets = [16, 0], sizes = [16, 32], strides = [1, 1]} : vector<32x32xf32> to vector<16x32xf32>
    %cst_443 = arith.constant dense<0.000000e+00> : vector<32xf32>
    %819 = vector.multi_reduction <add>, %818, %cst_443 [0] : vector<16x32xf32> to vector<32xf32>
    %820 = vector.shape_cast %819 : vector<32xf32> to vector<1x32xf32>
    %821 = arith.addf %820, %812 : vector<1x32xf32>
    %c1_444 = arith.constant 1 : index
    %c0_445 = arith.constant 0 : index
    %822 = vector.load %arg4[%c1_444, %c0_445] : memref<2x32xf32, #tpu.memory_space<vmem>>, vector<1x32xf32>
    tpu.vector_store %arg4[%c1_444, %c0_445], %821 {strides = array<i32>} : memref<2x32xf32, #tpu.memory_space<vmem>>, vector<1x32xf32>,
    return
  }
}

</mosaic_0001>

<bundles_post_ra>
// kernel: tpu_custom_call.1
= control target key start
LH: loop header
LB: loop body
LE: loop exit
PB: predicated region body
PF: predicated region fallthrough
CT: control target
= control target key end

     0   :  { %vm43_vm0 = vcmask 1043456   ;;  %vm30_vm1 = vcmask 31744   ;;  %s6134_s0 = inlined_call_operand.vmem [shape: f32[32,4], index: 0, kind: input, shape index: {}]   ;;  %s6135_s1 = inlined_call_operand.vmem [shape: f32[10,96,32], index: 1, kind: input, shape index: {}]   ;;  %s6136_s2 = inlined_call_operand.vmem [shape: f32[5,96,64], index: 2, kind: input, shape index: {}]   ;;  %s6137_s3 = inlined_call_operand.vmem [shape: f32[360,128], index: 3, kind: input, shape index: {}]   ;;  %s6138_s4 = inlined_call_operand.hbm [shape: f32[2,32], index: 4, kind: output, shape index: {}]  }
   0x1   :  { %v27_v0 = vld [vmem:[%s6137_s3] sm:$0xf]  ;;  %v26_v2 = vld [vmem:[%s6134_s0 + $0x18] sm:$0xff]  ;;  %v24_v3 = vld [vmem:[%s6134_s0 + $0x8] sm:$0xff] }
   0x2   :  { %v23_v1 = vld [vmem:[%s6134_s0] sm:$0xff]  ;;  %3670 = vmatpush.msk.msra.mxu0 %vm43_vm0, %v27_v0  ;;  %3915 = vmatpush.msk.msra.mxu1 %vm43_vm0, %v27_v0 }
   0x3   :  { %3671 = vmatmul.msk.f32.vlgmr.msra.gmra.mxu0 %vm30_vm1, %v23_v1  ;;  %3674 = vmatmul.msk.f32.vlgmr.msra.gmra.mxu1 %vm30_vm1, %v26_v2 }
   0xb   :  { %3672 = vmatmul.msk.f32.gmra.mxu0 %vm30_vm1, %v24_v3 }
   0xc   :  { %9 = vsyncpa [#allocation4], 0  ;;  %v25_v4 = vld [vmem:[%s6134_s0 + $0x10] sm:$0xff]  ;;  %vm18_vm2 = vcmask 785408   ;;  %v4255_v5 = vmov 0.0   ;;  %v136_v6 = vld [vmem:[%s6135_s1 + $0x58] sm:$0xff] }
   0xd   :  { %19 = vst.msk [vmem:[#allocation2] sm:$0xff] %vm18_vm2, %v4255_v5  ;;  %v135_v7 = vld [vmem:[%s6135_s1 + $0x50] sm:$0xff]  ;;  %v3962_v8 = vld [vmem:[%s6137_s3 + $0x8] ss:$0 sm:$0xff]  ;;  %153 = vmatpush.msrb.mxu1 %v136_v6  ;;  %vm76_vm3 = vcmask 261120   ;;  %s4256_s6 = smov 64  }
   0xe   :  { %20 = vst.msk [vmem:[#allocation2 + $0x8] sm:$0xff] %vm18_vm2, %v4255_v5  ;;  %v134_v9 = vld [vmem:[%s6135_s1 + $0x48] sm:$0xff]  ;;  %s4257_s7 = smov 32   ;;  %vm78_vm4 = vcmask 258048   ;;  %v133_v18 = vld [vmem:[%s6135_s1 + $0x40] sm:$0xff]  ;;  %v132_v19 = vld [vmem:[%s6135_s1 + $0x38] sm:$0xff] }
   0xf   :  { %21 = vst.msk [vmem:[#allocation2 + $0x10] sm:$0xff] %vm18_vm2, %v4255_v5  ;;  %154 = vmatpush.msrb.mxu1 %v135_v7  ;;  %v131_v20 = vld [vmem:[%s6135_s1 + $0x30] sm:$0xff]  ;;  %v130_v21 = vld [vmem:[%s6135_s1 + $0x28] sm:$0xff]  ;;  %v129_v22 = vld [vmem:[%s6135_s1 + $0x20] sm:$0xff]  ;;  %vm98_vm5 = vcmask 523520   ;;  %vm109_vm6 = vcmask 785923  }
  0x10   :  { %22 = vst.msk [vmem:[#allocation2 + $0x18] sm:$0xff] %vm18_vm2, %v4255_v5  ;;  %v128_v23 = vld [vmem:[%s6135_s1 + $0x18] sm:$0xff]  ;;  %v127_v24 = vld [vmem:[%s6135_s1 + $0x10] sm:$0xff]  ;;  %v126_v25 = vld [vmem:[%s6135_s1 + $0x8] sm:$0xff]  ;;  %vm111_vm7 = vcmask 785920   ;;  %s4259_s9 = smov 96  }
  0x11   :  { %155 = vmatpush.msrb.mxu1 %v134_v9  ;;  %v125_v26 = vld [vmem:[%s6135_s1] sm:$0xff]  ;;  %v3963_v39 = vld [vmem:[%s6137_s3 + $0x10] ss:$0 sm:$0xff]  ;;  %s4268_s12 = smov [#allocation3]   ;;  %s3661_s16 = sshll.u32 %s6138_s4, 4  ;;  %s3662_s16 = int_to_ptr.hbm [resolvable:$true] %s3661_s16 }
  0x12   :  { %v3964_v40 = vld [vmem:[%s6137_s3 + $0x20] ss:$0 sm:$0xff]  ;;  %s3659_s13 = sshll.u32 %s4268_s12, 4  ;;  %s3660_s13 = int_to_ptr.vmem [resolvable:$true] %s3659_s13 }
  0x13   :  { %3673 = vmatmul.msk.f32.gmra.mxu0 %vm30_vm1, %v25_v4  ;;  %156 = vmatpush.msrb.mxu1 %v133_v18 }
  0x15   :  { %157 = vmatpush.msrb.mxu1 %v132_v19 }
  0x17   :  { %158 = vmatpush.msrb.mxu1 %v131_v20 }
  0x19   :  { %159 = vmatpush.msrb.mxu1 %v130_v21 }
  0x1b   :  { %160 = vmatpush.msrb.mxu1 %v129_v22 }
  0x1d   :  { %161 = vmatpush.msrb.mxu1 %v128_v23 }
  0x1f   :  { %162 = vmatpush.msrb.mxu1 %v127_v24 }
  0x21   :  { %163 = vmatpush.msrb.mxu1 %v126_v25 }
  0x23   :  { %164 = vmatpush.msrb.mxu1 %v125_v26 }
  0x80   :  { %v64_v10 = vpop.f32.mrf.mxu0  ;;  %v73_v11 = vpop.f32.mrf.mxu1 }
  0x81   :  { %v4325_v12 = vadd.f32 %v3962_v8, %v64_v10  ;;  %v4327_v13 = vadd.f32 %v3962_v8, %v73_v11 }
  0x83   :  { %103 = vrot.lane.b32.xlu1 %v4325_v12, %s4256_s6  ;;  %86 = vrot.lane.b32.xlu0 %v4325_v12, %s4257_s7  ;;  %77 = vst.msk [vmem:[#allocation2 + $0x3] sm:$0xff] %vm76_vm3, %v4325_v12 }
  0x84   :  { %81 = vst.msk [vmem:[#allocation2 + $0x1b] sm:$0x1f] %vm78_vm4, %v4327_v13 }
  0x88   :  { %v67_v14 = vpop.f32.mrf.mxu0 }
  0x89   :  { %v4337_v15 = vadd.f32 %v3962_v8, %v67_v14 }
  0x8b   :  { %105 = vrot.lane.b32.xlu1 %v4337_v15, %s4256_s6  ;;  %88 = vrot.lane.b32.xlu0 %v4337_v15, %s4257_s7  ;;  %79 = vst.msk [vmem:[#allocation2 + $0xb] sm:$0x1f] %vm78_vm4, %v4337_v15 }
  0x90   :  { %v70_v16 = vpop.f32.mrf.mxu0 }
  0x91   :  { %v4345_v17 = vadd.f32 %v3962_v8, %v70_v16 }
  0x93   :  { %115 = vrot.lane.b32.xlu1 %v4327_v13, %s4256_s6  ;;  %113 = vrot.lane.b32.xlu0 %v4345_v17, %s4256_s6  ;;  %80 = vst.msk [vmem:[#allocation2 + $0x13] sm:$0xff] %vm76_vm3, %v4345_v17 }
  0x94   :  { %90 = vrot.lane.b32.xlu2 %v4345_v17, %s4257_s7 }
  0x9c   :  { %92 = vrot.lane.b32.xlu2 %v4327_v13, %s4257_s7 }
  0xee   :  { %v91_v27 = vpop.permute.xlu2 %90 }
  0xef   :  { %101 = vst.msk [vmem:[#allocation2 + $0x10] sm:$0xff] %vm98_vm5, %v91_v27 }
  0xf5   :  { %v104_v28 = vpop.permute.xlu1 %103  ;;  %v87_v29 = vpop.permute.xlu0 %86 }
  0xf6   :  { %99 = vst.msk [vmem:[#allocation2] sm:$0xff] %vm98_vm5, %v87_v29  ;;  %v93_v30 = vpop.permute.xlu2 %92 }
  0xf7   :  { %110 = vst.msk [vmem:[#allocation2 - $0x3] sm:$0xf8] %vm109_vm6, %v104_v28 }
  0xf8   :  { %102 = vst.msk [vmem:[#allocation2 + $0x18] sm:$0xff] %vm98_vm5, %v93_v30 }
  0xfd   :  { %v106_v31 = vpop.permute.xlu1 %105  ;;  %v89_v32 = vpop.permute.xlu0 %88 }
  0xfe   :  { %100 = vst.msk [vmem:[#allocation2 + $0x8] sm:$0xff] %vm98_vm5, %v89_v32 }
  0xff   :  { %112 = vst.msk [vmem:[#allocation2 + $0x5] sm:$0xff] %vm111_vm7, %v106_v31 }
 0x105   :  { %v116_v33 = vpop.permute.xlu1 %115  ;;  %v114_v34 = vpop.permute.xlu0 %113 }
 0x106   :  { %v121_v35 = vld [vmem:[#allocation2] sm:$0xff]  ;;  %120 = vst.msk [vmem:[#allocation2 + $0x15] sm:$0xff] %vm111_vm7, %v116_v33  ;;  %v122_v36 = vld [vmem:[#allocation2 + $0x8] sm:$0xff] }
 0x107   :  { %3675 = vmatmul.msk.f32.vlgmr.msrb.gmra.mxu1 %vm18_vm2, %v121_v35  ;;  %119 = vst.msk [vmem:[#allocation2 + $0xd] sm:$0xf8] %vm109_vm6, %v114_v34 }
 0x10d   :  { %v124_v38 = vld [vmem:[#allocation2 + $0x18] sm:$0xff] }
 0x10e   :  { %v123_v37 = vld [vmem:[#allocation2 + $0x10] sm:$0xff] }
 0x10f   :  { %3676 = vmatmul.msk.f32.gmra.mxu1 %vm18_vm2, %v122_v36 }
 0x117   :  { %3677 = vmatmul.msk.f32.gmra.mxu1 %vm18_vm2, %v123_v37 }
 0x11f   :  { %3678 = vmatmul.msk.f32.gmra.mxu1 %vm18_vm2, %v124_v38 }
 0x184   :  { %v166_v41 = vpop.f32.mrf.mxu1 }
 0x185   :  { %v180_v42 = vmul.f32 %v3963_v39, %v166_v41 }
 0x187   :  { %v4402_v43 = vadd.f32 %v3964_v40, %v180_v42 }
 0x189   :  { %v4405_v44 = vmul.f32 0.70710677, %v4402_v43 }
 0x18b   :  { %v206_v45 = vand.u32 2147483647, %v4405_v44  ;;  %vm198_vm8 = vcmp.ge.f32.partialorder %v4405_v44, 0.0 }
 0x18c   :  { %v169_v46 = vpop.f32.mrf.mxu1 }
 0x18d   :  { %v210_v47 = vmul.f32 0.3275911, %v206_v45  ;;  %v181_v48 = vmul.f32 %v3963_v39, %v169_v46  ;;  %v270_v0 = vsub.f32 0.0, %v206_v45 }
 0x18f   :  { %v214_v49 = vadd.f32 1.0, %v210_v47  ;;  %v4408_v50 = vadd.f32 %v3964_v40, %v181_v48  ;;  %v274_v9 = vmul.f32 %v270_v0, %v206_v45 }
 0x191   :  { %3989 = vrcp.f32 %v214_v49  ;;  %v4411_v51 = vmul.f32 0.70710677, %v4408_v50  ;;  %v278_v20 = vmul.f32 1.442695, %v274_v9 }
 0x193   :  { %v207_v52 = vand.u32 2147483647, %v4411_v51  ;;  %vm199_vm9 = vcmp.ge.f32.partialorder %v4411_v51, 0.0 }
 0x194   :  { %v172_v53 = vpop.f32.mrf.mxu1 }
 0x195   :  { %v211_v54 = vmul.f32 0.3275911, %v207_v52  ;;  %v182_v55 = vmul.f32 %v3963_v39, %v172_v53  ;;  %v271_v22 = vsub.f32 0.0, %v207_v52 }
 0x197   :  { %v3990_v56 = vpop.eup %3989  ;;  %v215_v57 = vadd.f32 1.0, %v211_v54  ;;  %v4414_v58 = vadd.f32 %v3964_v40, %v182_v55  ;;  %v275_v31 = vmul.f32 %v271_v22, %v207_v52 }
 0x198   :  { %v222_v59 = vmul.f32 %v3990_v56, %v214_v49 }
 0x199   :  { %3991 = vrcp.f32 %v215_v57  ;;  %v4417_v60 = vmul.f32 0.70710677, %v4414_v58  ;;  %v280_v38 = vmul.f32 1.442695, %v275_v31 }
 0x19a   :  { %v226_v61 = vsub.f32 2.0, %v222_v59  ;;  %v4258_v59 = vmov -1.0  }
 0x19b   :  { %v208_v62 = vand.u32 2147483647, %v4417_v60  ;;  %vm200_vm10 = vcmp.ge.f32.partialorder %v4417_v60, 0.0 }
 0x19c   :  { %v230_v63 = vmul.f32 %v3990_v56, %v226_v61  ;;  %v175_v1 = vpop.f32.mrf.mxu1  ;;  %v202_v61 = vsel %vm198_vm8, 1.0, %v4258_v59 }
 0x19d   :  { %v212_v2 = vmul.f32 0.3275911, %v208_v62  ;;  %v183_v3 = vmul.f32 %v3963_v39, %v175_v1  ;;  %v272_v39 = vsub.f32 0.0, %v208_v62 }
 0x19e   :  { %v234_v4 = vmul.f32 1.0614054, %v230_v63 }
 0x19f   :  { %v3992_v5 = vpop.eup %3991  ;;  %v216_v6 = vadd.f32 1.0, %v212_v2  ;;  %v4420_v7 = vadd.f32 %v3964_v40, %v183_v3  ;;  %v276_v53 = vmul.f32 %v272_v39, %v208_v62  ;;  %v190_v3 = vmul.f32 0.5, %v4402_v43 }
 0x1a0   :  { %v238_v8 = vadd.f32 -1.4531521, %v234_v4  ;;  %v223_v10 = vmul.f32 %v3992_v5, %v215_v57 }
 0x1a1   :  { %3993 = vrcp.f32 %v216_v6  ;;  %v4423_v11 = vmul.f32 0.70710677, %v4420_v7  ;;  %v282_v44 = vmul.f32 1.442695, %v276_v53  ;;  %v3687_v53 = vld [vmem:[%s6135_s1 + $0xa0] sm:$0xff] }
 0x1a2   :  { %v242_v14 = vmul.f32 %v238_v8, %v230_v63  ;;  %v227_v16 = vsub.f32 2.0, %v223_v10  ;;  %3995 = vpow2.f32 %v278_v20 }
 0x1a3   :  { %v209_v18 = vand.u32 2147483647, %v4423_v11  ;;  %vm201_vm11 = vcmp.ge.f32.partialorder %v4423_v11, 0.0 }
 0x1a4   :  { %v246_v19 = vadd.f32 1.4214138, %v242_v14  ;;  %v231_v21 = vmul.f32 %v3992_v5, %v227_v16 }
 0x1a5   :  { %v213_v23 = vmul.f32 0.3275911, %v209_v18  ;;  %v273_v4 = vsub.f32 0.0, %v209_v18 }
 0x1a6   :  { %v250_v24 = vmul.f32 %v246_v19, %v230_v63  ;;  %v235_v25 = vmul.f32 1.0614054, %v231_v21 }
 0x1a7   :  { %v3994_v26 = vpop.eup %3993  ;;  %v217_v27 = vadd.f32 1.0, %v213_v23  ;;  %v277_v20 = vmul.f32 %v273_v4, %v209_v18  ;;  %v191_v18 = vmul.f32 0.5, %v4408_v50  ;;  %v192_v50 = vmul.f32 0.5, %v4414_v58 }
 0x1a8   :  { %v254_v28 = vadd.f32 -0.28449672, %v250_v24  ;;  %v239_v29 = vadd.f32 -1.4531521, %v235_v25  ;;  %v224_v30 = vmul.f32 %v3994_v26, %v216_v6  ;;  %v3996_v40 = vpop.eup %3995  ;;  %v203_v25 = vsel %vm199_vm9, 1.0, %v4258_v59 }
 0x1a9   :  { %3997 = vrcp.f32 %v217_v27  ;;  %v284_v51 = vmul.f32 1.442695, %v277_v20  ;;  %v193_v58 = vmul.f32 0.5, %v4420_v7  ;;  %v3689_v7 = vld [vmem:[%s6135_s1 + $0xb0] sm:$0xff]  ;;  %v3966_v20 = vld [vmem:[%s6137_s3 + $0x21] ss:$0 sm:$0xff] }
 0x1aa   :  { %v258_v32 = vmul.f32 %v254_v28, %v230_v63  ;;  %v243_v33 = vmul.f32 %v239_v29, %v231_v21  ;;  %v228_v34 = vsub.f32 2.0, %v224_v30  ;;  %3999 = vpow2.f32 %v280_v38 }
 0x1ab   :  { %4001 = vpow2.f32 %v282_v44  ;;  %v204_v38 = vsel %vm200_vm10, 1.0, %v4258_v59 }
 0x1ac   :  { %v262_v35 = vadd.f32 0.2548296, %v258_v32  ;;  %v247_v36 = vadd.f32 1.4214138, %v243_v33  ;;  %v232_v37 = vmul.f32 %v3994_v26, %v228_v34  ;;  %4003 = vpow2.f32 %v284_v51 }
 0x1ae   :  { %v266_v41 = vmul.f32 %v262_v35, %v230_v63  ;;  %v251_v42 = vmul.f32 %v247_v36, %v231_v21  ;;  %v236_v45 = vmul.f32 1.0614054, %v232_v37 }
 0x1af   :  { %v3998_v46 = vpop.eup %3997 }
 0x1b0   :  { %v286_v47 = vmul.f32 %v3996_v40, %v266_v41  ;;  %v255_v48 = vadd.f32 -0.28449672, %v251_v42  ;;  %v240_v49 = vadd.f32 -1.4531521, %v236_v45  ;;  %v225_v52 = vmul.f32 %v3998_v46, %v217_v27  ;;  %v4000_v62 = vpop.eup %3999 }
 0x1b1   :  { %v4002_v30 = vpop.eup %4001 }
 0x1b2   :  { %v290_v54 = vsub.f32 1.0, %v286_v47  ;;  %v259_v55 = vmul.f32 %v255_v48, %v231_v21  ;;  %v244_v56 = vmul.f32 %v240_v49, %v232_v37  ;;  %v229_v57 = vsub.f32 2.0, %v225_v52  ;;  %v4004_v41 = vpop.eup %4003 }
 0x1b3   :  { %v205_v47 = vsel %vm201_vm11, 1.0, %v4258_v59 }
 0x1b4   :  { %v294_v0 = vmul.f32 %v290_v54, %v202_v61  ;;  %v263_v63 = vadd.f32 0.2548296, %v259_v55  ;;  %v248_v1 = vadd.f32 1.4214138, %v244_v56  ;;  %v233_v2 = vmul.f32 %v3998_v46, %v229_v57  ;;  %v3686_v54 = vld [vmem:[%s6135_s1 + $0x98] sm:$0xff]  ;;  %v3685_v55 = vld [vmem:[%s6135_s1 + $0x90] sm:$0xff] }
 0x1b5   :  { %v3684_v56 = vld [vmem:[%s6135_s1 + $0x88] sm:$0xff]  ;;  %v3683_v61 = vld [vmem:[%s6135_s1 + $0x80] sm:$0xff] }
 0x1b6   :  { %v298_v5 = vadd.f32 1.0, %v294_v0  ;;  %v267_v6 = vmul.f32 %v263_v63, %v231_v21  ;;  %v252_v8 = vmul.f32 %v248_v1, %v232_v37  ;;  %v237_v9 = vmul.f32 1.0614054, %v233_v2  ;;  %v3682_v0 = vld [vmem:[%s6135_s1 + $0x78] sm:$0xff]  ;;  %v3681_v63 = vld [vmem:[%s6135_s1 + $0x70] sm:$0xff]  ;;  %v3680_v1 = vld [vmem:[%s6135_s1 + $0x68] sm:$0xff] }
 0x1b8   :  { %v302_v10 = vmul.f32 %v298_v5, %v190_v3  ;;  %v287_v14 = vmul.f32 %v4000_v62, %v267_v6  ;;  %v256_v16 = vadd.f32 -0.28449672, %v252_v8  ;;  %v241_v19 = vadd.f32 -1.4531521, %v237_v9 }
 0x1ba   :  { %v291_v22 = vsub.f32 1.0, %v287_v14  ;;  %v260_v23 = vmul.f32 %v256_v16, %v232_v37  ;;  %v245_v24 = vmul.f32 %v241_v19, %v233_v2  ;;  %v4431_v43 = vadd.f32 %v302_v10, %v4325_v12  ;;  %v3965_v19 = vld [vmem:[%s6137_s3 + $0x11] ss:$0 sm:$0xff] }
 0x1bc   :  { %v295_v21 = vmul.f32 %v291_v22, %v203_v25  ;;  %v264_v26 = vadd.f32 0.2548296, %v260_v23  ;;  %v249_v27 = vadd.f32 1.4214138, %v245_v24  ;;  %334 = vrot.lane.b32.xlu1 %v4431_v43, %s4256_s6  ;;  %310 = vst.msk [vmem:[#allocation2 + $0x3] sm:$0xff] %vm76_vm3, %v4431_v43  ;;  %318 = vrot.lane.b32.xlu2 %v4431_v43, %s4257_s7 }
 0x1be   :  { %v299_v28 = vadd.f32 1.0, %v295_v21  ;;  %v268_v12 = vmul.f32 %v264_v26, %v232_v37  ;;  %v253_v29 = vmul.f32 %v249_v27, %v233_v2 }
 0x1c0   :  { %v303_v31 = vmul.f32 %v299_v28, %v191_v18  ;;  %v288_v32 = vmul.f32 %v4002_v30, %v268_v12  ;;  %v257_v33 = vadd.f32 -0.28449672, %v253_v29 }
 0x1c2   :  { %v292_v34 = vsub.f32 1.0, %v288_v32  ;;  %v261_v35 = vmul.f32 %v257_v33, %v233_v2  ;;  %v4443_v36 = vadd.f32 %v303_v31, %v4337_v15 }
 0x1c4   :  { %v296_v39 = vmul.f32 %v292_v34, %v204_v38  ;;  %v265_v40 = vadd.f32 0.2548296, %v261_v35  ;;  %336 = vrot.lane.b32.xlu2 %v4443_v36, %s4256_s6  ;;  %311 = vst.msk [vmem:[#allocation2 + $0xb] sm:$0x1f] %vm78_vm4, %v4443_v36  ;;  %320 = vrot.lane.b32.xlu0 %v4443_v36, %s4257_s7 }
 0x1c6   :  { %v300_v60 = vadd.f32 1.0, %v296_v39  ;;  %v269_v37 = vmul.f32 %v265_v40, %v233_v2  ;;  %v3679_v2 = vld [vmem:[%s6135_s1 + $0x60] sm:$0xff] }
 0x1c8   :  { %v304_v15 = vmul.f32 %v300_v60, %v192_v50  ;;  %v289_v42 = vmul.f32 %v4004_v41, %v269_v37 }
 0x1ca   :  { %v293_v45 = vsub.f32 1.0, %v289_v42  ;;  %v4455_v46 = vadd.f32 %v304_v15, %v4345_v17  ;;  %v3690_v17 = vld [vmem:[%s6135_s1 + $0xb8] sm:$0xff] }
 0x1cb   :  { %383 = vmatpush.msra.mxu2 %v3690_v17 }
 0x1cc   :  { %v297_v48 = vmul.f32 %v293_v45, %v205_v47  ;;  %342 = vrot.lane.b32.xlu2 %v4455_v46, %s4256_s6  ;;  %312 = vst.msk [vmem:[#allocation2 + $0x13] sm:$0xff] %vm76_vm3, %v4455_v46  ;;  %322 = vrot.lane.b32.xlu0 %v4455_v46, %s4257_s7 }
 0x1cd   :  { %384 = vmatpush.msra.mxu2 %v3689_v7 }
 0x1ce   :  { %v301_v11 = vadd.f32 1.0, %v297_v48 }
 0x1d0   :  { %v305_v49 = vmul.f32 %v301_v11, %v193_v58 }
 0x1d2   :  { %v4466_v52 = vadd.f32 %v305_v49, %v4327_v13  ;;  %v3688_v13 = vld [vmem:[%s6135_s1 + $0xa8] sm:$0xff] }
 0x1d3   :  { %385 = vmatpush.msra.mxu2 %v3688_v13 }
 0x1d4   :  { %344 = vrot.lane.b32.xlu0 %v4466_v52, %s4256_s6  ;;  %313 = vst.msk [vmem:[#allocation2 + $0x1b] sm:$0x1f] %vm78_vm4, %v4466_v52  ;;  %324 = vrot.lane.b32.xlu1 %v4466_v52, %s4257_s7 }
 0x1d5   :  { %386 = vmatpush.msra.mxu2 %v3687_v53 }
 0x1d7   :  { %387 = vmatpush.msra.mxu2 %v3686_v54 }
 0x1d9   :  { %388 = vmatpush.msra.mxu2 %v3685_v55 }
 0x1db   :  { %389 = vmatpush.msra.mxu2 %v3684_v56 }
 0x1dd   :  { %390 = vmatpush.msra.mxu2 %v3683_v61 }
 0x1df   :  { %391 = vmatpush.msra.mxu2 %v3682_v0 }
 0x1e1   :  { %392 = vmatpush.msra.mxu2 %v3681_v63 }
 0x1e3   :  { %393 = vmatpush.msra.mxu2 %v3680_v1 }
 0x1e5   :  { %394 = vmatpush.msra.mxu2 %v3679_v2 }
 0x216   :  { %v319_v57 = vpop.permute.xlu2 %318 }
 0x217   :  { %330 = vst.msk [vmem:[#allocation2] sm:$0xff] %vm98_vm5, %v319_v57 }
 0x21e   :  { %v337_v44 = vpop.permute.xlu2 %336 }
 0x226   :  { %v343_v6 = vpop.permute.xlu2 %342 }
 0x22e   :  { %v335_v3 = vpop.permute.xlu1 %334 }
 0x22f   :  { %340 = vst.msk [vmem:[#allocation2 - $0x3] sm:$0xf8] %vm109_vm6, %v335_v3 }
 0x236   :  { %v321_v4 = vpop.permute.xlu0 %320 }
 0x237   :  { %331 = vst.msk [vmem:[#allocation2 + $0x8] sm:$0xff] %vm98_vm5, %v321_v4 }
 0x238   :  { %341 = vst.msk [vmem:[#allocation2 + $0x5] sm:$0xff] %vm111_vm7, %v337_v44 }
 0x23e   :  { %v323_v5 = vpop.permute.xlu0 %322 }
 0x23f   :  { %332 = vst.msk [vmem:[#allocation2 + $0x10] sm:$0xff] %vm98_vm5, %v323_v5  ;;  %v350_v8 = vld [vmem:[#allocation2] sm:$0xff]  ;;  %v351_v10 = vld [vmem:[#allocation2 + $0x8] sm:$0xff] }
 0x240   :  { %348 = vst.msk [vmem:[#allocation2 + $0xd] sm:$0xf8] %vm109_vm6, %v343_v6  ;;  %3691 = vmatmul.msk.f32.vlgmr.msra.gmra.mxu2 %vm18_vm2, %v350_v8 }
 0x246   :  { %v345_v9 = vpop.permute.xlu0 %344  ;;  %v325_v62 = vpop.permute.xlu1 %324 }
 0x247   :  { %333 = vst.msk [vmem:[#allocation2 + $0x18] sm:$0xff] %vm98_vm5, %v325_v62 }
 0x248   :  { %349 = vst.msk [vmem:[#allocation2 + $0x15] sm:$0xff] %vm111_vm7, %v345_v9  ;;  %3692 = vmatmul.msk.f32.gmra.mxu2 %vm18_vm2, %v351_v10 }
 0x24f   :  { %v352_v14 = vld [vmem:[#allocation2 + $0x10] sm:$0xff]  ;;  %v353_v16 = vld [vmem:[#allocation2 + $0x18] sm:$0xff] }
 0x250   :  { %3693 = vmatmul.msk.f32.gmra.mxu2 %vm18_vm2, %v352_v14 }
 0x258   :  { %3694 = vmatmul.msk.f32.gmra.mxu2 %vm18_vm2, %v353_v16 }
 0x2c3   :  { %v396_v22 = vpop.f32.mrf.mxu2 }
 0x2c4   :  { %v410_v23 = vmul.f32 %v3965_v19, %v396_v22 }
 0x2c6   :  { %v4528_v24 = vadd.f32 %v3966_v20, %v410_v23 }
 0x2c8   :  { %v4531_v25 = vmul.f32 0.70710677, %v4528_v24 }
 0x2ca   :  { %v436_v21 = vand.u32 2147483647, %v4531_v25  ;;  %vm428_vm12 = vcmp.ge.f32.partialorder %v4531_v25, 0.0 }
 0x2cb   :  { %v399_v26 = vpop.f32.mrf.mxu2 }
 0x2cc   :  { %v440_v27 = vmul.f32 0.3275911, %v436_v21  ;;  %v411_v51 = vmul.f32 %v3965_v19, %v399_v26  ;;  %v500_v37 = vsub.f32 0.0, %v436_v21 }
 0x2ce   :  { %v444_v18 = vadd.f32 1.0, %v440_v27  ;;  %v4534_v28 = vadd.f32 %v3966_v20, %v411_v51  ;;  %v504_v11 = vmul.f32 %v500_v37, %v436_v21 }
 0x2d0   :  { %4005 = vrcp.f32 %v444_v18  ;;  %v4537_v12 = vmul.f32 0.70710677, %v4534_v28  ;;  %v508_v55 = vmul.f32 1.442695, %v504_v11 }
 0x2d2   :  { %v437_v29 = vand.u32 2147483647, %v4537_v12  ;;  %vm429_vm13 = vcmp.ge.f32.partialorder %v4537_v12, 0.0 }
 0x2d3   :  { %v402_v30 = vpop.f32.mrf.mxu2 }
 0x2d4   :  { %v441_v31 = vmul.f32 0.3275911, %v437_v29  ;;  %v412_v32 = vmul.f32 %v3965_v19, %v402_v30  ;;  %v501_v61 = vsub.f32 0.0, %v437_v29 }
 0x2d6   :  { %v4006_v33 = vpop.eup %4005  ;;  %v445_v34 = vadd.f32 1.0, %v441_v31  ;;  %v4540_v35 = vadd.f32 %v3966_v20, %v412_v32  ;;  %v505_v6 = vmul.f32 %v501_v61, %v437_v29 }
 0x2d7   :  { %v452_v38 = vmul.f32 %v4006_v33, %v444_v18 }
 0x2d8   :  { %4007 = vrcp.f32 %v445_v34  ;;  %v4543_v39 = vmul.f32 0.70710677, %v4540_v35 }
 0x2d9   :  { %v456_v40 = vsub.f32 2.0, %v452_v38 }
 0x2da   :  { %v438_v50 = vand.u32 2147483647, %v4543_v39  ;;  %vm430_vm14 = vcmp.ge.f32.partialorder %v4543_v39, 0.0  ;;  %v422_v39 = vmul.f32 0.5, %v4540_v35 }
 0x2db   :  { %v460_v60 = vmul.f32 %v4006_v33, %v456_v40  ;;  %v405_v41 = vpop.f32.mrf.mxu2  ;;  %v432_v40 = vsel %vm428_vm12, 1.0, %v4258_v59 }
 0x2dc   :  { %v442_v15 = vmul.f32 0.3275911, %v438_v50  ;;  %v413_v42 = vmul.f32 %v3965_v19, %v405_v41  ;;  %v510_v19 = vmul.f32 1.442695, %v505_v6 }
 0x2dd   :  { %v464_v45 = vmul.f32 1.0614054, %v460_v60 }
 0x2de   :  { %v4008_v47 = vpop.eup %4007  ;;  %v446_v48 = vadd.f32 1.0, %v442_v15  ;;  %v4546_v58 = vadd.f32 %v3966_v20, %v413_v42  ;;  %v502_v20 = vsub.f32 0.0, %v438_v50  ;;  %v420_v42 = vmul.f32 0.5, %v4528_v24 }
 0x2df   :  { %v453_v49 = vmul.f32 %v4008_v47, %v445_v34  ;;  %v468_v17 = vadd.f32 -1.4531521, %v464_v45 }
 0x2e0   :  { %4009 = vrcp.f32 %v446_v48  ;;  %v4549_v7 = vmul.f32 0.70710677, %v4546_v58  ;;  %v506_v31 = vmul.f32 %v502_v20, %v438_v50  ;;  %v423_v35 = vmul.f32 0.5, %v4546_v58  ;;  %v593_v58 = vld [vmem:[%s6136_s2 + $0x48] sm:$0xff] }
 0x2e1   :  { %v457_v13 = vsub.f32 2.0, %v453_v49  ;;  %v472_v53 = vmul.f32 %v468_v17, %v460_v60  ;;  %4011 = vpow2.f32 %v508_v55 }
 0x2e2   :  { %v439_v54 = vand.u32 2147483647, %v4549_v7  ;;  %v512_v45 = vmul.f32 1.442695, %v506_v31  ;;  %vm431_vm15 = vcmp.ge.f32.partialorder %v4549_v7, 0.0  ;;  %v594_v31 = vld [vmem:[%s6136_s2 + $0x50] sm:$0xff] }
 0x2e3   :  { %v461_v56 = vmul.f32 %v4008_v47, %v457_v13  ;;  %v476_v57 = vadd.f32 1.4214138, %v472_v53 }
 0x2e4   :  { %v443_v0 = vmul.f32 0.3275911, %v439_v54  ;;  %v503_v25 = vsub.f32 0.0, %v439_v54 }
 0x2e5   :  { %v480_v63 = vmul.f32 %v476_v57, %v460_v60  ;;  %v465_v1 = vmul.f32 1.0614054, %v461_v56 }
 0x2e6   :  { %v4010_v2 = vpop.eup %4009  ;;  %v447_v3 = vadd.f32 1.0, %v443_v0  ;;  %v507_v57 = vmul.f32 %v503_v25, %v439_v54 }
 0x2e7   :  { %v454_v44 = vmul.f32 %v4010_v2, %v446_v48  ;;  %v484_v4 = vadd.f32 -0.28449672, %v480_v63  ;;  %v469_v5 = vadd.f32 -1.4531521, %v465_v1  ;;  %v4012_v22 = vpop.eup %4011  ;;  %v433_v1 = vsel %vm429_vm13, 1.0, %v4258_v59 }
 0x2e8   :  { %4013 = vrcp.f32 %v447_v3 }
 0x2e9   :  { %v458_v8 = vsub.f32 2.0, %v454_v44  ;;  %v488_v9 = vmul.f32 %v484_v4, %v460_v60  ;;  %v473_v62 = vmul.f32 %v469_v5, %v461_v56  ;;  %4015 = vpow2.f32 %v510_v19 }
 0x2ea   :  { %4017 = vpow2.f32 %v512_v45  ;;  %v421_v44 = vmul.f32 0.5, %v4534_v28  ;;  %v434_v19 = vsel %vm430_vm14, 1.0, %v4258_v59 }
 0x2eb   :  { %v462_v10 = vmul.f32 %v4010_v2, %v458_v8  ;;  %v492_v14 = vadd.f32 0.2548296, %v488_v9  ;;  %v477_v16 = vadd.f32 1.4214138, %v473_v62 }
 0x2ed   :  { %v496_v23 = vmul.f32 %v492_v14, %v460_v60  ;;  %v481_v21 = vmul.f32 %v477_v16, %v461_v56  ;;  %v466_v26 = vmul.f32 1.0614054, %v462_v10 }
 0x2ee   :  { %v4014_v27 = vpop.eup %4013 }
 0x2ef   :  { %v455_v51 = vmul.f32 %v4014_v27, %v447_v3  ;;  %v516_v18 = vmul.f32 %v4012_v22, %v496_v23  ;;  %v485_v30 = vadd.f32 -0.28449672, %v481_v21  ;;  %v470_v29 = vadd.f32 -1.4531521, %v466_v26  ;;  %v4016_v17 = vpop.eup %4015 }
 0x2f0   :  { %v514_v3 = vmul.f32 1.442695, %v507_v57  ;;  %v4018_v5 = vpop.eup %4017 }
 0x2f1   :  { %v459_v32 = vsub.f32 2.0, %v455_v51  ;;  %v520_v33 = vsub.f32 1.0, %v516_v18  ;;  %v489_v34 = vmul.f32 %v485_v30, %v461_v56  ;;  %v474_v38 = vmul.f32 %v470_v29, %v462_v10 }
 0x2f2   :  { %4019 = vpow2.f32 %v514_v3  ;;  %v435_v51 = vsel %vm431_vm15, 1.0, %v4258_v59 }
 0x2f3   :  { %v463_v37 = vmul.f32 %v4014_v27, %v459_v32  ;;  %v524_v41 = vmul.f32 %v520_v33, %v432_v40  ;;  %v493_v60 = vadd.f32 0.2548296, %v489_v34  ;;  %v478_v15 = vadd.f32 1.4214138, %v474_v38  ;;  %v591_v32 = vld [vmem:[%s6136_s2 + $0x38] sm:$0xff]  ;;  %v590_v33 = vld [vmem:[%s6136_s2 + $0x30] sm:$0xff] }
 0x2f4   :  { %v589_v34 = vld [vmem:[%s6136_s2 + $0x28] sm:$0xff]  ;;  %v588_v38 = vld [vmem:[%s6136_s2 + $0x20] sm:$0xff]  ;;  %v587_v40 = vld [vmem:[%s6136_s2 + $0x18] sm:$0xff] }
 0x2f5   :  { %v528_v47 = vadd.f32 1.0, %v524_v41  ;;  %v497_v48 = vmul.f32 %v493_v60, %v461_v56  ;;  %v482_v11 = vmul.f32 %v478_v15, %v462_v10  ;;  %v467_v49 = vmul.f32 1.0614054, %v463_v37  ;;  %v585_v41 = vld [vmem:[%s6136_s2 + $0x8] sm:$0xff]  ;;  %v584_v60 = vld [vmem:[%s6136_s2] sm:$0xff] }
 0x2f7   :  { %v532_v50 = vmul.f32 %v528_v47, %v420_v42  ;;  %v517_v13 = vmul.f32 %v4016_v17, %v497_v48  ;;  %v486_v53 = vadd.f32 -0.28449672, %v482_v11  ;;  %v471_v55 = vadd.f32 -1.4531521, %v467_v49 }
 0x2f8   :  { %v4020_v23 = vpop.eup %4019 }
 0x2f9   :  { %v536_v61 = vadd.f32 %v532_v50, %v4431_v43  ;;  %v521_v0 = vsub.f32 1.0, %v517_v13  ;;  %v490_v63 = vmul.f32 %v486_v53, %v462_v10  ;;  %v475_v24 = vmul.f32 %v471_v55, %v463_v37  ;;  %v3967_v55 = vld [vmem:[%s6137_s3 + $0x30] ss:$0 sm:$0xff] }
 0x2fb   :  { %564 = vrot.lane.b32.xlu0 %v536_v61, %s4256_s6  ;;  %540 = vst.msk [vmem:[#allocation2 + $0x3] sm:$0xff] %vm76_vm3, %v536_v61  ;;  %548 = vrot.lane.b32.xlu1 %v536_v61, %s4257_s7  ;;  %v525_v12 = vmul.f32 %v521_v0, %v433_v1  ;;  %v494_v56 = vadd.f32 0.2548296, %v490_v63  ;;  %v479_v2 = vadd.f32 1.4214138, %v475_v24 }
 0x2fd   :  { %v529_v54 = vadd.f32 1.0, %v525_v12  ;;  %v498_v4 = vmul.f32 %v494_v56, %v462_v10  ;;  %v483_v43 = vmul.f32 %v479_v2, %v463_v37 }
 0x2ff   :  { %v533_v6 = vmul.f32 %v529_v54, %v421_v44  ;;  %v518_v8 = vmul.f32 %v4018_v5, %v498_v4  ;;  %v487_v9 = vadd.f32 -0.28449672, %v483_v43 }
 0x301   :  { %v537_v62 = vadd.f32 %v533_v6, %v4443_v36  ;;  %v522_v14 = vsub.f32 1.0, %v518_v8  ;;  %v491_v16 = vmul.f32 %v487_v9, %v463_v37 }
 0x303   :  { %550 = vrot.lane.b32.xlu2 %v537_v62, %s4257_s7  ;;  %541 = vst.msk [vmem:[#allocation2 + $0xb] sm:$0x1f] %vm78_vm4, %v537_v62  ;;  %566 = vrot.lane.b32.xlu1 %v537_v62, %s4256_s6  ;;  %v526_v28 = vmul.f32 %v522_v14, %v434_v19  ;;  %v495_v10 = vadd.f32 0.2548296, %v491_v16 }
 0x305   :  { %v530_v20 = vadd.f32 1.0, %v526_v28  ;;  %v499_v22 = vmul.f32 %v495_v10, %v463_v37  ;;  %v586_v37 = vld [vmem:[%s6136_s2 + $0x10] sm:$0xff] }
 0x307   :  { %v534_v36 = vmul.f32 %v530_v20, %v422_v39  ;;  %v519_v21 = vmul.f32 %v4020_v23, %v499_v22 }
 0x309   :  { %v538_v26 = vadd.f32 %v534_v36, %v4455_v46  ;;  %v523_v27 = vsub.f32 1.0, %v519_v21  ;;  %v595_v46 = vld [vmem:[%s6136_s2 + $0x58] sm:$0xff] }
 0x30a   :  { %614 = vmatpush.msra.mxu3 %v595_v46 }
 0x30b   :  { %572 = vrot.lane.b32.xlu1 %v538_v26, %s4256_s6  ;;  %542 = vst.msk [vmem:[#allocation2 + $0x13] sm:$0xff] %vm76_vm3, %v538_v26  ;;  %552 = vrot.lane.b32.xlu2 %v538_v26, %s4257_s7  ;;  %v527_v18 = vmul.f32 %v523_v27, %v435_v51 }
 0x30c   :  { %615 = vmatpush.msra.mxu3 %v594_v31 }
 0x30d   :  { %v531_v30 = vadd.f32 1.0, %v527_v18 }
 0x30e   :  { %616 = vmatpush.msra.mxu3 %v593_v58 }
 0x30f   :  { %v535_v29 = vmul.f32 %v531_v30, %v423_v35 }
 0x311   :  { %v539_v7 = vadd.f32 %v535_v29, %v4466_v52  ;;  %v592_v52 = vld [vmem:[%s6136_s2 + $0x40] sm:$0xff] }
 0x312   :  { %617 = vmatpush.msra.mxu3 %v592_v52 }
 0x313   :  { %574 = vrot.lane.b32.xlu2 %v539_v7, %s4256_s6  ;;  %543 = vst.msk [vmem:[#allocation2 + $0x1b] sm:$0x1f] %vm78_vm4, %v539_v7  ;;  %554 = vrot.lane.b32.xlu0 %v539_v7, %s4257_s7 }
 0x314   :  { %618 = vmatpush.msra.mxu3 %v591_v32 }
 0x316   :  { %619 = vmatpush.msra.mxu3 %v590_v33 }
 0x318   :  { %620 = vmatpush.msra.mxu3 %v589_v34 }
 0x31a   :  { %621 = vmatpush.msra.mxu3 %v588_v38 }
 0x31c   :  { %622 = vmatpush.msra.mxu3 %v587_v40 }
 0x31e   :  { %623 = vmatpush.msra.mxu3 %v586_v37 }
 0x320   :  { %624 = vmatpush.msra.mxu3 %v585_v41 }
 0x322   :  { %625 = vmatpush.msra.mxu3 %v584_v60 }
 0x35d   :  { %v551_v15 = vpop.permute.xlu2 %550 }
 0x35e   :  { %561 = vst.msk [vmem:[#allocation2 + $0x8] sm:$0xff] %vm98_vm5, %v551_v15 }
 0x365   :  { %v553_v42 = vpop.permute.xlu2 %552 }
 0x366   :  { %562 = vst.msk [vmem:[#allocation2 + $0x10] sm:$0xff] %vm98_vm5, %v553_v42 }
 0x36d   :  { %v565_v45 = vpop.permute.xlu0 %564  ;;  %v549_v25 = vpop.permute.xlu1 %548 }
 0x36e   :  { %560 = vst.msk [vmem:[#allocation2] sm:$0xff] %vm98_vm5, %v549_v25  ;;  %v575_v50 = vpop.permute.xlu2 %574 }
 0x36f   :  { %570 = vst.msk [vmem:[#allocation2 - $0x3] sm:$0xf8] %vm109_vm6, %v565_v45 }
 0x375   :  { %v567_v47 = vpop.permute.xlu1 %566 }
 0x376   :  { %571 = vst.msk [vmem:[#allocation2 + $0x5] sm:$0xff] %vm111_vm7, %v567_v47 }
 0x37d   :  { %v573_v48 = vpop.permute.xlu1 %572  ;;  %v580_v11 = vld [vmem:[#allocation2] sm:$0xff]  ;;  %v581_v17 = vld [vmem:[#allocation2 + $0x8] sm:$0xff] }
 0x37e   :  { %578 = vst.msk [vmem:[#allocation2 + $0xd] sm:$0xf8] %vm109_vm6, %v573_v48  ;;  %3695 = vmatmul.msk.f32.vlgmr.msra.gmra.mxu3 %vm18_vm2, %v580_v11 }
 0x385   :  { %v555_v49 = vpop.permute.xlu0 %554 }
 0x386   :  { %563 = vst.msk [vmem:[#allocation2 + $0x18] sm:$0xff] %vm98_vm5, %v555_v49  ;;  %3696 = vmatmul.msk.f32.gmra.mxu3 %vm18_vm2, %v581_v17 }
 0x387   :  { %579 = vst.msk [vmem:[#allocation2 + $0x15] sm:$0xff] %vm111_vm7, %v575_v50 }
 0x38e   :  { %v582_v13 = vld [vmem:[#allocation2 + $0x10] sm:$0xff]  ;;  %v583_v53 = vld [vmem:[#allocation2 + $0x18] sm:$0xff] }
 0x38f   :  { %3697 = vmatmul.msk.f32.gmra.mxu3 %vm18_vm2, %v582_v13 }
 0x397   :  { %3698 = vmatmul.msk.f32.gmra.mxu3 %vm18_vm2, %v583_v53 }
 0x401   :  { %v627_v57 = vpop.f32.mrf.mxu3 }
 0x402   :  { %v4631_v61 = vadd.f32 %v3967_v55, %v627_v57 }
 0x404   :  { %v3699_v0 = vmul.f32 -1.442695, %v4631_v61 }
 0x406   :  { %4021 = vpow2.f32 %v3699_v0 }
 0x409   :  { %v630_v63 = vpop.f32.mrf.mxu3 }
 0x40a   :  { %v4634_v24 = vadd.f32 %v3967_v55, %v630_v63 }
 0x40c   :  { %v4022_v1 = vpop.eup %4021  ;;  %v3700_v12 = vmul.f32 -1.442695, %v4634_v24 }
 0x40d   :  { %v651_v56 = vadd.f32 1.0, %v4022_v1 }
 0x40e   :  { %4023 = vpow2.f32 %v3700_v12  ;;  %v3713_v12 = vld [vmem:[%s6135_s1 + $0x110] sm:$0xff] }
 0x40f   :  { %4025 = vrcp.f32 %v651_v56  ;;  %v666_v8 = vand.u32 2147483648, %v651_v56  ;;  %v664_v14 = vand.u32 2147483647, %v651_v56  ;;  %vm660_vm1 = vweird.f32 %v651_v56 }
 0x411   :  { %v667_v39 = vor.u32 1.1754944e-38, %v666_v8  ;;  %vm665_vm9 = vcmp.eq.f32.partialorder %v664_v14, 8.507059e+37  ;;  %v3703_v8 = vld [vmem:[%s6135_s1 + $0xc0] sm:$0xff] }
 0x412   :  { %v633_v2 = vpop.f32.mrf.mxu3 }
 0x413   :  { %v4637_v3 = vadd.f32 %v3967_v55, %v633_v2  ;;  %v3711_v2 = vld [vmem:[%s6135_s1 + $0x100] sm:$0xff] }
 0x414   :  { %v4024_v44 = vpop.eup %4023 }
 0x415   :  { %v4026_v54 = vpop.eup %4025  ;;  %v652_v4 = vadd.f32 1.0, %v4024_v44  ;;  %v3701_v43 = vmul.f32 -1.442695, %v4637_v3  ;;  %v3709_v44 = vld [vmem:[%s6135_s1 + $0xf0] sm:$0xff] }
 0x416   :  { %v656_v5 = vmul.f32 %v4026_v54, %v651_v56  ;;  %vm661_vm0 = vweird.f32 %v4026_v54  ;;  %v3712_v56 = vld [vmem:[%s6135_s1 + $0x108] sm:$0xff] }
 0x417   :  { %4027 = vrcp.f32 %v652_v4  ;;  %vm662_vm8 = vmor %vm660_vm1, %vm661_vm0  ;;  %v681_v27 = vand.u32 2147483648, %v652_v4  ;;  %v679_v18 = vand.u32 2147483647, %v652_v4  ;;  %vm675_vm11 = vweird.f32 %v652_v4 }
 0x418   :  { %4029 = vpow2.f32 %v3701_v43  ;;  %v657_v6 = vsub.f32 1.0, %v656_v5  ;;  %v3706_v43 = vld [vmem:[%s6135_s1 + $0xd8] sm:$0xff]  ;;  %v3705_v5 = vld [vmem:[%s6135_s1 + $0xd0] sm:$0xff] }
 0x419   :  { %v682_v29 = vor.u32 1.1754944e-38, %v681_v27  ;;  %vm680_vm13 = vcmp.eq.f32.partialorder %v679_v18, 8.507059e+37 }
 0x41a   :  { %v636_v9 = vpop.f32.mrf.mxu3  ;;  %v658_v62 = vmul.f32 %v4026_v54, %v657_v6  ;;  %v3704_v6 = vld [vmem:[%s6135_s1 + $0xc8] sm:$0xff] }
 0x41b   :  { %v4640_v16 = vadd.f32 %v3967_v55, %v636_v9 }
 0x41c   :  { %v659_v19 = vadd.f32 %v4026_v54, %v658_v62 }
 0x41d   :  { %v4028_v28 = vpop.eup %4027  ;;  %v3702_v10 = vmul.f32 -1.442695, %v4640_v16 }
 0x41e   :  { %v4030_v20 = vpop.eup %4029  ;;  %v663_v22 = vsel %vm662_vm8, %v4026_v54, %v659_v19  ;;  %v671_v23 = vmul.f32 %v4028_v28, %v652_v4  ;;  %vm676_vm10 = vweird.f32 %v4028_v28  ;;  %v3708_v54 = vld [vmem:[%s6135_s1 + $0xe8] sm:$0xff]  ;;  %v3707_v4 = vld [vmem:[%s6135_s1 + $0xe0] sm:$0xff] }
 0x41f   :  { %v653_v36 = vadd.f32 1.0, %v4030_v20  ;;  %4031 = vpow2.f32 %v3702_v10  ;;  %v668_v21 = vsel %vm665_vm9, %v667_v39, %v663_v22  ;;  %vm677_vm12 = vmor %vm675_vm11, %vm676_vm10 }
 0x420   :  { %719 = vrot.lane.b32.xlu0 %v668_v21, %s4259_s9  ;;  %v672_v26 = vsub.f32 1.0, %v671_v23  ;;  %v3968_v21 = vld [vmem:[%s6137_s3 + $0x12] ss:$0 sm:$0xff] }
 0x421   :  { %4033 = vrcp.f32 %v653_v36  ;;  %v696_v33 = vand.u32 2147483648, %v653_v36  ;;  %v694_v38 = vand.u32 2147483647, %v653_v36  ;;  %vm690_vm15 = vweird.f32 %v653_v36 }
 0x422   :  { %v673_v51 = vmul.f32 %v4028_v28, %v672_v26  ;;  %v3969_v26 = vld [vmem:[%s6137_s3 + $0x22] ss:$0 sm:$0xff] }
 0x423   :  { %v697_v41 = vor.u32 1.1754944e-38, %v696_v33  ;;  %vm695_vm1 = vcmp.eq.f32.partialorder %v694_v38, 8.507059e+37 }
 0x424   :  { %v674_v35 = vadd.f32 %v4028_v28, %v673_v51 }
 0x425   :  { %v4032_v30 = vpop.eup %4031 }
 0x426   :  { %v654_v7 = vadd.f32 1.0, %v4032_v30  ;;  %v678_v46 = vsel %vm677_vm12, %v4028_v28, %v674_v35 }
 0x427   :  { %v4034_v31 = vpop.eup %4033  ;;  %v683_v58 = vsel %vm680_vm13, %v682_v29, %v678_v46 }
 0x428   :  { %4035 = vrcp.f32 %v654_v7  ;;  %721 = vrot.lane.b32.xlu1 %v683_v58, %s4259_s9  ;;  %v686_v52 = vmul.f32 %v4034_v31, %v653_v36  ;;  %vm691_vm14 = vweird.f32 %v4034_v31  ;;  %v711_v25 = vand.u32 2147483648, %v654_v7 }
 0x429   :  { %vm692_vm0 = vmor %vm690_vm15, %vm691_vm14  ;;  %v709_v48 = vand.u32 2147483647, %v654_v7  ;;  %vm705_vm9 = vweird.f32 %v654_v7 }
 0x42a   :  { %v687_v32 = vsub.f32 1.0, %v686_v52  ;;  %v712_v49 = vor.u32 1.1754944e-38, %v711_v25 }
 0x42b   :  { %vm710_vm11 = vcmp.eq.f32.partialorder %v709_v48, 8.507059e+37 }
 0x42c   :  { %v688_v34 = vmul.f32 %v4034_v31, %v687_v32 }
 0x42e   :  { %v4036_v40 = vpop.eup %4035  ;;  %v689_v37 = vadd.f32 %v4034_v31, %v688_v34 }
 0x42f   :  { %v701_v60 = vmul.f32 %v4036_v40, %v654_v7  ;;  %vm706_vm8 = vweird.f32 %v4036_v40 }
 0x430   :  { %v693_v15 = vsel %vm692_vm0, %v4034_v31, %v689_v37  ;;  %vm707_vm10 = vmor %vm705_vm9, %vm706_vm8 }
 0x431   :  { %v698_v42 = vsel %vm695_vm1, %v697_v41, %v693_v15  ;;  %v702_v45 = vsub.f32 1.0, %v701_v60 }
 0x432   :  { %723 = vrot.lane.b32.xlu2 %v698_v42, %s4259_s9 }
 0x433   :  { %v703_v47 = vmul.f32 %v4036_v40, %v702_v45 }
 0x435   :  { %v704_v11 = vadd.f32 %v4036_v40, %v703_v47 }
 0x437   :  { %v708_v17 = vsel %vm707_vm10, %v4036_v40, %v704_v11 }
 0x438   :  { %v713_v50 = vsel %vm710_vm11, %v712_v49, %v708_v17 }
 0x439   :  { %725 = vrot.lane.b32.xlu0 %v713_v50, %s4259_s9 }
 0x48c   :  { %v724_v13 = vpop.permute.xlu2 %723 }
 0x48d   :  { %v4648_v53 = vmul.f32 %v724_v13, %v4637_v3  ;;  %v3710_v3 = vld [vmem:[%s6135_s1 + $0xf8] sm:$0xff] }
 0x48f   :  { %737 = vst.msk [vmem:[#allocation2 + $0x13] sm:$0xff] %vm76_vm3, %v4648_v53 }
 0x492   :  { %v720_v55 = vpop.permute.xlu0 %719 }
 0x493   :  { %v4653_v57 = vmul.f32 %v720_v55, %v4631_v61 }
 0x495   :  { %735 = vst.msk [vmem:[#allocation2 + $0x3] sm:$0xff] %vm76_vm3, %v4653_v57  ;;  %743 = vrot.lane.b32.xlu1 %v4653_v57, %s4257_s7  ;;  %759 = vrot.lane.b32.xlu0 %v4653_v57, %s4256_s6 }
 0x49a   :  { %v722_v0 = vpop.permute.xlu1 %721 }
 0x49b   :  { %v4662_v63 = vmul.f32 %v722_v0, %v4634_v24  ;;  %v3714_v24 = vld [vmem:[%s6135_s1 + $0x118] sm:$0xff] }
 0x49c   :  { %808 = vmatpush.msrb.mxu0 %v3714_v24 }
 0x49d   :  { %736 = vst.msk [vmem:[#allocation2 + $0xb] sm:$0x1f] %vm78_vm4, %v4662_v63  ;;  %761 = vrot.lane.b32.xlu1 %v4662_v63, %s4256_s6  ;;  %745 = vrot.lane.b32.xlu2 %v4662_v63, %s4257_s7 }
 0x49e   :  { %809 = vmatpush.msrb.mxu0 %v3713_v12 }
 0x4a0   :  { %810 = vmatpush.msrb.mxu0 %v3712_v56 }
 0x4a2   :  { %811 = vmatpush.msrb.mxu0 %v3711_v2 }
 0x4a4   :  { %812 = vmatpush.msrb.mxu0 %v3710_v3 }
 0x4a5   :  { %767 = vrot.lane.b32.xlu1 %v4648_v53, %s4256_s6  ;;  %747 = vrot.lane.b32.xlu2 %v4648_v53, %s4257_s7 }
 0x4a6   :  { %813 = vmatpush.msrb.mxu0 %v3709_v44 }
 0x4a8   :  { %814 = vmatpush.msrb.mxu0 %v3708_v54 }
 0x4aa   :  { %815 = vmatpush.msrb.mxu0 %v3707_v4 }
 0x4ab   :  { %v726_v61 = vpop.permute.xlu0 %725 }
 0x4ac   :  { %v4675_v1 = vmul.f32 %v726_v61, %v4640_v16  ;;  %816 = vmatpush.msrb.mxu0 %v3706_v43 }
 0x4ae   :  { %738 = vst.msk [vmem:[#allocation2 + $0x1b] sm:$0x1f] %vm78_vm4, %v4675_v1  ;;  %749 = vrot.lane.b32.xlu0 %v4675_v1, %s4257_s7  ;;  %769 = vrot.lane.b32.xlu2 %v4675_v1, %s4256_s6 }
 0x4af   :  { %817 = vmatpush.msrb.mxu0 %v3705_v5 }
 0x4b1   :  { %818 = vmatpush.msrb.mxu0 %v3704_v6 }
 0x4b3   :  { %819 = vmatpush.msrb.mxu0 %v3703_v8 }
 0x4f7   :  { %v746_v9 = vpop.permute.xlu2 %745 }
 0x4f8   :  { %756 = vst.msk [vmem:[#allocation2 + $0x8] sm:$0xff] %vm98_vm5, %v746_v9 }
 0x4ff   :  { %v748_v62 = vpop.permute.xlu2 %747 }
 0x500   :  { %757 = vst.msk [vmem:[#allocation2 + $0x10] sm:$0xff] %vm98_vm5, %v748_v62 }
 0x507   :  { %v744_v14 = vpop.permute.xlu1 %743  ;;  %v760_v16 = vpop.permute.xlu0 %759 }
 0x508   :  { %755 = vst.msk [vmem:[#allocation2] sm:$0xff] %vm98_vm5, %v744_v14  ;;  %v770_v22 = vpop.permute.xlu2 %769 }
 0x509   :  { %765 = vst.msk [vmem:[#allocation2 - $0x3] sm:$0xf8] %vm109_vm6, %v760_v16 }
 0x50f   :  { %v762_v19 = vpop.permute.xlu1 %761 }
 0x510   :  { %766 = vst.msk [vmem:[#allocation2 + $0x5] sm:$0xff] %vm111_vm7, %v762_v19 }
 0x517   :  { %v768_v28 = vpop.permute.xlu1 %767  ;;  %v775_v10 = vld [vmem:[#allocation2] sm:$0xff]  ;;  %v776_v39 = vld [vmem:[#allocation2 + $0x8] sm:$0xff] }
 0x518   :  { %773 = vst.msk [vmem:[#allocation2 + $0xd] sm:$0xf8] %vm109_vm6, %v768_v28  ;;  %3715 = vmatmul.msk.f32.vlgmr.msrb.gmra.mxu0 %vm18_vm2, %v775_v10 }
 0x520   :  { %v750_v20 = vpop.permute.xlu0 %749  ;;  %3716 = vmatmul.msk.f32.gmra.mxu0 %vm18_vm2, %v776_v39 }
 0x521   :  { %758 = vst.msk [vmem:[#allocation2 + $0x18] sm:$0xff] %vm98_vm5, %v750_v20 }
 0x522   :  { %774 = vst.msk [vmem:[#allocation2 + $0x15] sm:$0xff] %vm111_vm7, %v770_v22 }
 0x529   :  { %v777_v23 = vld [vmem:[#allocation2 + $0x10] sm:$0xff]  ;;  %v778_v36 = vld [vmem:[#allocation2 + $0x18] sm:$0xff] }
 0x52a   :  { %3717 = vmatmul.msk.f32.gmra.mxu0 %vm18_vm2, %v777_v23 }
 0x532   :  { %3718 = vmatmul.msk.f32.gmra.mxu0 %vm18_vm2, %v778_v36 }
 0x595   :  { %v821_v27 = vpop.f32.mrf.mxu0 }
 0x596   :  { %v835_v51 = vmul.f32 %v3968_v21, %v821_v27 }
 0x598   :  { %v4737_v18 = vadd.f32 %v3969_v26, %v835_v51 }
 0x59a   :  { %v4740_v35 = vmul.f32 0.70710677, %v4737_v18 }
 0x59c   :  { %v861_v30 = vand.u32 2147483647, %v4740_v35  ;;  %vm853_vm12 = vcmp.ge.f32.partialorder %v4740_v35, 0.0 }
 0x59d   :  { %v824_v29 = vpop.f32.mrf.mxu0 }
 0x59e   :  { %v865_v7 = vmul.f32 0.3275911, %v861_v30  ;;  %v836_v46 = vmul.f32 %v3968_v21, %v824_v29  ;;  %v925_v25 = vsub.f32 0.0, %v861_v30 }
 0x5a0   :  { %v869_v31 = vadd.f32 1.0, %v865_v7  ;;  %v4743_v58 = vadd.f32 %v3969_v26, %v836_v46  ;;  %v929_v0 = vmul.f32 %v925_v25, %v861_v30 }
 0x5a2   :  { %4037 = vrcp.f32 %v869_v31  ;;  %v4746_v52 = vmul.f32 0.70710677, %v4743_v58  ;;  %v933_v54 = vmul.f32 1.442695, %v929_v0 }
 0x5a4   :  { %v862_v32 = vand.u32 2147483647, %v4746_v52  ;;  %vm854_vm13 = vcmp.ge.f32.partialorder %v4746_v52, 0.0  ;;  %v846_v52 = vmul.f32 0.5, %v4743_v58 }
 0x5a6   :  { %v866_v33 = vmul.f32 0.3275911, %v862_v32  ;;  %v926_v4 = vsub.f32 0.0, %v862_v32 }
 0x5a7   :  { %v827_v34 = vpop.f32.mrf.mxu0 }
 0x5a8   :  { %v4038_v38 = vpop.eup %4037  ;;  %v870_v40 = vadd.f32 1.0, %v866_v33  ;;  %v837_v37 = vmul.f32 %v3968_v21, %v827_v34  ;;  %v930_v16 = vmul.f32 %v926_v4, %v862_v32 }
 0x5a9   :  { %v877_v41 = vmul.f32 %v4038_v38, %v869_v31 }
 0x5aa   :  { %4039 = vrcp.f32 %v870_v40  ;;  %v4749_v60 = vadd.f32 %v3969_v26, %v837_v37  ;;  %v935_v36 = vmul.f32 1.442695, %v930_v16 }
 0x5ab   :  { %v881_v15 = vsub.f32 2.0, %v877_v41 }
 0x5ac   :  { %v4752_v42 = vmul.f32 0.70710677, %v4749_v60 }
 0x5ad   :  { %v885_v45 = vmul.f32 %v4038_v38, %v881_v15 }
 0x5ae   :  { %v863_v47 = vand.u32 2147483647, %v4752_v42  ;;  %vm855_vm14 = vcmp.ge.f32.partialorder %v4752_v42, 0.0 }
 0x5af   :  { %v889_v48 = vmul.f32 1.0614054, %v885_v45  ;;  %v830_v11 = vpop.f32.mrf.mxu0  ;;  %v859_v58 = vsel %vm855_vm14, 1.0, %v4258_v59 }
 0x5b0   :  { %v4040_v49 = vpop.eup %4039  ;;  %v867_v17 = vmul.f32 0.3275911, %v863_v47  ;;  %v838_v50 = vmul.f32 %v3968_v21, %v830_v11  ;;  %v927_v30 = vsub.f32 0.0, %v863_v47 }
 0x5b1   :  { %v893_v13 = vadd.f32 -1.4531521, %v889_v48  ;;  %v878_v55 = vmul.f32 %v4040_v49, %v870_v40  ;;  %v857_v40 = vsel %vm853_vm12, 1.0, %v4258_v59  ;;  %v845_v48 = vmul.f32 0.5, %v4737_v18 }
 0x5b2   :  { %v871_v61 = vadd.f32 1.0, %v867_v17  ;;  %v4755_v24 = vadd.f32 %v3969_v26, %v838_v50  ;;  %v931_v37 = vmul.f32 %v927_v30, %v863_v47  ;;  %v858_v18 = vsel %vm854_vm13, 1.0, %v4258_v59 }
 0x5b3   :  { %v897_v12 = vmul.f32 %v893_v13, %v885_v45  ;;  %v882_v56 = vsub.f32 2.0, %v878_v55 }
 0x5b4   :  { %4041 = vrcp.f32 %v871_v61  ;;  %v4758_v2 = vmul.f32 0.70710677, %v4755_v24  ;;  %v937_v13 = vmul.f32 1.442695, %v931_v37  ;;  %v3724_v37 = vld [vmem:[%s6135_s1 + $0x148] sm:$0xff] }
 0x5b5   :  { %v901_v3 = vadd.f32 1.4214138, %v897_v12  ;;  %v886_v44 = vmul.f32 %v4040_v49, %v882_v56  ;;  %4043 = vpow2.f32 %v933_v54 }
 0x5b6   :  { %v864_v43 = vand.u32 2147483647, %v4758_v2  ;;  %vm856_vm15 = vcmp.ge.f32.partialorder %v4758_v2, 0.0 }
 0x5b7   :  { %v905_v5 = vmul.f32 %v901_v3, %v885_v45  ;;  %v890_v6 = vmul.f32 1.0614054, %v886_v44 }
 0x5b8   :  { %v868_v8 = vmul.f32 0.3275911, %v864_v43  ;;  %v928_v55 = vsub.f32 0.0, %v864_v43 }
 0x5b9   :  { %v909_v9 = vadd.f32 -0.28449672, %v905_v5  ;;  %v894_v62 = vadd.f32 -1.4531521, %v890_v6 }
 0x5ba   :  { %v4042_v14 = vpop.eup %4041  ;;  %v872_v19 = vadd.f32 1.0, %v868_v8 }
 0x5bb   :  { %v913_v28 = vmul.f32 %v909_v9, %v885_v45  ;;  %v898_v10 = vmul.f32 %v894_v62, %v886_v44  ;;  %v879_v39 = vmul.f32 %v4042_v14, %v871_v61  ;;  %v4044_v51 = vpop.eup %4043 }
 0x5bc   :  { %4045 = vrcp.f32 %v872_v19 }
 0x5bd   :  { %v917_v20 = vadd.f32 0.2548296, %v913_v28  ;;  %v902_v22 = vadd.f32 1.4214138, %v898_v10  ;;  %v883_v23 = vsub.f32 2.0, %v879_v39  ;;  %4047 = vpow2.f32 %v935_v36 }
 0x5be   :  { %4049 = vpow2.f32 %v937_v13 }
 0x5bf   :  { %v921_v21 = vmul.f32 %v917_v20, %v885_v45  ;;  %v906_v26 = vmul.f32 %v902_v22, %v886_v44  ;;  %v887_v27 = vmul.f32 %v4042_v14, %v883_v23 }
 0x5c1   :  { %v941_v29 = vmul.f32 %v4044_v51, %v921_v21  ;;  %v910_v7 = vadd.f32 -0.28449672, %v906_v26  ;;  %v891_v46 = vmul.f32 1.0614054, %v887_v27  ;;  %v847_v21 = vmul.f32 0.5, %v4749_v60 }
 0x5c2   :  { %v4046_v31 = vpop.eup %4045  ;;  %v848_v60 = vmul.f32 0.5, %v4755_v24  ;;  %v3729_v24 = vld [vmem:[%s6135_s1 + $0x170] sm:$0xff] }
 0x5c3   :  { %v945_v32 = vsub.f32 1.0, %v941_v29  ;;  %v914_v33 = vmul.f32 %v910_v7, %v886_v44  ;;  %v895_v34 = vadd.f32 -1.4531521, %v891_v46  ;;  %v880_v38 = vmul.f32 %v4046_v31, %v872_v19  ;;  %v4048_v50 = vpop.eup %4047 }
 0x5c4   :  { %v4050_v28 = vpop.eup %4049  ;;  %v860_v46 = vsel %vm856_vm15, 1.0, %v4258_v59 }
 0x5c5   :  { %v949_v41 = vmul.f32 %v945_v32, %v857_v40  ;;  %v918_v15 = vadd.f32 0.2548296, %v914_v33  ;;  %v899_v45 = vmul.f32 %v895_v34, %v887_v27  ;;  %v884_v25 = vsub.f32 2.0, %v880_v38  ;;  %v3727_v34 = vld [vmem:[%s6135_s1 + $0x160] sm:$0xff]  ;;  %v3726_v38 = vld [vmem:[%s6135_s1 + $0x158] sm:$0xff]  ;;  %v3725_v40 = vld [vmem:[%s6135_s1 + $0x150] sm:$0xff] }
 0x5c7   :  { %v953_v11 = vadd.f32 1.0, %v949_v41  ;;  %v922_v35 = vmul.f32 %v918_v15, %v886_v44  ;;  %v903_v49 = vadd.f32 1.4214138, %v899_v45  ;;  %v888_v17 = vmul.f32 %v4046_v31, %v884_v25  ;;  %v3723_v41 = vld [vmem:[%s6135_s1 + $0x140] sm:$0xff]  ;;  %v3722_v15 = vld [vmem:[%s6135_s1 + $0x138] sm:$0xff]  ;;  %v3721_v45 = vld [vmem:[%s6135_s1 + $0x130] sm:$0xff] }
 0x5c8   :  { %v932_v44 = vmul.f32 %v928_v55, %v864_v43  ;;  %v3720_v25 = vld [vmem:[%s6135_s1 + $0x128] sm:$0xff] }
 0x5c9   :  { %v957_v0 = vmul.f32 %v953_v11, %v845_v48  ;;  %v942_v61 = vmul.f32 %v4048_v50, %v922_v35  ;;  %v907_v12 = vmul.f32 %v903_v49, %v887_v27  ;;  %v892_v56 = vmul.f32 1.0614054, %v888_v17  ;;  %v3719_v48 = vld [vmem:[%s6135_s1 + $0x120] sm:$0xff] }
 0x5ca   :  { %v939_v14 = vmul.f32 1.442695, %v932_v44 }
 0x5cb   :  { %v946_v47 = vsub.f32 1.0, %v942_v61  ;;  %v911_v3 = vadd.f32 -0.28449672, %v907_v12  ;;  %v896_v54 = vadd.f32 -1.4531521, %v892_v56  ;;  %v4766_v4 = vadd.f32 %v957_v0, %v4653_v57 }
 0x5cc   :  { %4051 = vpow2.f32 %v939_v14 }
 0x5cd   :  { %v950_v5 = vmul.f32 %v946_v47, %v858_v18  ;;  %v915_v6 = vmul.f32 %v911_v3, %v887_v27  ;;  %v900_v8 = vmul.f32 %v896_v54, %v888_v17  ;;  %989 = vrot.lane.b32.xlu2 %v4766_v4, %s4256_s6  ;;  %965 = vst.msk [vmem:[#allocation2 + $0x3] sm:$0xff] %vm76_vm3, %v4766_v4  ;;  %v3970_v3 = vld [vmem:[%s6137_s3 + $0x13] ss:$0 sm:$0xff]  ;;  %v3971_v54 = vld [vmem:[%s6137_s3 + $0x23] ss:$0 sm:$0xff] }
 0x5ce   :  { %973 = vrot.lane.b32.xlu0 %v4766_v4, %s4257_s7 }
 0x5cf   :  { %v954_v57 = vadd.f32 1.0, %v950_v5  ;;  %v919_v9 = vadd.f32 0.2548296, %v915_v6  ;;  %v904_v62 = vadd.f32 1.4214138, %v900_v8 }
 0x5d1   :  { %v958_v16 = vmul.f32 %v954_v57, %v846_v52  ;;  %v923_v43 = vmul.f32 %v919_v9, %v887_v27  ;;  %v908_v19 = vmul.f32 %v904_v62, %v888_v17 }
 0x5d2   :  { %v4052_v27 = vpop.eup %4051 }
 0x5d3   :  { %v943_v10 = vmul.f32 %v4050_v28, %v923_v43  ;;  %v912_v39 = vadd.f32 -0.28449672, %v908_v19  ;;  %v4778_v20 = vadd.f32 %v958_v16, %v4662_v63 }
 0x5d5   :  { %v947_v22 = vsub.f32 1.0, %v943_v10  ;;  %v916_v23 = vmul.f32 %v912_v39, %v888_v17  ;;  %966 = vst.msk [vmem:[#allocation2 + $0xb] sm:$0x1f] %vm78_vm4, %v4778_v20  ;;  %975 = vrot.lane.b32.xlu1 %v4778_v20, %s4257_s7 }
 0x5d6   :  { %991 = vrot.lane.b32.xlu0 %v4778_v20, %s4256_s6 }
 0x5d7   :  { %v951_v42 = vmul.f32 %v947_v22, %v859_v58  ;;  %v920_v36 = vadd.f32 0.2548296, %v916_v23 }
 0x5d9   :  { %v955_v63 = vadd.f32 1.0, %v951_v42  ;;  %v924_v26 = vmul.f32 %v920_v36, %v888_v17 }
 0x5db   :  { %v959_v51 = vmul.f32 %v955_v63, %v847_v21  ;;  %v944_v30 = vmul.f32 %v4052_v27, %v924_v26 }
 0x5dd   :  { %v948_v29 = vsub.f32 1.0, %v944_v30  ;;  %v4790_v7 = vadd.f32 %v959_v51, %v4648_v53  ;;  %v3730_v53 = vld [vmem:[%s6135_s1 + $0x178] sm:$0xff] }
 0x5de   :  { %1038 = vmatpush.msra.mxu1 %v3730_v53 }
 0x5df   :  { %v952_v31 = vmul.f32 %v948_v29, %v860_v46  ;;  %997 = vrot.lane.b32.xlu0 %v4790_v7, %s4256_s6  ;;  %967 = vst.msk [vmem:[#allocation2 + $0x13] sm:$0xff] %vm76_vm3, %v4790_v7  ;;  %977 = vrot.lane.b32.xlu1 %v4790_v7, %s4257_s7 }
 0x5e0   :  { %1039 = vmatpush.msra.mxu1 %v3729_v24 }
 0x5e1   :  { %v956_v2 = vadd.f32 1.0, %v952_v31 }
 0x5e3   :  { %v960_v32 = vmul.f32 %v956_v2, %v848_v60 }
 0x5e5   :  { %v4801_v33 = vadd.f32 %v960_v32, %v4675_v1  ;;  %v3728_v1 = vld [vmem:[%s6135_s1 + $0x168] sm:$0xff] }
 0x5e6   :  { %1040 = vmatpush.msra.mxu1 %v3728_v1 }
 0x5e7   :  { %999 = vrot.lane.b32.xlu1 %v4801_v33, %s4256_s6  ;;  %968 = vst.msk [vmem:[#allocation2 + $0x1b] sm:$0x1f] %vm78_vm4, %v4801_v33  ;;  %979 = vrot.lane.b32.xlu2 %v4801_v33, %s4257_s7 }
 0x5e8   :  { %1041 = vmatpush.msra.mxu1 %v3727_v34 }
 0x5ea   :  { %1042 = vmatpush.msra.mxu1 %v3726_v38 }
 0x5ec   :  { %1043 = vmatpush.msra.mxu1 %v3725_v40 }
 0x5ee   :  { %1044 = vmatpush.msra.mxu1 %v3724_v37 }
 0x5f0   :  { %1045 = vmatpush.msra.mxu1 %v3723_v41 }
 0x5f2   :  { %1046 = vmatpush.msra.mxu1 %v3722_v15 }
 0x5f4   :  { %1047 = vmatpush.msra.mxu1 %v3721_v45 }
 0x5f6   :  { %1048 = vmatpush.msra.mxu1 %v3720_v25 }
 0x5f8   :  { %1049 = vmatpush.msra.mxu1 %v3719_v48 }
 0x627   :  { %v990_v11 = vpop.permute.xlu2 %989 }
 0x640   :  { %v974_v35 = vpop.permute.xlu0 %973 }
 0x641   :  { %985 = vst.msk [vmem:[#allocation2] sm:$0xff] %vm98_vm5, %v974_v35  ;;  %v980_v49 = vpop.permute.xlu2 %979 }
 0x642   :  { %995 = vst.msk [vmem:[#allocation2 - $0x3] sm:$0xf8] %vm109_vm6, %v990_v11 }
 0x643   :  { %988 = vst.msk [vmem:[#allocation2 + $0x18] sm:$0xff] %vm98_vm5, %v980_v49 }
 0x647   :  { %v976_v50 = vpop.permute.xlu1 %975 }
 0x648   :  { %v992_v17 = vpop.permute.xlu0 %991  ;;  %986 = vst.msk [vmem:[#allocation2 + $0x8] sm:$0xff] %vm98_vm5, %v976_v50 }
 0x649   :  { %996 = vst.msk [vmem:[#allocation2 + $0x5] sm:$0xff] %vm111_vm7, %v992_v17 }
 0x650   :  { %v1005_v13 = vld [vmem:[#allocation2] sm:$0xff]  ;;  %v1006_v61 = vld [vmem:[#allocation2 + $0x8] sm:$0xff] }
 0x651   :  { %v998_v55 = vpop.permute.xlu0 %997  ;;  %v978_v0 = vpop.permute.xlu1 %977  ;;  %3731 = vmatmul.msk.f32.vlgmr.msra.gmra.mxu1 %vm18_vm2, %v1005_v13 }
 0x652   :  { %987 = vst.msk [vmem:[#allocation2 + $0x10] sm:$0xff] %vm98_vm5, %v978_v0 }
 0x653   :  { %1003 = vst.msk [vmem:[#allocation2 + $0xd] sm:$0xf8] %vm109_vm6, %v998_v55 }
 0x659   :  { %v1000_v12 = vpop.permute.xlu1 %999  ;;  %3732 = vmatmul.msk.f32.gmra.mxu1 %vm18_vm2, %v1006_v61 }
 0x65a   :  { %1004 = vst.msk [vmem:[#allocation2 + $0x15] sm:$0xff] %vm111_vm7, %v1000_v12 }
 0x661   :  { %v1007_v56 = vld [vmem:[#allocation2 + $0x10] sm:$0xff]  ;;  %v1008_v47 = vld [vmem:[#allocation2 + $0x18] sm:$0xff] }
 0x662   :  { %3733 = vmatmul.msk.f32.gmra.mxu1 %vm18_vm2, %v1007_v56 }
 0x66a   :  { %3734 = vmatmul.msk.f32.gmra.mxu1 %vm18_vm2, %v1008_v47 }
 0x6ce   :  { %v1051_v18 = vpop.f32.mrf.mxu1 }
 0x6cf   :  { %v1065_v44 = vmul.f32 %v3970_v3, %v1051_v18 }
 0x6d1   :  { %v4863_v5 = vadd.f32 %v3971_v54, %v1065_v44 }
 0x6d3   :  { %v4866_v6 = vmul.f32 0.70710677, %v4863_v5 }
 0x6d5   :  { %v1091_v8 = vand.u32 2147483647, %v4866_v6  ;;  %vm1083_vm0 = vcmp.ge.f32.partialorder %v4866_v6, 0.0  ;;  %v1075_v6 = vmul.f32 0.5, %v4863_v5 }
 0x6d6   :  { %v1054_v52 = vpop.f32.mrf.mxu1 }
 0x6d7   :  { %v1095_v57 = vmul.f32 0.3275911, %v1091_v8  ;;  %v1066_v9 = vmul.f32 %v3970_v3, %v1054_v52  ;;  %v1155_v27 = vsub.f32 0.0, %v1091_v8 }
 0x6d9   :  { %v1099_v62 = vadd.f32 1.0, %v1095_v57  ;;  %v4869_v14 = vadd.f32 %v3971_v54, %v1066_v9  ;;  %v1159_v53 = vmul.f32 %v1155_v27, %v1091_v8 }
 0x6db   :  { %4053 = vrcp.f32 %v1099_v62  ;;  %v4872_v16 = vmul.f32 0.70710677, %v4869_v14  ;;  %v1163_v15 = vmul.f32 1.442695, %v1159_v53 }
 0x6dd   :  { %v1092_v43 = vand.u32 2147483647, %v4872_v16  ;;  %vm1084_vm1 = vcmp.ge.f32.partialorder %v4872_v16, 0.0 }
 0x6df   :  { %v1096_v19 = vmul.f32 0.3275911, %v1092_v43  ;;  %v1057_v28 = vpop.f32.mrf.mxu1  ;;  %v1156_v40 = vsub.f32 0.0, %v1092_v43 }
 0x6e0   :  { %v1067_v10 = vmul.f32 %v3970_v3, %v1057_v28 }
 0x6e1   :  { %v4054_v39 = vpop.eup %4053  ;;  %v1100_v22 = vadd.f32 1.0, %v1096_v19  ;;  %v1160_v49 = vmul.f32 %v1156_v40, %v1092_v43 }
 0x6e2   :  { %v1107_v23 = vmul.f32 %v4054_v39, %v1099_v62  ;;  %v4875_v58 = vadd.f32 %v3971_v54, %v1067_v10 }
 0x6e3   :  { %4055 = vrcp.f32 %v1100_v22  ;;  %v1165_v56 = vmul.f32 1.442695, %v1160_v49 }
 0x6e4   :  { %v1111_v42 = vsub.f32 2.0, %v1107_v23  ;;  %v4878_v36 = vmul.f32 0.70710677, %v4875_v58  ;;  %v1087_v23 = vsel %vm1083_vm0, 1.0, %v4258_v59 }
 0x6e6   :  { %v1115_v21 = vmul.f32 %v4054_v39, %v1111_v42  ;;  %v1093_v63 = vand.u32 2147483647, %v4878_v36  ;;  %vm1085_vm8 = vcmp.ge.f32.partialorder %v4878_v36, 0.0 }
 0x6e7   :  { %v1060_v26 = vpop.f32.mrf.mxu1 }
 0x6e8   :  { %v1097_v51 = vmul.f32 0.3275911, %v1093_v63  ;;  %v1068_v30 = vmul.f32 %v3970_v3, %v1060_v26  ;;  %v1119_v29 = vmul.f32 1.0614054, %v1115_v21 }
 0x6e9   :  { %v4056_v46 = vpop.eup %4055 }
 0x6ea   :  { %v1108_v31 = vmul.f32 %v4056_v46, %v1100_v22  ;;  %v1101_v60 = vadd.f32 1.0, %v1097_v51  ;;  %v4881_v2 = vadd.f32 %v3971_v54, %v1068_v30  ;;  %v1123_v32 = vadd.f32 -1.4531521, %v1119_v29 }
 0x6eb   :  { %v1157_v54 = vsub.f32 0.0, %v1093_v63 }
 0x6ec   :  { %v1112_v24 = vsub.f32 2.0, %v1108_v31  ;;  %4057 = vrcp.f32 %v1101_v60  ;;  %v4884_v1 = vmul.f32 0.70710677, %v4881_v2  ;;  %v1127_v34 = vmul.f32 %v1123_v32, %v1115_v21 }
 0x6ed   :  { %4059 = vpow2.f32 %v1163_v15  ;;  %v1161_v19 = vmul.f32 %v1157_v54, %v1093_v63  ;;  %v1088_v15 = vsel %vm1084_vm1, 1.0, %v4258_v59  ;;  %v1077_v54 = vmul.f32 0.5, %v4875_v58 }
 0x6ee   :  { %v1116_v38 = vmul.f32 %v4056_v46, %v1112_v24  ;;  %v1094_v37 = vand.u32 2147483647, %v4884_v1  ;;  %v1131_v41 = vadd.f32 1.4214138, %v1127_v34  ;;  %vm1086_vm9 = vcmp.ge.f32.partialorder %v4884_v1, 0.0  ;;  %v3745_v1 = vld [vmem:[%s6136_s2 + $0xb0] sm:$0xff] }
 0x6ef   :  { %v1167_v51 = vmul.f32 1.442695, %v1161_v19  ;;  %v1078_v58 = vmul.f32 0.5, %v4881_v2  ;;  %v3744_v2 = vld [vmem:[%s6136_s2 + $0xa8] sm:$0xff] }
 0x6f0   :  { %v1120_v45 = vmul.f32 1.0614054, %v1116_v38  ;;  %v1098_v25 = vmul.f32 0.3275911, %v1094_v37  ;;  %v1135_v48 = vmul.f32 %v1131_v41, %v1115_v21  ;;  %v1158_v31 = vsub.f32 0.0, %v1094_v37 }
 0x6f2   :  { %v4058_v11 = vpop.eup %4057  ;;  %v1124_v35 = vadd.f32 -1.4531521, %v1120_v45  ;;  %v1102_v50 = vadd.f32 1.0, %v1098_v25  ;;  %v1139_v13 = vadd.f32 -0.28449672, %v1135_v48  ;;  %v1162_v45 = vmul.f32 %v1158_v31, %v1094_v37 }
 0x6f3   :  { %v1109_v17 = vmul.f32 %v4058_v11, %v1101_v60  ;;  %v4060_v52 = vpop.eup %4059 }
 0x6f4   :  { %v1128_v55 = vmul.f32 %v1124_v35, %v1116_v38  ;;  %4061 = vrcp.f32 %v1102_v50  ;;  %v1143_v61 = vmul.f32 %v1139_v13, %v1115_v21 }
 0x6f5   :  { %v1113_v0 = vsub.f32 2.0, %v1109_v17  ;;  %4063 = vpow2.f32 %v1165_v56  ;;  %v1169_v17 = vmul.f32 1.442695, %v1162_v45  ;;  %v1089_v56 = vsel %vm1085_vm8, 1.0, %v4258_v59 }
 0x6f6   :  { %v1132_v12 = vadd.f32 1.4214138, %v1128_v55  ;;  %v1147_v3 = vadd.f32 0.2548296, %v1143_v61  ;;  %4065 = vpow2.f32 %v1167_v51  ;;  %v3735_v51 = vld [vmem:[%s6136_s2 + $0x60] sm:$0xff] }
 0x6f7   :  { %v1117_v47 = vmul.f32 %v4058_v11, %v1113_v0  ;;  %v1076_v11 = vmul.f32 0.5, %v4869_v14  ;;  %4067 = vpow2.f32 %v1169_v17 }
 0x6f8   :  { %v1136_v18 = vmul.f32 %v1132_v12, %v1116_v38  ;;  %v1151_v44 = vmul.f32 %v1147_v3, %v1115_v21 }
 0x6f9   :  { %v1121_v8 = vmul.f32 1.0614054, %v1117_v47 }
 0x6fa   :  { %v1140_v57 = vadd.f32 -0.28449672, %v1136_v18  ;;  %v4062_v9 = vpop.eup %4061  ;;  %v1171_v62 = vmul.f32 %v4060_v52, %v1151_v44 }
 0x6fb   :  { %v1125_v43 = vadd.f32 -1.4531521, %v1121_v8  ;;  %v1110_v28 = vmul.f32 %v4062_v9, %v1102_v50  ;;  %v4064_v46 = vpop.eup %4063 }
 0x6fc   :  { %v1144_v10 = vmul.f32 %v1140_v57, %v1116_v38  ;;  %v1175_v39 = vsub.f32 1.0, %v1171_v62  ;;  %v4066_v13 = vpop.eup %4065 }
 0x6fd   :  { %v1129_v22 = vmul.f32 %v1125_v43, %v1117_v47  ;;  %v1114_v42 = vsub.f32 2.0, %v1110_v28  ;;  %v4068_v44 = vpop.eup %4067 }
 0x6fe   :  { %v1148_v26 = vadd.f32 0.2548296, %v1144_v10  ;;  %v1179_v27 = vmul.f32 %v1175_v39, %v1087_v23  ;;  %v3742_v10 = vld [vmem:[%s6136_s2 + $0x98] sm:$0xff]  ;;  %v3741_v39 = vld [vmem:[%s6136_s2 + $0x90] sm:$0xff]  ;;  %v3739_v23 = vld [vmem:[%s6136_s2 + $0x80] sm:$0xff] }
 0x6ff   :  { %v1133_v21 = vadd.f32 1.4214138, %v1129_v22  ;;  %v1118_v30 = vmul.f32 %v4062_v9, %v1114_v42  ;;  %v1090_v9 = vsel %vm1086_vm9, 1.0, %v4258_v59  ;;  %v3740_v22 = vld [vmem:[%s6136_s2 + $0x88] sm:$0xff]  ;;  %v3738_v42 = vld [vmem:[%s6136_s2 + $0x78] sm:$0xff] }
 0x700   :  { %v1152_v29 = vmul.f32 %v1148_v26, %v1116_v38  ;;  %v1183_v60 = vadd.f32 1.0, %v1179_v27  ;;  %v3737_v27 = vld [vmem:[%s6136_s2 + $0x70] sm:$0xff] }
 0x701   :  { %v1137_v32 = vmul.f32 %v1133_v21, %v1117_v47  ;;  %v1122_v53 = vmul.f32 1.0614054, %v1118_v30  ;;  %v3736_v21 = vld [vmem:[%s6136_s2 + $0x68] sm:$0xff] }
 0x702   :  { %v1172_v63 = vmul.f32 %v4064_v46, %v1152_v29  ;;  %v1187_v24 = vmul.f32 %v1183_v60, %v1075_v6 }
 0x703   :  { %v1141_v34 = vadd.f32 -0.28449672, %v1137_v32  ;;  %v1126_v41 = vadd.f32 -1.4531521, %v1122_v53 }
 0x704   :  { %v1176_v40 = vsub.f32 1.0, %v1172_v63  ;;  %v1191_v38 = vadd.f32 %v1187_v24, %v4766_v4 }
 0x705   :  { %v1145_v25 = vmul.f32 %v1141_v34, %v1117_v47  ;;  %v1130_v5 = vmul.f32 %v1126_v41, %v1118_v30 }
 0x706   :  { %v1180_v48 = vmul.f32 %v1176_v40, %v1088_v15  ;;  %1219 = vrot.lane.b32.xlu1 %v1191_v38, %s4256_s6  ;;  %1195 = vst.msk [vmem:[#allocation2 + $0x3] sm:$0xff] %vm76_vm3, %v1191_v38  ;;  %1203 = vrot.lane.b32.xlu2 %v1191_v38, %s4257_s7  ;;  %v3972_v40 = vld [vmem:[%s6137_s3 + $0x31] ss:$0 sm:$0xff] }
 0x707   :  { %v1149_v16 = vadd.f32 0.2548296, %v1145_v25  ;;  %v1134_v49 = vadd.f32 1.4214138, %v1130_v5 }
 0x708   :  { %v1184_v35 = vadd.f32 1.0, %v1180_v48 }
 0x709   :  { %v1153_v50 = vmul.f32 %v1149_v16, %v1117_v47  ;;  %v1138_v55 = vmul.f32 %v1134_v49, %v1118_v30 }
 0x70a   :  { %v1188_v37 = vmul.f32 %v1184_v35, %v1076_v11 }
 0x70b   :  { %v1173_v4 = vmul.f32 %v4066_v13, %v1153_v50  ;;  %v1142_v61 = vadd.f32 -0.28449672, %v1138_v55 }
 0x70c   :  { %v1192_v0 = vadd.f32 %v1188_v37, %v4778_v20 }
 0x70d   :  { %v1177_v12 = vsub.f32 1.0, %v1173_v4  ;;  %v1146_v14 = vmul.f32 %v1142_v61, %v1118_v30 }
 0x70e   :  { %1196 = vst.msk [vmem:[#allocation2 + $0xb] sm:$0x1f] %vm78_vm4, %v1192_v0  ;;  %1205 = vrot.lane.b32.xlu0 %v1192_v0, %s4257_s7  ;;  %1221 = vrot.lane.b32.xlu2 %v1192_v0, %s4256_s6 }
 0x70f   :  { %v1181_v47 = vmul.f32 %v1177_v12, %v1089_v56  ;;  %v1150_v3 = vadd.f32 0.2548296, %v1146_v14 }
 0x711   :  { %v1185_v36 = vadd.f32 1.0, %v1181_v47  ;;  %v1154_v18 = vmul.f32 %v1150_v3, %v1118_v30 }
 0x713   :  { %v1189_v20 = vmul.f32 %v1185_v36, %v1077_v54  ;;  %v1174_v8 = vmul.f32 %v4068_v44, %v1154_v18 }
 0x715   :  { %v1193_v52 = vadd.f32 %v1189_v20, %v4790_v7  ;;  %v1178_v57 = vsub.f32 1.0, %v1174_v8  ;;  %v3746_v7 = vld [vmem:[%s6136_s2 + $0xb8] sm:$0xff] }
 0x716   :  { %1270 = vmatpush.msrb.mxu2 %v3746_v7 }
 0x717   :  { %1227 = vrot.lane.b32.xlu2 %v1193_v52, %s4256_s6  ;;  %1197 = vst.msk [vmem:[#allocation2 + $0x13] sm:$0xff] %vm76_vm3, %v1193_v52  ;;  %1207 = vrot.lane.b32.xlu0 %v1193_v52, %s4257_s7  ;;  %v1182_v62 = vmul.f32 %v1178_v57, %v1090_v9 }
 0x718   :  { %1271 = vmatpush.msrb.mxu2 %v3745_v1 }
 0x719   :  { %v1186_v43 = vadd.f32 1.0, %v1182_v62 }
 0x71a   :  { %1272 = vmatpush.msrb.mxu2 %v3744_v2 }
 0x71b   :  { %v1190_v19 = vmul.f32 %v1186_v43, %v1078_v58 }
 0x71d   :  { %v1194_v28 = vadd.f32 %v1190_v19, %v4801_v33  ;;  %v3743_v33 = vld [vmem:[%s6136_s2 + $0xa0] sm:$0xff] }
 0x71e   :  { %1273 = vmatpush.msrb.mxu2 %v3743_v33 }
 0x71f   :  { %1229 = vrot.lane.b32.xlu0 %v1194_v28, %s4256_s6  ;;  %1198 = vst.msk [vmem:[#allocation2 + $0x1b] sm:$0x1f] %vm78_vm4, %v1194_v28  ;;  %1209 = vrot.lane.b32.xlu1 %v1194_v28, %s4257_s7 }
 0x720   :  { %1274 = vmatpush.msrb.mxu2 %v3742_v10 }
 0x722   :  { %1275 = vmatpush.msrb.mxu2 %v3741_v39 }
 0x724   :  { %1276 = vmatpush.msrb.mxu2 %v3740_v22 }
 0x726   :  { %1277 = vmatpush.msrb.mxu2 %v3739_v23 }
 0x728   :  { %1278 = vmatpush.msrb.mxu2 %v3738_v42 }
 0x72a   :  { %1279 = vmatpush.msrb.mxu2 %v3737_v27 }
 0x72c   :  { %1280 = vmatpush.msrb.mxu2 %v3736_v21 }
 0x72e   :  { %1281 = vmatpush.msrb.mxu2 %v3735_v51 }
 0x760   :  { %v1204_v26 = vpop.permute.xlu2 %1203 }
 0x761   :  { %1215 = vst.msk [vmem:[#allocation2] sm:$0xff] %vm98_vm5, %v1204_v26 }
 0x768   :  { %v1222_v29 = vpop.permute.xlu2 %1221 }
 0x771   :  { %v1228_v60 = vpop.permute.xlu2 %1227 }
 0x778   :  { %v1220_v30 = vpop.permute.xlu1 %1219 }
 0x779   :  { %1225 = vst.msk [vmem:[#allocation2 - $0x3] sm:$0xf8] %vm109_vm6, %v1220_v30 }
 0x780   :  { %v1206_v46 = vpop.permute.xlu0 %1205 }
 0x781   :  { %1216 = vst.msk [vmem:[#allocation2 + $0x8] sm:$0xff] %vm98_vm5, %v1206_v46 }
 0x782   :  { %1226 = vst.msk [vmem:[#allocation2 + $0x5] sm:$0xff] %vm111_vm7, %v1222_v29 }
 0x789   :  { %v1208_v6 = vpop.permute.xlu0 %1207  ;;  %v1235_v31 = vld [vmem:[#allocation2] sm:$0xff]  ;;  %v1236_v32 = vld [vmem:[#allocation2 + $0x8] sm:$0xff] }
 0x78a   :  { %1217 = vst.msk [vmem:[#allocation2 + $0x10] sm:$0xff] %vm98_vm5, %v1208_v6  ;;  %3747 = vmatmul.msk.f32.vlgmr.msrb.gmra.mxu2 %vm18_vm2, %v1235_v31 }
 0x78b   :  { %1233 = vst.msk [vmem:[#allocation2 + $0xd] sm:$0xf8] %vm109_vm6, %v1228_v60 }
 0x791   :  { %v1230_v63 = vpop.permute.xlu0 %1229  ;;  %v1210_v53 = vpop.permute.xlu1 %1209 }
 0x792   :  { %3748 = vmatmul.msk.f32.gmra.mxu2 %vm18_vm2, %v1236_v32  ;;  %1218 = vst.msk [vmem:[#allocation2 + $0x18] sm:$0xff] %vm98_vm5, %v1210_v53 }
 0x793   :  { %1234 = vst.msk [vmem:[#allocation2 + $0x15] sm:$0xff] %vm111_vm7, %v1230_v63 }
 0x79a   :  { %v1237_v24 = vld [vmem:[#allocation2 + $0x10] sm:$0xff]  ;;  %v1238_v34 = vld [vmem:[#allocation2 + $0x18] sm:$0xff] }
 0x79b   :  { %3749 = vmatmul.msk.f32.gmra.mxu2 %vm18_vm2, %v1237_v24 }
 0x7a3   :  { %3750 = vmatmul.msk.f32.gmra.mxu2 %vm18_vm2, %v1238_v34 }
 0x80d   :  { %v1283_v41 = vpop.f32.mrf.mxu2 }
 0x80e   :  { %v4966_v15 = vadd.f32 %v3972_v40, %v1283_v41 }
 0x810   :  { %v3751_v45 = vmul.f32 -1.442695, %v4966_v15 }
 0x812   :  { %4069 = vpow2.f32 %v3751_v45 }
 0x815   :  { %v1286_v38 = vpop.f32.mrf.mxu2 }
 0x816   :  { %v4969_v25 = vadd.f32 %v3972_v40, %v1286_v38 }
 0x818   :  { %v4070_v48 = vpop.eup %4069  ;;  %v3752_v5 = vmul.f32 -1.442695, %v4969_v25 }
 0x819   :  { %v1307_v16 = vadd.f32 1.0, %v4070_v48  ;;  %v3766_v48 = vld [vmem:[%s6135_s1 + $0x1d8] sm:$0xff] }
 0x81a   :  { %4071 = vpow2.f32 %v3752_v5  ;;  %v3765_v5 = vld [vmem:[%s6135_s1 + $0x1d0] sm:$0xff]  ;;  %1464 = vmatpush.msrb.mxu3 %v3766_v48 }
 0x81b   :  { %4073 = vrcp.f32 %v1307_v16  ;;  %v1322_v4 = vand.u32 2147483648, %v1307_v16  ;;  %v1320_v61 = vand.u32 2147483647, %v1307_v16  ;;  %vm1316_vm11 = vweird.f32 %v1307_v16 }
 0x81c   :  { %1465 = vmatpush.msrb.mxu3 %v3765_v5 }
 0x81d   :  { %v1323_v3 = vor.u32 1.1754944e-38, %v1322_v4  ;;  %vm1321_vm13 = vcmp.eq.f32.partialorder %v1320_v61, 8.507059e+37  ;;  %v3755_v4 = vld [vmem:[%s6135_s1 + $0x180] sm:$0xff] }
 0x81e   :  { %v1289_v11 = vpop.f32.mrf.mxu2 }
 0x81f   :  { %v4972_v49 = vadd.f32 %v3972_v40, %v1289_v11  ;;  %v3763_v11 = vld [vmem:[%s6135_s1 + $0x1c0] sm:$0xff] }
 0x820   :  { %v4072_v35 = vpop.eup %4071 }
 0x821   :  { %v4074_v17 = vpop.eup %4073  ;;  %v1308_v50 = vadd.f32 1.0, %v4072_v35  ;;  %v3753_v13 = vmul.f32 -1.442695, %v4972_v49  ;;  %v3762_v35 = vld [vmem:[%s6135_s1 + $0x1b8] sm:$0xff] }
 0x822   :  { %v1312_v37 = vmul.f32 %v4074_v17, %v1307_v16  ;;  %vm1317_vm10 = vweird.f32 %v4074_v17  ;;  %v3764_v16 = vld [vmem:[%s6135_s1 + $0x1c8] sm:$0xff] }
 0x823   :  { %4075 = vrcp.f32 %v1308_v50  ;;  %vm1318_vm12 = vmor %vm1316_vm11, %vm1317_vm10  ;;  %v1337_v57 = vand.u32 2147483648, %v1308_v50  ;;  %v1335_v62 = vand.u32 2147483647, %v1308_v50  ;;  %vm1331_vm15 = vweird.f32 %v1308_v50  ;;  %1466 = vmatpush.msrb.mxu3 %v3764_v16 }
 0x824   :  { %4077 = vpow2.f32 %v3753_v13  ;;  %v1313_v55 = vsub.f32 1.0, %v1312_v37  ;;  %v3758_v13 = vld [vmem:[%s6135_s1 + $0x198] sm:$0xff]  ;;  %v3757_v37 = vld [vmem:[%s6135_s1 + $0x190] sm:$0xff] }
 0x825   :  { %v1338_v43 = vor.u32 1.1754944e-38, %v1337_v57  ;;  %vm1336_vm1 = vcmp.eq.f32.partialorder %v1335_v62, 8.507059e+37  ;;  %1467 = vmatpush.msrb.mxu3 %v3763_v11 }
 0x826   :  { %v1314_v0 = vmul.f32 %v4074_v17, %v1313_v55  ;;  %v1292_v12 = vpop.f32.mrf.mxu2  ;;  %v3756_v55 = vld [vmem:[%s6135_s1 + $0x188] sm:$0xff] }
 0x827   :  { %v4975_v56 = vadd.f32 %v3972_v40, %v1292_v12  ;;  %1468 = vmatpush.msrb.mxu3 %v3762_v35 }
 0x828   :  { %v1315_v14 = vadd.f32 %v4074_v17, %v1314_v0 }
 0x829   :  { %v4076_v47 = vpop.eup %4075  ;;  %v3754_v36 = vmul.f32 -1.442695, %v4975_v56 }
 0x82a   :  { %v4078_v54 = vpop.eup %4077  ;;  %v1319_v18 = vsel %vm1318_vm12, %v4074_v17, %v1315_v14  ;;  %v1327_v44 = vmul.f32 %v4076_v47, %v1308_v50  ;;  %vm1332_vm14 = vweird.f32 %v4076_v47  ;;  %v3760_v17 = vld [vmem:[%s6135_s1 + $0x1a8] sm:$0xff]  ;;  %v3759_v50 = vld [vmem:[%s6135_s1 + $0x1a0] sm:$0xff] }
 0x82b   :  { %v1309_v20 = vadd.f32 1.0, %v4078_v54  ;;  %v1324_v8 = vsel %vm1321_vm13, %v1323_v3, %v1319_v18  ;;  %4079 = vpow2.f32 %v3754_v36  ;;  %vm1333_vm0 = vmor %vm1331_vm15, %vm1332_vm14 }
 0x82c   :  { %1375 = vrot.lane.b32.xlu1 %v1324_v8, %s4259_s9  ;;  %v1328_v52 = vsub.f32 1.0, %v1327_v44  ;;  %v3973_v8 = vld [vmem:[%s6137_s3 + $0x14] ss:$0 sm:$0xff] }
 0x82d   :  { %4081 = vrcp.f32 %v1309_v20  ;;  %v1352_v39 = vand.u32 2147483648, %v1309_v20  ;;  %v1350_v23 = vand.u32 2147483647, %v1309_v20  ;;  %vm1346_vm9 = vweird.f32 %v1309_v20 }
 0x82e   :  { %v1329_v9 = vmul.f32 %v4076_v47, %v1328_v52  ;;  %v3974_v52 = vld [vmem:[%s6137_s3 + $0x24] ss:$0 sm:$0xff] }
 0x82f   :  { %v1353_v27 = vor.u32 1.1754944e-38, %v1352_v39  ;;  %vm1351_vm11 = vcmp.eq.f32.partialorder %v1350_v23, 8.507059e+37 }
 0x830   :  { %v1330_v58 = vadd.f32 %v4076_v47, %v1329_v9 }
 0x831   :  { %v4080_v19 = vpop.eup %4079 }
 0x832   :  { %v1334_v28 = vsel %vm1333_vm0, %v4076_v47, %v1330_v58  ;;  %v1310_v1 = vadd.f32 1.0, %v4080_v19 }
 0x833   :  { %v4082_v7 = vpop.eup %4081  ;;  %v1339_v2 = vsel %vm1336_vm1, %v1338_v43, %v1334_v28 }
 0x834   :  { %1377 = vrot.lane.b32.xlu2 %v1339_v2, %s4259_s9  ;;  %v1342_v33 = vmul.f32 %v4082_v7, %v1309_v20  ;;  %4083 = vrcp.f32 %v1310_v1  ;;  %vm1347_vm8 = vweird.f32 %v4082_v7  ;;  %v1367_v46 = vand.u32 2147483648, %v1310_v1 }
 0x835   :  { %vm1348_vm10 = vmor %vm1346_vm9, %vm1347_vm8  ;;  %v1365_v31 = vand.u32 2147483647, %v1310_v1  ;;  %vm1361_vm13 = vweird.f32 %v1310_v1 }
 0x836   :  { %v1343_v10 = vsub.f32 1.0, %v1342_v33  ;;  %v1368_v32 = vor.u32 1.1754944e-38, %v1367_v46 }
 0x837   :  { %vm1366_vm15 = vcmp.eq.f32.partialorder %v1365_v31, 8.507059e+37 }
 0x838   :  { %v1344_v22 = vmul.f32 %v4082_v7, %v1343_v10 }
 0x83a   :  { %v1345_v42 = vadd.f32 %v4082_v7, %v1344_v22  ;;  %v4084_v26 = vpop.eup %4083 }
 0x83b   :  { %v1357_v51 = vmul.f32 %v4084_v26, %v1310_v1  ;;  %vm1362_vm12 = vweird.f32 %v4084_v26 }
 0x83c   :  { %v1349_v21 = vsel %vm1348_vm10, %v4082_v7, %v1345_v42  ;;  %vm1363_vm14 = vmor %vm1361_vm13, %vm1362_vm12 }
 0x83d   :  { %v1354_v30 = vsel %vm1351_vm11, %v1353_v27, %v1349_v21  ;;  %v1358_v29 = vsub.f32 1.0, %v1357_v51 }
 0x83e   :  { %1379 = vrot.lane.b32.xlu0 %v1354_v30, %s4259_s9 }
 0x83f   :  { %v1359_v6 = vmul.f32 %v4084_v26, %v1358_v29 }
 0x841   :  { %v1360_v60 = vadd.f32 %v4084_v26, %v1359_v6 }
 0x843   :  { %v1364_v63 = vsel %vm1363_vm14, %v4084_v26, %v1360_v60 }
 0x844   :  { %v1369_v53 = vsel %vm1366_vm15, %v1368_v32, %v1364_v63 }
 0x845   :  { %1381 = vrot.lane.b32.xlu1 %v1369_v53, %s4259_s9 }
 0x88e   :  { %v1378_v24 = vpop.permute.xlu2 %1377 }
 0x88f   :  { %v4983_v34 = vmul.f32 %v1378_v24, %v4969_v25 }
 0x891   :  { %1392 = vst.msk [vmem:[#allocation2 + $0xb] sm:$0x1f] %vm78_vm4, %v4983_v34  ;;  %1401 = vrot.lane.b32.xlu0 %v4983_v34, %s4257_s7 }
 0x89e   :  { %v1376_v40 = vpop.permute.xlu1 %1375 }
 0x89f   :  { %v4990_v41 = vmul.f32 %v1376_v40, %v4966_v15 }
 0x8a1   :  { %1391 = vst.msk [vmem:[#allocation2 + $0x3] sm:$0xff] %vm76_vm3, %v4990_v41  ;;  %1399 = vrot.lane.b32.xlu2 %v4990_v41, %s4257_s7  ;;  %1415 = vrot.lane.b32.xlu1 %v4990_v41, %s4256_s6 }
 0x8a9   :  { %1417 = vrot.lane.b32.xlu2 %v4983_v34, %s4256_s6 }
 0x8b0   :  { %v1380_v45 = vpop.permute.xlu0 %1379 }
 0x8b1   :  { %v5001_v38 = vmul.f32 %v1380_v45, %v4972_v49  ;;  %v3761_v49 = vld [vmem:[%s6135_s1 + $0x1b0] sm:$0xff] }
 0x8b2   :  { %1469 = vmatpush.msrb.mxu3 %v3761_v49 }
 0x8b3   :  { %1393 = vst.msk [vmem:[#allocation2 + $0x13] sm:$0xff] %vm76_vm3, %v5001_v38  ;;  %1423 = vrot.lane.b32.xlu2 %v5001_v38, %s4256_s6  ;;  %1403 = vrot.lane.b32.xlu0 %v5001_v38, %s4257_s7 }
 0x8b4   :  { %1470 = vmatpush.msrb.mxu3 %v3760_v17 }
 0x8b6   :  { %1471 = vmatpush.msrb.mxu3 %v3759_v50 }
 0x8b7   :  { %v1382_v15 = vpop.permute.xlu1 %1381 }
 0x8b8   :  { %v5010_v25 = vmul.f32 %v1382_v15, %v4975_v56  ;;  %1472 = vmatpush.msrb.mxu3 %v3758_v13 }
 0x8ba   :  { %1394 = vst.msk [vmem:[#allocation2 + $0x1b] sm:$0x1f] %vm78_vm4, %v5010_v25  ;;  %1405 = vrot.lane.b32.xlu1 %v5010_v25, %s4257_s7  ;;  %1473 = vmatpush.msrb.mxu3 %v3757_v37 }
 0x8bb   :  { %1425 = vrot.lane.b32.xlu0 %v5010_v25, %s4256_s6 }
 0x8bc   :  { %1474 = vmatpush.msrb.mxu3 %v3756_v55 }
 0x8be   :  { %1475 = vmatpush.msrb.mxu3 %v3755_v4 }
 0x8fb   :  { %v1400_v0 = vpop.permute.xlu2 %1399 }
 0x8fc   :  { %1411 = vst.msk [vmem:[#allocation2] sm:$0xff] %vm98_vm5, %v1400_v0 }
 0x903   :  { %v1402_v61 = vpop.permute.xlu0 %1401  ;;  %v1418_v12 = vpop.permute.xlu2 %1417 }
 0x904   :  { %1412 = vst.msk [vmem:[#allocation2 + $0x8] sm:$0xff] %vm98_vm5, %v1402_v61 }
 0x905   :  { %1422 = vst.msk [vmem:[#allocation2 + $0x5] sm:$0xff] %vm111_vm7, %v1418_v12 }
 0x90c   :  { %v1432_v47 = vld [vmem:[#allocation2 + $0x8] sm:$0xff] }
 0x90d   :  { %v1424_v54 = vpop.permute.xlu2 %1423 }
 0x913   :  { %v1416_v56 = vpop.permute.xlu1 %1415 }
 0x914   :  { %1421 = vst.msk [vmem:[#allocation2 - $0x3] sm:$0xf8] %vm109_vm6, %v1416_v56 }
 0x91b   :  { %v1431_v14 = vld [vmem:[#allocation2] sm:$0xff] }
 0x91c   :  { %3767 = vmatmul.msk.f32.vlgmr.msrb.gmra.mxu3 %vm18_vm2, %v1431_v14 }
 0x924   :  { %3768 = vmatmul.msk.f32.gmra.mxu3 %vm18_vm2, %v1432_v47 }
 0x925   :  { %v1404_v3 = vpop.permute.xlu0 %1403 }
 0x926   :  { %1413 = vst.msk [vmem:[#allocation2 + $0x10] sm:$0xff] %vm98_vm5, %v1404_v3 }
 0x927   :  { %1429 = vst.msk [vmem:[#allocation2 + $0xd] sm:$0xf8] %vm109_vm6, %v1424_v54 }
 0x92c   :  { %v1406_v36 = vpop.permute.xlu1 %1405 }
 0x92d   :  { %v1426_v18 = vpop.permute.xlu0 %1425  ;;  %1414 = vst.msk [vmem:[#allocation2 + $0x18] sm:$0xff] %vm98_vm5, %v1406_v36 }
 0x92e   :  { %1430 = vst.msk [vmem:[#allocation2 + $0x15] sm:$0xff] %vm111_vm7, %v1426_v18 }
 0x935   :  { %v1433_v44 = vld [vmem:[#allocation2 + $0x10] sm:$0xff]  ;;  %v1434_v20 = vld [vmem:[#allocation2 + $0x18] sm:$0xff] }
 0x936   :  { %3769 = vmatmul.msk.f32.gmra.mxu3 %vm18_vm2, %v1433_v44 }
 0x93e   :  { %3770 = vmatmul.msk.f32.gmra.mxu3 %vm18_vm2, %v1434_v20 }
 0x99f   :  { %v1477_v57 = vpop.f32.mrf.mxu3 }
 0x9a0   :  { %v1491_v9 = vmul.f32 %v3973_v8, %v1477_v57 }
 0x9a2   :  { %v5072_v62 = vadd.f32 %v3974_v52, %v1491_v9 }
 0x9a4   :  { %v5075_v58 = vmul.f32 0.70710677, %v5072_v62 }
 0x9a6   :  { %v1517_v43 = vand.u32 2147483647, %v5075_v58  ;;  %vm1509_vm0 = vcmp.ge.f32.partialorder %v5075_v58, 0.0 }
 0x9a7   :  { %v1480_v19 = vpop.f32.mrf.mxu3 }
 0x9a8   :  { %v1521_v28 = vmul.f32 0.3275911, %v1517_v43  ;;  %v1492_v7 = vmul.f32 %v3973_v8, %v1480_v19  ;;  %v1581_v21 = vsub.f32 0.0, %v1517_v43 }
 0x9aa   :  { %v1525_v1 = vadd.f32 1.0, %v1521_v28  ;;  %v5078_v2 = vadd.f32 %v3974_v52, %v1492_v7  ;;  %v1585_v60 = vmul.f32 %v1581_v21, %v1517_v43  ;;  %v1513_v43 = vsel %vm1509_vm0, 1.0, %v4258_v59 }
 0x9ac   :  { %4085 = vrcp.f32 %v1525_v1  ;;  %v5081_v33 = vmul.f32 0.70710677, %v5078_v2  ;;  %v1589_v15 = vmul.f32 1.442695, %v1585_v60 }
 0x9ae   :  { %v1518_v10 = vand.u32 2147483647, %v5081_v33  ;;  %vm1510_vm1 = vcmp.ge.f32.partialorder %v5081_v33, 0.0 }
 0x9b0   :  { %v1522_v39 = vmul.f32 0.3275911, %v1518_v10  ;;  %v1582_v48 = vsub.f32 0.0, %v1518_v10 }
 0x9b2   :  { %v4086_v22 = vpop.eup %4085  ;;  %v1526_v23 = vadd.f32 1.0, %v1522_v39  ;;  %v1586_v37 = vmul.f32 %v1582_v48, %v1518_v10  ;;  %v1501_v39 = vmul.f32 0.5, %v5072_v62 }
 0x9b3   :  { %v1533_v42 = vmul.f32 %v4086_v22, %v1525_v1 }
 0x9b4   :  { %4087 = vrcp.f32 %v1526_v23  ;;  %v1591_v14 = vmul.f32 1.442695, %v1586_v37 }
 0x9b5   :  { %v1537_v26 = vsub.f32 2.0, %v1533_v42  ;;  %4089 = vpow2.f32 %v1589_v15 }
 0x9b7   :  { %v1541_v27 = vmul.f32 %v4086_v22, %v1537_v26 }
 0x9b9   :  { %v1545_v51 = vmul.f32 1.0614054, %v1541_v27  ;;  %v1483_v29 = vpop.f32.mrf.mxu3 }
 0x9ba   :  { %v4088_v30 = vpop.eup %4087  ;;  %v1493_v31 = vmul.f32 %v3973_v8, %v1483_v29 }
 0x9bb   :  { %v1549_v46 = vadd.f32 -1.4531521, %v1545_v51  ;;  %v1534_v6 = vmul.f32 %v4088_v30, %v1526_v23  ;;  %v4090_v36 = vpop.eup %4089 }
 0x9bc   :  { %v5084_v53 = vadd.f32 %v3974_v52, %v1493_v31 }
 0x9bd   :  { %v1553_v32 = vmul.f32 %v1549_v46, %v1541_v27  ;;  %v1538_v63 = vsub.f32 2.0, %v1534_v6  ;;  %v1514_v6 = vsel %vm1510_vm1, 1.0, %v4258_v59 }
 0x9be   :  { %v5087_v45 = vmul.f32 0.70710677, %v5084_v53 }
 0x9bf   :  { %v1557_v24 = vadd.f32 1.4214138, %v1553_v32  ;;  %v1542_v40 = vmul.f32 %v4088_v30, %v1538_v63 }
 0x9c0   :  { %v1519_v11 = vand.u32 2147483647, %v5087_v45  ;;  %vm1511_vm8 = vcmp.ge.f32.partialorder %v5087_v45, 0.0 }
 0x9c1   :  { %v1561_v5 = vmul.f32 %v1557_v24, %v1541_v27  ;;  %v1546_v16 = vmul.f32 1.0614054, %v1542_v40  ;;  %v1486_v35 = vpop.f32.mrf.mxu3 }
 0x9c2   :  { %v1523_v50 = vmul.f32 0.3275911, %v1519_v11  ;;  %v1494_v13 = vmul.f32 %v3973_v8, %v1486_v35  ;;  %v1583_v21 = vsub.f32 0.0, %v1519_v11 }
 0x9c3   :  { %v1565_v49 = vadd.f32 -0.28449672, %v1561_v5  ;;  %v1550_v17 = vadd.f32 -1.4531521, %v1546_v16 }
 0x9c4   :  { %v1527_v0 = vadd.f32 1.0, %v1523_v50  ;;  %v5090_v61 = vadd.f32 %v3974_v52, %v1494_v13  ;;  %v1587_v62 = vmul.f32 %v1583_v21, %v1519_v11  ;;  %v3773_v21 = vld [vmem:[%s6135_s1 + $0x1f0] sm:$0xff] }
 0x9c5   :  { %v1569_v55 = vmul.f32 %v1565_v49, %v1541_v27  ;;  %v1554_v4 = vmul.f32 %v1550_v17, %v1542_v40 }
 0x9c6   :  { %4091 = vrcp.f32 %v1527_v0  ;;  %v5093_v47 = vmul.f32 0.70710677, %v5090_v61  ;;  %v1593_v48 = vmul.f32 1.442695, %v1587_v62 }
 0x9c7   :  { %v1573_v12 = vadd.f32 0.2548296, %v1569_v55  ;;  %v1558_v56 = vadd.f32 1.4214138, %v1554_v4  ;;  %4093 = vpow2.f32 %v1591_v14 }
 0x9c8   :  { %v1520_v18 = vand.u32 2147483647, %v5093_v47  ;;  %vm1512_vm9 = vcmp.ge.f32.partialorder %v5093_v47, 0.0 }
 0x9c9   :  { %v1577_v3 = vmul.f32 %v1573_v12, %v1541_v27  ;;  %v1562_v54 = vmul.f32 %v1558_v56, %v1542_v40 }
 0x9ca   :  { %v1524_v8 = vmul.f32 0.3275911, %v1520_v18  ;;  %v1584_v11 = vsub.f32 0.0, %v1520_v18 }
 0x9cb   :  { %v1597_v44 = vmul.f32 %v4090_v36, %v1577_v3  ;;  %v1566_v20 = vadd.f32 -0.28449672, %v1562_v54  ;;  %v1515_v36 = vsel %vm1511_vm8, 1.0, %v4258_v59 }
 0x9cc   :  { %v4092_v52 = vpop.eup %4091  ;;  %v1528_v28 = vadd.f32 1.0, %v1524_v8  ;;  %v1588_v13 = vmul.f32 %v1584_v11, %v1520_v18  ;;  %v1503_v18 = vmul.f32 0.5, %v5084_v53 }
 0x9cd   :  { %v1601_v57 = vsub.f32 1.0, %v1597_v44  ;;  %v1570_v9 = vmul.f32 %v1566_v20, %v1542_v40  ;;  %v1535_v19 = vmul.f32 %v4092_v52, %v1527_v0  ;;  %v4094_v58 = vpop.eup %4093 }
 0x9ce   :  { %4095 = vrcp.f32 %v1528_v28 }
 0x9cf   :  { %v1605_v7 = vmul.f32 %v1601_v57, %v1513_v43  ;;  %v1574_v1 = vadd.f32 0.2548296, %v1570_v9  ;;  %v1539_v10 = vsub.f32 2.0, %v1535_v19  ;;  %4097 = vpow2.f32 %v1593_v48  ;;  %v3975_v48 = vld [vmem:[%s6137_s3 + $0x15] ss:$0 sm:$0xff] }
 0x9d1   :  { %v1609_v22 = vadd.f32 1.0, %v1605_v7  ;;  %v1578_v23 = vmul.f32 %v1574_v1, %v1542_v40  ;;  %v1543_v42 = vmul.f32 %v4092_v52, %v1539_v10  ;;  %v1516_v7 = vsel %vm1512_vm9, 1.0, %v4258_v59 }
 0x9d2   :  { %v1504_v1 = vmul.f32 0.5, %v5090_v61  ;;  %v3781_v61 = vld [vmem:[%s6135_s1 + $0x230] sm:$0xff] }
 0x9d3   :  { %v1613_v26 = vmul.f32 %v1609_v22, %v1501_v39  ;;  %v1598_v27 = vmul.f32 %v4094_v58, %v1578_v23  ;;  %v1547_v51 = vmul.f32 1.0614054, %v1543_v42  ;;  %v3782_v39 = vld [vmem:[%s6135_s1 + $0x238] sm:$0xff]  ;;  %v3779_v22 = vld [vmem:[%s6135_s1 + $0x220] sm:$0xff]  ;;  %v3777_v58 = vld [vmem:[%s6135_s1 + $0x210] sm:$0xff] }
 0x9d4   :  { %v4096_v46 = vpop.eup %4095  ;;  %1694 = vmatpush.msra.mxu0 %v3782_v39  ;;  %v3778_v23 = vld [vmem:[%s6135_s1 + $0x218] sm:$0xff] }
 0x9d5   :  { %v1602_v30 = vsub.f32 1.0, %v1598_v27  ;;  %v5101_v29 = vadd.f32 %v1613_v26, %v4990_v41  ;;  %v1551_v31 = vadd.f32 -1.4531521, %v1547_v51  ;;  %v1536_v32 = vmul.f32 %v4096_v46, %v1528_v28  ;;  %v4098_v12 = vpop.eup %4097  ;;  %v3775_v26 = vld [vmem:[%s6135_s1 + $0x200] sm:$0xff]  ;;  %v3774_v27 = vld [vmem:[%s6135_s1 + $0x1f8] sm:$0xff]  ;;  %v3772_v51 = vld [vmem:[%s6135_s1 + $0x1e8] sm:$0xff] }
 0x9d6   :  { %v1502_v41 = vmul.f32 0.5, %v5078_v2  ;;  %1695 = vmatpush.msra.mxu0 %v3781_v61 }
 0x9d7   :  { %v1606_v60 = vmul.f32 %v1602_v30, %v1514_v6  ;;  %1645 = vrot.lane.b32.xlu0 %v5101_v29, %s4256_s6  ;;  %1621 = vst.msk [vmem:[#allocation2 + $0x3] sm:$0xff] %vm76_vm3, %v5101_v29  ;;  %1629 = vrot.lane.b32.xlu1 %v5101_v29, %s4257_s7  ;;  %v1555_v33 = vmul.f32 %v1551_v31, %v1543_v42  ;;  %v1540_v24 = vsub.f32 2.0, %v1536_v32  ;;  %v3771_v30 = vld [vmem:[%s6135_s1 + $0x1e0] sm:$0xff] }
 0x9d9   :  { %v1610_v63 = vadd.f32 1.0, %v1606_v60  ;;  %v1559_v40 = vadd.f32 1.4214138, %v1555_v33  ;;  %v1544_v5 = vmul.f32 %v4096_v46, %v1540_v24 }
 0x9db   :  { %v1614_v15 = vmul.f32 %v1610_v63, %v1502_v41  ;;  %v1563_v16 = vmul.f32 %v1559_v40, %v1543_v42  ;;  %v1548_v35 = vmul.f32 1.0614054, %v1544_v5 }
 0x9dd   :  { %v5112_v49 = vadd.f32 %v1614_v15, %v4983_v34  ;;  %v1567_v17 = vadd.f32 -0.28449672, %v1563_v16  ;;  %v1552_v50 = vadd.f32 -1.4531521, %v1548_v35  ;;  %v1595_v34 = vmul.f32 1.442695, %v1588_v13 }
 0x9df   :  { %1647 = vrot.lane.b32.xlu1 %v5112_v49, %s4256_s6  ;;  %1622 = vst.msk [vmem:[#allocation2 + $0xb] sm:$0x1f] %vm78_vm4, %v5112_v49  ;;  %1631 = vrot.lane.b32.xlu2 %v5112_v49, %s4257_s7  ;;  %v1571_v2 = vmul.f32 %v1567_v17, %v1543_v42  ;;  %v1556_v37 = vmul.f32 %v1552_v50, %v1544_v5  ;;  %4099 = vpow2.f32 %v1595_v34 }
 0x9e1   :  { %v1575_v55 = vadd.f32 0.2548296, %v1571_v2  ;;  %v1560_v4 = vadd.f32 1.4214138, %v1556_v37 }
 0x9e3   :  { %v1579_v0 = vmul.f32 %v1575_v55, %v1543_v42  ;;  %v1564_v56 = vmul.f32 %v1560_v4, %v1544_v5  ;;  %v3776_v42 = vld [vmem:[%s6135_s1 + $0x208] sm:$0xff] }
 0x9e5   :  { %v1599_v14 = vmul.f32 %v4098_v12, %v1579_v0  ;;  %v1568_v3 = vadd.f32 -0.28449672, %v1564_v56  ;;  %v4100_v9 = vpop.eup %4099 }
 0x9e7   :  { %v1603_v54 = vsub.f32 1.0, %v1599_v14  ;;  %v1572_v44 = vmul.f32 %v1568_v3, %v1544_v5 }
 0x9e9   :  { %v1607_v20 = vmul.f32 %v1603_v54, %v1515_v36  ;;  %v1576_v8 = vadd.f32 0.2548296, %v1572_v44 }
 0x9eb   :  { %v1611_v52 = vadd.f32 1.0, %v1607_v20  ;;  %v1580_v57 = vmul.f32 %v1576_v8, %v1544_v5  ;;  %v3976_v5 = vld [vmem:[%s6137_s3 + $0x25] ss:$0 sm:$0xff] }
 0x9ed   :  { %v1615_v43 = vmul.f32 %v1611_v52, %v1503_v18  ;;  %v1600_v19 = vmul.f32 %v4100_v9, %v1580_v57 }
 0x9ef   :  { %v5125_v45 = vadd.f32 %v1615_v43, %v5001_v38  ;;  %v1604_v28 = vsub.f32 1.0, %v1600_v19 }
 0x9f1   :  { %1653 = vrot.lane.b32.xlu1 %v5125_v45, %s4256_s6  ;;  %1623 = vst.msk [vmem:[#allocation2 + $0x13] sm:$0xff] %vm76_vm3, %v5125_v45  ;;  %1633 = vrot.lane.b32.xlu2 %v5125_v45, %s4257_s7  ;;  %v1608_v53 = vmul.f32 %v1604_v28, %v1516_v7 }
 0x9f3   :  { %v1612_v47 = vadd.f32 1.0, %v1608_v53 }
 0x9f5   :  { %v1616_v10 = vmul.f32 %v1612_v47, %v1504_v1 }
 0x9f7   :  { %v5136_v38 = vadd.f32 %v1616_v10, %v5010_v25  ;;  %v3780_v25 = vld [vmem:[%s6135_s1 + $0x228] sm:$0xff] }
 0x9f8   :  { %1696 = vmatpush.msra.mxu0 %v3780_v25 }
 0x9f9   :  { %1655 = vrot.lane.b32.xlu2 %v5136_v38, %s4256_s6  ;;  %1624 = vst.msk [vmem:[#allocation2 + $0x1b] sm:$0x1f] %vm78_vm4, %v5136_v38  ;;  %1635 = vrot.lane.b32.xlu0 %v5136_v38, %s4257_s7 }
 0x9fa   :  { %1697 = vmatpush.msra.mxu0 %v3779_v22 }
 0x9fc   :  { %1698 = vmatpush.msra.mxu0 %v3778_v23 }
 0x9fe   :  { %1699 = vmatpush.msra.mxu0 %v3777_v58 }
 0xa00   :  { %1700 = vmatpush.msra.mxu0 %v3776_v42 }
 0xa02   :  { %1701 = vmatpush.msra.mxu0 %v3775_v26 }
 0xa04   :  { %1702 = vmatpush.msra.mxu0 %v3774_v27 }
 0xa06   :  { %1703 = vmatpush.msra.mxu0 %v3773_v21 }
 0xa08   :  { %1704 = vmatpush.msra.mxu0 %v3772_v51 }
 0xa0a   :  { %1705 = vmatpush.msra.mxu0 %v3771_v30 }
 0xa39   :  { %v1632_v46 = vpop.permute.xlu2 %1631 }
 0xa3a   :  { %1642 = vst.msk [vmem:[#allocation2 + $0x8] sm:$0xff] %vm98_vm5, %v1632_v46 }
 0xa49   :  { %v1646_v6 = vpop.permute.xlu0 %1645  ;;  %v1630_v31 = vpop.permute.xlu1 %1629 }
 0xa4a   :  { %1641 = vst.msk [vmem:[#allocation2] sm:$0xff] %vm98_vm5, %v1630_v31 }
 0xa4b   :  { %1651 = vst.msk [vmem:[#allocation2 - $0x3] sm:$0xf8] %vm109_vm6, %v1646_v6  ;;  %v1634_v60 = vpop.permute.xlu2 %1633 }
 0xa4c   :  { %1643 = vst.msk [vmem:[#allocation2 + $0x10] sm:$0xff] %vm98_vm5, %v1634_v60 }
 0xa51   :  { %v1648_v62 = vpop.permute.xlu1 %1647 }
 0xa52   :  { %1652 = vst.msk [vmem:[#allocation2 + $0x5] sm:$0xff] %vm111_vm7, %v1648_v62 }
 0xa53   :  { %v1656_v24 = vpop.permute.xlu2 %1655 }
 0xa59   :  { %v1661_v32 = vld [vmem:[#allocation2] sm:$0xff]  ;;  %v1662_v33 = vld [vmem:[#allocation2 + $0x8] sm:$0xff] }
 0xa5a   :  { %3783 = vmatmul.msk.f32.vlgmr.msra.gmra.mxu0 %vm18_vm2, %v1661_v32 }
 0xa62   :  { %3784 = vmatmul.msk.f32.gmra.mxu0 %vm18_vm2, %v1662_v33 }
 0xa63   :  { %v1654_v41 = vpop.permute.xlu1 %1653 }
 0xa64   :  { %1659 = vst.msk [vmem:[#allocation2 + $0xd] sm:$0xf8] %vm109_vm6, %v1654_v41 }
 0xa6b   :  { %v1636_v63 = vpop.permute.xlu0 %1635 }
 0xa6c   :  { %1644 = vst.msk [vmem:[#allocation2 + $0x18] sm:$0xff] %vm98_vm5, %v1636_v63 }
 0xa6d   :  { %1660 = vst.msk [vmem:[#allocation2 + $0x15] sm:$0xff] %vm111_vm7, %v1656_v24 }
 0xa74   :  { %v1663_v40 = vld [vmem:[#allocation2 + $0x10] sm:$0xff]  ;;  %v1664_v15 = vld [vmem:[#allocation2 + $0x18] sm:$0xff] }
 0xa75   :  { %3785 = vmatmul.msk.f32.gmra.mxu0 %vm18_vm2, %v1663_v40 }
 0xa7d   :  { %3786 = vmatmul.msk.f32.gmra.mxu0 %vm18_vm2, %v1664_v15 }
 0xad7   :  { %v1707_v16 = vpop.f32.mrf.mxu0 }
 0xad8   :  { %v1721_v11 = vmul.f32 %v3975_v48, %v1707_v16 }
 0xada   :  { %v5198_v35 = vadd.f32 %v3976_v5, %v1721_v11 }
 0xadc   :  { %v5201_v17 = vmul.f32 0.70710677, %v5198_v35 }
 0xade   :  { %v1747_v50 = vand.u32 2147483647, %v5201_v17  ;;  %vm1739_vm10 = vcmp.ge.f32.partialorder %v5201_v17, 0.0 }
 0xadf   :  { %v1710_v2 = vpop.f32.mrf.mxu0 }
 0xae0   :  { %v1751_v13 = vmul.f32 0.3275911, %v1747_v50  ;;  %v1722_v37 = vmul.f32 %v3975_v48, %v1710_v2  ;;  %v1811_v44 = vsub.f32 0.0, %v1747_v50 }
 0xae2   :  { %v1755_v55 = vadd.f32 1.0, %v1751_v13  ;;  %v5204_v4 = vadd.f32 %v3976_v5, %v1722_v37  ;;  %v1815_v57 = vmul.f32 %v1811_v44, %v1747_v50  ;;  %v1743_v50 = vsel %vm1739_vm10, 1.0, %v4258_v59 }
 0xae4   :  { %4101 = vrcp.f32 %v1755_v55  ;;  %v5207_v0 = vmul.f32 0.70710677, %v5204_v4  ;;  %v1819_v47 = vmul.f32 1.442695, %v1815_v57 }
 0xae6   :  { %v1748_v34 = vand.u32 2147483647, %v5207_v0  ;;  %vm1740_vm11 = vcmp.ge.f32.partialorder %v5207_v0, 0.0 }
 0xae7   :  { %v1744_v57 = vsel %vm1740_vm11, 1.0, %v4258_v59 }
 0xae8   :  { %v1752_v12 = vmul.f32 0.3275911, %v1748_v34  ;;  %v1812_v10 = vsub.f32 0.0, %v1748_v34 }
 0xaea   :  { %v4102_v56 = vpop.eup %4101  ;;  %v1756_v14 = vadd.f32 1.0, %v1752_v12  ;;  %v1816_v26 = vmul.f32 %v1812_v10, %v1748_v34  ;;  %v1731_v34 = vmul.f32 0.5, %v5198_v35 }
 0xaeb   :  { %v1763_v3 = vmul.f32 %v4102_v56, %v1755_v55 }
 0xaec   :  { %4103 = vrcp.f32 %v1756_v14  ;;  %v1821_v62 = vmul.f32 1.442695, %v1816_v26 }
 0xaed   :  { %v1767_v54 = vsub.f32 2.0, %v1763_v3  ;;  %4105 = vpow2.f32 %v1819_v47 }
 0xaef   :  { %v1771_v36 = vmul.f32 %v4102_v56, %v1767_v54 }
 0xaf1   :  { %v1775_v20 = vmul.f32 1.0614054, %v1771_v36 }
 0xaf2   :  { %v4104_v8 = vpop.eup %4103  ;;  %v1713_v9 = vpop.f32.mrf.mxu0 }
 0xaf3   :  { %v1764_v18 = vmul.f32 %v4104_v8, %v1756_v14  ;;  %v1779_v52 = vadd.f32 -1.4531521, %v1775_v20  ;;  %v1723_v19 = vmul.f32 %v3975_v48, %v1713_v9  ;;  %v4106_v33 = vpop.eup %4105 }
 0xaf5   :  { %v1768_v43 = vsub.f32 2.0, %v1764_v18  ;;  %v1783_v28 = vmul.f32 %v1779_v52, %v1771_v36  ;;  %v5210_v53 = vadd.f32 %v3976_v5, %v1723_v19  ;;  %v1732_v19 = vmul.f32 0.5, %v5204_v4 }
 0xaf7   :  { %v1772_v7 = vmul.f32 %v4104_v8, %v1768_v43  ;;  %v1787_v1 = vadd.f32 1.4214138, %v1783_v28  ;;  %v5213_v39 = vmul.f32 0.70710677, %v5210_v53 }
 0xaf9   :  { %v1791_v61 = vmul.f32 %v1787_v1, %v1771_v36  ;;  %v1776_v25 = vmul.f32 1.0614054, %v1772_v7  ;;  %v1749_v22 = vand.u32 2147483647, %v5213_v39  ;;  %vm1741_vm12 = vcmp.ge.f32.partialorder %v5213_v39, 0.0 }
 0xafa   :  { %v1716_v58 = vpop.f32.mrf.mxu0 }
 0xafb   :  { %v1795_v23 = vadd.f32 -0.28449672, %v1791_v61  ;;  %v1780_v42 = vadd.f32 -1.4531521, %v1776_v25  ;;  %v1753_v27 = vmul.f32 0.3275911, %v1749_v22  ;;  %v1724_v21 = vmul.f32 %v3975_v48, %v1716_v58 }
 0xafc   :  { %v1813_v44 = vsub.f32 0.0, %v1749_v22 }
 0xafd   :  { %v1799_v51 = vmul.f32 %v1795_v23, %v1771_v36  ;;  %v1784_v30 = vmul.f32 %v1780_v42, %v1772_v7  ;;  %v1757_v46 = vadd.f32 1.0, %v1753_v27  ;;  %v5216_v6 = vadd.f32 %v3976_v5, %v1724_v21 }
 0xafe   :  { %v1817_v43 = vmul.f32 %v1813_v44, %v1749_v22  ;;  %v3789_v44 = vld [vmem:[%s6136_s2 + $0xd0] sm:$0xff] }
 0xaff   :  { %v1803_v31 = vadd.f32 0.2548296, %v1799_v51  ;;  %v1788_v60 = vadd.f32 1.4214138, %v1784_v30  ;;  %4107 = vrcp.f32 %v1757_v46  ;;  %v5219_v32 = vmul.f32 0.70710677, %v5216_v6 }
 0xb00   :  { %4109 = vpow2.f32 %v1821_v62  ;;  %v1823_v61 = vmul.f32 1.442695, %v1817_v43 }
 0xb01   :  { %v1807_v41 = vmul.f32 %v1803_v31, %v1771_v36  ;;  %v1792_v63 = vmul.f32 %v1788_v60, %v1772_v7  ;;  %v1750_v24 = vand.u32 2147483647, %v5219_v32  ;;  %vm1742_vm13 = vcmp.ge.f32.partialorder %v5219_v32, 0.0 }
 0xb03   :  { %v1827_v40 = vmul.f32 %v4106_v33, %v1807_v41  ;;  %v1796_v15 = vadd.f32 -0.28449672, %v1792_v63  ;;  %v1754_v48 = vmul.f32 0.3275911, %v1750_v24  ;;  %v1814_v25 = vsub.f32 0.0, %v1750_v24 }
 0xb05   :  { %v1831_v5 = vsub.f32 1.0, %v1827_v40  ;;  %v1800_v16 = vmul.f32 %v1796_v15, %v1772_v7  ;;  %v4108_v11 = vpop.eup %4107  ;;  %v1758_v2 = vadd.f32 1.0, %v1754_v48  ;;  %v1818_v26 = vmul.f32 %v1814_v25, %v1750_v24 }
 0xb06   :  { %v1765_v13 = vmul.f32 %v4108_v11, %v1757_v46  ;;  %v4110_v17 = vpop.eup %4109  ;;  %v1745_v40 = vsel %vm1741_vm12, 1.0, %v4258_v59  ;;  %v1733_v24 = vmul.f32 0.5, %v5210_v53  ;;  %v1734_v53 = vmul.f32 0.5, %v5216_v6  ;;  %v3796_v6 = vld [vmem:[%s6136_s2 + $0x108] sm:$0xff] }
 0xb07   :  { %v1835_v37 = vmul.f32 %v1831_v5, %v1743_v50  ;;  %v1804_v55 = vadd.f32 0.2548296, %v1800_v16  ;;  %4111 = vrcp.f32 %v1758_v2  ;;  %v1825_v46 = vmul.f32 1.442695, %v1818_v26 }
 0xb08   :  { %v1769_v12 = vsub.f32 2.0, %v1765_v13  ;;  %4113 = vpow2.f32 %v1823_v61 }
 0xb09   :  { %v1839_v56 = vadd.f32 1.0, %v1835_v37  ;;  %v1808_v14 = vmul.f32 %v1804_v55, %v1772_v7  ;;  %4115 = vpow2.f32 %v1825_v46  ;;  %v1746_v37 = vsel %vm1742_vm13, 1.0, %v4258_v59 }
 0xb0a   :  { %v1773_v3 = vmul.f32 %v4108_v11, %v1769_v12 }
 0xb0b   :  { %v1843_v54 = vmul.f32 %v1839_v56, %v1731_v34  ;;  %v1828_v36 = vmul.f32 %v4110_v17, %v1808_v14  ;;  %v3797_v56 = vld [vmem:[%s6136_s2 + $0x110] sm:$0xff]  ;;  %v3794_v14 = vld [vmem:[%s6136_s2 + $0xf8] sm:$0xff] }
 0xb0c   :  { %v1777_v18 = vmul.f32 1.0614054, %v1773_v3  ;;  %v3793_v17 = vld [vmem:[%s6136_s2 + $0xf0] sm:$0xff] }
 0xb0d   :  { %v1847_v20 = vadd.f32 %v1843_v54, %v5101_v29  ;;  %v1832_v8 = vsub.f32 1.0, %v1828_v36  ;;  %v4112_v52 = vpop.eup %4111  ;;  %v3791_v54 = vld [vmem:[%s6136_s2 + $0xe0] sm:$0xff]  ;;  %v3790_v36 = vld [vmem:[%s6136_s2 + $0xd8] sm:$0xff] }
 0xb0e   :  { %v1766_v9 = vmul.f32 %v4112_v52, %v1758_v2  ;;  %v1781_v0 = vadd.f32 -1.4531521, %v1777_v18 }
 0xb0f   :  { %1875 = vrot.lane.b32.xlu2 %v1847_v20, %s4256_s6  ;;  %1851 = vst.msk [vmem:[#allocation2 + $0x3] sm:$0xff] %vm76_vm3, %v1847_v20  ;;  %1859 = vrot.lane.b32.xlu0 %v1847_v20, %s4257_s7  ;;  %v1836_v35 = vmul.f32 %v1832_v8, %v1744_v57  ;;  %v3788_v20 = vld [vmem:[%s6136_s2 + $0xc8] sm:$0xff]  ;;  %v3787_v8 = vld [vmem:[%s6136_s2 + $0xc0] sm:$0xff] }
 0xb10   :  { %v1770_v28 = vsub.f32 2.0, %v1766_v9  ;;  %v1785_v29 = vmul.f32 %v1781_v0, %v1773_v3 }
 0xb11   :  { %v1840_v7 = vadd.f32 1.0, %v1836_v35 }
 0xb12   :  { %v1774_v1 = vmul.f32 %v4112_v52, %v1770_v28  ;;  %v1789_v10 = vadd.f32 1.4214138, %v1785_v29 }
 0xb13   :  { %v1844_v47 = vmul.f32 %v1840_v7, %v1732_v19 }
 0xb14   :  { %v1793_v58 = vmul.f32 %v1789_v10, %v1773_v3  ;;  %v1778_v42 = vmul.f32 1.0614054, %v1774_v1 }
 0xb15   :  { %v1848_v23 = vadd.f32 %v1844_v47, %v5112_v49  ;;  %v4114_v49 = vpop.eup %4113  ;;  %v3977_v47 = vld [vmem:[%s6137_s3 + $0x32] ss:$0 sm:$0xff] }
 0xb16   :  { %v1797_v22 = vadd.f32 -0.28449672, %v1793_v58  ;;  %v1782_v4 = vadd.f32 -1.4531521, %v1778_v42  ;;  %v4116_v11 = vpop.eup %4115 }
 0xb17   :  { %1877 = vrot.lane.b32.xlu0 %v1848_v23, %s4256_s6  ;;  %1852 = vst.msk [vmem:[#allocation2 + $0xb] sm:$0x1f] %vm78_vm4, %v1848_v23  ;;  %1861 = vrot.lane.b32.xlu1 %v1848_v23, %s4257_s7 }
 0xb18   :  { %v1801_v27 = vmul.f32 %v1797_v22, %v1773_v3  ;;  %v1786_v21 = vmul.f32 %v1782_v4, %v1774_v1 }
 0xb1a   :  { %v1805_v51 = vadd.f32 0.2548296, %v1801_v27  ;;  %v1790_v30 = vadd.f32 1.4214138, %v1786_v21 }
 0xb1c   :  { %v1809_v31 = vmul.f32 %v1805_v51, %v1773_v3  ;;  %v1794_v60 = vmul.f32 %v1790_v30, %v1774_v1  ;;  %v3792_v3 = vld [vmem:[%s6136_s2 + $0xe8] sm:$0xff] }
 0xb1e   :  { %v1829_v62 = vmul.f32 %v4114_v49, %v1809_v31  ;;  %v1798_v33 = vadd.f32 -0.28449672, %v1794_v60 }
 0xb20   :  { %v1833_v41 = vsub.f32 1.0, %v1829_v62  ;;  %v1802_v63 = vmul.f32 %v1798_v33, %v1774_v1 }
 0xb22   :  { %v1837_v15 = vmul.f32 %v1833_v41, %v1745_v40  ;;  %v1806_v48 = vadd.f32 0.2548296, %v1802_v63 }
 0xb24   :  { %v1841_v5 = vadd.f32 1.0, %v1837_v15  ;;  %v1810_v16 = vmul.f32 %v1806_v48, %v1774_v1 }
 0xb26   :  { %v1845_v50 = vmul.f32 %v1841_v5, %v1733_v24  ;;  %v1830_v2 = vmul.f32 %v4116_v11, %v1810_v16 }
 0xb28   :  { %v1849_v39 = vadd.f32 %v1845_v50, %v5125_v45  ;;  %v1834_v13 = vsub.f32 1.0, %v1830_v2  ;;  %v3798_v45 = vld [vmem:[%s6136_s2 + $0x118] sm:$0xff] }
 0xb29   :  { %1926 = vmatpush.msrb.mxu1 %v3798_v45 }
 0xb2a   :  { %1883 = vrot.lane.b32.xlu0 %v1849_v39, %s4256_s6  ;;  %1853 = vst.msk [vmem:[#allocation2 + $0x13] sm:$0xff] %vm76_vm3, %v1849_v39  ;;  %1863 = vrot.lane.b32.xlu1 %v1849_v39, %s4257_s7  ;;  %v1838_v55 = vmul.f32 %v1834_v13, %v1746_v37 }
 0xb2b   :  { %1927 = vmatpush.msrb.mxu1 %v3797_v56 }
 0xb2c   :  { %v1842_v34 = vadd.f32 1.0, %v1838_v55 }
 0xb2d   :  { %1928 = vmatpush.msrb.mxu1 %v3796_v6 }
 0xb2e   :  { %v1846_v12 = vmul.f32 %v1842_v34, %v1734_v53 }
 0xb30   :  { %v1850_v32 = vadd.f32 %v1846_v12, %v5136_v38  ;;  %v3795_v38 = vld [vmem:[%s6136_s2 + $0x100] sm:$0xff] }
 0xb31   :  { %1929 = vmatpush.msrb.mxu1 %v3795_v38 }
 0xb32   :  { %1885 = vrot.lane.b32.xlu1 %v1850_v32, %s4256_s6  ;;  %1854 = vst.msk [vmem:[#allocation2 + $0x1b] sm:$0x1f] %vm78_vm4, %v1850_v32  ;;  %1865 = vrot.lane.b32.xlu2 %v1850_v32, %s4257_s7 }
 0xb33   :  { %1930 = vmatpush.msrb.mxu1 %v3794_v14 }
 0xb35   :  { %1931 = vmatpush.msrb.mxu1 %v3793_v17 }
 0xb37   :  { %1932 = vmatpush.msrb.mxu1 %v3792_v3 }
 0xb39   :  { %1933 = vmatpush.msrb.mxu1 %v3791_v54 }
 0xb3b   :  { %1934 = vmatpush.msrb.mxu1 %v3790_v36 }
 0xb3d   :  { %1935 = vmatpush.msrb.mxu1 %v3789_v44 }
 0xb3f   :  { %1936 = vmatpush.msrb.mxu1 %v3788_v20 }
 0xb41   :  { %1937 = vmatpush.msrb.mxu1 %v3787_v8 }
 0xb69   :  { %v1876_v52 = vpop.permute.xlu2 %1875 }
 0xb81   :  { %v1860_v18 = vpop.permute.xlu0 %1859 }
 0xb82   :  { %1871 = vst.msk [vmem:[#allocation2] sm:$0xff] %vm98_vm5, %v1860_v18 }
 0xb83   :  { %1881 = vst.msk [vmem:[#allocation2 - $0x3] sm:$0xf8] %vm109_vm6, %v1876_v52 }
 0xb89   :  { %v1878_v57 = vpop.permute.xlu0 %1877  ;;  %v1862_v9 = vpop.permute.xlu1 %1861 }
 0xb8a   :  { %1872 = vst.msk [vmem:[#allocation2 + $0x8] sm:$0xff] %vm98_vm5, %v1862_v9 }
 0xb8b   :  { %1882 = vst.msk [vmem:[#allocation2 + $0x5] sm:$0xff] %vm111_vm7, %v1878_v57 }
 0xb8c   :  { %v1866_v35 = vpop.permute.xlu2 %1865 }
 0xb8d   :  { %1874 = vst.msk [vmem:[#allocation2 + $0x18] sm:$0xff] %vm98_vm5, %v1866_v35 }
 0xb92   :  { %v1891_v0 = vld [vmem:[#allocation2] sm:$0xff]  ;;  %v1892_v43 = vld [vmem:[#allocation2 + $0x8] sm:$0xff] }
 0xb93   :  { %3799 = vmatmul.msk.f32.vlgmr.msrb.gmra.mxu1 %vm18_vm2, %v1891_v0 }
 0xb9b   :  { %3800 = vmatmul.msk.f32.gmra.mxu1 %vm18_vm2, %v1892_v43 }
 0xb9c   :  { %v1884_v19 = vpop.permute.xlu0 %1883  ;;  %v1864_v28 = vpop.permute.xlu1 %1863 }
 0xb9d   :  { %1873 = vst.msk [vmem:[#allocation2 + $0x10] sm:$0xff] %vm98_vm5, %v1864_v28 }
 0xb9e   :  { %1889 = vst.msk [vmem:[#allocation2 + $0xd] sm:$0xf8] %vm109_vm6, %v1884_v19 }
 0xba4   :  { %v1886_v7 = vpop.permute.xlu1 %1885 }
 0xba5   :  { %1890 = vst.msk [vmem:[#allocation2 + $0x15] sm:$0xff] %vm111_vm7, %v1886_v7 }
 0xbac   :  { %v1893_v29 = vld [vmem:[#allocation2 + $0x10] sm:$0xff]  ;;  %v1894_v1 = vld [vmem:[#allocation2 + $0x18] sm:$0xff] }
 0xbad   :  { %3801 = vmatmul.msk.f32.gmra.mxu1 %vm18_vm2, %v1893_v29 }
 0xbb5   :  { %3802 = vmatmul.msk.f32.gmra.mxu1 %vm18_vm2, %v1894_v1 }
 0xc10   :  { %v1939_v10 = vpop.f32.mrf.mxu1 }
 0xc11   :  { %v5301_v61 = vadd.f32 %v3977_v47, %v1939_v10 }
 0xc13   :  { %v3803_v25 = vmul.f32 -1.442695, %v5301_v61 }
 0xc15   :  { %4117 = vpow2.f32 %v3803_v25 }
 0xc18   :  { %v1942_v23 = vpop.f32.mrf.mxu1 }
 0xc19   :  { %v5304_v58 = vadd.f32 %v3977_v47, %v1942_v23 }
 0xc1b   :  { %v4118_v42 = vpop.eup %4117  ;;  %v3804_v22 = vmul.f32 -1.442695, %v5304_v58 }
 0xc1c   :  { %v1963_v4 = vadd.f32 1.0, %v4118_v42  ;;  %v3818_v42 = vld [vmem:[%s6135_s1 + $0x298] sm:$0xff] }
 0xc1d   :  { %4119 = vpow2.f32 %v3804_v22  ;;  %2120 = vmatpush.msra.mxu2 %v3818_v42  ;;  %v3817_v22 = vld [vmem:[%s6135_s1 + $0x290] sm:$0xff] }
 0xc1e   :  { %4121 = vrcp.f32 %v1963_v4  ;;  %v1978_v46 = vand.u32 2147483648, %v1963_v4  ;;  %v1976_v60 = vand.u32 2147483647, %v1963_v4  ;;  %vm1972_vm15 = vweird.f32 %v1963_v4 }
 0xc1f   :  { %2121 = vmatpush.msra.mxu2 %v3817_v22 }
 0xc20   :  { %v1979_v63 = vor.u32 1.1754944e-38, %v1978_v46  ;;  %vm1977_vm1 = vcmp.eq.f32.partialorder %v1976_v60, 8.507059e+37  ;;  %v3810_v46 = vld [vmem:[%s6135_s1 + $0x258] sm:$0xff] }
 0xc23   :  { %v4120_v26 = vpop.eup %4119 }
 0xc24   :  { %v4122_v27 = vpop.eup %4121  ;;  %v1964_v21 = vadd.f32 1.0, %v4120_v26  ;;  %v3815_v26 = vld [vmem:[%s6135_s1 + $0x280] sm:$0xff] }
 0xc25   :  { %v1968_v51 = vmul.f32 %v4122_v27, %v1963_v4  ;;  %vm1973_vm14 = vweird.f32 %v4122_v27  ;;  %v3816_v4 = vld [vmem:[%s6135_s1 + $0x288] sm:$0xff] }
 0xc26   :  { %4123 = vrcp.f32 %v1964_v21  ;;  %vm1974_vm0 = vmor %vm1972_vm15, %vm1973_vm14  ;;  %v1993_v16 = vand.u32 2147483648, %v1964_v21  ;;  %v1991_v50 = vand.u32 2147483647, %v1964_v21  ;;  %vm1987_vm9 = vweird.f32 %v1964_v21  ;;  %2122 = vmatpush.msra.mxu2 %v3816_v4 }
 0xc27   :  { %v1969_v30 = vsub.f32 1.0, %v1968_v51  ;;  %v3812_v51 = vld [vmem:[%s6135_s1 + $0x268] sm:$0xff] }
 0xc28   :  { %v1994_v37 = vor.u32 1.1754944e-38, %v1993_v16  ;;  %vm1992_vm11 = vcmp.eq.f32.partialorder %v1991_v50, 8.507059e+37  ;;  %2123 = vmatpush.msra.mxu2 %v3815_v26 }
 0xc29   :  { %v1970_v31 = vmul.f32 %v4122_v27, %v1969_v30  ;;  %v3811_v30 = vld [vmem:[%s6135_s1 + $0x260] sm:$0xff] }
 0xc2a   :  { %v1945_v49 = vpop.f32.mrf.mxu1 }
 0xc2b   :  { %v1971_v62 = vadd.f32 %v4122_v27, %v1970_v31  ;;  %v5307_v41 = vadd.f32 %v3977_v47, %v1945_v49  ;;  %v3809_v49 = vld [vmem:[%s6135_s1 + $0x250] sm:$0xff] }
 0xc2c   :  { %v4124_v33 = vpop.eup %4123 }
 0xc2d   :  { %v1975_v40 = vsel %vm1974_vm0, %v4122_v27, %v1971_v62  ;;  %v1983_v15 = vmul.f32 %v4124_v33, %v1964_v21  ;;  %v3805_v48 = vmul.f32 -1.442695, %v5307_v41  ;;  %vm1988_vm8 = vweird.f32 %v4124_v33  ;;  %v3814_v27 = vld [vmem:[%s6135_s1 + $0x278] sm:$0xff]  ;;  %v3813_v21 = vld [vmem:[%s6135_s1 + $0x270] sm:$0xff]  ;;  %v3808_v62 = vld [vmem:[%s6135_s1 + $0x248] sm:$0xff] }
 0xc2e   :  { %v1980_v24 = vsel %vm1977_vm1, %v1979_v63, %v1975_v40  ;;  %vm1989_vm10 = vmor %vm1987_vm9, %vm1988_vm8  ;;  %2124 = vmatpush.msra.mxu2 %v3814_v27 }
 0xc2f   :  { %2031 = vrot.lane.b32.xlu2 %v1980_v24, %s4259_s9  ;;  %v1984_v5 = vsub.f32 1.0, %v1983_v15  ;;  %4125 = vpow2.f32 %v3805_v48 }
 0xc30   :  { %2125 = vmatpush.msra.mxu2 %v3813_v21 }
 0xc31   :  { %v1985_v11 = vmul.f32 %v4124_v33, %v1984_v5 }
 0xc32   :  { %v1948_v2 = vpop.f32.mrf.mxu1  ;;  %2126 = vmatpush.msra.mxu2 %v3812_v51 }
 0xc33   :  { %v1986_v39 = vadd.f32 %v4124_v33, %v1985_v11  ;;  %v1949_v13 = vadd.f32 %v3977_v47, %v1948_v2  ;;  %v3978_v2 = vld [vmem:[%s6137_s3 + $0x16] ss:$0 sm:$0xff] }
 0xc34   :  { %2127 = vmatpush.msra.mxu2 %v3811_v30 }
 0xc35   :  { %v1990_v55 = vsel %vm1989_vm10, %v4124_v33, %v1986_v39  ;;  %v4126_v53 = vpop.eup %4125  ;;  %v3806_v34 = vmul.f32 -1.442695, %v1949_v13  ;;  %v3807_v33 = vld [vmem:[%s6135_s1 + $0x240] sm:$0xff] }
 0xc36   :  { %v1995_v12 = vsel %vm1992_vm11, %v1994_v37, %v1990_v55  ;;  %v1965_v32 = vadd.f32 1.0, %v4126_v53  ;;  %2128 = vmatpush.msra.mxu2 %v3810_v46  ;;  %v3979_v39 = vld [vmem:[%s6137_s3 + $0x26] ss:$0 sm:$0xff] }
 0xc37   :  { %2033 = vrot.lane.b32.xlu0 %v1995_v12, %s4259_s9  ;;  %4127 = vpow2.f32 %v3806_v34 }
 0xc38   :  { %4129 = vrcp.f32 %v1965_v32  ;;  %v2008_v17 = vand.u32 2147483648, %v1965_v32  ;;  %v2006_v54 = vand.u32 2147483647, %v1965_v32  ;;  %vm2002_vm13 = vweird.f32 %v1965_v32  ;;  %2129 = vmatpush.msra.mxu2 %v3809_v49 }
 0xc3a   :  { %v2009_v20 = vor.u32 1.1754944e-38, %v2008_v17  ;;  %vm2007_vm15 = vcmp.eq.f32.partialorder %v2006_v54, 8.507059e+37  ;;  %2130 = vmatpush.msra.mxu2 %v3808_v62 }
 0xc3c   :  { %2131 = vmatpush.msra.mxu2 %v3807_v33 }
 0xc3d   :  { %v4128_v45 = vpop.eup %4127 }
 0xc3e   :  { %v4130_v56 = vpop.eup %4129  ;;  %v1966_v6 = vadd.f32 1.0, %v4128_v45 }
 0xc3f   :  { %v1998_v38 = vmul.f32 %v4130_v56, %v1965_v32  ;;  %vm2003_vm12 = vweird.f32 %v4130_v56 }
 0xc40   :  { %4131 = vrcp.f32 %v1966_v6  ;;  %vm2004_vm14 = vmor %vm2002_vm13, %vm2003_vm12  ;;  %v2023_v9 = vand.u32 2147483648, %v1966_v6  ;;  %v2021_v0 = vand.u32 2147483647, %v1966_v6  ;;  %vm2017_vm1 = vweird.f32 %v1966_v6 }
 0xc41   :  { %v1999_v14 = vsub.f32 1.0, %v1998_v38 }
 0xc42   :  { %v2024_v19 = vor.u32 1.1754944e-38, %v2023_v9  ;;  %vm2022_vm9 = vcmp.eq.f32.partialorder %v2021_v0, 8.507059e+37 }
 0xc43   :  { %v2000_v3 = vmul.f32 %v4130_v56, %v1999_v14 }
 0xc45   :  { %v2001_v36 = vadd.f32 %v4130_v56, %v2000_v3 }
 0xc46   :  { %v4132_v44 = vpop.eup %4131 }
 0xc47   :  { %v2005_v8 = vsel %vm2004_vm14, %v4130_v56, %v2001_v36  ;;  %v2013_v18 = vmul.f32 %v4132_v44, %v1966_v6  ;;  %vm2018_vm0 = vweird.f32 %v4132_v44 }
 0xc48   :  { %v2010_v52 = vsel %vm2007_vm15, %v2009_v20, %v2005_v8  ;;  %vm2019_vm8 = vmor %vm2017_vm1, %vm2018_vm0 }
 0xc49   :  { %2035 = vrot.lane.b32.xlu1 %v2010_v52, %s4259_s9  ;;  %v2014_v57 = vsub.f32 1.0, %v2013_v18 }
 0xc4b   :  { %v2015_v35 = vmul.f32 %v4132_v44, %v2014_v57 }
 0xc4d   :  { %v2016_v43 = vadd.f32 %v4132_v44, %v2015_v35 }
 0xc4f   :  { %v2020_v28 = vsel %vm2019_vm8, %v4132_v44, %v2016_v43 }
 0xc50   :  { %v2025_v7 = vsel %vm2022_vm9, %v2024_v19, %v2020_v28 }
 0xc51   :  { %2037 = vrot.lane.b32.xlu2 %v2025_v7, %s4259_s9 }
 0xc89   :  { %v2032_v29 = vpop.permute.xlu2 %2031 }
 0xc8a   :  { %v5315_v1 = vmul.f32 %v2032_v29, %v5301_v61 }
 0xc8c   :  { %2047 = vst.msk [vmem:[#allocation2 + $0x3] sm:$0xff] %vm76_vm3, %v5315_v1  ;;  %2071 = vrot.lane.b32.xlu2 %v5315_v1, %s4256_s6  ;;  %2055 = vrot.lane.b32.xlu0 %v5315_v1, %s4257_s7 }
 0xca9   :  { %v2034_v47 = vpop.permute.xlu0 %2033 }
 0xcaa   :  { %v5324_v10 = vmul.f32 %v2034_v47, %v5304_v58 }
 0xcab   :  { %v2038_v25 = vpop.permute.xlu2 %2037 }
 0xcac   :  { %2048 = vst.msk [vmem:[#allocation2 + $0xb] sm:$0x1f] %vm78_vm4, %v5324_v10  ;;  %2057 = vrot.lane.b32.xlu1 %v5324_v10, %s4257_s7  ;;  %2073 = vrot.lane.b32.xlu0 %v5324_v10, %s4256_s6  ;;  %v5332_v61 = vmul.f32 %v2038_v25, %v1949_v13 }
 0xcae   :  { %2050 = vst.msk [vmem:[#allocation2 + $0x1b] sm:$0x1f] %vm78_vm4, %v5332_v61  ;;  %2061 = vrot.lane.b32.xlu2 %v5332_v61, %s4257_s7 }
 0xcbb   :  { %v2036_v23 = vpop.permute.xlu1 %2035 }
 0xcbc   :  { %v5339_v58 = vmul.f32 %v2036_v23, %v5307_v41 }
 0xcbe   :  { %2049 = vst.msk [vmem:[#allocation2 + $0x13] sm:$0xff] %vm76_vm3, %v5339_v58  ;;  %2059 = vrot.lane.b32.xlu1 %v5339_v58, %s4257_s7  ;;  %2079 = vrot.lane.b32.xlu0 %v5339_v58, %s4256_s6 }
 0xcc6   :  { %2081 = vrot.lane.b32.xlu1 %v5332_v61, %s4256_s6 }
 0xce6   :  { %v2072_v60 = vpop.permute.xlu2 %2071 }
 0xcfe   :  { %v2056_v31 = vpop.permute.xlu0 %2055 }
 0xcff   :  { %2067 = vst.msk [vmem:[#allocation2] sm:$0xff] %vm98_vm5, %v2056_v31 }
 0xd00   :  { %2077 = vst.msk [vmem:[#allocation2 - $0x3] sm:$0xf8] %vm109_vm6, %v2072_v60 }
 0xd08   :  { %v2062_v41 = vpop.permute.xlu2 %2061 }
 0xd09   :  { %2070 = vst.msk [vmem:[#allocation2 + $0x18] sm:$0xff] %vm98_vm5, %v2062_v41 }
 0xd1e   :  { %v2058_v63 = vpop.permute.xlu1 %2057  ;;  %v2074_v40 = vpop.permute.xlu0 %2073 }
 0xd1f   :  { %2068 = vst.msk [vmem:[#allocation2 + $0x8] sm:$0xff] %vm98_vm5, %v2058_v63 }
 0xd20   :  { %2078 = vst.msk [vmem:[#allocation2 + $0x5] sm:$0xff] %vm111_vm7, %v2074_v40 }
 0xd27   :  { %v2087_v15 = vld [vmem:[#allocation2] sm:$0xff]  ;;  %v2088_v48 = vld [vmem:[#allocation2 + $0x8] sm:$0xff] }
 0xd28   :  { %3819 = vmatmul.msk.f32.vlgmr.msra.gmra.mxu2 %vm18_vm2, %v2087_v15 }
 0xd30   :  { %3820 = vmatmul.msk.f32.gmra.mxu2 %vm18_vm2, %v2088_v48  ;;  %v2060_v24 = vpop.permute.xlu1 %2059  ;;  %v2080_v5 = vpop.permute.xlu0 %2079 }
 0xd31   :  { %2069 = vst.msk [vmem:[#allocation2 + $0x10] sm:$0xff] %vm98_vm5, %v2060_v24 }
 0xd32   :  { %2085 = vst.msk [vmem:[#allocation2 + $0xd] sm:$0xf8] %vm109_vm6, %v2080_v5 }
 0xd38   :  { %v2082_v16 = vpop.permute.xlu1 %2081 }
 0xd39   :  { %2086 = vst.msk [vmem:[#allocation2 + $0x15] sm:$0xff] %vm111_vm7, %v2082_v16 }
 0xd40   :  { %v2089_v11 = vld [vmem:[#allocation2 + $0x10] sm:$0xff]  ;;  %v2090_v50 = vld [vmem:[#allocation2 + $0x18] sm:$0xff] }
 0xd41   :  { %3821 = vmatmul.msk.f32.gmra.mxu2 %vm18_vm2, %v2089_v11 }
 0xd49   :  { %3822 = vmatmul.msk.f32.gmra.mxu2 %vm18_vm2, %v2090_v50 }
 0xdab   :  { %v2133_v13 = vpop.f32.mrf.mxu2 }
 0xdac   :  { %v2147_v37 = vmul.f32 %v3978_v2, %v2133_v13 }
 0xdae   :  { %v5403_v55 = vadd.f32 %v3979_v39, %v2147_v37 }
 0xdb0   :  { %v5406_v53 = vmul.f32 0.70710677, %v5403_v55 }
 0xdb2   :  { %v2173_v34 = vand.u32 2147483647, %v5406_v53  ;;  %vm2165_vm10 = vcmp.ge.f32.partialorder %v5406_v53, 0.0 }
 0xdb3   :  { %v2136_v12 = vpop.f32.mrf.mxu2 }
 0xdb4   :  { %v2177_v32 = vmul.f32 0.3275911, %v2173_v34  ;;  %v2148_v45 = vmul.f32 %v3978_v2, %v2136_v12  ;;  %v2237_v8 = vsub.f32 0.0, %v2173_v34 }
 0xdb6   :  { %v2181_v56 = vadd.f32 1.0, %v2177_v32  ;;  %v5409_v6 = vadd.f32 %v3979_v39, %v2148_v45  ;;  %v2241_v43 = vmul.f32 %v2237_v8, %v2173_v34  ;;  %v2169_v32 = vsel %vm2165_vm10, 1.0, %v4258_v59 }
 0xdb8   :  { %4133 = vrcp.f32 %v2181_v56  ;;  %v5412_v38 = vmul.f32 0.70710677, %v5409_v6  ;;  %v2245_v23 = vmul.f32 1.442695, %v2241_v43 }
 0xdba   :  { %v2174_v14 = vand.u32 2147483647, %v5412_v38  ;;  %vm2166_vm11 = vcmp.ge.f32.partialorder %v5412_v38, 0.0  ;;  %v2158_v38 = vmul.f32 0.5, %v5409_v6 }
 0xdbb   :  { %v2170_v43 = vsel %vm2166_vm11, 1.0, %v4258_v59 }
 0xdbc   :  { %v2178_v17 = vmul.f32 0.3275911, %v2174_v14  ;;  %v2238_v42 = vsub.f32 0.0, %v2174_v14 }
 0xdbe   :  { %v4134_v3 = vpop.eup %4133  ;;  %v2182_v54 = vadd.f32 1.0, %v2178_v17  ;;  %v2242_v31 = vmul.f32 %v2238_v42, %v2174_v14  ;;  %v2157_v17 = vmul.f32 0.5, %v5403_v55 }
 0xdbf   :  { %v2189_v36 = vmul.f32 %v4134_v3, %v2181_v56 }
 0xdc0   :  { %4135 = vrcp.f32 %v2182_v54  ;;  %v2247_v15 = vmul.f32 1.442695, %v2242_v31 }
 0xdc1   :  { %v2193_v44 = vsub.f32 2.0, %v2189_v36  ;;  %4137 = vpow2.f32 %v2245_v23 }
 0xdc3   :  { %v2197_v20 = vmul.f32 %v4134_v3, %v2193_v44 }
 0xdc4   :  { %v2139_v52 = vpop.f32.mrf.mxu2 }
 0xdc5   :  { %v2201_v18 = vmul.f32 1.0614054, %v2197_v20  ;;  %v2149_v9 = vmul.f32 %v3978_v2, %v2139_v52 }
 0xdc6   :  { %v4136_v57 = vpop.eup %4135 }
 0xdc7   :  { %v2205_v35 = vadd.f32 -1.4531521, %v2201_v18  ;;  %v2190_v0 = vmul.f32 %v4136_v57, %v2182_v54  ;;  %v5415_v19 = vadd.f32 %v3979_v39, %v2149_v9  ;;  %v4138_v16 = vpop.eup %4137 }
 0xdc9   :  { %v2209_v28 = vmul.f32 %v2205_v35, %v2197_v20  ;;  %v2194_v7 = vsub.f32 2.0, %v2190_v0  ;;  %v5418_v29 = vmul.f32 0.70710677, %v5415_v19 }
 0xdcb   :  { %v2213_v47 = vadd.f32 1.4214138, %v2209_v28  ;;  %v2198_v25 = vmul.f32 %v4136_v57, %v2194_v7  ;;  %v2175_v22 = vand.u32 2147483647, %v5418_v29  ;;  %vm2167_vm12 = vcmp.ge.f32.partialorder %v5418_v29, 0.0 }
 0xdcc   :  { %v2142_v27 = vpop.f32.mrf.mxu2 }
 0xdcd   :  { %v2217_v4 = vmul.f32 %v2213_v47, %v2197_v20  ;;  %v2202_v26 = vmul.f32 1.0614054, %v2198_v25  ;;  %v2179_v21 = vmul.f32 0.3275911, %v2175_v22  ;;  %v2150_v51 = vmul.f32 %v3978_v2, %v2142_v27 }
 0xdce   :  { %v2239_v44 = vsub.f32 0.0, %v2175_v22 }
 0xdcf   :  { %v2221_v30 = vadd.f32 -0.28449672, %v2217_v4  ;;  %v2206_v46 = vadd.f32 -1.4531521, %v2202_v26  ;;  %v2183_v60 = vadd.f32 1.0, %v2179_v21  ;;  %v5421_v49 = vadd.f32 %v3979_v39, %v2150_v51 }
 0xdd0   :  { %v2243_v55 = vmul.f32 %v2239_v44, %v2175_v22  ;;  %v3827_v44 = vld [vmem:[%s6135_s1 + $0x2c0] sm:$0xff] }
 0xdd1   :  { %v2225_v62 = vmul.f32 %v2221_v30, %v2197_v20  ;;  %v2210_v33 = vmul.f32 %v2206_v46, %v2198_v25  ;;  %4139 = vrcp.f32 %v2183_v60  ;;  %v5424_v41 = vmul.f32 0.70710677, %v5421_v49 }
 0xdd2   :  { %4141 = vpow2.f32 %v2247_v15  ;;  %v2249_v42 = vmul.f32 1.442695, %v2243_v55 }
 0xdd3   :  { %v2229_v63 = vadd.f32 0.2548296, %v2225_v62  ;;  %v2214_v40 = vadd.f32 1.4214138, %v2210_v33  ;;  %v2176_v48 = vand.u32 2147483647, %v5424_v41 }
 0xdd4   :  { %vm2168_vm13 = vcmp.ge.f32.partialorder %v5424_v41, 0.0 }
 0xdd5   :  { %v2233_v24 = vmul.f32 %v2229_v63, %v2197_v20  ;;  %v2218_v5 = vmul.f32 %v2214_v40, %v2198_v25  ;;  %v2180_v11 = vmul.f32 0.3275911, %v2176_v48  ;;  %v2240_v4 = vsub.f32 0.0, %v2176_v48 }
 0xdd7   :  { %v2253_v50 = vmul.f32 %v4138_v16, %v2233_v24  ;;  %v2222_v2 = vadd.f32 -0.28449672, %v2218_v5  ;;  %v4140_v39 = vpop.eup %4139  ;;  %v2184_v13 = vadd.f32 1.0, %v2180_v11  ;;  %v2244_v46 = vmul.f32 %v2240_v4, %v2176_v48  ;;  %v3981_v4 = vld [vmem:[%s6137_s3 + $0x27] ss:$0 sm:$0xff] }
 0xdd8   :  { %v2191_v12 = vmul.f32 %v4140_v39, %v2183_v60  ;;  %v4142_v53 = vpop.eup %4141  ;;  %v2171_v16 = vsel %vm2167_vm12, 1.0, %v4258_v59 }
 0xdd9   :  { %v2257_v37 = vsub.f32 1.0, %v2253_v50  ;;  %v2226_v34 = vmul.f32 %v2222_v2, %v2198_v25  ;;  %4143 = vrcp.f32 %v2184_v13  ;;  %v2251_v33 = vmul.f32 1.442695, %v2244_v46 }
 0xdda   :  { %v2195_v14 = vsub.f32 2.0, %v2191_v12  ;;  %4145 = vpow2.f32 %v2249_v42  ;;  %v2159_v2 = vmul.f32 0.5, %v5415_v19  ;;  %v2160_v19 = vmul.f32 0.5, %v5421_v49  ;;  %v3833_v49 = vld [vmem:[%s6135_s1 + $0x2f0] sm:$0xff] }
 0xddb   :  { %v2261_v45 = vmul.f32 %v2257_v37, %v2169_v32  ;;  %v2230_v56 = vadd.f32 0.2548296, %v2226_v34  ;;  %4147 = vpow2.f32 %v2251_v33  ;;  %v3980_v42 = vld [vmem:[%s6137_s3 + $0x17] ss:$0 sm:$0xff] }
 0xddc   :  { %v2199_v36 = vmul.f32 %v4140_v39, %v2195_v14 }
 0xddd   :  { %v2265_v3 = vadd.f32 1.0, %v2261_v45  ;;  %v2234_v54 = vmul.f32 %v2230_v56, %v2198_v25  ;;  %v2172_v45 = vsel %vm2168_vm13, 1.0, %v4258_v59 }
 0xdde   :  { %v2203_v18 = vmul.f32 1.0614054, %v2199_v36 }
 0xddf   :  { %v2269_v20 = vmul.f32 %v2265_v3, %v2157_v17  ;;  %v2254_v8 = vmul.f32 %v4142_v53, %v2234_v54  ;;  %v4144_v52 = vpop.eup %4143  ;;  %v3831_v3 = vld [vmem:[%s6135_s1 + $0x2e0] sm:$0xff]  ;;  %v3830_v54 = vld [vmem:[%s6135_s1 + $0x2d8] sm:$0xff]  ;;  %v3828_v53 = vld [vmem:[%s6135_s1 + $0x2c8] sm:$0xff] }
 0xde0   :  { %v2207_v9 = vadd.f32 -1.4531521, %v2203_v18  ;;  %v2192_v35 = vmul.f32 %v4144_v52, %v2184_v13  ;;  %v3825_v18 = vld [vmem:[%s6135_s1 + $0x2b0] sm:$0xff] }
 0xde1   :  { %v2258_v57 = vsub.f32 1.0, %v2254_v8  ;;  %v5432_v0 = vadd.f32 %v2269_v20, %v5315_v1  ;;  %v3826_v20 = vld [vmem:[%s6135_s1 + $0x2b8] sm:$0xff] }
 0xde2   :  { %v2211_v7 = vmul.f32 %v2207_v9, %v2199_v36  ;;  %v2196_v47 = vsub.f32 2.0, %v2192_v35 }
 0xde3   :  { %v2262_v28 = vmul.f32 %v2258_v57, %v2170_v43  ;;  %2301 = vrot.lane.b32.xlu1 %v5432_v0, %s4256_s6  ;;  %2277 = vst.msk [vmem:[#allocation2 + $0x3] sm:$0xff] %vm76_vm3, %v5432_v0  ;;  %2285 = vrot.lane.b32.xlu2 %v5432_v0, %s4257_s7  ;;  %v3823_v57 = vld [vmem:[%s6135_s1 + $0x2a0] sm:$0xff] }
 0xde4   :  { %v2215_v1 = vadd.f32 1.4214138, %v2211_v7  ;;  %v2200_v23 = vmul.f32 %v4144_v52, %v2196_v47  ;;  %v3824_v52 = vld [vmem:[%s6135_s1 + $0x2a8] sm:$0xff] }
 0xde5   :  { %v2266_v25 = vadd.f32 1.0, %v2262_v28 }
 0xde6   :  { %v2219_v26 = vmul.f32 %v2215_v1, %v2199_v36  ;;  %v2204_v27 = vmul.f32 1.0614054, %v2200_v23 }
 0xde7   :  { %v2270_v22 = vmul.f32 %v2266_v25, %v2158_v38 }
 0xde8   :  { %v2223_v21 = vadd.f32 -0.28449672, %v2219_v26  ;;  %v2208_v51 = vadd.f32 -1.4531521, %v2204_v27 }
 0xde9   :  { %v5443_v30 = vadd.f32 %v2270_v22, %v5324_v10  ;;  %v4146_v10 = vpop.eup %4145 }
 0xdea   :  { %v2227_v31 = vmul.f32 %v2223_v21, %v2199_v36  ;;  %v2212_v60 = vmul.f32 %v2208_v51, %v2200_v23  ;;  %v4148_v37 = vpop.eup %4147 }
 0xdeb   :  { %2303 = vrot.lane.b32.xlu2 %v5443_v30, %s4256_s6  ;;  %2278 = vst.msk [vmem:[#allocation2 + $0xb] sm:$0x1f] %vm78_vm4, %v5443_v30  ;;  %2287 = vrot.lane.b32.xlu0 %v5443_v30, %s4257_s7 }
 0xdec   :  { %v2231_v6 = vadd.f32 0.2548296, %v2227_v31  ;;  %v2216_v62 = vadd.f32 1.4214138, %v2212_v60 }
 0xdee   :  { %v2235_v63 = vmul.f32 %v2231_v6, %v2199_v36  ;;  %v2220_v40 = vmul.f32 %v2216_v62, %v2200_v23  ;;  %v3829_v36 = vld [vmem:[%s6135_s1 + $0x2d0] sm:$0xff] }
 0xdf0   :  { %v2255_v15 = vmul.f32 %v4146_v10, %v2235_v63  ;;  %v2224_v48 = vadd.f32 -0.28449672, %v2220_v40 }
 0xdf2   :  { %v2259_v24 = vsub.f32 1.0, %v2255_v15  ;;  %v2228_v5 = vmul.f32 %v2224_v48, %v2200_v23 }
 0xdf4   :  { %v2263_v11 = vmul.f32 %v2259_v24, %v2171_v16  ;;  %v2232_v50 = vadd.f32 0.2548296, %v2228_v5 }
 0xdf6   :  { %v2267_v39 = vadd.f32 1.0, %v2263_v11  ;;  %v2236_v13 = vmul.f32 %v2232_v50, %v2200_v23 }
 0xdf8   :  { %v2271_v34 = vmul.f32 %v2267_v39, %v2159_v2  ;;  %v2256_v12 = vmul.f32 %v4148_v37, %v2236_v13 }
 0xdfa   :  { %v2260_v32 = vsub.f32 1.0, %v2256_v12  ;;  %v5456_v29 = vadd.f32 %v2271_v34, %v5339_v58  ;;  %v3834_v58 = vld [vmem:[%s6135_s1 + $0x2f8] sm:$0xff] }
 0xdfb   :  { %2350 = vmatpush.msra.mxu3 %v3834_v58 }
 0xdfc   :  { %v2264_v56 = vmul.f32 %v2260_v32, %v2172_v45  ;;  %2309 = vrot.lane.b32.xlu2 %v5456_v29, %s4256_s6  ;;  %2279 = vst.msk [vmem:[#allocation2 + $0x13] sm:$0xff] %vm76_vm3, %v5456_v29  ;;  %2289 = vrot.lane.b32.xlu0 %v5456_v29, %s4257_s7 }
 0xdfd   :  { %2351 = vmatpush.msra.mxu3 %v3833_v49 }
 0xdfe   :  { %v2268_v41 = vadd.f32 1.0, %v2264_v56 }
 0xe00   :  { %v2272_v14 = vmul.f32 %v2268_v41, %v2160_v19 }
 0xe02   :  { %v5467_v17 = vadd.f32 %v2272_v14, %v5332_v61  ;;  %v3832_v61 = vld [vmem:[%s6135_s1 + $0x2e8] sm:$0xff] }
 0xe03   :  { %2352 = vmatpush.msra.mxu3 %v3832_v61 }
 0xe04   :  { %2311 = vrot.lane.b32.xlu0 %v5467_v17, %s4256_s6  ;;  %2280 = vst.msk [vmem:[#allocation2 + $0x1b] sm:$0x1f] %vm78_vm4, %v5467_v17  ;;  %2291 = vrot.lane.b32.xlu1 %v5467_v17, %s4257_s7 }
 0xe05   :  { %2353 = vmatpush.msra.mxu3 %v3831_v3 }
 0xe07   :  { %2354 = vmatpush.msra.mxu3 %v3830_v54 }
 0xe09   :  { %2355 = vmatpush.msra.mxu3 %v3829_v36 }
 0xe0b   :  { %2356 = vmatpush.msra.mxu3 %v3828_v53 }
 0xe0d   :  { %2357 = vmatpush.msra.mxu3 %v3827_v44 }
 0xe0f   :  { %2358 = vmatpush.msra.mxu3 %v3826_v20 }
 0xe11   :  { %2359 = vmatpush.msra.mxu3 %v3825_v18 }
 0xe13   :  { %2360 = vmatpush.msra.mxu3 %v3824_v52 }
 0xe15   :  { %2361 = vmatpush.msra.mxu3 %v3823_v57 }
 0xe3d   :  { %v2286_v8 = vpop.permute.xlu2 %2285 }
 0xe3e   :  { %2297 = vst.msk [vmem:[#allocation2] sm:$0xff] %vm98_vm5, %v2286_v8 }
 0xe45   :  { %v2304_v43 = vpop.permute.xlu2 %2303 }
 0xe55   :  { %v2302_v9 = vpop.permute.xlu1 %2301 }
 0xe56   :  { %2307 = vst.msk [vmem:[#allocation2 - $0x3] sm:$0xf8] %vm109_vm6, %v2302_v9  ;;  %v2310_v47 = vpop.permute.xlu2 %2309 }
 0xe5d   :  { %v2288_v35 = vpop.permute.xlu0 %2287 }
 0xe5e   :  { %2298 = vst.msk [vmem:[#allocation2 + $0x8] sm:$0xff] %vm98_vm5, %v2288_v35 }
 0xe5f   :  { %2308 = vst.msk [vmem:[#allocation2 + $0x5] sm:$0xff] %vm111_vm7, %v2304_v43 }
 0xe66   :  { %v2317_v55 = vld [vmem:[#allocation2] sm:$0xff]  ;;  %v2318_v28 = vld [vmem:[#allocation2 + $0x8] sm:$0xff] }
 0xe67   :  { %3835 = vmatmul.msk.f32.vlgmr.msra.gmra.mxu3 %vm18_vm2, %v2317_v55 }
 0xe6e   :  { %v2290_v7 = vpop.permute.xlu0 %2289 }
 0xe6f   :  { %3836 = vmatmul.msk.f32.gmra.mxu3 %vm18_vm2, %v2318_v28  ;;  %2299 = vst.msk [vmem:[#allocation2 + $0x10] sm:$0xff] %vm98_vm5, %v2290_v7 }
 0xe70   :  { %2315 = vst.msk [vmem:[#allocation2 + $0xd] sm:$0xf8] %vm109_vm6, %v2310_v47 }
 0xe76   :  { %v2312_v38 = vpop.permute.xlu0 %2311  ;;  %v2292_v25 = vpop.permute.xlu1 %2291 }
 0xe77   :  { %2300 = vst.msk [vmem:[#allocation2 + $0x18] sm:$0xff] %vm98_vm5, %v2292_v25 }
 0xe78   :  { %2316 = vst.msk [vmem:[#allocation2 + $0x15] sm:$0xff] %vm111_vm7, %v2312_v38 }
 0xe7f   :  { %v2319_v1 = vld [vmem:[#allocation2 + $0x10] sm:$0xff]  ;;  %v2320_v23 = vld [vmem:[#allocation2 + $0x18] sm:$0xff] }
 0xe80   :  { %3837 = vmatmul.msk.f32.gmra.mxu3 %vm18_vm2, %v2319_v1 }
 0xe88   :  { %3838 = vmatmul.msk.f32.gmra.mxu3 %vm18_vm2, %v2320_v23 }
 0xeea   :  { %v2363_v22 = vpop.f32.mrf.mxu3 }
 0xeeb   :  { %v2377_v26 = vmul.f32 %v3980_v42, %v2363_v22 }
 0xeed   :  { %v5529_v27 = vadd.f32 %v3981_v4, %v2377_v26 }
 0xeef   :  { %v5532_v21 = vmul.f32 0.70710677, %v5529_v27 }
 0xef1   :  { %v2403_v51 = vand.u32 2147483647, %v5532_v21  ;;  %vm2395_vm14 = vcmp.ge.f32.partialorder %v5532_v21, 0.0 }
 0xef2   :  { %v2366_v46 = vpop.f32.mrf.mxu3 }
 0xef3   :  { %v2407_v31 = vmul.f32 0.3275911, %v2403_v51  ;;  %v2378_v60 = vmul.f32 %v3980_v42, %v2366_v46  ;;  %v2467_v16 = vsub.f32 0.0, %v2403_v51 }
 0xef5   :  { %v2411_v6 = vadd.f32 1.0, %v2407_v31  ;;  %v5535_v62 = vadd.f32 %v3981_v4, %v2378_v60  ;;  %v2471_v34 = vmul.f32 %v2467_v16, %v2403_v51  ;;  %v2399_v31 = vsel %vm2395_vm14, 1.0, %v4258_v59 }
 0xef7   :  { %4149 = vrcp.f32 %v2411_v6  ;;  %v5538_v33 = vmul.f32 0.70710677, %v5535_v62  ;;  %v2475_v14 = vmul.f32 1.442695, %v2471_v34 }
 0xef9   :  { %v2404_v63 = vand.u32 2147483647, %v5538_v33  ;;  %vm2396_vm15 = vcmp.ge.f32.partialorder %v5538_v33, 0.0 }
 0xefa   :  { %v2400_v34 = vsel %vm2396_vm15, 1.0, %v4258_v59 }
 0xefb   :  { %v2408_v40 = vmul.f32 0.3275911, %v2404_v63  ;;  %v2468_v58 = vsub.f32 0.0, %v2404_v63 }
 0xefd   :  { %v4150_v10 = vpop.eup %4149  ;;  %v2412_v15 = vadd.f32 1.0, %v2408_v40  ;;  %v2472_v8 = vmul.f32 %v2468_v58, %v2404_v63  ;;  %v2387_v40 = vmul.f32 0.5, %v5529_v27 }
 0xefe   :  { %v2419_v48 = vmul.f32 %v4150_v10, %v2411_v6 }
 0xeff   :  { %4151 = vrcp.f32 %v2412_v15  ;;  %v2477_v28 = vmul.f32 1.442695, %v2472_v8 }
 0xf00   :  { %v2423_v24 = vsub.f32 2.0, %v2419_v48  ;;  %4153 = vpow2.f32 %v2475_v14 }
 0xf02   :  { %v2427_v5 = vmul.f32 %v4150_v10, %v2423_v24 }
 0xf03   :  { %v2369_v11 = vpop.f32.mrf.mxu3 }
 0xf04   :  { %v2431_v50 = vmul.f32 1.0614054, %v2427_v5  ;;  %v2379_v39 = vmul.f32 %v3980_v42, %v2369_v11 }
 0xf05   :  { %v4152_v2 = vpop.eup %4151 }
 0xf06   :  { %v2420_v13 = vmul.f32 %v4152_v2, %v2412_v15  ;;  %v2435_v37 = vadd.f32 -1.4531521, %v2431_v50  ;;  %v5541_v12 = vadd.f32 %v3981_v4, %v2379_v39  ;;  %v4154_v25 = vpop.eup %4153 }
 0xf08   :  { %v2424_v32 = vsub.f32 2.0, %v2420_v13  ;;  %v2439_v45 = vmul.f32 %v2435_v37, %v2427_v5  ;;  %v5544_v56 = vmul.f32 0.70710677, %v5541_v12 }
 0xf0a   :  { %v2428_v19 = vmul.f32 %v4152_v2, %v2424_v32  ;;  %v2443_v41 = vadd.f32 1.4214138, %v2439_v45  ;;  %v2405_v49 = vand.u32 2147483647, %v5544_v56  ;;  %vm2397_vm0 = vcmp.ge.f32.partialorder %v5544_v56, 0.0 }
 0xf0b   :  { %v2372_v61 = vpop.f32.mrf.mxu3 }
 0xf0c   :  { %v2447_v3 = vmul.f32 %v2443_v41, %v2427_v5  ;;  %v2432_v54 = vmul.f32 1.0614054, %v2428_v19  ;;  %v2409_v36 = vmul.f32 0.3275911, %v2405_v49  ;;  %v2380_v53 = vmul.f32 %v3980_v42, %v2372_v61 }
 0xf0d   :  { %v2469_v24 = vsub.f32 0.0, %v2405_v49 }
 0xf0e   :  { %v2451_v44 = vadd.f32 -0.28449672, %v2447_v3  ;;  %v2436_v20 = vadd.f32 -1.4531521, %v2432_v54  ;;  %v2413_v18 = vadd.f32 1.0, %v2409_v36  ;;  %v5547_v52 = vadd.f32 %v3981_v4, %v2380_v53 }
 0xf0f   :  { %v2473_v32 = vmul.f32 %v2469_v24, %v2405_v49  ;;  %v3843_v24 = vld [vmem:[%s6136_s2 + $0x140] sm:$0xff] }
 0xf10   :  { %v2455_v57 = vmul.f32 %v2451_v44, %v2427_v5  ;;  %v2440_v9 = vmul.f32 %v2436_v20, %v2428_v19  ;;  %4155 = vrcp.f32 %v2413_v18  ;;  %v5550_v35 = vmul.f32 0.70710677, %v5547_v52 }
 0xf11   :  { %4157 = vpow2.f32 %v2477_v28 }
 0xf12   :  { %v2459_v43 = vadd.f32 0.2548296, %v2455_v57  ;;  %v2444_v55 = vadd.f32 1.4214138, %v2440_v9  ;;  %v2406_v7 = vand.u32 2147483647, %v5550_v35 }
 0xf13   :  { %vm2398_vm1 = vcmp.ge.f32.partialorder %v5550_v35, 0.0 }
 0xf14   :  { %v2463_v47 = vmul.f32 %v2459_v43, %v2427_v5  ;;  %v2448_v38 = vmul.f32 %v2444_v55, %v2428_v19  ;;  %v2410_v1 = vmul.f32 0.3275911, %v2406_v7  ;;  %v2470_v61 = vsub.f32 0.0, %v2406_v7 }
 0xf16   :  { %v2483_v23 = vmul.f32 %v4154_v25, %v2463_v47  ;;  %v2452_v42 = vadd.f32 -0.28449672, %v2448_v38  ;;  %v4156_v4 = vpop.eup %4155  ;;  %v2414_v22 = vadd.f32 1.0, %v2410_v1  ;;  %v2474_v20 = vmul.f32 %v2470_v61, %v2406_v7 }
 0xf17   :  { %v2421_v26 = vmul.f32 %v4156_v4, %v2413_v18  ;;  %v4158_v21 = vpop.eup %4157  ;;  %v2401_v25 = vsel %vm2397_vm0, 1.0, %v4258_v59 }
 0xf18   :  { %v2487_v51 = vsub.f32 1.0, %v2483_v23  ;;  %v2456_v46 = vmul.f32 %v2452_v42, %v2428_v19  ;;  %4159 = vrcp.f32 %v2414_v22  ;;  %v2481_v9 = vmul.f32 1.442695, %v2474_v20 }
 0xf19   :  { %v2425_v60 = vsub.f32 2.0, %v2421_v26  ;;  %v2389_v42 = vmul.f32 0.5, %v5541_v12  ;;  %v2390_v12 = vmul.f32 0.5, %v5547_v52  ;;  %v3848_v52 = vld [vmem:[%s6136_s2 + $0x168] sm:$0xff] }
 0xf1a   :  { %v2491_v6 = vmul.f32 %v2487_v51, %v2399_v31  ;;  %v2460_v63 = vadd.f32 0.2548296, %v2456_v46 }
 0xf1b   :  { %v2429_v10 = vmul.f32 %v4156_v4, %v2425_v60  ;;  %v2402_v60 = vsel %vm2398_vm1, 1.0, %v4258_v59 }
 0xf1c   :  { %v2495_v15 = vadd.f32 1.0, %v2491_v6  ;;  %v2464_v48 = vmul.f32 %v2460_v63, %v2428_v19  ;;  %v2388_v19 = vmul.f32 0.5, %v5535_v62 }
 0xf1d   :  { %v2433_v11 = vmul.f32 1.0614054, %v2429_v10 }
 0xf1e   :  { %v2499_v5 = vmul.f32 %v2495_v15, %v2387_v40  ;;  %v2484_v16 = vmul.f32 %v4158_v21, %v2464_v48  ;;  %v4160_v50 = vpop.eup %4159  ;;  %v3846_v15 = vld [vmem:[%s6136_s2 + $0x158] sm:$0xff]  ;;  %v3845_v48 = vld [vmem:[%s6136_s2 + $0x150] sm:$0xff]  ;;  %v3844_v21 = vld [vmem:[%s6136_s2 + $0x148] sm:$0xff] }
 0xf1f   :  { %v2422_v2 = vmul.f32 %v4160_v50, %v2414_v22  ;;  %v2437_v37 = vadd.f32 -1.4531521, %v2433_v11  ;;  %v3840_v11 = vld [vmem:[%s6136_s2 + $0x128] sm:$0xff] }
 0xf20   :  { %v2503_v39 = vadd.f32 %v2499_v5, %v5432_v0  ;;  %v2488_v13 = vsub.f32 1.0, %v2484_v16  ;;  %v2479_v0 = vmul.f32 1.442695, %v2473_v32  ;;  %v3842_v5 = vld [vmem:[%s6136_s2 + $0x138] sm:$0xff]  ;;  %v3841_v16 = vld [vmem:[%s6136_s2 + $0x130] sm:$0xff] }
 0xf21   :  { %v2426_v27 = vsub.f32 2.0, %v2422_v2  ;;  %v2441_v45 = vmul.f32 %v2437_v37, %v2429_v10 }
 0xf22   :  { %2531 = vrot.lane.b32.xlu0 %v2503_v39, %s4256_s6  ;;  %2507 = vst.msk [vmem:[#allocation2 + $0x3] sm:$0xff] %vm76_vm3, %v2503_v39  ;;  %2515 = vrot.lane.b32.xlu1 %v2503_v39, %s4257_s7  ;;  %v2492_v33 = vmul.f32 %v2488_v13, %v2400_v34  ;;  %4161 = vpow2.f32 %v2479_v0 }
 0xf23   :  { %v2430_v41 = vmul.f32 %v4160_v50, %v2426_v27  ;;  %v2445_v58 = vadd.f32 1.4214138, %v2441_v45  ;;  %4163 = vpow2.f32 %v2481_v9  ;;  %v3839_v50 = vld [vmem:[%s6136_s2 + $0x120] sm:$0xff] }
 0xf24   :  { %v2496_v14 = vadd.f32 1.0, %v2492_v33 }
 0xf25   :  { %v2449_v54 = vmul.f32 %v2445_v58, %v2429_v10  ;;  %v2434_v36 = vmul.f32 1.0614054, %v2430_v41  ;;  %v3982_v58 = vld [vmem:[%s6137_s3 + $0x33] ss:$0 sm:$0xff] }
 0xf26   :  { %v2500_v3 = vmul.f32 %v2496_v14, %v2388_v19 }
 0xf27   :  { %v2453_v53 = vadd.f32 -0.28449672, %v2449_v54  ;;  %v2438_v44 = vadd.f32 -1.4531521, %v2434_v36 }
 0xf28   :  { %v2504_v49 = vadd.f32 %v2500_v3, %v5443_v30  ;;  %v4162_v28 = vpop.eup %4161 }
 0xf29   :  { %v2457_v62 = vmul.f32 %v2453_v53, %v2429_v10  ;;  %v2442_v8 = vmul.f32 %v2438_v44, %v2430_v41  ;;  %v4164_v26 = vpop.eup %4163 }
 0xf2a   :  { %2533 = vrot.lane.b32.xlu1 %v2504_v49, %s4256_s6  ;;  %2508 = vst.msk [vmem:[#allocation2 + $0xb] sm:$0x1f] %vm78_vm4, %v2504_v49  ;;  %2517 = vrot.lane.b32.xlu2 %v2504_v49, %s4257_s7 }
 0xf2b   :  { %v2461_v18 = vadd.f32 0.2548296, %v2457_v62  ;;  %v2446_v57 = vadd.f32 1.4214138, %v2442_v8 }
 0xf2d   :  { %v2465_v43 = vmul.f32 %v2461_v18, %v2429_v10  ;;  %v2450_v55 = vmul.f32 %v2446_v57, %v2430_v41  ;;  %v3849_v10 = vld [vmem:[%s6136_s2 + $0x170] sm:$0xff] }
 0xf2f   :  { %v2485_v30 = vmul.f32 %v4162_v28, %v2465_v43  ;;  %v2454_v47 = vadd.f32 -0.28449672, %v2450_v55 }
 0xf31   :  { %v2489_v7 = vsub.f32 1.0, %v2485_v30  ;;  %v2458_v38 = vmul.f32 %v2454_v47, %v2430_v41 }
 0xf33   :  { %v2493_v1 = vmul.f32 %v2489_v7, %v2401_v25  ;;  %v2462_v23 = vadd.f32 0.2548296, %v2458_v38 }
 0xf35   :  { %v2497_v4 = vadd.f32 1.0, %v2493_v1  ;;  %v2466_v22 = vmul.f32 %v2462_v23, %v2430_v41 }
 0xf37   :  { %v2501_v51 = vmul.f32 %v2497_v4, %v2389_v42  ;;  %v2486_v46 = vmul.f32 %v4164_v26, %v2466_v22 }
 0xf39   :  { %v2505_v56 = vadd.f32 %v2501_v51, %v5456_v29  ;;  %v2490_v31 = vsub.f32 1.0, %v2486_v46  ;;  %v3850_v29 = vld [vmem:[%s6136_s2 + $0x178] sm:$0xff] }
 0xf3a   :  { %2582 = vmatpush.msrb.mxu0 %v3850_v29 }
 0xf3b   :  { %2539 = vrot.lane.b32.xlu1 %v2505_v56, %s4256_s6  ;;  %2509 = vst.msk [vmem:[#allocation2 + $0x13] sm:$0xff] %vm76_vm3, %v2505_v56  ;;  %2519 = vrot.lane.b32.xlu2 %v2505_v56, %s4257_s7  ;;  %v2494_v6 = vmul.f32 %v2490_v31, %v2402_v60 }
 0xf3c   :  { %2583 = vmatpush.msrb.mxu0 %v3849_v10 }
 0xf3d   :  { %v2498_v63 = vadd.f32 1.0, %v2494_v6 }
 0xf3e   :  { %2584 = vmatpush.msrb.mxu0 %v3848_v52 }
 0xf3f   :  { %v2502_v40 = vmul.f32 %v2498_v63, %v2390_v12 }
 0xf41   :  { %v2506_v35 = vadd.f32 %v2502_v40, %v5467_v17  ;;  %v3847_v17 = vld [vmem:[%s6136_s2 + $0x160] sm:$0xff] }
 0xf42   :  { %2585 = vmatpush.msrb.mxu0 %v3847_v17 }
 0xf43   :  { %2541 = vrot.lane.b32.xlu2 %v2506_v35, %s4256_s6  ;;  %2510 = vst.msk [vmem:[#allocation2 + $0x1b] sm:$0x1f] %vm78_vm4, %v2506_v35  ;;  %2521 = vrot.lane.b32.xlu0 %v2506_v35, %s4257_s7 }
 0xf44   :  { %2586 = vmatpush.msrb.mxu0 %v3846_v15 }
 0xf46   :  { %2587 = vmatpush.msrb.mxu0 %v3845_v48 }
 0xf48   :  { %2588 = vmatpush.msrb.mxu0 %v3844_v21 }
 0xf4a   :  { %2589 = vmatpush.msrb.mxu0 %v3843_v24 }
 0xf4c   :  { %2590 = vmatpush.msrb.mxu0 %v3842_v5 }
 0xf4e   :  { %2591 = vmatpush.msrb.mxu0 %v3841_v16 }
 0xf50   :  { %2592 = vmatpush.msrb.mxu0 %v3840_v11 }
 0xf52   :  { %2593 = vmatpush.msrb.mxu0 %v3839_v50 }
 0xf84   :  { %v2518_v2 = vpop.permute.xlu2 %2517 }
 0xf85   :  { %2528 = vst.msk [vmem:[#allocation2 + $0x8] sm:$0xff] %vm98_vm5, %v2518_v2 }
 0xf94   :  { %v2532_v39 = vpop.permute.xlu0 %2531  ;;  %v2516_v13 = vpop.permute.xlu1 %2515 }
 0xf95   :  { %2527 = vst.msk [vmem:[#allocation2] sm:$0xff] %vm98_vm5, %v2516_v13  ;;  %v2520_v37 = vpop.permute.xlu2 %2519 }
 0xf96   :  { %2537 = vst.msk [vmem:[#allocation2 - $0x3] sm:$0xf8] %vm109_vm6, %v2532_v39 }
 0xf97   :  { %2529 = vst.msk [vmem:[#allocation2 + $0x10] sm:$0xff] %vm98_vm5, %v2520_v37 }
 0xf9c   :  { %v2534_v34 = vpop.permute.xlu1 %2533 }
 0xf9d   :  { %2538 = vst.msk [vmem:[#allocation2 + $0x5] sm:$0xff] %vm111_vm7, %v2534_v34  ;;  %v2542_v19 = vpop.permute.xlu2 %2541 }
 0xfa4   :  { %v2547_v32 = vld [vmem:[#allocation2] sm:$0xff]  ;;  %v2548_v27 = vld [vmem:[#allocation2 + $0x8] sm:$0xff] }
 0xfa5   :  { %3851 = vmatmul.msk.f32.vlgmr.msrb.gmra.mxu0 %vm18_vm2, %v2547_v32 }
 0xfad   :  { %3852 = vmatmul.msk.f32.gmra.mxu0 %vm18_vm2, %v2548_v27  ;;  %v2540_v33 = vpop.permute.xlu1 %2539 }
 0xfae   :  { %2545 = vst.msk [vmem:[#allocation2 + $0xd] sm:$0xf8] %vm109_vm6, %v2540_v33 }
 0xfb5   :  { %v2522_v45 = vpop.permute.xlu0 %2521 }
 0xfb6   :  { %2530 = vst.msk [vmem:[#allocation2 + $0x18] sm:$0xff] %vm98_vm5, %v2522_v45 }
 0xfb7   :  { %2546 = vst.msk [vmem:[#allocation2 + $0x15] sm:$0xff] %vm111_vm7, %v2542_v19 }
 0xfbe   :  { %v2549_v41 = vld [vmem:[#allocation2 + $0x10] sm:$0xff]  ;;  %v2550_v14 = vld [vmem:[#allocation2 + $0x18] sm:$0xff] }
 0xfbf   :  { %3853 = vmatmul.msk.f32.gmra.mxu0 %vm18_vm2, %v2549_v41 }
 0xfc7   :  { %3854 = vmatmul.msk.f32.gmra.mxu0 %vm18_vm2, %v2550_v14 }
0x1022   :  { %v2595_v0 = vpop.f32.mrf.mxu0 }
0x1023   :  { %v5632_v61 = vadd.f32 %v3982_v58, %v2595_v0 }
0x1025   :  { %v3855_v3 = vmul.f32 -1.442695, %v5632_v61 }
0x1027   :  { %4165 = vpow2.f32 %v3855_v3 }
0x102a   :  { %v2598_v54 = vpop.f32.mrf.mxu0 }
0x102b   :  { %v5635_v36 = vadd.f32 %v3982_v58, %v2598_v54 }
0x102d   :  { %v4166_v49 = vpop.eup %4165  ;;  %v3856_v53 = vmul.f32 -1.442695, %v5635_v36 }
0x102e   :  { %v2619_v44 = vadd.f32 1.0, %v4166_v49 }
0x102f   :  { %4167 = vpow2.f32 %v3856_v53  ;;  %v3869_v53 = vld [vmem:[%s6135_s1 + $0x350] sm:$0xff] }
0x1030   :  { %4169 = vrcp.f32 %v2619_v44  ;;  %v2634_v9 = vand.u32 2147483648, %v2619_v44  ;;  %v2632_v55 = vand.u32 2147483647, %v2619_v44  ;;  %vm2628_vm9 = vweird.f32 %v2619_v44 }
0x1032   :  { %v2635_v38 = vor.u32 1.1754944e-38, %v2634_v9  ;;  %vm2633_vm11 = vcmp.eq.f32.partialorder %v2632_v55, 8.507059e+37  ;;  %v3862_v9 = vld [vmem:[%s6135_s1 + $0x318] sm:$0xff]  ;;  %v3860_v55 = vld [vmem:[%s6135_s1 + $0x308] sm:$0xff] }
0x1035   :  { %v4168_v20 = vpop.eup %4167 }
0x1036   :  { %v4170_v62 = vpop.eup %4169  ;;  %v2620_v8 = vadd.f32 1.0, %v4168_v20  ;;  %v3867_v20 = vld [vmem:[%s6135_s1 + $0x340] sm:$0xff] }
0x1037   :  { %v2624_v18 = vmul.f32 %v4170_v62, %v2619_v44  ;;  %vm2629_vm8 = vweird.f32 %v4170_v62  ;;  %v3868_v44 = vld [vmem:[%s6135_s1 + $0x348] sm:$0xff] }
0x1038   :  { %4171 = vrcp.f32 %v2620_v8  ;;  %vm2630_vm10 = vmor %vm2628_vm9, %vm2629_vm8  ;;  %v2649_v22 = vand.u32 2147483648, %v2620_v8  ;;  %v2647_v51 = vand.u32 2147483647, %v2620_v8  ;;  %vm2643_vm13 = vweird.f32 %v2620_v8 }
0x1039   :  { %v2625_v57 = vsub.f32 1.0, %v2624_v18  ;;  %v3864_v18 = vld [vmem:[%s6135_s1 + $0x328] sm:$0xff] }
0x103a   :  { %v2650_v60 = vor.u32 1.1754944e-38, %v2649_v22  ;;  %vm2648_vm15 = vcmp.eq.f32.partialorder %v2647_v51, 8.507059e+37 }
0x103b   :  { %v2626_v43 = vmul.f32 %v4170_v62, %v2625_v57  ;;  %v3863_v57 = vld [vmem:[%s6135_s1 + $0x320] sm:$0xff] }
0x103c   :  { %v2601_v28 = vpop.f32.mrf.mxu0 }
0x103d   :  { %v2627_v30 = vadd.f32 %v4170_v62, %v2626_v43  ;;  %v5638_v7 = vadd.f32 %v3982_v58, %v2601_v28  ;;  %v3861_v43 = vld [vmem:[%s6135_s1 + $0x310] sm:$0xff]  ;;  %v3859_v28 = vld [vmem:[%s6135_s1 + $0x300] sm:$0xff] }
0x103e   :  { %v4172_v47 = vpop.eup %4171 }
0x103f   :  { %v2631_v25 = vsel %vm2630_vm10, %v4170_v62, %v2627_v30  ;;  %v2639_v1 = vmul.f32 %v4172_v47, %v2620_v8  ;;  %v3857_v23 = vmul.f32 -1.442695, %v5638_v7  ;;  %vm2644_vm12 = vweird.f32 %v4172_v47  ;;  %v3866_v62 = vld [vmem:[%s6135_s1 + $0x338] sm:$0xff]  ;;  %v3865_v8 = vld [vmem:[%s6135_s1 + $0x330] sm:$0xff] }
0x1040   :  { %v2636_v42 = vsel %vm2633_vm11, %v2635_v38, %v2631_v25  ;;  %vm2645_vm14 = vmor %vm2643_vm13, %vm2644_vm12 }
0x1041   :  { %2687 = vrot.lane.b32.xlu0 %v2636_v42, %s4259_s9  ;;  %v2640_v4 = vsub.f32 1.0, %v2639_v1  ;;  %4173 = vpow2.f32 %v3857_v23 }
0x1043   :  { %v2641_v26 = vmul.f32 %v4172_v47, %v2640_v4 }
0x1044   :  { %v2604_v46 = vpop.f32.mrf.mxu0 }
0x1045   :  { %v2642_v56 = vadd.f32 %v4172_v47, %v2641_v26  ;;  %v2605_v31 = vadd.f32 %v3982_v58, %v2604_v46  ;;  %v3983_v46 = vld [vmem:[%s6137_s3 + $0x18] ss:$0 sm:$0xff] }
0x1047   :  { %v2646_v6 = vsel %vm2645_vm14, %v4172_v47, %v2642_v56  ;;  %v4174_v12 = vpop.eup %4173  ;;  %v3858_v63 = vmul.f32 -1.442695, %v2605_v31  ;;  %v3984_v56 = vld [vmem:[%s6137_s3 + $0x28] ss:$0 sm:$0xff] }
0x1048   :  { %v2651_v40 = vsel %vm2648_vm15, %v2650_v60, %v2646_v6  ;;  %v2621_v35 = vadd.f32 1.0, %v4174_v12 }
0x1049   :  { %2689 = vrot.lane.b32.xlu1 %v2651_v40, %s4259_s9  ;;  %4175 = vpow2.f32 %v3858_v63 }
0x104a   :  { %4177 = vrcp.f32 %v2621_v35  ;;  %v2664_v48 = vand.u32 2147483648, %v2621_v35  ;;  %v2662_v24 = vand.u32 2147483647, %v2621_v35  ;;  %vm2658_vm1 = vweird.f32 %v2621_v35 }
0x104c   :  { %v2665_v11 = vor.u32 1.1754944e-38, %v2664_v48  ;;  %vm2663_vm9 = vcmp.eq.f32.partialorder %v2662_v24, 8.507059e+37 }
0x104f   :  { %v4176_v29 = vpop.eup %4175 }
0x1050   :  { %v4178_v10 = vpop.eup %4177  ;;  %v2622_v52 = vadd.f32 1.0, %v4176_v29 }
0x1051   :  { %v2654_v17 = vmul.f32 %v4178_v10, %v2621_v35  ;;  %vm2659_vm0 = vweird.f32 %v4178_v10 }
0x1052   :  { %4179 = vrcp.f32 %v2622_v52  ;;  %vm2660_vm8 = vmor %vm2658_vm1, %vm2659_vm0  ;;  %v2679_v37 = vand.u32 2147483648, %v2622_v52  ;;  %v2677_v32 = vand.u32 2147483647, %v2622_v52  ;;  %vm2673_vm11 = vweird.f32 %v2622_v52 }
0x1053   :  { %v2655_v15 = vsub.f32 1.0, %v2654_v17 }
0x1054   :  { %v2680_v33 = vor.u32 1.1754944e-38, %v2679_v37  ;;  %vm2678_vm13 = vcmp.eq.f32.partialorder %v2677_v32, 8.507059e+37 }
0x1055   :  { %v2656_v21 = vmul.f32 %v4178_v10, %v2655_v15 }
0x1057   :  { %v2657_v5 = vadd.f32 %v4178_v10, %v2656_v21 }
0x1058   :  { %v4180_v16 = vpop.eup %4179 }
0x1059   :  { %v2661_v50 = vsel %vm2660_vm8, %v4178_v10, %v2657_v5  ;;  %v2669_v2 = vmul.f32 %v4180_v16, %v2622_v52  ;;  %vm2674_vm10 = vweird.f32 %v4180_v16 }
0x105a   :  { %v2666_v39 = vsel %vm2663_vm9, %v2665_v11, %v2661_v50  ;;  %vm2675_vm12 = vmor %vm2673_vm11, %vm2674_vm10 }
0x105b   :  { %2691 = vrot.lane.b32.xlu2 %v2666_v39, %s4259_s9  ;;  %v2670_v13 = vsub.f32 1.0, %v2669_v2 }
0x105d   :  { %v2671_v34 = vmul.f32 %v4180_v16, %v2670_v13 }
0x105f   :  { %v2672_v27 = vadd.f32 %v4180_v16, %v2671_v34 }
0x1061   :  { %v2676_v45 = vsel %vm2675_vm12, %v4180_v16, %v2672_v27 }
0x1062   :  { %v2681_v19 = vsel %vm2678_vm13, %v2680_v33, %v2676_v45 }
0x1063   :  { %2693 = vrot.lane.b32.xlu0 %v2681_v19, %s4259_s9 }
0x10b3   :  { %v2688_v41 = vpop.permute.xlu0 %2687 }
0x10b4   :  { %v5646_v14 = vmul.f32 %v2688_v41, %v5632_v61 }
0x10b5   :  { %v2692_v58 = vpop.permute.xlu2 %2691 }
0x10b6   :  { %2703 = vst.msk [vmem:[#allocation2 + $0x3] sm:$0xff] %vm76_vm3, %v5646_v14  ;;  %2711 = vrot.lane.b32.xlu1 %v5646_v14, %s4257_s7  ;;  %2727 = vrot.lane.b32.xlu0 %v5646_v14, %s4256_s6  ;;  %v5655_v0 = vmul.f32 %v2692_v58, %v5638_v7 }
0x10b8   :  { %2705 = vst.msk [vmem:[#allocation2 + $0x13] sm:$0xff] %vm76_vm3, %v5655_v0 }
0x10bb   :  { %v2690_v3 = vpop.permute.xlu1 %2689 }
0x10bc   :  { %v5660_v61 = vmul.f32 %v2690_v3, %v5635_v36  ;;  %v3870_v36 = vld [vmem:[%s6135_s1 + $0x358] sm:$0xff] }
0x10bd   :  { %2776 = vmatpush.msra.mxu1 %v3870_v36 }
0x10be   :  { %2704 = vst.msk [vmem:[#allocation2 + $0xb] sm:$0x1f] %vm78_vm4, %v5660_v61  ;;  %2729 = vrot.lane.b32.xlu1 %v5660_v61, %s4256_s6  ;;  %2713 = vrot.lane.b32.xlu2 %v5660_v61, %s4257_s7 }
0x10bf   :  { %2777 = vmatpush.msra.mxu1 %v3869_v53 }
0x10c1   :  { %2778 = vmatpush.msra.mxu1 %v3868_v44 }
0x10c3   :  { %2779 = vmatpush.msra.mxu1 %v3867_v20 }
0x10c5   :  { %2780 = vmatpush.msra.mxu1 %v3866_v62 }
0x10c6   :  { %2735 = vrot.lane.b32.xlu1 %v5655_v0, %s4256_s6  ;;  %2715 = vrot.lane.b32.xlu2 %v5655_v0, %s4257_s7 }
0x10c7   :  { %2781 = vmatpush.msra.mxu1 %v3865_v8 }
0x10c9   :  { %2782 = vmatpush.msra.mxu1 %v3864_v18 }
0x10cb   :  { %2783 = vmatpush.msra.mxu1 %v3863_v57 }
0x10cd   :  { %2784 = vmatpush.msra.mxu1 %v3862_v9 }
0x10cf   :  { %2785 = vmatpush.msra.mxu1 %v3861_v43 }
0x10d1   :  { %2786 = vmatpush.msra.mxu1 %v3860_v55 }
0x10d3   :  { %2787 = vmatpush.msra.mxu1 %v3859_v28 }
0x10d5   :  { %v2694_v54 = vpop.permute.xlu0 %2693 }
0x10d6   :  { %v5672_v49 = vmul.f32 %v2694_v54, %v2605_v31 }
0x10d8   :  { %2706 = vst.msk [vmem:[#allocation2 + $0x1b] sm:$0x1f] %vm78_vm4, %v5672_v49  ;;  %2717 = vrot.lane.b32.xlu0 %v5672_v49, %s4257_s7  ;;  %2737 = vrot.lane.b32.xlu2 %v5672_v49, %s4256_s6 }
0x1118   :  { %v2714_v30 = vpop.permute.xlu2 %2713 }
0x1119   :  { %2724 = vst.msk [vmem:[#allocation2 + $0x8] sm:$0xff] %vm98_vm5, %v2714_v30 }
0x1120   :  { %v2716_v47 = vpop.permute.xlu2 %2715 }
0x1121   :  { %2725 = vst.msk [vmem:[#allocation2 + $0x10] sm:$0xff] %vm98_vm5, %v2716_v47 }
0x1128   :  { %v2712_v7 = vpop.permute.xlu1 %2711  ;;  %v2728_v38 = vpop.permute.xlu0 %2727 }
0x1129   :  { %2723 = vst.msk [vmem:[#allocation2] sm:$0xff] %vm98_vm5, %v2712_v7 }
0x112a   :  { %2733 = vst.msk [vmem:[#allocation2 - $0x3] sm:$0xf8] %vm109_vm6, %v2728_v38 }
0x1130   :  { %v2730_v25 = vpop.permute.xlu1 %2729 }
0x1131   :  { %2734 = vst.msk [vmem:[#allocation2 + $0x5] sm:$0xff] %vm111_vm7, %v2730_v25 }
0x1132   :  { %v2738_v22 = vpop.permute.xlu2 %2737 }
0x1138   :  { %v2736_v1 = vpop.permute.xlu1 %2735  ;;  %v2743_v23 = vld [vmem:[#allocation2] sm:$0xff]  ;;  %v2744_v42 = vld [vmem:[#allocation2 + $0x8] sm:$0xff] }
0x1139   :  { %2741 = vst.msk [vmem:[#allocation2 + $0xd] sm:$0xf8] %vm109_vm6, %v2736_v1  ;;  %3871 = vmatmul.msk.f32.vlgmr.msra.gmra.mxu1 %vm18_vm2, %v2743_v23 }
0x1141   :  { %3872 = vmatmul.msk.f32.gmra.mxu1 %vm18_vm2, %v2744_v42 }
0x114a   :  { %v2718_v4 = vpop.permute.xlu0 %2717 }
0x114b   :  { %2726 = vst.msk [vmem:[#allocation2 + $0x18] sm:$0xff] %vm98_vm5, %v2718_v4 }
0x114c   :  { %2742 = vst.msk [vmem:[#allocation2 + $0x15] sm:$0xff] %vm111_vm7, %v2738_v22 }
0x1153   :  { %v2745_v26 = vld [vmem:[#allocation2 + $0x10] sm:$0xff]  ;;  %v2746_v51 = vld [vmem:[#allocation2 + $0x18] sm:$0xff] }
0x1154   :  { %3873 = vmatmul.msk.f32.gmra.mxu1 %vm18_vm2, %v2745_v26 }
0x115c   :  { %3874 = vmatmul.msk.f32.gmra.mxu1 %vm18_vm2, %v2746_v51 }
0x11b6   :  { %v2789_v31 = vpop.f32.mrf.mxu1 }
0x11b7   :  { %v2803_v60 = vmul.f32 %v3983_v46, %v2789_v31 }
0x11b9   :  { %v5734_v6 = vadd.f32 %v3984_v56, %v2803_v60 }
0x11bb   :  { %v5737_v12 = vmul.f32 0.70710677, %v5734_v6 }
0x11bd   :  { %v2829_v63 = vand.u32 2147483647, %v5737_v12  ;;  %vm2821_vm14 = vcmp.ge.f32.partialorder %v5737_v12, 0.0 }
0x11be   :  { %v2792_v40 = vpop.f32.mrf.mxu1 }
0x11bf   :  { %v2833_v35 = vmul.f32 0.3275911, %v2829_v63  ;;  %v2804_v29 = vmul.f32 %v3983_v46, %v2792_v40  ;;  %v2893_v50 = vsub.f32 0.0, %v2829_v63 }
0x11c1   :  { %v2837_v10 = vadd.f32 1.0, %v2833_v35  ;;  %v5740_v52 = vadd.f32 %v3984_v56, %v2804_v29  ;;  %v2897_v32 = vmul.f32 %v2893_v50, %v2829_v63  ;;  %v2825_v63 = vsel %vm2821_vm14, 1.0, %v4258_v59 }
0x11c3   :  { %4181 = vrcp.f32 %v2837_v10  ;;  %v5743_v17 = vmul.f32 0.70710677, %v5740_v52  ;;  %v2901_v3 = vmul.f32 1.442695, %v2897_v32 }
0x11c5   :  { %v2830_v15 = vand.u32 2147483647, %v5743_v17  ;;  %vm2822_vm15 = vcmp.ge.f32.partialorder %v5743_v17, 0.0 }
0x11c7   :  { %v2834_v48 = vmul.f32 0.3275911, %v2830_v15  ;;  %v2894_v54 = vsub.f32 0.0, %v2830_v15 }
0x11c9   :  { %v4182_v21 = vpop.eup %4181  ;;  %v2838_v24 = vadd.f32 1.0, %v2834_v48  ;;  %v2898_v57 = vmul.f32 %v2894_v54, %v2830_v15  ;;  %v2813_v15 = vmul.f32 0.5, %v5734_v6 }
0x11ca   :  { %v2845_v5 = vmul.f32 %v4182_v21, %v2837_v10 }
0x11cb   :  { %4183 = vrcp.f32 %v2838_v24  ;;  %v2903_v25 = vmul.f32 1.442695, %v2898_v57 }
0x11cc   :  { %v2849_v16 = vsub.f32 2.0, %v2845_v5  ;;  %4185 = vpow2.f32 %v2901_v3 }
0x11ce   :  { %v2853_v11 = vmul.f32 %v4182_v21, %v2849_v16 }
0x11d0   :  { %v2857_v2 = vmul.f32 1.0614054, %v2853_v11 }
0x11d1   :  { %v4184_v39 = vpop.eup %4183  ;;  %v2795_v34 = vpop.f32.mrf.mxu1 }
0x11d2   :  { %v2861_v13 = vadd.f32 -1.4531521, %v2857_v2  ;;  %v2846_v37 = vmul.f32 %v4184_v39, %v2838_v24  ;;  %v2805_v27 = vmul.f32 %v3983_v46, %v2795_v34  ;;  %v4186_v4 = vpop.eup %4185  ;;  %v2826_v34 = vsel %vm2822_vm15, 1.0, %v4258_v59 }
0x11d4   :  { %v2865_v33 = vmul.f32 %v2861_v13, %v2853_v11  ;;  %v2850_v45 = vsub.f32 2.0, %v2846_v37  ;;  %v5746_v19 = vadd.f32 %v3984_v56, %v2805_v27 }
0x11d6   :  { %v2869_v41 = vadd.f32 1.4214138, %v2865_v33  ;;  %v2854_v58 = vmul.f32 %v4184_v39, %v2850_v45  ;;  %v5749_v36 = vmul.f32 0.70710677, %v5746_v19  ;;  %v2814_v33 = vmul.f32 0.5, %v5740_v52 }
0x11d8   :  { %v2873_v53 = vmul.f32 %v2869_v41, %v2853_v11  ;;  %v2858_v44 = vmul.f32 1.0614054, %v2854_v58  ;;  %v2831_v20 = vand.u32 2147483647, %v5749_v36  ;;  %vm2823_vm0 = vcmp.ge.f32.partialorder %v5749_v36, 0.0 }
0x11d9   :  { %v2798_v18 = vpop.f32.mrf.mxu1 }
0x11da   :  { %v2877_v62 = vadd.f32 -0.28449672, %v2873_v53  ;;  %v2862_v8 = vadd.f32 -1.4531521, %v2858_v44  ;;  %v2835_v9 = vmul.f32 0.3275911, %v2831_v20  ;;  %v2806_v43 = vmul.f32 %v3983_v46, %v2798_v18 }
0x11db   :  { %v2895_v50 = vsub.f32 0.0, %v2831_v20 }
0x11dc   :  { %v2881_v55 = vmul.f32 %v2877_v62, %v2853_v11  ;;  %v2866_v28 = vmul.f32 %v2862_v8, %v2854_v58  ;;  %v2839_v30 = vadd.f32 1.0, %v2835_v9  ;;  %v5752_v47 = vadd.f32 %v3984_v56, %v2806_v43 }
0x11dd   :  { %v2899_v17 = vmul.f32 %v2895_v50, %v2831_v20  ;;  %v3877_v50 = vld [vmem:[%s6135_s1 + $0x370] sm:$0xff] }
0x11de   :  { %v2885_v7 = vadd.f32 0.2548296, %v2881_v55  ;;  %v2870_v38 = vadd.f32 1.4214138, %v2866_v28  ;;  %4187 = vrcp.f32 %v2839_v30  ;;  %v5755_v1 = vmul.f32 0.70710677, %v5752_v47 }
0x11df   :  { %4189 = vpow2.f32 %v2903_v25  ;;  %v2905_v53 = vmul.f32 1.442695, %v2899_v17 }
0x11e0   :  { %v2889_v23 = vmul.f32 %v2885_v7, %v2853_v11  ;;  %v2874_v42 = vmul.f32 %v2870_v38, %v2854_v58  ;;  %v2832_v22 = vand.u32 2147483647, %v5755_v1  ;;  %vm2824_vm1 = vcmp.ge.f32.partialorder %v5755_v1, 0.0 }
0x11e2   :  { %v2909_v26 = vmul.f32 %v4186_v4, %v2889_v23  ;;  %v2878_v51 = vadd.f32 -0.28449672, %v2874_v42  ;;  %v2836_v46 = vmul.f32 0.3275911, %v2832_v22  ;;  %v2896_v44 = vsub.f32 0.0, %v2832_v22 }
0x11e4   :  { %v2913_v56 = vsub.f32 1.0, %v2909_v26  ;;  %v2882_v31 = vmul.f32 %v2878_v51, %v2854_v58  ;;  %v4188_v60 = vpop.eup %4187  ;;  %v2840_v40 = vadd.f32 1.0, %v2836_v46  ;;  %v2900_v52 = vmul.f32 %v2896_v44, %v2832_v22 }
0x11e5   :  { %v2847_v10 = vmul.f32 %v4188_v60, %v2839_v30  ;;  %v4190_v12 = vpop.eup %4189  ;;  %v2827_v26 = vsel %vm2823_vm0, 1.0, %v4258_v59  ;;  %v2815_v22 = vmul.f32 0.5, %v5746_v19  ;;  %v2816_v19 = vmul.f32 0.5, %v5752_v47  ;;  %v3885_v47 = vld [vmem:[%s6135_s1 + $0x3b0] sm:$0xff] }
0x11e6   :  { %v2917_v35 = vmul.f32 %v2913_v56, %v2825_v63  ;;  %v2886_v29 = vadd.f32 0.2548296, %v2882_v31  ;;  %4191 = vrcp.f32 %v2840_v40  ;;  %v2907_v30 = vmul.f32 1.442695, %v2900_v52 }
0x11e7   :  { %v2851_v24 = vsub.f32 2.0, %v2847_v10  ;;  %4193 = vpow2.f32 %v2905_v53  ;;  %v3986_v53 = vld [vmem:[%s6137_s3 + $0x29] ss:$0 sm:$0xff] }
0x11e8   :  { %v2921_v48 = vadd.f32 1.0, %v2917_v35  ;;  %v2890_v21 = vmul.f32 %v2886_v29, %v2854_v58  ;;  %4195 = vpow2.f32 %v2907_v30  ;;  %v2828_v29 = vsel %vm2824_vm1, 1.0, %v4258_v59 }
0x11e9   :  { %v2855_v11 = vmul.f32 %v4188_v60, %v2851_v24  ;;  %v3882_v24 = vld [vmem:[%s6135_s1 + $0x398] sm:$0xff] }
0x11ea   :  { %v2925_v5 = vmul.f32 %v2921_v48, %v2813_v15  ;;  %v2910_v16 = vmul.f32 %v4190_v12, %v2890_v21  ;;  %v3883_v21 = vld [vmem:[%s6135_s1 + $0x3a0] sm:$0xff]  ;;  %v3881_v12 = vld [vmem:[%s6135_s1 + $0x390] sm:$0xff] }
0x11eb   :  { %v2859_v39 = vmul.f32 1.0614054, %v2855_v11 }
0x11ec   :  { %v2914_v2 = vsub.f32 1.0, %v2910_v16  ;;  %v5763_v13 = vadd.f32 %v2925_v5, %v5646_v14  ;;  %v4192_v37 = vpop.eup %4191  ;;  %v3880_v5 = vld [vmem:[%s6135_s1 + $0x388] sm:$0xff]  ;;  %v3879_v16 = vld [vmem:[%s6135_s1 + $0x380] sm:$0xff] }
0x11ed   :  { %v2863_v6 = vadd.f32 -1.4531521, %v2859_v39  ;;  %v2848_v27 = vmul.f32 %v4192_v37, %v2840_v40  ;;  %v4194_v38 = vpop.eup %4193  ;;  %v3875_v39 = vld [vmem:[%s6135_s1 + $0x360] sm:$0xff] }
0x11ee   :  { %v2918_v32 = vmul.f32 %v2914_v2, %v2826_v34  ;;  %2957 = vrot.lane.b32.xlu2 %v5763_v13, %s4256_s6  ;;  %2933 = vst.msk [vmem:[#allocation2 + $0x3] sm:$0xff] %vm76_vm3, %v5763_v13  ;;  %2941 = vrot.lane.b32.xlu0 %v5763_v13, %s4257_s7  ;;  %v4196_v60 = vpop.eup %4195  ;;  %v3876_v2 = vld [vmem:[%s6135_s1 + $0x368] sm:$0xff] }
0x11ef   :  { %v2867_v45 = vmul.f32 %v2863_v6, %v2855_v11  ;;  %v2852_v41 = vsub.f32 2.0, %v2848_v27 }
0x11f0   :  { %v2922_v14 = vadd.f32 1.0, %v2918_v32 }
0x11f1   :  { %v2871_v3 = vadd.f32 1.4214138, %v2867_v45  ;;  %v2856_v54 = vmul.f32 %v4192_v37, %v2852_v41 }
0x11f2   :  { %v2926_v58 = vmul.f32 %v2922_v14, %v2814_v33 }
0x11f3   :  { %v2875_v62 = vmul.f32 %v2871_v3, %v2855_v11  ;;  %v2860_v8 = vmul.f32 1.0614054, %v2856_v54 }
0x11f4   :  { %v5774_v18 = vadd.f32 %v2926_v58, %v5660_v61 }
0x11f5   :  { %v2879_v57 = vadd.f32 -0.28449672, %v2875_v62  ;;  %v2864_v9 = vadd.f32 -1.4531521, %v2860_v8 }
0x11f6   :  { %2959 = vrot.lane.b32.xlu0 %v5774_v18, %s4256_s6  ;;  %2934 = vst.msk [vmem:[#allocation2 + $0xb] sm:$0x1f] %vm78_vm4, %v5774_v18  ;;  %2943 = vrot.lane.b32.xlu1 %v5774_v18, %s4257_s7 }
0x11f7   :  { %v2883_v20 = vmul.f32 %v2879_v57, %v2855_v11  ;;  %v2868_v43 = vmul.f32 %v2864_v9, %v2856_v54 }
0x11f9   :  { %v2887_v55 = vadd.f32 0.2548296, %v2883_v20  ;;  %v2872_v28 = vadd.f32 1.4214138, %v2868_v43 }
0x11fb   :  { %v2891_v61 = vmul.f32 %v2887_v55, %v2855_v11  ;;  %v2876_v7 = vmul.f32 %v2872_v28, %v2856_v54  ;;  %v3878_v11 = vld [vmem:[%s6135_s1 + $0x378] sm:$0xff] }
0x11fd   :  { %v2911_v25 = vmul.f32 %v4194_v38, %v2891_v61  ;;  %v2880_v23 = vadd.f32 -0.28449672, %v2876_v7 }
0x11ff   :  { %v2915_v42 = vsub.f32 1.0, %v2911_v25  ;;  %v2884_v4 = vmul.f32 %v2880_v23, %v2856_v54 }
0x1201   :  { %v2919_v51 = vmul.f32 %v2915_v42, %v2827_v26  ;;  %v2888_v46 = vadd.f32 0.2548296, %v2884_v4 }
0x1203   :  { %v2923_v56 = vadd.f32 1.0, %v2919_v51  ;;  %v2892_v31 = vmul.f32 %v2888_v46, %v2856_v54  ;;  %v3985_v54 = vld [vmem:[%s6137_s3 + $0x19] ss:$0 sm:$0xff] }
0x1205   :  { %v2927_v63 = vmul.f32 %v2923_v56, %v2815_v22  ;;  %v2912_v40 = vmul.f32 %v4196_v60, %v2892_v31 }
0x1207   :  { %v2916_v35 = vsub.f32 1.0, %v2912_v40  ;;  %v5787_v36 = vadd.f32 %v2927_v63, %v5655_v0  ;;  %v3886_v0 = vld [vmem:[%s6135_s1 + $0x3b8] sm:$0xff] }
0x1208   :  { %3006 = vmatpush.msrb.mxu2 %v3886_v0 }
0x1209   :  { %v2920_v10 = vmul.f32 %v2916_v35, %v2828_v29  ;;  %2965 = vrot.lane.b32.xlu0 %v5787_v36, %s4256_s6  ;;  %2935 = vst.msk [vmem:[#allocation2 + $0x13] sm:$0xff] %vm76_vm3, %v5787_v36  ;;  %2945 = vrot.lane.b32.xlu1 %v5787_v36, %s4257_s7 }
0x120a   :  { %3007 = vmatpush.msrb.mxu2 %v3885_v47 }
0x120b   :  { %v2924_v1 = vadd.f32 1.0, %v2920_v10 }
0x120d   :  { %v2928_v15 = vmul.f32 %v2924_v1, %v2816_v19 }
0x120f   :  { %v5798_v48 = vadd.f32 %v2928_v15, %v5672_v49  ;;  %v3884_v49 = vld [vmem:[%s6135_s1 + $0x3a8] sm:$0xff] }
0x1210   :  { %3008 = vmatpush.msrb.mxu2 %v3884_v49 }
0x1211   :  { %2967 = vrot.lane.b32.xlu1 %v5798_v48, %s4256_s6  ;;  %2936 = vst.msk [vmem:[#allocation2 + $0x1b] sm:$0x1f] %vm78_vm4, %v5798_v48  ;;  %2947 = vrot.lane.b32.xlu2 %v5798_v48, %s4257_s7 }
0x1212   :  { %3009 = vmatpush.msrb.mxu2 %v3883_v21 }
0x1214   :  { %3010 = vmatpush.msrb.mxu2 %v3882_v24 }
0x1216   :  { %3011 = vmatpush.msrb.mxu2 %v3881_v12 }
0x1218   :  { %3012 = vmatpush.msrb.mxu2 %v3880_v5 }
0x121a   :  { %3013 = vmatpush.msrb.mxu2 %v3879_v16 }
0x121c   :  { %3014 = vmatpush.msrb.mxu2 %v3878_v11 }
0x121e   :  { %3015 = vmatpush.msrb.mxu2 %v3877_v50 }
0x1220   :  { %3016 = vmatpush.msrb.mxu2 %v3876_v2 }
0x1222   :  { %3017 = vmatpush.msrb.mxu2 %v3875_v39 }
0x1248   :  { %v2958_v34 = vpop.permute.xlu2 %2957 }
0x1260   :  { %v2942_v37 = vpop.permute.xlu0 %2941 }
0x1261   :  { %2953 = vst.msk [vmem:[#allocation2] sm:$0xff] %vm98_vm5, %v2942_v37 }
0x1262   :  { %2963 = vst.msk [vmem:[#allocation2 - $0x3] sm:$0xf8] %vm109_vm6, %v2958_v34 }
0x1268   :  { %v2960_v32 = vpop.permute.xlu0 %2959  ;;  %v2944_v6 = vpop.permute.xlu1 %2943 }
0x1269   :  { %2954 = vst.msk [vmem:[#allocation2 + $0x8] sm:$0xff] %vm98_vm5, %v2944_v6 }
0x126a   :  { %2964 = vst.msk [vmem:[#allocation2 + $0x5] sm:$0xff] %vm111_vm7, %v2960_v32 }
0x126b   :  { %v2948_v27 = vpop.permute.xlu2 %2947 }
0x126c   :  { %2956 = vst.msk [vmem:[#allocation2 + $0x18] sm:$0xff] %vm98_vm5, %v2948_v27 }
0x1271   :  { %v2973_v17 = vld [vmem:[#allocation2] sm:$0xff]  ;;  %v2974_v33 = vld [vmem:[#allocation2 + $0x8] sm:$0xff] }
0x1272   :  { %3887 = vmatmul.msk.f32.vlgmr.msrb.gmra.mxu2 %vm18_vm2, %v2973_v17 }
0x127a   :  { %3888 = vmatmul.msk.f32.gmra.mxu2 %vm18_vm2, %v2974_v33 }
0x127b   :  { %v2966_v14 = vpop.permute.xlu0 %2965  ;;  %v2946_v45 = vpop.permute.xlu1 %2945 }
0x127c   :  { %2955 = vst.msk [vmem:[#allocation2 + $0x10] sm:$0xff] %vm98_vm5, %v2946_v45 }
0x127d   :  { %2971 = vst.msk [vmem:[#allocation2 + $0xd] sm:$0xf8] %vm109_vm6, %v2966_v14 }
0x1283   :  { %v2968_v41 = vpop.permute.xlu1 %2967 }
0x1284   :  { %2972 = vst.msk [vmem:[#allocation2 + $0x15] sm:$0xff] %vm111_vm7, %v2968_v41 }
0x128b   :  { %v2975_v58 = vld [vmem:[#allocation2 + $0x10] sm:$0xff]  ;;  %v2976_v3 = vld [vmem:[#allocation2 + $0x18] sm:$0xff] }
0x128c   :  { %3889 = vmatmul.msk.f32.gmra.mxu2 %vm18_vm2, %v2975_v58 }
0x1294   :  { %3890 = vmatmul.msk.f32.gmra.mxu2 %vm18_vm2, %v2976_v3 }
0x12f5   :  { %v3019_v44 = vpop.f32.mrf.mxu2 }
0x12f6   :  { %v3033_v62 = vmul.f32 %v3985_v54, %v3019_v44 }
0x12f8   :  { %v5860_v8 = vadd.f32 %v3986_v53, %v3033_v62 }
0x12fa   :  { %v5863_v57 = vmul.f32 0.70710677, %v5860_v8 }
0x12fc   :  { %v3059_v9 = vand.u32 2147483647, %v5863_v57  ;;  %vm3051_vm8 = vcmp.ge.f32.partialorder %v5863_v57, 0.0 }
0x12fd   :  { %v3022_v52 = vpop.f32.mrf.mxu2 }
0x12fe   :  { %v3063_v20 = vmul.f32 0.3275911, %v3059_v9  ;;  %v3034_v43 = vmul.f32 %v3985_v54, %v3022_v52  ;;  %v3123_v26 = vsub.f32 0.0, %v3059_v9 }
0x1300   :  { %v3067_v55 = vadd.f32 1.0, %v3063_v20  ;;  %v5866_v28 = vadd.f32 %v3986_v53, %v3034_v43  ;;  %v3127_v63 = vmul.f32 %v3123_v26, %v3059_v9  ;;  %v3055_v20 = vsel %vm3051_vm8, 1.0, %v4258_v59 }
0x1302   :  { %4197 = vrcp.f32 %v3067_v55  ;;  %v5869_v30 = vmul.f32 0.70710677, %v5866_v28  ;;  %v3131_v15 = vmul.f32 1.442695, %v3127_v63 }
0x1304   :  { %v3060_v61 = vand.u32 2147483647, %v5869_v30  ;;  %vm3052_vm9 = vcmp.ge.f32.partialorder %v5869_v30, 0.0 }
0x1305   :  { %v3056_v63 = vsel %vm3052_vm9, 1.0, %v4258_v59 }
0x1306   :  { %v3064_v7 = vmul.f32 0.3275911, %v3060_v61  ;;  %v3124_v0 = vsub.f32 0.0, %v3060_v61 }
0x1308   :  { %v4198_v38 = vpop.eup %4197  ;;  %v3068_v25 = vadd.f32 1.0, %v3064_v7  ;;  %v3128_v50 = vmul.f32 %v3124_v0, %v3060_v61  ;;  %v3043_v7 = vmul.f32 0.5, %v5860_v8 }
0x1309   :  { %v3075_v23 = vmul.f32 %v4198_v38, %v3067_v55 }
0x130a   :  { %4199 = vrcp.f32 %v3068_v25  ;;  %v3133_v17 = vmul.f32 1.442695, %v3128_v50 }
0x130b   :  { %v3079_v42 = vsub.f32 2.0, %v3075_v23  ;;  %4201 = vpow2.f32 %v3131_v15 }
0x130d   :  { %v3083_v4 = vmul.f32 %v4198_v38, %v3079_v42 }
0x130f   :  { %v3087_v51 = vmul.f32 1.0614054, %v3083_v4  ;;  %v3025_v22 = vpop.f32.mrf.mxu2 }
0x1310   :  { %v4200_v46 = vpop.eup %4199  ;;  %v3035_v31 = vmul.f32 %v3985_v54, %v3025_v22 }
0x1311   :  { %v3076_v56 = vmul.f32 %v4200_v46, %v3068_v25  ;;  %v3091_v60 = vadd.f32 -1.4531521, %v3087_v51  ;;  %v4202_v14 = vpop.eup %4201 }
0x1312   :  { %v5872_v35 = vadd.f32 %v3986_v53, %v3035_v31 }
0x1313   :  { %v3080_v40 = vsub.f32 2.0, %v3076_v56  ;;  %v3095_v29 = vmul.f32 %v3091_v60, %v3083_v4 }
0x1314   :  { %v5875_v19 = vmul.f32 0.70710677, %v5872_v35 }
0x1315   :  { %v3084_v10 = vmul.f32 %v4200_v46, %v3080_v40  ;;  %v3099_v1 = vadd.f32 1.4214138, %v3095_v29 }
0x1316   :  { %v3061_v47 = vand.u32 2147483647, %v5875_v19  ;;  %vm3053_vm10 = vcmp.ge.f32.partialorder %v5875_v19, 0.0 }
0x1317   :  { %v3103_v49 = vmul.f32 %v3099_v1, %v3083_v4  ;;  %v3088_v21 = vmul.f32 1.0614054, %v3084_v10  ;;  %v3028_v24 = vpop.f32.mrf.mxu2 }
0x1318   :  { %v3065_v12 = vmul.f32 0.3275911, %v3061_v47  ;;  %v3036_v5 = vmul.f32 %v3985_v54, %v3028_v24  ;;  %v3125_v42 = vsub.f32 0.0, %v3061_v47 }
0x1319   :  { %v3107_v16 = vadd.f32 -0.28449672, %v3103_v49  ;;  %v3092_v11 = vadd.f32 -1.4531521, %v3088_v21 }
0x131a   :  { %v3069_v2 = vadd.f32 1.0, %v3065_v12  ;;  %v5878_v39 = vadd.f32 %v3986_v53, %v3036_v5  ;;  %v3129_v40 = vmul.f32 %v3125_v42, %v3061_v47  ;;  %v3894_v42 = vld [vmem:[%s6136_s2 + $0x198] sm:$0xff] }
0x131b   :  { %v3111_v37 = vmul.f32 %v3107_v16, %v3083_v4  ;;  %v3096_v34 = vmul.f32 %v3092_v11, %v3084_v10 }
0x131c   :  { %4203 = vrcp.f32 %v3069_v2  ;;  %v5881_v32 = vmul.f32 0.70710677, %v5878_v39 }
0x131d   :  { %v3115_v6 = vadd.f32 0.2548296, %v3111_v37  ;;  %v3100_v27 = vadd.f32 1.4214138, %v3096_v34  ;;  %4205 = vpow2.f32 %v3133_v17 }
0x131e   :  { %v3062_v33 = vand.u32 2147483647, %v5881_v32  ;;  %vm3054_vm11 = vcmp.ge.f32.partialorder %v5881_v32, 0.0 }
0x131f   :  { %v3119_v45 = vmul.f32 %v3115_v6, %v3083_v4  ;;  %v3104_v41 = vmul.f32 %v3100_v27, %v3084_v10 }
0x1320   :  { %v3066_v58 = vmul.f32 0.3275911, %v3062_v33  ;;  %v3126_v49 = vsub.f32 0.0, %v3062_v33 }
0x1321   :  { %v3139_v3 = vmul.f32 %v4202_v14, %v3119_v45  ;;  %v3108_v54 = vadd.f32 -0.28449672, %v3104_v41  ;;  %v3057_v41 = vsel %vm3053_vm10, 1.0, %v4258_v59 }
0x1322   :  { %v4204_v53 = vpop.eup %4203  ;;  %v3070_v44 = vadd.f32 1.0, %v3066_v58  ;;  %v3130_v11 = vmul.f32 %v3126_v49, %v3062_v33 }
0x1323   :  { %v3077_v62 = vmul.f32 %v4204_v53, %v3069_v2  ;;  %v3143_v9 = vsub.f32 1.0, %v3139_v3  ;;  %v3112_v52 = vmul.f32 %v3108_v54, %v3084_v10  ;;  %v4206_v57 = vpop.eup %4205  ;;  %v3045_v54 = vmul.f32 0.5, %v5872_v35 }
0x1324   :  { %4207 = vrcp.f32 %v3070_v44  ;;  %v3137_v34 = vmul.f32 1.442695, %v3130_v11  ;;  %v3046_v35 = vmul.f32 0.5, %v5878_v39  ;;  %v3900_v39 = vld [vmem:[%s6136_s2 + $0x1c8] sm:$0xff] }
0x1325   :  { %v3081_v43 = vsub.f32 2.0, %v3077_v62  ;;  %v3147_v55 = vmul.f32 %v3143_v9, %v3055_v20  ;;  %v3116_v61 = vadd.f32 0.2548296, %v3112_v52 }
0x1327   :  { %v3085_v38 = vmul.f32 %v4204_v53, %v3081_v43  ;;  %v3151_v25 = vadd.f32 1.0, %v3147_v55  ;;  %v3120_v23 = vmul.f32 %v3116_v61, %v3084_v10  ;;  %v3044_v10 = vmul.f32 0.5, %v5866_v28 }
0x1328   :  { %v3058_v43 = vsel %vm3054_vm11, 1.0, %v4258_v59  ;;  %v3902_v59 = vld [vmem:[%s6136_s2 + $0x1d8] sm:$0xff] }
0x1329   :  { %v3155_v4 = vmul.f32 %v3151_v25, %v3043_v7  ;;  %v3140_v26 = vmul.f32 %v4206_v57, %v3120_v23  ;;  %v3089_v51 = vmul.f32 1.0614054, %v3085_v38  ;;  %3238 = vmatpush.msrb.mxu3 %v3902_v59  ;;  %v3897_v25 = vld [vmem:[%s6136_s2 + $0x1b0] sm:$0xff]  ;;  %v3896_v23 = vld [vmem:[%s6136_s2 + $0x1a8] sm:$0xff]  ;;  %v3895_v57 = vld [vmem:[%s6136_s2 + $0x1a0] sm:$0xff] }
0x132a   :  { %v4208_v46 = vpop.eup %4207 }
0x132b   :  { %v3078_v22 = vmul.f32 %v4208_v46, %v3070_v44  ;;  %v3159_v56 = vadd.f32 %v3155_v4, %v5763_v13  ;;  %v3144_v31 = vsub.f32 1.0, %v3140_v26  ;;  %v3093_v60 = vadd.f32 -1.4531521, %v3089_v51  ;;  %v3893_v26 = vld [vmem:[%s6136_s2 + $0x190] sm:$0xff]  ;;  %v3892_v51 = vld [vmem:[%s6136_s2 + $0x188] sm:$0xff] }
0x132c   :  { %v3135_v13 = vmul.f32 1.442695, %v3129_v40 }
0x132d   :  { %v3082_v8 = vsub.f32 2.0, %v3078_v22  ;;  %3187 = vrot.lane.b32.xlu1 %v3159_v56, %s4256_s6  ;;  %3163 = vst.msk [vmem:[#allocation2 + $0x3] sm:$0xff] %vm76_vm3, %v3159_v56  ;;  %3171 = vrot.lane.b32.xlu2 %v3159_v56, %s4257_s7  ;;  %v3148_v30 = vmul.f32 %v3144_v31, %v3056_v63  ;;  %v3097_v29 = vmul.f32 %v3093_v60, %v3085_v38 }
0x132e   :  { %4209 = vpow2.f32 %v3135_v13 }
0x132f   :  { %v3086_v1 = vmul.f32 %v4208_v46, %v3082_v8  ;;  %v3152_v15 = vadd.f32 1.0, %v3148_v30  ;;  %v3101_v0 = vadd.f32 1.4214138, %v3097_v29  ;;  %4211 = vpow2.f32 %v3137_v34  ;;  %v3891_v46 = vld [vmem:[%s6136_s2 + $0x180] sm:$0xff] }
0x1331   :  { %v3156_v21 = vmul.f32 %v3152_v15, %v3044_v10  ;;  %v3105_v24 = vmul.f32 %v3101_v0, %v3085_v38  ;;  %v3090_v12 = vmul.f32 1.0614054, %v3086_v1  ;;  %v3987_v15 = vld [vmem:[%s6137_s3 + $0x34] ss:$0 sm:$0xff] }
0x1333   :  { %v3160_v47 = vadd.f32 %v3156_v21, %v5774_v18  ;;  %v3109_v5 = vadd.f32 -0.28449672, %v3105_v24  ;;  %v3094_v16 = vadd.f32 -1.4531521, %v3090_v12 }
0x1334   :  { %v4210_v17 = vpop.eup %4209 }
0x1335   :  { %3189 = vrot.lane.b32.xlu2 %v3160_v47, %s4256_s6  ;;  %3164 = vst.msk [vmem:[#allocation2 + $0xb] sm:$0x1f] %vm78_vm4, %v3160_v47  ;;  %3173 = vrot.lane.b32.xlu0 %v3160_v47, %s4257_s7  ;;  %v3113_v28 = vmul.f32 %v3109_v5, %v3085_v38  ;;  %v3098_v50 = vmul.f32 %v3094_v16, %v3086_v1  ;;  %v4212_v62 = vpop.eup %4211 }
0x1337   :  { %v3117_v2 = vadd.f32 0.2548296, %v3113_v28  ;;  %v3102_v37 = vadd.f32 1.4214138, %v3098_v50 }
0x1339   :  { %v3121_v6 = vmul.f32 %v3117_v2, %v3085_v38  ;;  %v3106_v27 = vmul.f32 %v3102_v37, %v3086_v1  ;;  %v3898_v38 = vld [vmem:[%s6136_s2 + $0x1b8] sm:$0xff] }
0x133b   :  { %v3141_v18 = vmul.f32 %v4210_v17, %v3121_v6  ;;  %v3110_v14 = vadd.f32 -0.28449672, %v3106_v27 }
0x133d   :  { %v3145_v33 = vsub.f32 1.0, %v3141_v18  ;;  %v3114_v45 = vmul.f32 %v3110_v14, %v3086_v1 }
0x133f   :  { %v3149_v58 = vmul.f32 %v3145_v33, %v3057_v41  ;;  %v3118_v3 = vadd.f32 0.2548296, %v3114_v45 }
0x1341   :  { %v3153_v53 = vadd.f32 1.0, %v3149_v58  ;;  %v3122_v44 = vmul.f32 %v3118_v3, %v3086_v1 }
0x1343   :  { %v3157_v9 = vmul.f32 %v3153_v53, %v3045_v54  ;;  %v3142_v52 = vmul.f32 %v4212_v62, %v3122_v44 }
0x1345   :  { %v3161_v19 = vadd.f32 %v3157_v9, %v5787_v36  ;;  %v3146_v20 = vsub.f32 1.0, %v3142_v52  ;;  %v3901_v36 = vld [vmem:[%s6136_s2 + $0x1d0] sm:$0xff]  ;;  %v3361_v52 = vld [vmem:[%s6137_s3 + $0x48] sm:$0xff] }
0x1346   :  { %3239 = vmatpush.msrb.mxu3 %v3901_v36  ;;  %v3362_v9 = vld [vmem:[%s6137_s3 + $0x50] sm:$0xff] }
0x1347   :  { %3195 = vrot.lane.b32.xlu2 %v3161_v19, %s4256_s6  ;;  %3165 = vst.msk [vmem:[#allocation2 + $0x13] sm:$0xff] %vm76_vm3, %v3161_v19  ;;  %3175 = vrot.lane.b32.xlu0 %v3161_v19, %s4257_s7  ;;  %v3150_v55 = vmul.f32 %v3146_v20, %v3058_v43 }
0x1348   :  { %3240 = vmatpush.msrb.mxu3 %v3900_v39  ;;  %3389 = vmatpush.msra.mxu0 %v3362_v9  ;;  %v3434_v9 = vld [vmem:[%s6137_s3 + $0x88] sm:$0xff] }
0x1349   :  { %v3154_v61 = vadd.f32 1.0, %v3150_v55 }
0x134a   :  { %3390 = vmatpush.msra.mxu0 %v3361_v52  ;;  %v3462_v52 = vld [vmem:[%s6137_s3 + $0xa8] sm:$0xff] }
0x134b   :  { %v3158_v7 = vmul.f32 %v3154_v61, %v3046_v35 }
0x134d   :  { %v3162_v32 = vadd.f32 %v3158_v7, %v5798_v48  ;;  %v3899_v48 = vld [vmem:[%s6136_s2 + $0x1c0] sm:$0xff] }
0x134e   :  { %3241 = vmatpush.msrb.mxu3 %v3899_v48 }
0x134f   :  { %3197 = vrot.lane.b32.xlu0 %v3162_v32, %s4256_s6  ;;  %3166 = vst.msk [vmem:[#allocation2 + $0x1b] sm:$0x1f] %vm78_vm4, %v3162_v32  ;;  %3177 = vrot.lane.b32.xlu1 %v3162_v32, %s4257_s7 }
0x1350   :  { %3242 = vmatpush.msrb.mxu3 %v3898_v38 }
0x1352   :  { %3243 = vmatpush.msrb.mxu3 %v3897_v25 }
0x1354   :  { %3244 = vmatpush.msrb.mxu3 %v3896_v23 }
0x1356   :  { %3245 = vmatpush.msrb.mxu3 %v3895_v57 }
0x1358   :  { %3246 = vmatpush.msrb.mxu3 %v3894_v42 }
0x135a   :  { %3247 = vmatpush.msrb.mxu3 %v3893_v26 }
0x135c   :  { %3248 = vmatpush.msrb.mxu3 %v3892_v51 }
0x135e   :  { %3249 = vmatpush.msrb.mxu3 %v3891_v46 }
0x1387   :  { %v3172_v4 = vpop.permute.xlu2 %3171 }
0x1388   :  { %3183 = vst.msk [vmem:[#allocation2] sm:$0xff] %vm98_vm5, %v3172_v4 }
0x138f   :  { %v3190_v31 = vpop.permute.xlu2 %3189 }
0x139f   :  { %v3188_v22 = vpop.permute.xlu1 %3187 }
0x13a0   :  { %3193 = vst.msk [vmem:[#allocation2 - $0x3] sm:$0xf8] %vm109_vm6, %v3188_v22 }
0x13a1   :  { %v3196_v8 = vpop.permute.xlu2 %3195 }
0x13a7   :  { %v3174_v56 = vpop.permute.xlu0 %3173 }
0x13a8   :  { %3184 = vst.msk [vmem:[#allocation2 + $0x8] sm:$0xff] %vm98_vm5, %v3174_v56 }
0x13a9   :  { %3194 = vst.msk [vmem:[#allocation2 + $0x5] sm:$0xff] %vm111_vm7, %v3190_v31 }
0x13b0   :  { %v3203_v60 = vld [vmem:[#allocation2] sm:$0xff]  ;;  %v3204_v63 = vld [vmem:[#allocation2 + $0x8] sm:$0xff] }
0x13b1   :  { %3903 = vmatmul.msk.f32.vlgmr.msrb.gmra.mxu3 %vm18_vm2, %v3203_v60 }
0x13b9   :  { %v3176_v40 = vpop.permute.xlu0 %3175  ;;  %3904 = vmatmul.msk.f32.gmra.mxu3 %vm18_vm2, %v3204_v63 }
0x13ba   :  { %3185 = vst.msk [vmem:[#allocation2 + $0x10] sm:$0xff] %vm98_vm5, %v3176_v40 }
0x13bb   :  { %3201 = vst.msk [vmem:[#allocation2 + $0xd] sm:$0xf8] %vm109_vm6, %v3196_v8 }
0x13c1   :  { %v3198_v30 = vpop.permute.xlu0 %3197  ;;  %v3178_v29 = vpop.permute.xlu1 %3177 }
0x13c2   :  { %3186 = vst.msk [vmem:[#allocation2 + $0x18] sm:$0xff] %vm98_vm5, %v3178_v29 }
0x13c3   :  { %3202 = vst.msk [vmem:[#allocation2 + $0x15] sm:$0xff] %vm111_vm7, %v3198_v30 }
0x13ca   :  { %v3205_v10 = vld [vmem:[#allocation2 + $0x10] sm:$0xff]  ;;  %v3206_v1 = vld [vmem:[#allocation2 + $0x18] sm:$0xff] }
0x13cb   :  { %3905 = vmatmul.msk.f32.gmra.mxu3 %vm18_vm2, %v3205_v10 }
0x13d3   :  { %3906 = vmatmul.msk.f32.gmra.mxu3 %vm18_vm2, %v3206_v1  ;;  %v3360_v1 = vld [vmem:[%s6137_s3 + $0x40] sm:$0xff] }
0x13d4   :  { %3391 = vmatpush.msra.mxu0 %v3360_v1 }
0x1434   :  { %v3251_v0 = vpop.f32.mrf.mxu3 }
0x1435   :  { %v5963_v13 = vadd.f32 %v3987_v15, %v3251_v0 }
0x1437   :  { %v3907_v49 = vmul.f32 -1.442695, %v5963_v13 }
0x1439   :  { %4213 = vpow2.f32 %v3907_v49 }
0x143c   :  { %v3254_v21 = vpop.f32.mrf.mxu3 }
0x143d   :  { %v5966_v24 = vadd.f32 %v3987_v15, %v3254_v21 }
0x143f   :  { %v4214_v12 = vpop.eup %4213  ;;  %v3908_v47 = vmul.f32 -1.442695, %v5966_v24 }
0x1440   :  { %v3275_v5 = vadd.f32 1.0, %v4214_v12 }
0x1441   :  { %4215 = vpow2.f32 %v3908_v47 }
0x1442   :  { %4217 = vrcp.f32 %v3275_v5  ;;  %v3290_v37 = vand.u32 2147483648, %v3275_v5  ;;  %v3288_v6 = vand.u32 2147483647, %v3275_v5  ;;  %vm3284_vm4 = vweird.f32 %v3275_v5 }
0x1444   :  { %v3291_v33 = vor.u32 1.1754944e-38, %v3290_v37  ;;  %vm3289_vm6 = vcmp.eq.f32.partialorder %v3288_v6, 8.507059e+37 }
0x1447   :  { %v4216_v16 = vpop.eup %4215 }
0x1448   :  { %v4218_v11 = vpop.eup %4217  ;;  %v3276_v28 = vadd.f32 1.0, %v4216_v16 }
0x1449   :  { %v3280_v50 = vmul.f32 %v4218_v11, %v3275_v5  ;;  %vm3285_vm2 = vweird.f32 %v4218_v11 }
0x144a   :  { %4219 = vrcp.f32 %v3276_v28  ;;  %vm3286_vm5 = vmor %vm3284_vm4, %vm3285_vm2  ;;  %v3305_v53 = vand.u32 2147483648, %v3276_v28  ;;  %v3303_v62 = vand.u32 2147483647, %v3276_v28  ;;  %vm3299_vm12 = vweird.f32 %v3276_v28 }
0x144b   :  { %v3281_v2 = vsub.f32 1.0, %v3280_v50  ;;  %v4262_v50 = vmov 0   ;;  %vm3641_vm4 = vcmask 253952  }
0x144c   :  { %v3306_v55 = vor.u32 1.1754944e-38, %v3305_v53  ;;  %vm3304_vm14 = vcmp.eq.f32.partialorder %v3303_v62, 8.507059e+37  ;;  %3930 = vset.pattern.permute.xlu2 %v4262_v50  ;;  %v3406_v62 = vld [vmem:[%s6137_s3 + $0x68] sm:$0xff] }
0x144d   :  { %v3282_v34 = vmul.f32 %v4218_v11, %v3281_v2 }
0x144e   :  { %v3257_v27 = vpop.f32.mrf.mxu3 }
0x144f   :  { %v5969_v17 = vadd.f32 %v3987_v15, %v3257_v27  ;;  %v3283_v18 = vadd.f32 %v4218_v11, %v3282_v34  ;;  %v4263_v27 = vmov 2  }
0x1450   :  { %v4220_v14 = vpop.eup %4219 }
0x1451   :  { %v3909_v45 = vmul.f32 -1.442695, %v5969_v17  ;;  %v3287_v41 = vsel %vm3286_vm5, %v4218_v11, %v3283_v18  ;;  %v3295_v58 = vmul.f32 %v4220_v14, %v3276_v28  ;;  %vm3300_vm7 = vweird.f32 %v4220_v14 }
0x1452   :  { %v3292_v3 = vsel %vm3289_vm6, %v3291_v33, %v3287_v41  ;;  %vm3301_vm13 = vmor %vm3299_vm12, %vm3300_vm7  ;;  %v4260_v28 = vmov 4   ;;  %v4265_v18 = vmov 5   ;;  %v4267_v41 = vmov 7  }
0x1453   :  { %4221 = vpow2.f32 %v3909_v45  ;;  %3343 = vrot.lane.b32.xlu1 %v3292_v3, %s4259_s9  ;;  %v3296_v54 = vsub.f32 1.0, %v3295_v58  ;;  %3934 = vset.pattern.permute.xlu0 %v4260_v28 }
0x1455   :  { %v3297_v44 = vmul.f32 %v4220_v14, %v3296_v54 }
0x1456   :  { %v3260_v19 = vpop.f32.mrf.mxu3 }
0x1457   :  { %v3261_v20 = vadd.f32 %v3987_v15, %v3260_v19  ;;  %v3298_v43 = vadd.f32 %v4220_v14, %v3297_v44  ;;  %v3359_v15 = vld [vmem:[%s6137_s3 + $0x38] sm:$0xff] }
0x1458   :  { %3392 = vmatpush.msra.mxu0 %v3359_v15 }
0x1459   :  { %v4222_v35 = vpop.eup %4221  ;;  %v3910_v61 = vmul.f32 -1.442695, %v3261_v20  ;;  %v3302_v7 = vsel %vm3301_vm13, %v4220_v14, %v3298_v43  ;;  %v4266_v14 = vmov 6  }
0x145a   :  { %v3277_v32 = vadd.f32 1.0, %v4222_v35  ;;  %v3307_v59 = vsel %vm3304_vm14, %v3306_v55, %v3302_v7 }
0x145b   :  { %4223 = vpow2.f32 %v3910_v61  ;;  %3345 = vrot.lane.b32.xlu2 %v3307_v59, %s4259_s9  ;;  %v3518_v59 = vld [vmem:[%s6137_s3 + $0xe8] sm:$0xff] }
0x145c   :  { %4225 = vrcp.f32 %v3277_v32  ;;  %v3320_v23 = vand.u32 2147483648, %v3277_v32  ;;  %v3318_v42 = vand.u32 2147483647, %v3277_v32  ;;  %vm3314_vm0 = vweird.f32 %v3277_v32 }
0x145e   :  { %v3321_v51 = vor.u32 1.1754944e-38, %v3320_v23  ;;  %vm3319_vm8 = vcmp.eq.f32.partialorder %v3318_v42, 8.507059e+37 }
0x1461   :  { %v4224_v36 = vpop.eup %4223 }
0x1462   :  { %v4226_v39 = vpop.eup %4225  ;;  %v3278_v48 = vadd.f32 1.0, %v4224_v36 }
0x1463   :  { %v3310_v38 = vmul.f32 %v4226_v39, %v3277_v32  ;;  %vm3315_vm15 = vweird.f32 %v4226_v39  ;;  %v3490_v32 = vld [vmem:[%s6137_s3 + $0xc8] sm:$0xff] }
0x1464   :  { %4227 = vrcp.f32 %v3278_v48  ;;  %vm3316_vm1 = vmor %vm3314_vm0, %vm3315_vm15  ;;  %v3335_v60 = vand.u32 2147483648, %v3278_v48  ;;  %v3333_v40 = vand.u32 2147483647, %v3278_v48  ;;  %vm3329_vm10 = vweird.f32 %v3278_v48 }
0x1465   :  { %v3311_v25 = vsub.f32 1.0, %v3310_v38  ;;  %v3546_v38 = vld [vmem:[%s6137_s3 + $0x108] sm:$0xff] }
0x1466   :  { %v3336_v30 = vor.u32 1.1754944e-38, %v3335_v60  ;;  %vm3334_vm2 = vcmp.eq.f32.partialorder %v3333_v40, 8.507059e+37 }
0x1467   :  { %v3312_v57 = vmul.f32 %v4226_v39, %v3311_v25 }
0x1469   :  { %v3313_v4 = vadd.f32 %v4226_v39, %v3312_v57 }
0x146a   :  { %v4228_v26 = vpop.eup %4227 }
0x146b   :  { %v3317_v46 = vsel %vm3316_vm1, %v4226_v39, %v3313_v4  ;;  %v3325_v22 = vmul.f32 %v4228_v26, %v3278_v48  ;;  %vm3330_vm9 = vweird.f32 %v4228_v26 }
0x146c   :  { %v3322_v56 = vsel %vm3319_vm8, %v3321_v51, %v3317_v46  ;;  %vm3331_vm11 = vmor %vm3329_vm10, %vm3330_vm9  ;;  %v3602_v46 = vld [vmem:[%s6137_s3 + $0x148] sm:$0xff] }
0x146d   :  { %3347 = vrot.lane.b32.xlu0 %v3322_v56, %s4259_s9  ;;  %v3326_v31 = vsub.f32 1.0, %v3325_v22 }
0x146f   :  { %v3327_v63 = vmul.f32 %v4228_v26, %v3326_v31 }
0x1471   :  { %v3328_v8 = vadd.f32 %v4228_v26, %v3327_v63 }
0x1473   :  { %v3332_v29 = vsel %vm3331_vm11, %v4228_v26, %v3328_v8  ;;  %v3574_v26 = vld [vmem:[%s6137_s3 + $0x128] sm:$0xff] }
0x1474   :  { %v3337_v10 = vsel %vm3334_vm2, %v3336_v30, %v3332_v29 }
0x1475   :  { %3349 = vrot.lane.b32.xlu1 %v3337_v10, %s4259_s9 }
0x14b5   :  { %v3346_v21 = vpop.permute.xlu2 %3345 }
0x14b6   :  { %v3356_v12 = vmul.f32 %v3346_v21, %v5966_v24  ;;  %v3988_v24 = vld [vmem:[%s6137_s3 + $0x58] ss:$0 sm:$0xff] }
0x14c5   :  { %v3344_v0 = vpop.permute.xlu1 %3343 }
0x14c6   :  { %v3355_v49 = vmul.f32 %v3344_v0, %v5963_v13  ;;  %v4261_v13 = vmov 1  }
0x14c7   :  { %3931 = vset.pattern.permute.xlu1 %v4261_v13 }
0x14c8   :  { %3911 = vmatmul.msk.f32.vlgmr.msra.gmra.mxu0 %vm76_vm3, %v3355_v49 }
0x14d0   :  { %3912 = vmatmul.msk.f32.gmra.mxu0 %vm76_vm3, %v3356_v12 }
0x14df   :  { %v3348_v47 = vpop.permute.xlu0 %3347 }
0x14e0   :  { %v3357_v5 = vmul.f32 %v3348_v47, %v5969_v17  ;;  %v4264_v17 = vmov 3  }
0x14e2   :  { %3913 = vmatmul.msk.f32.gmra.mxu0 %vm76_vm3, %v3357_v5 }
0x14e7   :  { %v3350_v16 = vpop.permute.xlu1 %3349 }
0x14e8   :  { %v3358_v11 = vmul.f32 %v3350_v16, %v3261_v20 }
0x14ea   :  { %3914 = vmatmul.msk.f32.gmra.mxu0 %vm76_vm3, %v3358_v11 }
0x1545   :  { %v3394_v2 = vpop.f32.mrf.mxu0 }
0x1546   :  { %v3395_v37 = vadd.f32 %v3988_v24, %v3394_v2  ;;  %v3409_v2 = vld [vmem:[%s6137_s3 + $0x80] sm:$0xff] }
0x1548   :  { %3412 = vperm.xlu2 %3930, %v3395_v37   ;;  %3439 = vperm.xlu1 %3931, %v3395_v37  }
0x1549   :  { %3523 = vperm.xlu0 %3934, %v3395_v37  }
0x154d   :  { %v3397_v34 = vpop.f32.mrf.mxu0 }
0x154e   :  { %v6000_v6 = vadd.f32 %v3988_v24, %v3397_v34 }
0x1550   :  { %3932 = vset.pattern.permute.xlu2 %v4263_v27  ;;  %3933 = vset.pattern.permute.xlu1 %v4264_v17 }
0x1551   :  { %3938 = vset.pattern.permute.xlu0 %v4262_v50  ;;  %3467 = vperm.xlu2 %3932, %v3395_v37  }
0x1552   :  { %3495 = vperm.xlu1 %3933, %v3395_v37   ;;  %3417 = vperm.xlu0 %3938, %v6000_v6  }
0x1559   :  { %3935 = vset.pattern.permute.xlu2 %v4265_v18 }
0x155a   :  { %3936 = vset.pattern.permute.xlu1 %v4266_v14  ;;  %3943 = vset.pattern.permute.xlu0 %v4265_v18 }
0x155b   :  { %3551 = vperm.xlu2 %3935, %v3395_v37   ;;  %3579 = vperm.xlu1 %3936, %v3395_v37  }
0x155c   :  { %3555 = vperm.xlu0 %3943, %v6000_v6  }
0x155f   :  { %v3400_v33 = vpop.f32.mrf.mxu0 }
0x1560   :  { %v3401_v45 = vadd.f32 %v3988_v24, %v3400_v33  ;;  %v3465_v33 = vld [vmem:[%s6137_s3 + $0xc0] sm:$0xff] }
0x1563   :  { %3937 = vset.pattern.permute.xlu2 %v4267_v41  ;;  %3940 = vset.pattern.permute.xlu1 %v4263_v27 }
0x1564   :  { %3946 = vset.pattern.permute.xlu0 %v4261_v13  ;;  %3607 = vperm.xlu2 %3937, %v3395_v37  }
0x1565   :  { %3471 = vperm.xlu1 %3940, %v6000_v6   ;;  %3447 = vperm.xlu0 %3946, %v3401_v45  }
0x1567   :  { %v3403_v58 = vpop.f32.mrf.mxu0 }
0x1568   :  { %v3404_v3 = vadd.f32 %v3988_v24, %v3403_v58  ;;  %v3435_v58 = vld [vmem:[%s6137_s3 + $0x90] sm:$0xff] }
0x156c   :  { %3939 = vset.pattern.permute.xlu2 %v4261_v13 }
0x156d   :  { %3942 = vset.pattern.permute.xlu1 %v4260_v28  ;;  %3951 = vset.pattern.permute.xlu0 %v4266_v14 }
0x156e   :  { %3527 = vperm.xlu1 %3942, %v6000_v6   ;;  %3443 = vperm.xlu2 %3939, %v6000_v6  }
0x156f   :  { %3587 = vperm.xlu0 %3951, %v3401_v45  }
0x1576   :  { %3945 = vset.pattern.permute.xlu1 %v4262_v50  ;;  %3941 = vset.pattern.permute.xlu2 %v4264_v17 }
0x1577   :  { %3954 = vset.pattern.permute.xlu0 %v4263_v27  ;;  %3422 = vperm.xlu1 %3945, %v3401_v45  }
0x1578   :  { %3499 = vperm.xlu2 %3941, %v6000_v6   ;;  %3479 = vperm.xlu0 %3954, %v3404_v3  }
0x157f   :  { %3948 = vset.pattern.permute.xlu1 %v4264_v17 }
0x1580   :  { %3944 = vset.pattern.permute.xlu2 %v4266_v14  ;;  %3961 = vset.pattern.permute.xlu0 %v4267_v41 }
0x1581   :  { %3503 = vperm.xlu1 %3948, %v3401_v45   ;;  %3583 = vperm.xlu2 %3944, %v6000_v6  }
0x1582   :  { %3619 = vperm.xlu0 %3961, %v3404_v3  }
0x1589   :  { %3950 = vset.pattern.permute.xlu1 %v4265_v18  ;;  %3947 = vset.pattern.permute.xlu2 %v4263_v27  ;;  %v3464_v27 = vld [vmem:[%s6137_s3 + $0xb8] sm:$0xff] }
0x158a   :  { %3559 = vperm.xlu1 %3950, %v3401_v45   ;;  %3475 = vperm.xlu2 %3947, %v3401_v45  }
0x1592   :  { %3953 = vset.pattern.permute.xlu1 %v4261_v13  ;;  %3949 = vset.pattern.permute.xlu2 %v4260_v28  ;;  %v3436_v13 = vld [vmem:[%s6137_s3 + $0x98] sm:$0xff] }
0x1593   :  { %3451 = vperm.xlu1 %3953, %v3404_v3   ;;  %3531 = vperm.xlu2 %3949, %v3401_v45  }
0x159b   :  { %3956 = vset.pattern.permute.xlu1 %v4260_v28  ;;  %3952 = vset.pattern.permute.xlu2 %v4262_v50  ;;  %v3408_v28 = vld [vmem:[%s6137_s3 + $0x78] sm:$0xff]  ;;  %v3437_v50 = vld [vmem:[%s6137_s3 + $0xa0] sm:$0xff] }
0x159c   :  { %3535 = vperm.xlu1 %3956, %v3404_v3   ;;  %3427 = vperm.xlu2 %3952, %v3404_v3  }
0x15a2   :  { %v3413_v54 = vpop.permute.xlu2 %3412 }
0x15a3   :  { %v3430_v20 = vmul.f32 %v3413_v54, %v3406_v62  ;;  %v3463_v62 = vld [vmem:[%s6137_s3 + $0xb0] sm:$0xff] }
0x15a4   :  { %3958 = vset.pattern.permute.xlu1 %v4266_v14  ;;  %3955 = vset.pattern.permute.xlu2 %v4264_v17  ;;  %v3492_v17 = vld [vmem:[%s6137_s3 + $0xd8] sm:$0xff] }
0x15a5   :  { %3591 = vperm.xlu1 %3958, %v3404_v3   ;;  %3507 = vperm.xlu2 %3955, %v3404_v3  }
0x15ab   :  { %v3468_v53 = vpop.permute.xlu2 %3467 }
0x15ac   :  { %v3482_v55 = vmul.f32 %v3468_v53, %v3462_v52  ;;  %v3520_v52 = vld [vmem:[%s6137_s3 + $0xf8] sm:$0xff] }
0x15ad   :  { %3959 = vset.pattern.permute.xlu1 %v4267_v41  ;;  %3957 = vset.pattern.permute.xlu2 %v4265_v18 }
0x15ae   :  { %3611 = vperm.xlu1 %3959, %v6000_v6   ;;  %3563 = vperm.xlu2 %3957, %v3404_v3  }
0x15b5   :  { %v3552_v44 = vpop.permute.xlu2 %3551 }
0x15b6   :  { %3960 = vset.pattern.permute.xlu2 %v4267_v41  ;;  %v3566_v42 = vmul.f32 %v3552_v44, %v3546_v38  ;;  %v3407_v44 = vld [vmem:[%s6137_s3 + $0x70] sm:$0xff] }
0x15b7   :  { %3615 = vperm.xlu2 %3960, %v3401_v45  }
0x15ba   :  { %v3440_v19 = vpop.permute.xlu1 %3439 }
0x15bb   :  { %v3454_v43 = vmul.f32 %v3440_v19, %v3434_v9  ;;  %v3524_v36 = vpop.permute.xlu0 %3523 }
0x15bc   :  { %v3538_v25 = vmul.f32 %v3524_v36, %v3518_v59 }
0x15bd   :  { %v3458_v35 = vadd.f32 %v3454_v43, %v3430_v20  ;;  %v3548_v43 = vld [vmem:[%s6137_s3 + $0x118] sm:$0xff] }
0x15be   :  { %v3608_v61 = vpop.permute.xlu2 %3607 }
0x15bf   :  { %v3486_v7 = vadd.f32 %v3482_v55, %v3458_v35  ;;  %v3622_v31 = vmul.f32 %v3608_v61, %v3602_v46  ;;  %v3493_v55 = vld [vmem:[%s6137_s3 + $0xe0] sm:$0xff]  ;;  %v3576_v46 = vld [vmem:[%s6137_s3 + $0x138] sm:$0xff] }
0x15c0   :  { %v3521_v35 = vld [vmem:[%s6137_s3 + $0x100] sm:$0xff] }
0x15c4   :  { %v3496_v39 = vpop.permute.xlu1 %3495  ;;  %v3418_v10 = vpop.permute.xlu0 %3417 }
0x15c5   :  { %v3510_v48 = vmul.f32 %v3496_v39, %v3490_v32  ;;  %v3431_v59 = vmul.f32 %v3418_v10, %v3407_v44 }
0x15c7   :  { %v3514_v23 = vadd.f32 %v3510_v48, %v3486_v7 }
0x15c8   :  { %v3444_v57 = vpop.permute.xlu2 %3443 }
0x15c9   :  { %v3542_v4 = vadd.f32 %v3538_v25, %v3514_v23  ;;  %v3455_v20 = vmul.f32 %v3444_v57, %v3435_v58  ;;  %v3491_v57 = vld [vmem:[%s6137_s3 + $0xd0] sm:$0xff] }
0x15cb   :  { %v3570_v51 = vadd.f32 %v3566_v42, %v3542_v4  ;;  %v3459_v23 = vadd.f32 %v3455_v20, %v3431_v59  ;;  %v3519_v42 = vld [vmem:[%s6137_s3 + $0xf0] sm:$0xff] }
0x15cd   :  { %v3580_v22 = vpop.permute.xlu1 %3579 }
0x15ce   :  { %v3594_v56 = vmul.f32 %v3580_v22, %v3574_v26  ;;  %v6046_v0 = vpop.permute.xlu0 %3555  ;;  %v3549_v22 = vld [vmem:[%s6137_s3 + $0x120] sm:$0xff] }
0x15d0   :  { %v3598_v60 = vadd.f32 %v3594_v56, %v3570_v51  ;;  %v3604_v56 = vld [vmem:[%s6137_s3 + $0x158] sm:$0xff] }
0x15d2   :  { %v6040_v63 = vadd.f32 %v3622_v31, %v3598_v60  ;;  %v6042_v40 = vpop.permute.xlu2 %3499 }
0x15d3   :  { %v3511_v10 = vmul.f32 %v6042_v40, %v3491_v57 }
0x15d7   :  { %v3472_v8 = vpop.permute.xlu1 %3471  ;;  %v3448_v12 = vpop.permute.xlu0 %3447 }
0x15d8   :  { %v3456_v34 = vmul.f32 %v3448_v12, %v3436_v13  ;;  %v3483_v36 = vmul.f32 %v3472_v8, %v3463_v62  ;;  %v3547_v13 = vld [vmem:[%s6137_s3 + $0x110] sm:$0xff] }
0x15da   :  { %v3487_v51 = vadd.f32 %v3483_v36, %v3459_v23 }
0x15db   :  { %v6044_v30 = vpop.permute.xlu2 %3583 }
0x15e0   :  { %v3528_v29 = vpop.permute.xlu1 %3527 }
0x15e1   :  { %v3588_v16 = vpop.permute.xlu0 %3587 }
0x15e4   :  { %v3476_v1 = vpop.permute.xlu2 %3475 }
0x15e5   :  { %v3484_v3 = vmul.f32 %v3476_v1, %v3464_v27  ;;  %v3539_v1 = vmul.f32 %v3528_v29, %v3519_v42 }
0x15e9   :  { %v3423_v15 = vpop.permute.xlu1 %3422 }
0x15ea   :  { %v3432_v24 = vmul.f32 %v3423_v15, %v3408_v28  ;;  %v3480_v45 = vpop.permute.xlu0 %3479  ;;  %v3577_v15 = vld [vmem:[%s6137_s3 + $0x140] sm:$0xff] }
0x15eb   :  { %v3485_v9 = vmul.f32 %v3480_v45, %v3465_v33  ;;  %v3603_v33 = vld [vmem:[%s6137_s3 + $0x150] sm:$0xff] }
0x15ec   :  { %v3460_v18 = vadd.f32 %v3456_v34, %v3432_v24  ;;  %v3567_v34 = vmul.f32 %v6046_v0, %v3547_v13 }
0x15ed   :  { %v3532_v49 = vpop.permute.xlu2 %3531 }
0x15ee   :  { %v3488_v19 = vadd.f32 %v3484_v3, %v3460_v18  ;;  %v3540_v39 = vmul.f32 %v3532_v49, %v3520_v52  ;;  %v3596_v49 = vmul.f32 %v3588_v16, %v3576_v46 }
0x15f3   :  { %v3504_v21 = vpop.permute.xlu1 %3503 }
0x15f4   :  { %v3512_v54 = vmul.f32 %v3504_v21, %v3492_v17 }
0x15f6   :  { %v3428_v47 = vpop.permute.xlu2 %3427  ;;  %v3516_v61 = vadd.f32 %v3512_v54, %v3488_v19 }
0x15f7   :  { %v3433_v14 = vmul.f32 %v3428_v47, %v3409_v2  ;;  %v3515_v47 = vadd.f32 %v3511_v10, %v3487_v51 }
0x15f8   :  { %v3544_v4 = vadd.f32 %v3540_v39, %v3516_v61 }
0x15f9   :  { %v3543_v24 = vadd.f32 %v3539_v1, %v3515_v47 }
0x15fb   :  { %v3571_v17 = vadd.f32 %v3567_v34, %v3543_v24 }
0x15fc   :  { %v3560_v5 = vpop.permute.xlu1 %3559 }
0x15fd   :  { %v3568_v48 = vmul.f32 %v3560_v5, %v3548_v43  ;;  %v3605_v5 = vld [vmem:[%s6137_s3 + $0x160] sm:$0xff] }
0x15ff   :  { %v3508_v11 = vpop.permute.xlu2 %3507  ;;  %v3572_v60 = vadd.f32 %v3568_v48, %v3544_v4 }
0x1600   :  { %v3513_v38 = vmul.f32 %v3508_v11, %v3493_v55  ;;  %v3620_v11 = vpop.permute.xlu0 %3619 }
0x1601   :  { %v3600_v40 = vadd.f32 %v3596_v49, %v3572_v60  ;;  %v3625_v2 = vmul.f32 %v3620_v11, %v3605_v5 }
0x1605   :  { %v3452_v37 = vpop.permute.xlu1 %3451 }
0x1606   :  { %v3457_v6 = vmul.f32 %v3452_v37, %v3437_v50 }
0x1608   :  { %v3564_v41 = vpop.permute.xlu2 %3563  ;;  %v3461_v53 = vadd.f32 %v3457_v6, %v3433_v14  ;;  %v3575_v6 = vld [vmem:[%s6137_s3 + $0x130] sm:$0xff] }
0x1609   :  { %v3569_v21 = vmul.f32 %v3564_v41, %v3549_v22  ;;  %v3595_v45 = vmul.f32 %v6044_v30, %v3575_v6  ;;  %v3630_v30 = vld [vmem:[%s6137_s3 + $0x60] sm:$0x1] }
0x160a   :  { %v3489_v7 = vadd.f32 %v3485_v9, %v3461_v53  ;;  %v3631_v9 = vsel %vm76_vm3, %v6040_v63, 0.0 }
0x160b   :  { %v3599_v0 = vadd.f32 %v3595_v45, %v3571_v17 }
0x160c   :  { %v3517_v26 = vadd.f32 %v3513_v38, %v3489_v7 }
0x160e   :  { %v3536_v32 = vpop.permute.xlu1 %3535 }
0x160f   :  { %v3541_v25 = vmul.f32 %v3536_v32, %v3521_v35 }
0x1611   :  { %v3616_v31 = vpop.permute.xlu2 %3615  ;;  %v3545_v8 = vadd.f32 %v3541_v25, %v3517_v26 }
0x1612   :  { %v3624_v12 = vmul.f32 %v3616_v31, %v3604_v56 }
0x1613   :  { %v3573_v29 = vadd.f32 %v3569_v21, %v3545_v8 }
0x1614   :  { %v3628_v37 = vadd.f32 %v3624_v12, %v3600_v40 }
0x1616   :  { %v3643_v18 = vsel %vm76_vm3, %v3628_v37, 0.0 }
0x1617   :  { %v3592_v28 = vpop.permute.xlu1 %3591 }
0x1618   :  { %v3597_v50 = vmul.f32 %v3592_v28, %v3577_v15 }
0x161a   :  { %v3601_v16 = vadd.f32 %v3597_v50, %v3573_v29 }
0x161c   :  { %v3629_v27 = vadd.f32 %v3625_v2, %v3601_v16 }
0x161e   :  { %v3644_v14 = vsel %vm76_vm3, %v3629_v27, 0.0 }
0x161f   :  { %v3645_v41 = vadd.f32 %v3644_v14, %v3643_v18 }
0x1620   :  { %v3612_v58 = vpop.permute.xlu1 %3611 }
0x1621   :  { %v3646_v3 = vrot.slane %v3645_v41, 4  ;;  %v3623_v54 = vmul.f32 %v3612_v58, %v3603_v33 }
0x1623   :  { %v3647_v53 = vadd.f32 %v3646_v3, %v3645_v41  ;;  %v3627_v44 = vadd.f32 %v3623_v54, %v3599_v0 }
0x1625   :  { %v3648_v62 = vrot.slane %v3647_v53, 2  ;;  %v3632_v52 = vsel %vm76_vm3, %v3627_v44, 0.0 }
0x1626   :  { %v3633_v19 = vadd.f32 %v3632_v52, %v3631_v9 }
0x1627   :  { %v3649_v20 = vadd.f32 %v3648_v62, %v3647_v53 }
0x1628   :  { %v3634_v43 = vrot.slane %v3633_v19, 4 }
0x1629   :  { %v3650_v55 = vrot.slane %v3649_v20, 1 }
0x162a   :  { %v3635_v35 = vadd.f32 %v3634_v43, %v3633_v19 }
0x162b   :  { %v3651_v61 = vadd.f32 %v3650_v55, %v3649_v20 }
0x162c   :  { %v3636_v7 = vrot.slane %v3635_v35, 2 }
0x162d   :  { %v3652_v32 = vadd.f32 %v3651_v61, %v3630_v30 }
0x162e   :  { %v3637_v59 = vadd.f32 %v3636_v7, %v3635_v35 }
0x162f   :  { %3653 = vst.msk [vmem:[#allocation3 + $0x1] sm:$0x1] %vm3641_vm4, %v3652_v32 }
0x1630   :  { %v3638_v36 = vrot.slane %v3637_v59, 1 }
0x1632   :  { %v3639_v63 = vadd.f32 %v3638_v36, %v3637_v59 }
0x1634   :  { %v3640_v39 = vadd.f32 %v3639_v63, %v3630_v30 }
0x1636   :  { %3642 = vst.msk [vmem:[#allocation3] sm:$0x1] %vm3641_vm4, %v3640_v39 }
0x1637   :  { %3664 = dma.vmem_to_hbm [thread:$0]  %s3660_s13, 32, %s3662_s16, [#allocation4]  }
0x1638   :  { %4253 = dma.done.wait [#allocation4], 32  }
0x1639   :  { %4254 = vsyncadd [#allocation4], 4294967264 }
0x163a   :  { %3669 = vsyncpa [#allocation4], 1 }

</bundles_post_ra>
